<compile_context>
chip_gen: v5e
topology: v5e:2x2
jax: 0.10.0
libtpu: 0.0.40
codegen_flags: <defaults>
</compile_context>

<pallas_src>
import functools
import math

import jax
import jax.numpy as jnp
import numpy as np
from jax import lax
from jax.experimental import pallas as pl
from jax.experimental.pallas import tpu as pltpu

EPS_LN = 1e-5   # LayerNorm eps
EPS = 1e-8      # eps used in log_g / parallel_scan_log


# ---------- elementwise helpers (pure jnp; shared by kernel and reference) ----------
def _softplus(x):
    # numerically stable log(1 + exp(x))
    return jnp.maximum(x, 0.0) + jnp.log(1.0 + jnp.exp(-jnp.abs(x)))


def _log_g(x):
    return jnp.where(
        x >= 0.0,
        jnp.log(jnp.maximum(x, 0.0) + 0.5 + EPS),
        -_softplus(-x) + EPS,
    )


def _silu_fast(v):
    # SiLU with approx reciprocal for the sigmoid divide (kernel-only; EUP-friendly).
    return v * pl.reciprocal(1.0 + jnp.exp(-v), approx=True)


# ------------------------------------ Pallas kernel ------------------------------------
def minlstm_block_kernel(
    x_ref, norm_w_ref, norm_b_ref,
    wupx_ref, wupz_ref, bupx_ref, bupz_ref,
    mkw_ref, bconv_ref,
    wf_ref, wi_ref, wh_ref, skip_ref,
    wdown_ref, bdown_ref,
    out_ref,
    *, Bt, S, W, inner_dim, K,
):
    dim = x_ref.shape[-1]
    BtS = Bt * S
    pad = K // 2

    x3 = x_ref[...]                                   # (Bt, S, dim) f32
    xf = x3.reshape(BtS, dim)

    # --- LayerNorm (residual weight: scale = 1 + w, bias present) ---
    mu = jnp.mean(xf, axis=-1, keepdims=True)
    var = jnp.mean((xf - mu) ** 2, axis=-1, keepdims=True)
    y = (xf - mu) * lax.rsqrt(var + EPS_LN)
    y = y * (1.0 + norm_w_ref[...]) + norm_b_ref[...]

    # --- proj_up split into two lane-dense bf16 MXU matmuls (f32 accumulate) ---
    y16 = y.astype(jnp.bfloat16)
    xm = jnp.dot(y16, wupx_ref[...], preferred_element_type=jnp.float32) + bupx_ref[...]
    z = jnp.dot(y16, wupz_ref[...], preferred_element_type=jnp.float32) + bupz_ref[...]

    # --- depthwise KxK conv, zero padding, via sublane rolls + masked per-channel weights ---
    # mkw[t] = boundary_mask(t) * conv_weight(t)  (S, inner_dim); the mask also kills any
    # cross-sequence / circular-wrap leakage of the roll on the flattened token axis.
    conv = jnp.zeros((Bt, S, inner_dim), jnp.float32) + bconv_ref[...]
    for dy in range(K):
        for dx in range(K):
            t = dy * K + dx
            off = (dy - pad) * W + (dx - pad)
            shifted = xm if off == 0 else pltpu.roll(xm, (-off) % BtS, axis=0)
            conv = conv + shifted.reshape(Bt, S, inner_dim) * mkw_ref[t]
    act = _silu_fast(conv)                            # x_minlstm_conv_act, (Bt, S, ID)

    # --- minLSTM cell: grouped 1x1 conv gates are per-channel scalar multiplies ---
    f_gate = act * wf_ref[...]
    i_gate = act * wi_ref[...]
    hidden = act * wh_ref[...]
    diff = _softplus(-f_gate) - _softplus(-i_gate)
    log_f = -_softplus(diff)
    log_i = diff + log_f                              # == -softplus(-diff); one softplus fewer
    log_values = log_i + _log_g(hidden)

    # --- cumsum of (log_f + eps) via Hillis-Steele doubling scan on the flattened axis.
    #     Per-sequence offsets cancel below (only intra-sequence differences are used). ---
    c = (log_f + EPS).reshape(BtS, inner_dim)
    row = lax.broadcasted_iota(jnp.int32, (BtS, inner_dim), 0)
    g = c
    d = 1
    while d < BtS:
        g = g + jnp.where(row >= d, pltpu.roll(g, d, axis=0), 0.0)
        d *= 2
    g3 = g.reshape(Bt, S, inner_dim)

    # --- last-step hidden state: h_T = exp(a*_T + logsumexp_t(log_values_t - a*_t)) ---
    v = log_values - g3
    m = jnp.max(v, axis=1, keepdims=True)                          # (Bt, 1, ID)
    lse = m + jnp.log(jnp.sum(jnp.exp(v - m), axis=1, keepdims=True))
    h_last = jnp.exp(g3[:, S - 1:S, :] + lse)                      # (Bt, 1, ID)

    # --- skip, output gate, proj_down (bf16 MXU), DropPath(0) residual ---
    h = h_last + skip_ref[...] * act
    h = h * _silu_fast(z).reshape(Bt, S, inner_dim)
    h16 = h.reshape(BtS, inner_dim).astype(jnp.bfloat16)
    out = jnp.dot(h16, wdown_ref[...], preferred_element_type=jnp.float32) + bdown_ref[...]
    out_ref[...] = x3 + out.reshape(Bt, S, dim)


# ------------------------------------ wrapper ------------------------------------------
def make_conv_masks(H, W, K):
    """(K*K, S) 0/1 masks reproducing zero padding of the depthwise KxK conv."""
    pad = K // 2
    S = H * W
    m = np.zeros((K * K, S), np.float32)
    for dy in range(K):
        for dx in range(K):
            t = dy * K + dx
            for h in range(H):
                for w in range(W):
                    hi, wi = h + dy - pad, w + dx - pad
                    if 0 <= hi < H and 0 <= wi < W:
                        m[t, h * W + w] = 1.0
    return m


def minlstm_block_forward(x, params, H, W, kernel_size=3, block_b=2):
    B, S, dim = x.shape
    assert S == H * W
    assert S % 8 == 0, "sequence length must be sublane-aligned for free (Bt*S, D) reshapes"
    assert B % block_b == 0
    inner_dim = params["skip"].shape[-1]
    K = kernel_size
    n_taps = K * K

    # boundary-masked per-channel conv weights: (n_taps, S, inner_dim)
    mask = jnp.asarray(make_conv_masks(H, W, K))
    mkw = mask[:, :, None] * params["kconv"][:, None, :]

    kernel = functools.partial(
        minlstm_block_kernel, Bt=block_b, S=S, W=W, inner_dim=inner_dim, K=K
    )

    def const(shape):
        return pl.BlockSpec(shape, lambda b, _n=len(shape): (0,) * _n)

    in_specs = [
        pl.BlockSpec((block_b, S, dim), lambda b: (b, 0, 0)),  # x
        const((1, dim)), const((1, dim)),                      # norm w, b
        const((dim, inner_dim)), const((dim, inner_dim)),      # wup_x, wup_z (bf16)
        const((1, inner_dim)), const((1, inner_dim)),          # bup_x, bup_z
        const((n_taps, S, inner_dim)),                         # masked conv weights
        const((1, inner_dim)),                                 # conv bias
        const((1, inner_dim)), const((1, inner_dim)),          # w_f, w_i
        const((1, inner_dim)), const((1, inner_dim)),          # w_h, skip
        const((inner_dim, dim)), const((1, dim)),              # wdown (bf16), bdown
    ]

    return pl.pallas_call(
        kernel,
        out_shape=jax.ShapeDtypeStruct((B, S, dim), jnp.float32),
        grid_spec=pltpu.PrefetchScalarGridSpec(
            num_scalar_prefetch=0,
            grid=(B // block_b,),
            in_specs=in_specs,
            out_specs=pl.BlockSpec((block_b, S, dim), lambda b: (b, 0, 0)),
        ),
        compiler_params=pltpu.CompilerParams(dimension_semantics=("parallel",)),
    )(
        x,
        params["norm_w"], params["norm_b"],
        params["wup_x"], params["wup_z"], params["bup_x"], params["bup_z"],
        mkw, params["bconv"],
        params["wf"], params["wi"], params["wh"], params["skip"],
        params["wdown"], params["bdown"],
    )


# -------------------------- parameter setup (deterministic) ----------------------------
def init_params(key, dim, inner_dim, K):
    ks = jax.random.split(key, 8)
    std_up = math.sqrt(2.0 / (5.0 * dim))                 # small_init_ on proj_up
    std_down = 2.0 / 1.0 / math.sqrt(dim)                 # wang_init_ (num_blocks=1)
    std_cell = math.sqrt(2.0 / (5.0 * inner_dim))         # small_init_ on cell gates
    conv_bound = 1.0 / math.sqrt(K * K)                   # kaiming-uniform-style bound

    wup = jax.random.normal(ks[0], (2 * inner_dim, dim), jnp.float32) * std_up
    wdown = jax.random.normal(ks[1], (dim, inner_dim), jnp.float32) * std_down
    convw = jax.random.uniform(ks[2], (inner_dim, K, K), jnp.float32,
                               minval=-conv_bound, maxval=conv_bound)
    convb = jax.random.uniform(ks[3], (1, inner_dim), jnp.float32,
                               minval=-conv_bound, maxval=conv_bound)
    wf = jax.random.normal(ks[4], (1, inner_dim), jnp.float32) * std_cell
    wi = jax.random.normal(ks[5], (1, inner_dim), jnp.float32) * std_cell
    wh = jax.random.normal(ks[6], (1, inner_dim), jnp.float32) * std_cell

    return {
        "norm_w": jnp.zeros((1, dim), jnp.float32),        # LayerNorm residual weight init
        "norm_b": jnp.zeros((1, dim), jnp.float32),
        # proj_up split: first chunk -> x_minlstm branch, second chunk -> z branch.
        # MXU weights stored in bf16 (halves weight HBM traffic; f32 accumulate in-kernel).
        "wup_x": wup[:inner_dim].T.astype(jnp.bfloat16),   # (dim, ID)
        "wup_z": wup[inner_dim:].T.astype(jnp.bfloat16),   # (dim, ID)
        "bup_x": jnp.zeros((1, inner_dim), jnp.float32),
        "bup_z": jnp.zeros((1, inner_dim), jnp.float32),
        "kconv": convw.reshape(inner_dim, K * K).T,        # (K*K, ID) f32
        "bconv": convb,
        "wf": wf, "wi": wi, "wh": wh,
        "skip": jnp.ones((1, inner_dim), jnp.float32),     # learnable_skip init
        "wdown": wdown.T.astype(jnp.bfloat16),             # (ID, dim)
        "bdown": jnp.zeros((1, dim), jnp.float32),
    }


# ------------------------------- pure-JAX f32 reference --------------------------------
def reference_forward(x, params, H, W, K):
    B, S, dim = x.shape
    ID = params["skip"].shape[-1]
    pad = K // 2
    wup_x = params["wup_x"].astype(jnp.float32)
    wup_z = params["wup_z"].astype(jnp.float32)
    wdown = params["wdown"].astype(jnp.float32)

    mu = jnp.mean(x, -1, keepdims=True)
    var = jnp.mean((x - mu) ** 2, -1, keepdims=True)
    y = (x - mu) / jnp.sqrt(var + EPS_LN) * (1.0 + params["norm_w"][0]) + params["norm_b"][0]

    xm = y @ wup_x + params["bup_x"][0]
    z = y @ wup_z + params["bup_z"][0]

    xm2 = xm.reshape(B, H, W, ID)
    xp = jnp.pad(xm2, ((0, 0), (pad, pad), (pad, pad), (0, 0)))
    conv = jnp.zeros((B, H, W, ID), jnp.float32)
    for dy in range(K):
        for dx in range(K):
            conv = conv + xp[:, dy:dy + H, dx:dx + W, :] * params["kconv"][dy * K + dx]
    conv = conv.reshape(B, S, ID) + params["bconv"][0]
    act = conv * jax.nn.sigmoid(conv)

    f = act * params["wf"][0]
    i = act * params["wi"][0]
    hd = act * params["wh"][0]
    diff = _softplus(-f) - _softplus(-i)
    log_f = -_softplus(diff)
    log_i = -_softplus(-diff)
    log_values = log_i + _log_g(hd)
    a_star = jnp.cumsum(log_f + EPS, axis=1)
    lse = jax.scipy.special.logsumexp(log_values - a_star, axis=1)
    h_last = jnp.exp(a_star[:, -1] + lse)[:, None, :]

    h = h_last + params["skip"][0] * act
    h = h * (z * jax.nn.sigmoid(z))
    out = h @ wdown + params["bdown"][0]
    return x + out


# ---------------------------------------- main -----------------------------------------
if __name__ == "__main__":
    B, H, W = 4, 8, 8
    S = H * W                  # 64 tokens
    dim = 128                  # lane-dense (multiple of 128)
    expansion = 2
    inner_dim = expansion * dim  # 256
    K = 3                      # conv_kernel_size
    block_b = 2                # sequences per grid step -> M = block_b*S = 128, grid length 2

    key = jax.random.PRNGKey(0)
    kx, kp = jax.random.split(key)
    x = jax.random.normal(kx, (B, S, dim), jnp.float32)
    params = init_params(kp, dim, inner_dim, K)

    out = minlstm_block_forward(x, params, H, W, kernel_size=K, block_b=block_b)
    out = jax.block_until_ready(out)

    ref = reference_forward(x, params, H, W, K)
    # Kernel uses bf16 MXU operands (f32 accumulate) + approx-reciprocal SiLU vs a pure-f32
    # reference, hence the bf16-level tolerance.
    np.testing.assert_allclose(np.asarray(out), np.asarray(ref), rtol=3e-2, atol=3e-2)

    print("KERNEL_OK")
</pallas_src>

<mosaic_0001>
module attributes {stable_mosaic.version = 11 : i64} {
  func.func @minlstm_block_kernel(%arg0: i32, %arg1: memref<2x64x128xf32, #tpu.memory_space<vmem>>, %arg2: memref<1x128xf32, #tpu.memory_space<vmem>>, %arg3: memref<1x128xf32, #tpu.memory_space<vmem>>, %arg4: memref<128x256xbf16, #tpu.memory_space<vmem>>, %arg5: memref<128x256xbf16, #tpu.memory_space<vmem>>, %arg6: memref<1x256xf32, #tpu.memory_space<vmem>>, %arg7: memref<1x256xf32, #tpu.memory_space<vmem>>, %arg8: memref<9x64x256xf32, #tpu.memory_space<vmem>>, %arg9: memref<1x256xf32, #tpu.memory_space<vmem>>, %arg10: memref<1x256xf32, #tpu.memory_space<vmem>>, %arg11: memref<1x256xf32, #tpu.memory_space<vmem>>, %arg12: memref<1x256xf32, #tpu.memory_space<vmem>>, %arg13: memref<1x256xf32, #tpu.memory_space<vmem>>, %arg14: memref<256x128xbf16, #tpu.memory_space<vmem>>, %arg15: memref<1x128xf32, #tpu.memory_space<vmem>>, %arg16: memref<2x64x128xf32, #tpu.memory_space<vmem>>) attributes {dimension_semantics = [#tpu.dimension_semantics<parallel>], iteration_bounds = array<i64: 2>, scalar_prefetch = 0 : i64, scratch_operands = 0 : i64, tpu.core_type = #tpu.core_type<tc>, window_params = [{transform_indices = @transform_0, window_bounds = array<i64: 2, 64, 128>}, {pipeline_mode = #tpu.pipeline_mode<synchronous>, transform_indices = @transform_1, window_bounds = array<i64: 1, 128>}, {pipeline_mode = #tpu.pipeline_mode<synchronous>, transform_indices = @transform_2, window_bounds = array<i64: 1, 128>}, {pipeline_mode = #tpu.pipeline_mode<synchronous>, transform_indices = @transform_3, window_bounds = array<i64: 128, 256>}, {pipeline_mode = #tpu.pipeline_mode<synchronous>, transform_indices = @transform_4, window_bounds = array<i64: 128, 256>}, {pipeline_mode = #tpu.pipeline_mode<synchronous>, transform_indices = @transform_5, window_bounds = array<i64: 1, 256>}, {pipeline_mode = #tpu.pipeline_mode<synchronous>, transform_indices = @transform_6, window_bounds = array<i64: 1, 256>}, {pipeline_mode = #tpu.pipeline_mode<synchronous>, transform_indices = @transform_7, window_bounds = array<i64: 9, 64, 256>}, {pipeline_mode = #tpu.pipeline_mode<synchronous>, transform_indices = @transform_8, window_bounds = array<i64: 1, 256>}, {pipeline_mode = #tpu.pipeline_mode<synchronous>, transform_indices = @transform_9, window_bounds = array<i64: 1, 256>}, {pipeline_mode = #tpu.pipeline_mode<synchronous>, transform_indices = @transform_10, window_bounds = array<i64: 1, 256>}, {pipeline_mode = #tpu.pipeline_mode<synchronous>, transform_indices = @transform_11, window_bounds = array<i64: 1, 256>}, {pipeline_mode = #tpu.pipeline_mode<synchronous>, transform_indices = @transform_12, window_bounds = array<i64: 1, 256>}, {pipeline_mode = #tpu.pipeline_mode<synchronous>, transform_indices = @transform_13, window_bounds = array<i64: 256, 128>}, {pipeline_mode = #tpu.pipeline_mode<synchronous>, transform_indices = @transform_14, window_bounds = array<i64: 1, 128>}, {transform_indices = @transform_15, window_bounds = array<i64: 2, 64, 128>}]} {
    %c0 = arith.constant 0 : index
    %c0_0 = arith.constant 0 : index
    %c0_1 = arith.constant 0 : index
    %0 = vector.load %arg1[%c0, %c0_0, %c0_1] : memref<2x64x128xf32, #tpu.memory_space<vmem>>, vector<2x64x128xf32>
    %1 = vector.shape_cast %0 : vector<2x64x128xf32> to vector<128x128xf32>
    %cst = arith.constant dense<0.000000e+00> : vector<128xf32>
    %2 = vector.multi_reduction <add>, %1, %cst [1] : vector<128x128xf32> to vector<128xf32>
    %3 = vector.shape_cast %2 : vector<128xf32> to vector<128x1xf32>
    %cst_2 = arith.constant 1.280000e+02 : f32
    %4 = vector.broadcast %cst_2 : f32 to vector<128x1xf32>
    %5 = arith.divf %3, %4 : vector<128x1xf32>
    %6 = vector.broadcast %5 : vector<128x1xf32> to vector<128x128xf32>
    %7 = arith.subf %1, %6 : vector<128x128xf32>
    %8 = arith.mulf %7, %7 : vector<128x128xf32>
    %cst_3 = arith.constant dense<0.000000e+00> : vector<128xf32>
    %9 = vector.multi_reduction <add>, %8, %cst_3 [1] : vector<128x128xf32> to vector<128xf32>
    %10 = vector.shape_cast %9 : vector<128xf32> to vector<128x1xf32>
    %cst_4 = arith.constant 1.280000e+02 : f32
    %11 = vector.broadcast %cst_4 : f32 to vector<128x1xf32>
    %12 = arith.divf %10, %11 : vector<128x1xf32>
    %13 = vector.broadcast %5 : vector<128x1xf32> to vector<128x128xf32>
    %14 = arith.subf %1, %13 : vector<128x128xf32>
    %cst_5 = arith.constant 9.99999974E-6 : f32
    %15 = vector.broadcast %cst_5 : f32 to vector<128x1xf32>
    %16 = arith.addf %12, %15 : vector<128x1xf32>
    %17 = math.rsqrt %16 : vector<128x1xf32>
    %18 = vector.broadcast %17 : vector<128x1xf32> to vector<128x128xf32>
    %19 = arith.mulf %14, %18 : vector<128x128xf32>
    %c0_6 = arith.constant 0 : index
    %c0_7 = arith.constant 0 : index
    %20 = vector.load %arg2[%c0_6, %c0_7] : memref<1x128xf32, #tpu.memory_space<vmem>>, vector<1x128xf32>
    %cst_8 = arith.constant 1.000000e+00 : f32
    %21 = vector.broadcast %cst_8 : f32 to vector<1x128xf32>
    %22 = arith.addf %21, %20 : vector<1x128xf32>
    %23 = vector.broadcast %22 : vector<1x128xf32> to vector<128x128xf32>
    %24 = arith.mulf %19, %23 : vector<128x128xf32>
    %c0_9 = arith.constant 0 : index
    %c0_10 = arith.constant 0 : index
    %25 = vector.load %arg3[%c0_9, %c0_10] : memref<1x128xf32, #tpu.memory_space<vmem>>, vector<1x128xf32>
    %26 = vector.broadcast %25 : vector<1x128xf32> to vector<128x128xf32>
    %27 = arith.addf %24, %26 : vector<128x128xf32>
    %28 = arith.truncf %27 : vector<128x128xf32> to vector<128x128xbf16>
    %c0_11 = arith.constant 0 : index
    %c0_12 = arith.constant 0 : index
    %29 = vector.load %arg4[%c0_11, %c0_12] : memref<128x256xbf16, #tpu.memory_space<vmem>>, vector<128x256xbf16>
    %cst_13 = arith.constant dense<0.000000e+00> : vector<128x256xf32>
    %30 = tpu.matmul %28, %29, %cst_13 {dimension_numbers = #tpu.dot_dimension_numbers<[1], [0], [0], [1], [0, 0, 1, 1], [], []>} : vector<128x128xbf16>, vector<128x256xbf16>, vector<128x256xf32> -> vector<128x256xf32>
    %c0_14 = arith.constant 0 : index
    %c0_15 = arith.constant 0 : index
    %31 = vector.load %arg6[%c0_14, %c0_15] : memref<1x256xf32, #tpu.memory_space<vmem>>, vector<1x256xf32>
    %32 = vector.broadcast %31 : vector<1x256xf32> to vector<128x256xf32>
    %33 = arith.addf %30, %32 : vector<128x256xf32>
    %c0_16 = arith.constant 0 : index
    %c0_17 = arith.constant 0 : index
    %34 = vector.load %arg5[%c0_16, %c0_17] : memref<128x256xbf16, #tpu.memory_space<vmem>>, vector<128x256xbf16>
    %cst_18 = arith.constant dense<0.000000e+00> : vector<128x256xf32>
    %35 = tpu.matmul %28, %34, %cst_18 {dimension_numbers = #tpu.dot_dimension_numbers<[1], [0], [0], [1], [0, 0, 1, 1], [], []>} : vector<128x128xbf16>, vector<128x256xbf16>, vector<128x256xf32> -> vector<128x256xf32>
    %c0_19 = arith.constant 0 : index
    %c0_20 = arith.constant 0 : index
    %36 = vector.load %arg7[%c0_19, %c0_20] : memref<1x256xf32, #tpu.memory_space<vmem>>, vector<1x256xf32>
    %37 = vector.broadcast %36 : vector<1x256xf32> to vector<128x256xf32>
    %38 = arith.addf %35, %37 : vector<128x256xf32>
    %cst_21 = arith.constant 0.000000e+00 : f32
    %39 = vector.broadcast %cst_21 : f32 to vector<2x64x256xf32>
    %c0_22 = arith.constant 0 : index
    %c0_23 = arith.constant 0 : index
    %40 = vector.load %arg9[%c0_22, %c0_23] : memref<1x256xf32, #tpu.memory_space<vmem>>, vector<1x256xf32>
    %41 = vector.shape_cast %40 : vector<1x256xf32> to vector<1x1x256xf32>
    %42 = vector.broadcast %41 : vector<1x1x256xf32> to vector<2x64x256xf32>
    %43 = arith.addf %39, %42 : vector<2x64x256xf32>
    %c9_i32 = arith.constant 9 : i32
    %44 = tpu.dynamic_rotate %33 by %c9_i32 dim 0 : vector<128x256xf32>, i32 -> vector<128x256xf32>
    %45 = vector.shape_cast %44 : vector<128x256xf32> to vector<2x64x256xf32>
    %c0_24 = arith.constant 0 : index
    %c0_25 = arith.constant 0 : index
    %c0_26 = arith.constant 0 : index
    %46 = vector.load %arg8[%c0_24, %c0_25, %c0_26] : memref<9x64x256xf32, #tpu.memory_space<vmem>>, vector<1x64x256xf32>
    %47 = vector.shape_cast %46 : vector<1x64x256xf32> to vector<64x256xf32>
    %48 = vector.shape_cast %47 : vector<64x256xf32> to vector<1x64x256xf32>
    %49 = vector.broadcast %48 : vector<1x64x256xf32> to vector<2x64x256xf32>
    %50 = arith.mulf %45, %49 : vector<2x64x256xf32>
    %51 = arith.addf %43, %50 : vector<2x64x256xf32>
    %c8_i32 = arith.constant 8 : i32
    %52 = tpu.dynamic_rotate %33 by %c8_i32 dim 0 : vector<128x256xf32>, i32 -> vector<128x256xf32>
    %53 = vector.shape_cast %52 : vector<128x256xf32> to vector<2x64x256xf32>
    %c1 = arith.constant 1 : index
    %c0_27 = arith.constant 0 : index
    %c0_28 = arith.constant 0 : index
    %54 = vector.load %arg8[%c1, %c0_27, %c0_28] : memref<9x64x256xf32, #tpu.memory_space<vmem>>, vector<1x64x256xf32>
    %55 = vector.shape_cast %54 : vector<1x64x256xf32> to vector<64x256xf32>
    %56 = vector.shape_cast %55 : vector<64x256xf32> to vector<1x64x256xf32>
    %57 = vector.broadcast %56 : vector<1x64x256xf32> to vector<2x64x256xf32>
    %58 = arith.mulf %53, %57 : vector<2x64x256xf32>
    %59 = arith.addf %51, %58 : vector<2x64x256xf32>
    %c7_i32 = arith.constant 7 : i32
    %60 = tpu.dynamic_rotate %33 by %c7_i32 dim 0 : vector<128x256xf32>, i32 -> vector<128x256xf32>
    %61 = vector.shape_cast %60 : vector<128x256xf32> to vector<2x64x256xf32>
    %c2 = arith.constant 2 : index
    %c0_29 = arith.constant 0 : index
    %c0_30 = arith.constant 0 : index
    %62 = vector.load %arg8[%c2, %c0_29, %c0_30] : memref<9x64x256xf32, #tpu.memory_space<vmem>>, vector<1x64x256xf32>
    %63 = vector.shape_cast %62 : vector<1x64x256xf32> to vector<64x256xf32>
    %64 = vector.shape_cast %63 : vector<64x256xf32> to vector<1x64x256xf32>
    %65 = vector.broadcast %64 : vector<1x64x256xf32> to vector<2x64x256xf32>
    %66 = arith.mulf %61, %65 : vector<2x64x256xf32>
    %67 = arith.addf %59, %66 : vector<2x64x256xf32>
    %c1_i32 = arith.constant 1 : i32
    %68 = tpu.dynamic_rotate %33 by %c1_i32 dim 0 : vector<128x256xf32>, i32 -> vector<128x256xf32>
    %69 = vector.shape_cast %68 : vector<128x256xf32> to vector<2x64x256xf32>
    %c3 = arith.constant 3 : index
    %c0_31 = arith.constant 0 : index
    %c0_32 = arith.constant 0 : index
    %70 = vector.load %arg8[%c3, %c0_31, %c0_32] : memref<9x64x256xf32, #tpu.memory_space<vmem>>, vector<1x64x256xf32>
    %71 = vector.shape_cast %70 : vector<1x64x256xf32> to vector<64x256xf32>
    %72 = vector.shape_cast %71 : vector<64x256xf32> to vector<1x64x256xf32>
    %73 = vector.broadcast %72 : vector<1x64x256xf32> to vector<2x64x256xf32>
    %74 = arith.mulf %69, %73 : vector<2x64x256xf32>
    %75 = arith.addf %67, %74 : vector<2x64x256xf32>
    %76 = vector.shape_cast %33 : vector<128x256xf32> to vector<2x64x256xf32>
    %c4 = arith.constant 4 : index
    %c0_33 = arith.constant 0 : index
    %c0_34 = arith.constant 0 : index
    %77 = vector.load %arg8[%c4, %c0_33, %c0_34] : memref<9x64x256xf32, #tpu.memory_space<vmem>>, vector<1x64x256xf32>
    %78 = vector.shape_cast %77 : vector<1x64x256xf32> to vector<64x256xf32>
    %79 = vector.shape_cast %78 : vector<64x256xf32> to vector<1x64x256xf32>
    %80 = vector.broadcast %79 : vector<1x64x256xf32> to vector<2x64x256xf32>
    %81 = arith.mulf %76, %80 : vector<2x64x256xf32>
    %82 = arith.addf %75, %81 : vector<2x64x256xf32>
    %c127_i32 = arith.constant 127 : i32
    %83 = tpu.dynamic_rotate %33 by %c127_i32 dim 0 : vector<128x256xf32>, i32 -> vector<128x256xf32>
    %84 = vector.shape_cast %83 : vector<128x256xf32> to vector<2x64x256xf32>
    %c5 = arith.constant 5 : index
    %c0_35 = arith.constant 0 : index
    %c0_36 = arith.constant 0 : index
    %85 = vector.load %arg8[%c5, %c0_35, %c0_36] : memref<9x64x256xf32, #tpu.memory_space<vmem>>, vector<1x64x256xf32>
    %86 = vector.shape_cast %85 : vector<1x64x256xf32> to vector<64x256xf32>
    %87 = vector.shape_cast %86 : vector<64x256xf32> to vector<1x64x256xf32>
    %88 = vector.broadcast %87 : vector<1x64x256xf32> to vector<2x64x256xf32>
    %89 = arith.mulf %84, %88 : vector<2x64x256xf32>
    %90 = arith.addf %82, %89 : vector<2x64x256xf32>
    %c121_i32 = arith.constant 121 : i32
    %91 = tpu.dynamic_rotate %33 by %c121_i32 dim 0 : vector<128x256xf32>, i32 -> vector<128x256xf32>
    %92 = vector.shape_cast %91 : vector<128x256xf32> to vector<2x64x256xf32>
    %c6 = arith.constant 6 : index
    %c0_37 = arith.constant 0 : index
    %c0_38 = arith.constant 0 : index
    %93 = vector.load %arg8[%c6, %c0_37, %c0_38] : memref<9x64x256xf32, #tpu.memory_space<vmem>>, vector<1x64x256xf32>
    %94 = vector.shape_cast %93 : vector<1x64x256xf32> to vector<64x256xf32>
    %95 = vector.shape_cast %94 : vector<64x256xf32> to vector<1x64x256xf32>
    %96 = vector.broadcast %95 : vector<1x64x256xf32> to vector<2x64x256xf32>
    %97 = arith.mulf %92, %96 : vector<2x64x256xf32>
    %98 = arith.addf %90, %97 : vector<2x64x256xf32>
    %c120_i32 = arith.constant 120 : i32
    %99 = tpu.dynamic_rotate %33 by %c120_i32 dim 0 : vector<128x256xf32>, i32 -> vector<128x256xf32>
    %100 = vector.shape_cast %99 : vector<128x256xf32> to vector<2x64x256xf32>
    %c7 = arith.constant 7 : index
    %c0_39 = arith.constant 0 : index
    %c0_40 = arith.constant 0 : index
    %101 = vector.load %arg8[%c7, %c0_39, %c0_40] : memref<9x64x256xf32, #tpu.memory_space<vmem>>, vector<1x64x256xf32>
    %102 = vector.shape_cast %101 : vector<1x64x256xf32> to vector<64x256xf32>
    %103 = vector.shape_cast %102 : vector<64x256xf32> to vector<1x64x256xf32>
    %104 = vector.broadcast %103 : vector<1x64x256xf32> to vector<2x64x256xf32>
    %105 = arith.mulf %100, %104 : vector<2x64x256xf32>
    %106 = arith.addf %98, %105 : vector<2x64x256xf32>
    %c119_i32 = arith.constant 119 : i32
    %107 = tpu.dynamic_rotate %33 by %c119_i32 dim 0 : vector<128x256xf32>, i32 -> vector<128x256xf32>
    %108 = vector.shape_cast %107 : vector<128x256xf32> to vector<2x64x256xf32>
    %c8 = arith.constant 8 : index
    %c0_41 = arith.constant 0 : index
    %c0_42 = arith.constant 0 : index
    %109 = vector.load %arg8[%c8, %c0_41, %c0_42] : memref<9x64x256xf32, #tpu.memory_space<vmem>>, vector<1x64x256xf32>
    %110 = vector.shape_cast %109 : vector<1x64x256xf32> to vector<64x256xf32>
    %111 = vector.shape_cast %110 : vector<64x256xf32> to vector<1x64x256xf32>
    %112 = vector.broadcast %111 : vector<1x64x256xf32> to vector<2x64x256xf32>
    %113 = arith.mulf %108, %112 : vector<2x64x256xf32>
    %114 = arith.addf %106, %113 : vector<2x64x256xf32>
    %cst_43 = arith.constant 0.000000e+00 : f32
    %115 = vector.broadcast %cst_43 : f32 to vector<2x64x256xf32>
    %116 = arith.subf %115, %114 : vector<2x64x256xf32>
    %117 = math.exp %116 : vector<2x64x256xf32>
    %cst_44 = arith.constant 1.000000e+00 : f32
    %118 = vector.broadcast %cst_44 : f32 to vector<2x64x256xf32>
    %119 = arith.addf %118, %117 : vector<2x64x256xf32>
    %120 = tpu.reciprocal %119 {approx = true} : vector<2x64x256xf32> -> vector<2x64x256xf32>
    %121 = arith.mulf %114, %120 : vector<2x64x256xf32>
    %c0_45 = arith.constant 0 : index
    %c0_46 = arith.constant 0 : index
    %122 = vector.load %arg10[%c0_45, %c0_46] : memref<1x256xf32, #tpu.memory_space<vmem>>, vector<1x256xf32>
    %123 = vector.shape_cast %122 : vector<1x256xf32> to vector<1x1x256xf32>
    %124 = vector.broadcast %123 : vector<1x1x256xf32> to vector<2x64x256xf32>
    %125 = arith.mulf %121, %124 : vector<2x64x256xf32>
    %c0_47 = arith.constant 0 : index
    %c0_48 = arith.constant 0 : index
    %126 = vector.load %arg11[%c0_47, %c0_48] : memref<1x256xf32, #tpu.memory_space<vmem>>, vector<1x256xf32>
    %127 = vector.shape_cast %126 : vector<1x256xf32> to vector<1x1x256xf32>
    %128 = vector.broadcast %127 : vector<1x1x256xf32> to vector<2x64x256xf32>
    %129 = arith.mulf %121, %128 : vector<2x64x256xf32>
    %c0_49 = arith.constant 0 : index
    %c0_50 = arith.constant 0 : index
    %130 = vector.load %arg12[%c0_49, %c0_50] : memref<1x256xf32, #tpu.memory_space<vmem>>, vector<1x256xf32>
    %131 = vector.shape_cast %130 : vector<1x256xf32> to vector<1x1x256xf32>
    %132 = vector.broadcast %131 : vector<1x1x256xf32> to vector<2x64x256xf32>
    %133 = arith.mulf %121, %132 : vector<2x64x256xf32>
    %cst_51 = arith.constant 0.000000e+00 : f32
    %134 = vector.broadcast %cst_51 : f32 to vector<2x64x256xf32>
    %135 = arith.subf %134, %125 : vector<2x64x256xf32>
    %cst_52 = arith.constant 0.000000e+00 : f32
    %136 = vector.broadcast %cst_52 : f32 to vector<2x64x256xf32>
    %137 = arith.maximumf %135, %136 : vector<2x64x256xf32>
    %138 = math.absf %135 : vector<2x64x256xf32>
    %cst_53 = arith.constant 0.000000e+00 : f32
    %139 = vector.broadcast %cst_53 : f32 to vector<2x64x256xf32>
    %140 = arith.subf %139, %138 : vector<2x64x256xf32>
    %141 = math.exp %140 : vector<2x64x256xf32>
    %cst_54 = arith.constant 1.000000e+00 : f32
    %142 = vector.broadcast %cst_54 : f32 to vector<2x64x256xf32>
    %143 = arith.addf %142, %141 : vector<2x64x256xf32>
    %144 = math.log %143 : vector<2x64x256xf32>
    %145 = arith.addf %137, %144 : vector<2x64x256xf32>
    %cst_55 = arith.constant 0.000000e+00 : f32
    %146 = vector.broadcast %cst_55 : f32 to vector<2x64x256xf32>
    %147 = arith.subf %146, %129 : vector<2x64x256xf32>
    %cst_56 = arith.constant 0.000000e+00 : f32
    %148 = vector.broadcast %cst_56 : f32 to vector<2x64x256xf32>
    %149 = arith.maximumf %147, %148 : vector<2x64x256xf32>
    %150 = math.absf %147 : vector<2x64x256xf32>
    %cst_57 = arith.constant 0.000000e+00 : f32
    %151 = vector.broadcast %cst_57 : f32 to vector<2x64x256xf32>
    %152 = arith.subf %151, %150 : vector<2x64x256xf32>
    %153 = math.exp %152 : vector<2x64x256xf32>
    %cst_58 = arith.constant 1.000000e+00 : f32
    %154 = vector.broadcast %cst_58 : f32 to vector<2x64x256xf32>
    %155 = arith.addf %154, %153 : vector<2x64x256xf32>
    %156 = math.log %155 : vector<2x64x256xf32>
    %157 = arith.addf %149, %156 : vector<2x64x256xf32>
    %158 = arith.subf %145, %157 : vector<2x64x256xf32>
    %cst_59 = arith.constant 0.000000e+00 : f32
    %159 = vector.broadcast %cst_59 : f32 to vector<2x64x256xf32>
    %160 = arith.maximumf %158, %159 : vector<2x64x256xf32>
    %161 = math.absf %158 : vector<2x64x256xf32>
    %cst_60 = arith.constant 0.000000e+00 : f32
    %162 = vector.broadcast %cst_60 : f32 to vector<2x64x256xf32>
    %163 = arith.subf %162, %161 : vector<2x64x256xf32>
    %164 = math.exp %163 : vector<2x64x256xf32>
    %cst_61 = arith.constant 1.000000e+00 : f32
    %165 = vector.broadcast %cst_61 : f32 to vector<2x64x256xf32>
    %166 = arith.addf %165, %164 : vector<2x64x256xf32>
    %167 = math.log %166 : vector<2x64x256xf32>
    %168 = arith.addf %160, %167 : vector<2x64x256xf32>
    %cst_62 = arith.constant 0.000000e+00 : f32
    %169 = vector.broadcast %cst_62 : f32 to vector<2x64x256xf32>
    %170 = arith.subf %169, %168 : vector<2x64x256xf32>
    %171 = arith.addf %158, %170 : vector<2x64x256xf32>
    %cst_63 = arith.constant 0.000000e+00 : f32
    %172 = vector.broadcast %cst_63 : f32 to vector<2x64x256xf32>
    %173 = arith.cmpf oge, %133, %172 : vector<2x64x256xf32>
    %cst_64 = arith.constant 0.000000e+00 : f32
    %174 = vector.broadcast %cst_64 : f32 to vector<2x64x256xf32>
    %175 = arith.maximumf %133, %174 : vector<2x64x256xf32>
    %cst_65 = arith.constant 5.000000e-01 : f32
    %176 = vector.broadcast %cst_65 : f32 to vector<2x64x256xf32>
    %177 = arith.addf %175, %176 : vector<2x64x256xf32>
    %cst_66 = arith.constant 9.99999993E-9 : f32
    %178 = vector.broadcast %cst_66 : f32 to vector<2x64x256xf32>
    %179 = arith.addf %177, %178 : vector<2x64x256xf32>
    %180 = math.log %179 : vector<2x64x256xf32>
    %cst_67 = arith.constant 0.000000e+00 : f32
    %181 = vector.broadcast %cst_67 : f32 to vector<2x64x256xf32>
    %182 = arith.subf %181, %133 : vector<2x64x256xf32>
    %cst_68 = arith.constant 0.000000e+00 : f32
    %183 = vector.broadcast %cst_68 : f32 to vector<2x64x256xf32>
    %184 = arith.maximumf %182, %183 : vector<2x64x256xf32>
    %185 = math.absf %182 : vector<2x64x256xf32>
    %cst_69 = arith.constant 0.000000e+00 : f32
    %186 = vector.broadcast %cst_69 : f32 to vector<2x64x256xf32>
    %187 = arith.subf %186, %185 : vector<2x64x256xf32>
    %188 = math.exp %187 : vector<2x64x256xf32>
    %cst_70 = arith.constant 1.000000e+00 : f32
    %189 = vector.broadcast %cst_70 : f32 to vector<2x64x256xf32>
    %190 = arith.addf %189, %188 : vector<2x64x256xf32>
    %191 = math.log %190 : vector<2x64x256xf32>
    %192 = arith.addf %184, %191 : vector<2x64x256xf32>
    %cst_71 = arith.constant 0.000000e+00 : f32
    %193 = vector.broadcast %cst_71 : f32 to vector<2x64x256xf32>
    %194 = arith.subf %193, %192 : vector<2x64x256xf32>
    %cst_72 = arith.constant 9.99999993E-9 : f32
    %195 = vector.broadcast %cst_72 : f32 to vector<2x64x256xf32>
    %196 = arith.addf %194, %195 : vector<2x64x256xf32>
    %197 = arith.select %173, %180, %196 : vector<2x64x256xi1>, vector<2x64x256xf32>
    %198 = arith.addf %171, %197 : vector<2x64x256xf32>
    %cst_73 = arith.constant 9.99999993E-9 : f32
    %199 = vector.broadcast %cst_73 : f32 to vector<2x64x256xf32>
    %200 = arith.addf %170, %199 : vector<2x64x256xf32>
    %201 = vector.shape_cast %200 : vector<2x64x256xf32> to vector<128x256xf32>
    %202 = tpu.iota {dimensions = array<i32: 0>} : vector<128x256xi32>
    %c1_i32_74 = arith.constant 1 : i32
    %203 = vector.broadcast %c1_i32_74 : i32 to vector<128x256xi32>
    %204 = arith.cmpi sge, %202, %203 : vector<128x256xi32>
    %c1_i32_75 = arith.constant 1 : i32
    %205 = tpu.dynamic_rotate %201 by %c1_i32_75 dim 0 : vector<128x256xf32>, i32 -> vector<128x256xf32>
    %cst_76 = arith.constant 0.000000e+00 : f32
    %206 = vector.broadcast %cst_76 : f32 to vector<128x256xf32>
    %207 = arith.select %204, %205, %206 : vector<128x256xi1>, vector<128x256xf32>
    %208 = arith.addf %201, %207 : vector<128x256xf32>
    %c2_i32 = arith.constant 2 : i32
    %209 = vector.broadcast %c2_i32 : i32 to vector<128x256xi32>
    %210 = arith.cmpi sge, %202, %209 : vector<128x256xi32>
    %c2_i32_77 = arith.constant 2 : i32
    %211 = tpu.dynamic_rotate %208 by %c2_i32_77 dim 0 : vector<128x256xf32>, i32 -> vector<128x256xf32>
    %cst_78 = arith.constant 0.000000e+00 : f32
    %212 = vector.broadcast %cst_78 : f32 to vector<128x256xf32>
    %213 = arith.select %210, %211, %212 : vector<128x256xi1>, vector<128x256xf32>
    %214 = arith.addf %208, %213 : vector<128x256xf32>
    %c4_i32 = arith.constant 4 : i32
    %215 = vector.broadcast %c4_i32 : i32 to vector<128x256xi32>
    %216 = arith.cmpi sge, %202, %215 : vector<128x256xi32>
    %c4_i32_79 = arith.constant 4 : i32
    %217 = tpu.dynamic_rotate %214 by %c4_i32_79 dim 0 : vector<128x256xf32>, i32 -> vector<128x256xf32>
    %cst_80 = arith.constant 0.000000e+00 : f32
    %218 = vector.broadcast %cst_80 : f32 to vector<128x256xf32>
    %219 = arith.select %216, %217, %218 : vector<128x256xi1>, vector<128x256xf32>
    %220 = arith.addf %214, %219 : vector<128x256xf32>
    %c8_i32_81 = arith.constant 8 : i32
    %221 = vector.broadcast %c8_i32_81 : i32 to vector<128x256xi32>
    %222 = arith.cmpi sge, %202, %221 : vector<128x256xi32>
    %c8_i32_82 = arith.constant 8 : i32
    %223 = tpu.dynamic_rotate %220 by %c8_i32_82 dim 0 : vector<128x256xf32>, i32 -> vector<128x256xf32>
    %cst_83 = arith.constant 0.000000e+00 : f32
    %224 = vector.broadcast %cst_83 : f32 to vector<128x256xf32>
    %225 = arith.select %222, %223, %224 : vector<128x256xi1>, vector<128x256xf32>
    %226 = arith.addf %220, %225 : vector<128x256xf32>
    %c16_i32 = arith.constant 16 : i32
    %227 = vector.broadcast %c16_i32 : i32 to vector<128x256xi32>
    %228 = arith.cmpi sge, %202, %227 : vector<128x256xi32>
    %c16_i32_84 = arith.constant 16 : i32
    %229 = tpu.dynamic_rotate %226 by %c16_i32_84 dim 0 : vector<128x256xf32>, i32 -> vector<128x256xf32>
    %cst_85 = arith.constant 0.000000e+00 : f32
    %230 = vector.broadcast %cst_85 : f32 to vector<128x256xf32>
    %231 = arith.select %228, %229, %230 : vector<128x256xi1>, vector<128x256xf32>
    %232 = arith.addf %226, %231 : vector<128x256xf32>
    %c32_i32 = arith.constant 32 : i32
    %233 = vector.broadcast %c32_i32 : i32 to vector<128x256xi32>
    %234 = arith.cmpi sge, %202, %233 : vector<128x256xi32>
    %c32_i32_86 = arith.constant 32 : i32
    %235 = tpu.dynamic_rotate %232 by %c32_i32_86 dim 0 : vector<128x256xf32>, i32 -> vector<128x256xf32>
    %cst_87 = arith.constant 0.000000e+00 : f32
    %236 = vector.broadcast %cst_87 : f32 to vector<128x256xf32>
    %237 = arith.select %234, %235, %236 : vector<128x256xi1>, vector<128x256xf32>
    %238 = arith.addf %232, %237 : vector<128x256xf32>
    %c64_i32 = arith.constant 64 : i32
    %239 = vector.broadcast %c64_i32 : i32 to vector<128x256xi32>
    %240 = arith.cmpi sge, %202, %239 : vector<128x256xi32>
    %c64_i32_88 = arith.constant 64 : i32
    %241 = tpu.dynamic_rotate %238 by %c64_i32_88 dim 0 : vector<128x256xf32>, i32 -> vector<128x256xf32>
    %cst_89 = arith.constant 0.000000e+00 : f32
    %242 = vector.broadcast %cst_89 : f32 to vector<128x256xf32>
    %243 = arith.select %240, %241, %242 : vector<128x256xi1>, vector<128x256xf32>
    %244 = arith.addf %238, %243 : vector<128x256xf32>
    %245 = vector.shape_cast %244 : vector<128x256xf32> to vector<2x64x256xf32>
    %246 = arith.subf %198, %245 : vector<2x64x256xf32>
    %cst_90 = arith.constant dense<0xFF800000> : vector<2x256xf32>
    %247 = vector.multi_reduction <maximumf>, %246, %cst_90 [1] : vector<2x64x256xf32> to vector<2x256xf32>
    %248 = vector.shape_cast %247 : vector<2x256xf32> to vector<2x1x256xf32>
    %249 = vector.broadcast %248 : vector<2x1x256xf32> to vector<2x64x256xf32>
    %250 = arith.subf %246, %249 : vector<2x64x256xf32>
    %251 = math.exp %250 : vector<2x64x256xf32>
    %cst_91 = arith.constant dense<0.000000e+00> : vector<2x256xf32>
    %252 = vector.multi_reduction <add>, %251, %cst_91 [1] : vector<2x64x256xf32> to vector<2x256xf32>
    %253 = vector.shape_cast %252 : vector<2x256xf32> to vector<2x1x256xf32>
    %254 = math.log %253 : vector<2x1x256xf32>
    %255 = arith.addf %248, %254 : vector<2x1x256xf32>
    %256 = vector.extract_strided_slice %245 {offsets = [0, 63, 0], sizes = [2, 1, 256], strides = [1, 1, 1]} : vector<2x64x256xf32> to vector<2x1x256xf32>
    %257 = arith.addf %256, %255 : vector<2x1x256xf32>
    %258 = math.exp %257 : vector<2x1x256xf32>
    %c0_92 = arith.constant 0 : index
    %c0_93 = arith.constant 0 : index
    %259 = vector.load %arg13[%c0_92, %c0_93] : memref<1x256xf32, #tpu.memory_space<vmem>>, vector<1x256xf32>
    %260 = vector.shape_cast %259 : vector<1x256xf32> to vector<1x1x256xf32>
    %261 = vector.broadcast %260 : vector<1x1x256xf32> to vector<2x64x256xf32>
    %262 = arith.mulf %261, %121 : vector<2x64x256xf32>
    %263 = vector.broadcast %258 : vector<2x1x256xf32> to vector<2x64x256xf32>
    %264 = arith.addf %263, %262 : vector<2x64x256xf32>
    %cst_94 = arith.constant 0.000000e+00 : f32
    %265 = vector.broadcast %cst_94 : f32 to vector<128x256xf32>
    %266 = arith.subf %265, %38 : vector<128x256xf32>
    %267 = math.exp %266 : vector<128x256xf32>
    %cst_95 = arith.constant 1.000000e+00 : f32
    %268 = vector.broadcast %cst_95 : f32 to vector<128x256xf32>
    %269 = arith.addf %268, %267 : vector<128x256xf32>
    %270 = tpu.reciprocal %269 {approx = true} : vector<128x256xf32> -> vector<128x256xf32>
    %271 = arith.mulf %38, %270 : vector<128x256xf32>
    %272 = vector.shape_cast %271 : vector<128x256xf32> to vector<2x64x256xf32>
    %273 = arith.mulf %264, %272 : vector<2x64x256xf32>
    %274 = vector.shape_cast %273 : vector<2x64x256xf32> to vector<128x256xf32>
    %275 = arith.truncf %274 : vector<128x256xf32> to vector<128x256xbf16>
    %c0_96 = arith.constant 0 : index
    %c0_97 = arith.constant 0 : index
    %276 = vector.load %arg14[%c0_96, %c0_97] : memref<256x128xbf16, #tpu.memory_space<vmem>>, vector<256x128xbf16>
    %cst_98 = arith.constant dense<0.000000e+00> : vector<128x128xf32>
    %277 = tpu.matmul %275, %276, %cst_98 {dimension_numbers = #tpu.dot_dimension_numbers<[1], [0], [0], [1], [0, 0, 1, 1], [], []>} : vector<128x256xbf16>, vector<256x128xbf16>, vector<128x128xf32> -> vector<128x128xf32>
    %c0_99 = arith.constant 0 : index
    %c0_100 = arith.constant 0 : index
    %278 = vector.load %arg15[%c0_99, %c0_100] : memref<1x128xf32, #tpu.memory_space<vmem>>, vector<1x128xf32>
    %279 = vector.broadcast %278 : vector<1x128xf32> to vector<128x128xf32>
    %280 = arith.addf %277, %279 : vector<128x128xf32>
    %281 = vector.shape_cast %280 : vector<128x128xf32> to vector<2x64x128xf32>
    %282 = arith.addf %0, %281 : vector<2x64x128xf32>
    %c0_101 = arith.constant 0 : index
    %c0_102 = arith.constant 0 : index
    %c0_103 = arith.constant 0 : index
    %283 = vector.load %arg16[%c0_101, %c0_102, %c0_103] : memref<2x64x128xf32, #tpu.memory_space<vmem>>, vector<2x64x128xf32>
    tpu.vector_store %arg16[%c0_101, %c0_102, %c0_103], %282 {strides = array<i32>} : memref<2x64x128xf32, #tpu.memory_space<vmem>>, vector<2x64x128xf32>,
    return
  }
  func.func @transform_0(%arg0: i32) -> (i32, i32, i32) {
    %c0_i32 = arith.constant 0 : i32
    %c0_i32_0 = arith.constant 0 : i32
    %c0_i32_1 = arith.constant 0 : i32
    return %arg0, %c0_i32, %c0_i32_0 : i32, i32, i32
  }
  func.func @transform_1(%arg0: i32) -> (i32, i32) {
    %c0_i32 = arith.constant 0 : i32
    %c0_i32_0 = arith.constant 0 : i32
    %c0_i32_1 = arith.constant 0 : i32
    return %c0_i32, %c0_i32_0 : i32, i32
  }
  func.func @transform_2(%arg0: i32) -> (i32, i32) {
    %c0_i32 = arith.constant 0 : i32
    %c0_i32_0 = arith.constant 0 : i32
    %c0_i32_1 = arith.constant 0 : i32
    return %c0_i32, %c0_i32_0 : i32, i32
  }
  func.func @transform_3(%arg0: i32) -> (i32, i32) {
    %c0_i32 = arith.constant 0 : i32
    %c0_i32_0 = arith.constant 0 : i32
    %c0_i32_1 = arith.constant 0 : i32
    return %c0_i32, %c0_i32_0 : i32, i32
  }
  func.func @transform_4(%arg0: i32) -> (i32, i32) {
    %c0_i32 = arith.constant 0 : i32
    %c0_i32_0 = arith.constant 0 : i32
    %c0_i32_1 = arith.constant 0 : i32
    return %c0_i32, %c0_i32_0 : i32, i32
  }
  func.func @transform_5(%arg0: i32) -> (i32, i32) {
    %c0_i32 = arith.constant 0 : i32
    %c0_i32_0 = arith.constant 0 : i32
    %c0_i32_1 = arith.constant 0 : i32
    return %c0_i32, %c0_i32_0 : i32, i32
  }
  func.func @transform_6(%arg0: i32) -> (i32, i32) {
    %c0_i32 = arith.constant 0 : i32
    %c0_i32_0 = arith.constant 0 : i32
    %c0_i32_1 = arith.constant 0 : i32
    return %c0_i32, %c0_i32_0 : i32, i32
  }
  func.func @transform_7(%arg0: i32) -> (i32, i32, i32) {
    %c0_i32 = arith.constant 0 : i32
    %c0_i32_0 = arith.constant 0 : i32
    %c0_i32_1 = arith.constant 0 : i32
    %c0_i32_2 = arith.constant 0 : i32
    return %c0_i32, %c0_i32_0, %c0_i32_1 : i32, i32, i32
  }
  func.func @transform_8(%arg0: i32) -> (i32, i32) {
    %c0_i32 = arith.constant 0 : i32
    %c0_i32_0 = arith.constant 0 : i32
    %c0_i32_1 = arith.constant 0 : i32
    return %c0_i32, %c0_i32_0 : i32, i32
  }
  func.func @transform_9(%arg0: i32) -> (i32, i32) {
    %c0_i32 = arith.constant 0 : i32
    %c0_i32_0 = arith.constant 0 : i32
    %c0_i32_1 = arith.constant 0 : i32
    return %c0_i32, %c0_i32_0 : i32, i32
  }
  func.func @transform_10(%arg0: i32) -> (i32, i32) {
    %c0_i32 = arith.constant 0 : i32
    %c0_i32_0 = arith.constant 0 : i32
    %c0_i32_1 = arith.constant 0 : i32
    return %c0_i32, %c0_i32_0 : i32, i32
  }
  func.func @transform_11(%arg0: i32) -> (i32, i32) {
    %c0_i32 = arith.constant 0 : i32
    %c0_i32_0 = arith.constant 0 : i32
    %c0_i32_1 = arith.constant 0 : i32
    return %c0_i32, %c0_i32_0 : i32, i32
  }
  func.func @transform_12(%arg0: i32) -> (i32, i32) {
    %c0_i32 = arith.constant 0 : i32
    %c0_i32_0 = arith.constant 0 : i32
    %c0_i32_1 = arith.constant 0 : i32
    return %c0_i32, %c0_i32_0 : i32, i32
  }
  func.func @transform_13(%arg0: i32) -> (i32, i32) {
    %c0_i32 = arith.constant 0 : i32
    %c0_i32_0 = arith.constant 0 : i32
    %c0_i32_1 = arith.constant 0 : i32
    return %c0_i32, %c0_i32_0 : i32, i32
  }
  func.func @transform_14(%arg0: i32) -> (i32, i32) {
    %c0_i32 = arith.constant 0 : i32
    %c0_i32_0 = arith.constant 0 : i32
    %c0_i32_1 = arith.constant 0 : i32
    return %c0_i32, %c0_i32_0 : i32, i32
  }
  func.func @transform_15(%arg0: i32) -> (i32, i32, i32) {
    %c0_i32 = arith.constant 0 : i32
    %c0_i32_0 = arith.constant 0 : i32
    %c0_i32_1 = arith.constant 0 : i32
    return %arg0, %c0_i32, %c0_i32_0 : i32, i32, i32
  }
}

</mosaic_0001>

<bundles_post_ra>
// kernel: tpu_custom_call.1
= control target key start
LH: loop header
LB: loop body
LE: loop exit
PB: predicated region body
PF: predicated region fallthrough
CT: control target
= control target key end

     0   :  { %s13321_s0 = inlined_call_operand.hbm [shape: f32[4,64,128], index: 0, kind: input, shape index: {}]   ;;  %s13322_s1 = inlined_call_operand.hbm [shape: f32[1,128], index: 1, kind: input, shape index: {}]   ;;  %s13323_s2 = inlined_call_operand.hbm [shape: f32[1,128], index: 2, kind: input, shape index: {}]   ;;  %s13324_s3 = inlined_call_operand.hbm [shape: bf16[128,256], index: 3, kind: input, shape index: {}]   ;;  %s13325_s4 = inlined_call_operand.hbm [shape: bf16[128,256], index: 4, kind: input, shape index: {}]   ;;  %s13326_s5 = inlined_call_operand.vmem [shape: f32[1,256], index: 5, kind: input, shape index: {}]   ;;  %s13327_s6 = inlined_call_operand.vmem [shape: f32[1,256], index: 6, kind: input, shape index: {}]   ;;  %s13328_s7 = inlined_call_operand.hbm [shape: f32[9,64,256], index: 7, kind: input, shape index: {}]   ;;  %s13329_s8 = inlined_call_operand.vmem [shape: f32[1,256], index: 8, kind: input, shape index: {}]   ;;  %s13330_s9 = inlined_call_operand.vmem [shape: f32[1,256], index: 9, kind: input, shape index: {}]   ;;  %s13331_s10 = inlined_call_operand.hbm [shape: f32[1,256], index: 10, kind: input, shape index: {}]   ;;  %s13332_s11 = inlined_call_operand.vmem [shape: f32[1,256], index: 11, kind: input, shape index: {}]   ;;  %s13333_s12 = inlined_call_operand.hbm [shape: f32[1,256], index: 12, kind: input, shape index: {}]   ;;  %s13334_s13 = inlined_call_operand.hbm [shape: bf16[256,128], index: 13, kind: input, shape index: {}]   ;;  %s13335_s14 = inlined_call_operand.vmem [shape: f32[1,128], index: 14, kind: input, shape index: {}]   ;;  %s13336_s15 = inlined_call_operand.hbm [shape: f32[4,64,128], index: 15, kind: output, shape index: {}]  }
   0x1   :  { %13720 = sst [smem:[#allocation165_spill]] %s13322_s1 }
   0x2   :  { %13721 = sst [smem:[#allocation166_spill]] %s13323_s2 }
   0x3   :  { %13722 = sst [smem:[#allocation167_spill]] %s13324_s3 }
   0x4   :  { %13723 = sst [smem:[#allocation168_spill]] %s13325_s4 }
   0x5   :  { %13724 = sst [smem:[#allocation169_spill]] %s13327_s6 }
   0x6   :  { %13725 = sst [smem:[#allocation170_spill]] %s13328_s7 }
   0x7   :  { %13726 = sst [smem:[#allocation171_spill]] %s13331_s10 }
   0x8   :  { %13727 = sst [smem:[#allocation172_spill]] %s13332_s11 }
   0x9   :  { %13728 = sst [smem:[#allocation173_spill]] %s13333_s12 }
   0xa   :  { %13729 = sst [smem:[#allocation174_spill]] %s13334_s13 }
   0xb   :  { %13730 = sst [smem:[#allocation175_spill]] %s13335_s14 }
   0xc   :  { %13731 = sst [smem:[#allocation176_spill]] %s13336_s15 }
   0xd   :  { %20 = vsyncpa [#allocation3], 0 }
   0xe   :  { %22 = vsyncpa [#allocation3 + $0x1], 0 }
   0xf   :  { %23 = vsyncpa [#allocation6], 0 }
  0x10   :  { %24 = vsyncpa [#allocation9], 0 }
  0x11   :  { %25 = vsyncpa [#allocation12], 0 }
  0x12   :  { %26 = vsyncpa [#allocation15], 0 }
  0x13   :  { %27 = vsyncpa [#allocation4], 0 }
  0x14   :  { %29 = vsyncpa [#allocation4 + $0x1], 0  ;;  %s7992_s18 = smov 0   ;;  %s7994_s19 = smov 0  }
  0x15   :  { %s7996_s20 = smov 0   ;;  %s7998_s21 = smov 0  }
  0x16 LB: > { %s13732_s1 = sld [smem:[#allocation165_spill]]  ;;  %s8016_s25 = sadd.s32 4294967295, %s7893_s21   ;;  %s7893_s21 = sphi %s7998_s21, %s14758_s21   ;;  %s7889_s20 = sphi %s7996_s20, %s14757_s20   ;;  %s7885_s19 = sphi %s7994_s19, %s14756_s19   ;;  %s7881_s18 = sphi %s7992_s18, %s14755_s18  }
  0x17   : > { %p6072_p0 = scmp.ge.s32.totalorder %s7893_s21, 1  ;;  %p56_p1 = scmp.eq.s32.totalorder %s8016_s25, 0 }
  0x18   : > { %p386_p2 = scmp.lt.s32.totalorder %s7893_s21, 3  ;;  %s7895_s27 = smov [#allocation5]  }
  0x19   : > { %s400_s28 = sshll.u32 %s7895_s27, 4  ;;  %s13734_s3 = sld [smem:[#allocation167_spill]]  ;;  %s401_s28 = int_to_ptr.vmem [resolvable:$true] %s400_s28 }
  0x1a   : > { %p8021_p3 = pnand %p6072_p0, %p386_p2  ;;  %s7896_s22 = smov [#allocation8]  }
  0x1b   : > { %s423_s23 = sshll.u32 %s7896_s22, 4  ;;  %s13338_s27 = smov 128   ;;  %s424_s23 = int_to_ptr.vmem [resolvable:$true] %s423_s23 }
  0x1c   : > { %s398_s24 = sshll.u32 %s13732_s1, 4  ;;  %p6399_p5 = pneg %p8021_p3  ;;  %s399_s24 = int_to_ptr.hbm [resolvable:$true] %s398_s24 }
  0x1d   : > { %s13340_s1 = smov 8   ;;  %s13736_s7 = sld [smem:[#allocation170_spill]] }
  0x1e   : > { %p8033_p6 = pnand %p6399_p5, %p56_p1  ;;  %s7899_s15 = smov [#allocation11]  }
  0x1f   : > { %s421_s16 = sshll.u32 %s13734_s3, 4  ;;  %s457_s14 = sshll.u32 %s7899_s15, 4  ;;  %s422_s16 = int_to_ptr.hbm [resolvable:$true] %s421_s16  ;;  %s458_s14 = int_to_ptr.vmem [resolvable:$true] %s457_s14 }
  0x20   : > { %6402 = dma.hbm_to_vmem [thread:$0]  (!%p8033_p6), %s399_s24, 16, %s401_s28, [#allocation6]  }
  0x21   : > { %6408 = dma.hbm_to_vmem [thread:$0]  (!%p8033_p6), %s422_s16, 2048, %s424_s23, [#allocation9], %s13338_s27, %s13338_s27, %s13340_s1  }
  0x22   : > { %s13737_s12 = sld [smem:[#allocation173_spill]]  ;;  %s7900_s28 = smov 256  }
  0x23   : > { %s455_s3 = sshll.u32 %s13736_s7, 4  ;;  %s7901_s11 = smov 16   ;;  %s456_s3 = int_to_ptr.hbm [resolvable:$true] %s455_s3 }
  0x24   : > { %6414 = dma.hbm_to_vmem [thread:$0]  (!%p8033_p6), %s456_s3, 18432, %s458_s14, [#allocation12], %s7900_s28, %s7900_s28, %s7901_s11  }
  0x25   : > { %s7902_s16 = smov [#allocation14]   ;;  %s13738_s2 = sld [smem:[#allocation166_spill]] }
  0x26   : > { %s493_s23 = sshll.u32 %s7902_s16, 4  ;;  %s13739_s4 = sld [smem:[#allocation168_spill]]  ;;  %s494_s23 = int_to_ptr.vmem [resolvable:$true] %s493_s23 }
  0x27   : > { %s7903_s1 = smov [#allocation7]   ;;  %s7904_s3 = smov [#allocation10]  }
  0x28   : > { %s491_s24 = sshll.u32 %s13737_s12, 4  ;;  %s412_s7 = sshll.u32 %s7903_s1, 4  ;;  %s492_s24 = int_to_ptr.hbm [resolvable:$true] %s491_s24  ;;  %s413_s7 = int_to_ptr.vmem [resolvable:$true] %s412_s7 }
  0x29   : > { %6420 = dma.hbm_to_vmem [thread:$0]  (!%p8033_p6), %s492_s24, 32, %s494_s23, [#allocation15]  }
  0x2a   : > { %s437_s11 = sshll.u32 %s7904_s3, 4  ;;  %s13740_s10 = sld [smem:[#allocation171_spill]]  ;;  %s438_s11 = int_to_ptr.vmem [resolvable:$true] %s437_s11 }
  0x2b   : > { %s410_s30 = sshll.u32 %s13738_s2, 4  ;;  %s13741_s24 = smov 8   ;;  %s411_s30 = int_to_ptr.hbm [resolvable:$true] %s410_s30 }
  0x2c   : > { %s435_s22 = sshll.u32 %s13739_s4, 4  ;;  %s13742_s16 = smov 128   ;;  %s436_s22 = int_to_ptr.hbm [resolvable:$true] %s435_s22 }
  0x2d   : > { %6405 = dma.hbm_to_vmem [thread:$0]  (!%p8033_p6), %s411_s30, 16, %s413_s7, [#allocation6]  }
  0x2e   : > { %6411 = dma.hbm_to_vmem [thread:$0]  (!%p8033_p6), %s436_s22, 2048, %s438_s11, [#allocation9], %s13742_s16, %s13742_s16, %s13741_s24  }
  0x2f   : > { %s13743_s13 = sld [smem:[#allocation174_spill]]  ;;  %s7905_s29 = smov [#allocation13]  }
  0x30   : > { %s476_s28 = sshll.u32 %s13740_s10, 4  ;;  %s478_s30 = sshll.u32 %s7905_s29, 4  ;;  %s477_s28 = int_to_ptr.hbm [resolvable:$true] %s476_s28  ;;  %s479_s30 = int_to_ptr.vmem [resolvable:$true] %s478_s30 }
  0x31   : > { %6417 = dma.hbm_to_vmem [thread:$0]  (!%p8033_p6), %s477_s28, 32, %s479_s30, [#allocation12]  }
  0x32   : > { %s7906_s15 = smov [#allocation16]   ;;  %s7907_s22 = smov 64  }
  0x33   : > { %s504_s6 = sshll.u32 %s7906_s15, 4  ;;  %s7908_s3 = smov 4   ;;  %s505_s6 = int_to_ptr.vmem [resolvable:$true] %s504_s6 }
  0x34   : > { %s6071_s11 = sadd.s32 4294967294, %s7893_s21   ;;  %s8079_s14 = sadd.s32 1, %s7893_s21  }
  0x35   : > { %s502_s7 = sshll.u32 %s13743_s13, 4  ;;  %s39_s27 = ssub.s32 %s7893_s21, %s8079_s14  ;;  %s503_s7 = int_to_ptr.hbm [resolvable:$true] %s502_s7 }
  0x36   : > { %6423 = dma.hbm_to_vmem [thread:$0]  (!%p8033_p6), %s503_s7, 2048, %s505_s6, [#allocation15], %s7907_s22, %s7907_s22, %s7908_s3  }
  0x37   : > { %s42_s1 = sadd.s32 1, %s7889_s20  ;;  %p40_p7 = scmp.eq.s32.totalorder %s39_s27, 0 }
  0x38   : > { %p49_p8 = scmp.ne.s32.totalorder %s7889_s20, %s7885_s19  ;;  %p50_p9 = scmp.eq.s32.totalorder %s7893_s21, 0 }
  0x39   : > { %p55_p10 = scmp.ne.s32.totalorder %s7885_s19, %s7881_s18  ;;  %p373_p13 = scmp.eq.s32.totalorder %s8016_s25, 1 }
  0x3a   : > { %s8090_s28 = scalar_select %p40_p7, %s7889_s20, %s42_s1  }
  0x3b   : > { %p8092_p11 = por %p50_p9, %p49_p8  ;;  %p8098_p12 = por %p56_p1, %p55_p10 }
  0x3c   : > { %p379_p0 = scmp.eq.s32.totalorder %s6071_s11, 1  ;;  %p6440_p2 = scmp.lt.s32.totalorder %s7893_s21, 2 }
  0x3d   : > { %s521_s7 = sand.u32 1, %s7889_s20   ;;  %p8105_p5 = por %p373_p13, %p49_p8 }
  0x3e   : > { %p8109_p6 = por %p379_p0, %p55_p10  ;;  %s6082_s15 = sshll.u32 %s521_s7, 7 }
  0x3f   : > { %s6296_s6 = sshll.u32 %s7893_s21, 7  ;;  %s525_s1 = scalar_lea.vmem [#allocation2], %s6082_s15 }
  0x40   : > { %s531_s27 = scalar_lea.hbm %s13321_s0, %s6296_s6  ;;  %s534_s2 = sshll.u32 %s525_s1, 4  ;;  %s535_s2 = int_to_ptr.vmem [resolvable:$true] %s534_s2 }
  0x41   : > { %s532_s4 = sshll.u32 %s531_s27, 4  ;;  %p8119_p7 = pnand %p6440_p2, %p8092_p11  ;;  %s533_s4 = int_to_ptr.hbm [resolvable:$true] %s532_s4 }
  0x42   : > { %s522_s10 = scalar_lea.sflag [#allocation3], %s521_s7  ;;  %s7781_s12 = sshra.s32 %s533_s4, 4  ;;  %s7782_s12 = int_to_ptr.hbm [resolvable:$true] %s7781_s12 }
  0x43   : > { %s7783_s13 = scalar_lea.hbm %s7782_s12, 128  ;;  %p7785_p9 = pneg %p8119_p7 }
  0x44   : > { %p7784_p8 = scmp.ne.s32.totalorder %s7782_s12, %s7783_s13  ;;  %s7788_s22 = scalar_lea.hbm %s13321_s0, 256 }
  0x45   : > { %p7789_p11 = scmp.lt.s32.totalorder %s7782_s12, %s13321_s0  ;;  %p7790_p0 = scmp.lt.s32.totalorder %s7788_s22, %s7783_s13 }
  0x46   : > { %p7786_p10 = pnand %p7785_p9, %p7784_p8 }
  0x47   : > { %p7791_p2 = por %p7790_p0, %p7789_p11 }
  0x48   : > { %p7787_p13 = pneg %p7786_p10 }
  0x4a   : > { %p7792_p4 = pnand %p7791_p2, %p7787_p13 }
  0x4c   : > { %7795 = shalt.err (!%p7792_p4)
}
  0x4d   : > { %6427 = dma.hbm_to_vmem [thread:$0]  (!%p8119_p7), %s533_s4, 2048, %s535_s2, %s522_s10, %s13742_s16, %s13742_s16, %s13741_s24  }
  0x4e   : > { %546 = sbr.rel (%p8021_p3) target bundleno = 1781 (0x6f5), region = 80 }
  0x53   : > { %s8139_s7 = sand.u32 1, %s7885_s19  }
  0x54   : > { %s6087_s12 = sshll.u32 %s8139_s7, 7  ;;  %s549_s13 = scalar_lea.sflag [#allocation3], %s8139_s7 }
  0x55   : > { %s8145_s27 = scalar_lea.vmem [#allocation2], %s6087_s12 }
  0x56   : > { %7856 = dma.done.wait (%p8098_p12), %s549_s13, 2048  }
  0x57   : > { %7858 = vsyncadd (%p8098_p12), %s549_s13, 4294965248 }
  0x58   : > { %7860 = dma.done.wait (%p56_p1), [#allocation6], 32  }
  0x59   : > { %7862 = vsyncadd (%p56_p1), [#allocation6], 4294967264 }
  0x5a   : > { %7864 = dma.done.wait (%p56_p1), [#allocation9], 4096  }
  0x5b   : > { %7866 = vsyncadd (%p56_p1), [#allocation9], 4294963200 }
  0x5c   : > { %7868 = dma.done.wait (%p56_p1), [#allocation12], 18464  }
  0x5d   : > { %7870 = vsyncadd (%p56_p1), [#allocation12], 4294948832 }
  0x5e   : > { %7872 = dma.done.wait (%p56_p1), [#allocation15], 2080  }
  0x5f   : > { %7874 = vsyncadd (%p56_p1), [#allocation15], 4294965216  ;;  %v650_v0 = vld [vmem:[%s8145_s27 + $0x40] sm:$0xff]  ;;  %v652_v2 = vld [vmem:[%s8145_s27 + $0x50] sm:$0xff]  ;;  %v7909_v12 = vmov 128.0   ;;  %s13934_s11 = sld [smem:[#allocation172_spill]] }
  0x60   : > { %v642_v1 = vld [vmem:[%s8145_s27] sm:$0xff]  ;;  %674 = vadd.xlane.f32.xlu0 %v650_v0  ;;  %678 = vadd.xlane.f32.xlu1 %v652_v2  ;;  %v651_v3 = vld [vmem:[%s8145_s27 + $0x48] sm:$0xff]  ;;  %v653_v5 = vld [vmem:[%s8145_s27 + $0x58] sm:$0xff]  ;;  %6501 = vrcp.f32 %v7909_v12  ;;  %s14234_s22 = sld [smem:[#allocation169_spill]]  ;;  %s13231_s2 = scalar_lea.vmem [#allocation17], %s6087_s12 }
  0x61   : > { %658 = vadd.xlane.f32.xlu2 %v642_v1  ;;  %v643_v4 = vld [vmem:[%s8145_s27 + $0x8] sm:$0xff]  ;;  %v644_v6 = vld [vmem:[%s8145_s27 + $0x10] sm:$0xff]  ;;  %v8175_v7 = vld [vmem:[%s8145_s27 + $0x60] sm:$0xff]  ;;  %s14748_s13 = sld [smem:[#allocation175_spill]]  ;;  %s6346_s12 = sshll.u32 %s8016_s25, 7 }
  0x62   : > { %v8178_v8 = vld [vmem:[%s8145_s27 + $0x68] sm:$0xff]  ;;  %v8183_v9 = vld [vmem:[%s8145_s27 + $0x18] sm:$0xff]  ;;  %v8187_v10 = vld [vmem:[%s8145_s27 + $0x70] sm:$0xff]  ;;  %s14753_s26 = sld [smem:[#allocation176_spill]]  ;;  %s5919_s16 = sshll.u32 %s13231_s2, 4  ;;  %s5920_s16 = int_to_ptr.vmem [resolvable:$true] %s5919_s16 }
  0x63   : > { %v8191_v11 = vld [vmem:[%s8145_s27 + $0x28] sm:$0xff]  ;;  %v8211_v33 = vld [vmem:[%s8145_s27 + $0x78] sm:$0xff]  ;;  %v8230_v45 = vld [vmem:[%s8145_s27 + $0x20] sm:$0xff]  ;;  %s5906_s25 = scalar_lea.sflag [#allocation4], %s8139_s7 }
  0x64   : > { %v8216_v35 = vld [vmem:[%s8145_s27 + $0x38] sm:$0xff]  ;;  %v8252_v58 = vld [vmem:[%s8145_s27 + $0x30] sm:$0xff] }
  0x66   : > { %v6502_v13 = vpop.eup %6501 }
  0x67   : > { %v691_v14 = vmul.f32 128.0, %v6502_v13  ;;  %vm695_vm0 = vweird.f32 %v6502_v13 }
  0x68   : > { %676 = vadd.xlane.f32.xlu0 %v651_v3  ;;  %680 = vadd.xlane.f32.xlu1 %v653_v5  ;;  %s5918_s24 = scalar_lea.hbm %s14753_s26, %s6346_s12 }
  0x69   : > { %660 = vadd.xlane.f32.xlu2 %v643_v4  ;;  %v692_v15 = vsub.f32 1.0, %v691_v14  ;;  %v6147_v14 = vld [vmem:[#allocation8 + $0x60] sm:$0xf]  ;;  %s5921_s17 = sshll.u32 %s5918_s24, 4  ;;  %s5922_s17 = int_to_ptr.hbm [resolvable:$true] %s5921_s17 }
  0x6a   : > { %s7825_s1 = sshra.s32 %s5922_s17, 4  ;;  %s7826_s1 = int_to_ptr.hbm [resolvable:$true] %s7825_s1 }
  0x6b   : > { %v693_v16 = vmul.f32 %v6502_v13, %v692_v15  ;;  %v6310_v15 = vld [vmem:[#allocation8 + $0x64] sm:$0xf0]  ;;  %p7832_p12 = scmp.lt.s32.totalorder %s7826_s1, %s14753_s26 }
  0x6d   : > { %v694_v17 = vadd.f32 %v6502_v13, %v693_v16  ;;  %v6309_v16 = vld [vmem:[#allocation8 + $0x64] sm:$0xf] }
  0x6f   : > { %v8194_v18 = vsel %vm695_vm0, %v6502_v13, %v694_v17  ;;  %v6148_v17 = vor.u32 %v6310_v15, %v6147_v14 }
  0x70   : > { %682 = vadd.xlane.f32.xlu0 %v8175_v7  ;;  %684 = vadd.xlane.f32.xlu1 %v8178_v8 }
  0x71   : > { %662 = vadd.xlane.f32.xlu2 %v644_v6 }
  0x78   : > { %664 = vadd.xlane.f32.xlu0 %v8183_v9 }
  0x80   : > { %686 = vadd.xlane.f32.xlu0 %v8187_v10 }
  0x88   : > { %668 = vadd.xlane.f32.xlu0 %v8191_v11 }
  0xd3   : > { %v675_v19 = vpop.xlane.xlu0 %674  ;;  %v679_v27 = vpop.xlane.xlu1 %678 }
  0xd4   : > { %v659_v20 = vpop.xlane.xlu2 %658  ;;  %v705_v21 = vmul.f32 %v8194_v18, %v675_v19  ;;  %v707_v32 = vmul.f32 %v8194_v18, %v679_v27 }
  0xd5   : > { %v697_v22 = vmul.f32 %v8194_v18, %v659_v20  ;;  %v6139_v20 = vld [vmem:[#allocation8 + $0x50] sm:$0xf] }
  0xd6   : > { %v8198_v23 = vsub.f32 %v650_v0, %v705_v21  ;;  %v8219_v36 = vsub.f32 %v652_v2, %v707_v32  ;;  %v6308_v21 = vld [vmem:[#allocation8 + $0x54] sm:$0xf0] }
  0xd7   : > { %v8200_v24 = vsub.f32 %v642_v1, %v697_v22  ;;  %v6307_v22 = vld [vmem:[#allocation8 + $0x54] sm:$0xf] }
  0xd8   : > { %v737_v25 = vmul.f32 %v8198_v23, %v8198_v23  ;;  %v739_v43 = vmul.f32 %v8219_v36, %v8219_v36 }
  0xd9   : > { %v729_v26 = vmul.f32 %v8200_v24, %v8200_v24 }
  0xda   : > { %761 = vadd.xlane.f32.xlu1 %v737_v25  ;;  %v6140_v25 = vor.u32 %v6308_v21, %v6139_v20 }
  0xdb   : > { %745 = vadd.xlane.f32.xlu0 %v729_v26  ;;  %v677_v28 = vpop.xlane.xlu0 %676  ;;  %v681_v38 = vpop.xlane.xlu1 %680  ;;  %v6141_v26 = vld [vmem:[#allocation8 + $0x58] sm:$0xf0] }
  0xdc   : > { %v661_v29 = vpop.xlane.xlu2 %660  ;;  %v706_v30 = vmul.f32 %v8194_v18, %v677_v28  ;;  %v708_v44 = vmul.f32 %v8194_v18, %v681_v38  ;;  %v6144_v27 = vor.u32 %v6307_v22, %v6141_v26  ;;  %v6131_v28 = vld [vmem:[#allocation8 + $0x40] sm:$0xf]  ;;  %v6123_v38 = vld [vmem:[#allocation8 + $0x30] sm:$0xf] }
  0xdd   : > { %v698_v41 = vmul.f32 %v8194_v18, %v661_v29  ;;  %v6306_v29 = vld [vmem:[#allocation8 + $0x44] sm:$0xf0] }
  0xde   : > { %v8207_v31 = vsub.f32 %v651_v3, %v706_v30  ;;  %v8237_v48 = vsub.f32 %v653_v5, %v708_v44  ;;  %v6305_v30 = vld [vmem:[#allocation8 + $0x44] sm:$0xf]  ;;  %v6132_v32 = vor.u32 %v6306_v29, %v6131_v28 }
  0xdf   : > { %v8234_v47 = vsub.f32 %v643_v4, %v698_v41 }
  0xe0   : > { %v738_v34 = vmul.f32 %v8207_v31, %v8207_v31  ;;  %v740_v49 = vmul.f32 %v8237_v48, %v8237_v48 }
  0xe1   : > { %v730_v50 = vmul.f32 %v8234_v47, %v8234_v47 }
  0xe2   : > { %688 = vadd.xlane.f32.xlu1 %v8211_v33  ;;  %763 = vadd.xlane.f32.xlu2 %v738_v34  ;;  %v6133_v34 = vld [vmem:[#allocation8 + $0x48] sm:$0xf0] }
  0xe3   : > { %672 = vadd.xlane.f32.xlu0 %v8216_v35  ;;  %v683_v40 = vpop.xlane.xlu0 %682  ;;  %v685_v54 = vpop.xlane.xlu1 %684 }
  0xe4   : > { %v663_v37 = vpop.xlane.xlu2 %662  ;;  %v709_v51 = vmul.f32 %v8194_v18, %v683_v40  ;;  %v710_v56 = vmul.f32 %v8194_v18, %v685_v54  ;;  %v6303_v40 = vld [vmem:[#allocation8 + $0x34] sm:$0xf] }
  0xe5   : > { %v699_v39 = vmul.f32 %v8194_v18, %v663_v37  ;;  %v6136_v37 = vor.u32 %v6305_v30, %v6133_v34 }
  0xe6   : > { %v8245_v53 = vsub.f32 %v8175_v7, %v709_v51  ;;  %v8256_v60 = vsub.f32 %v8178_v8, %v710_v56  ;;  %v6155_v7 = vld [vmem:[#allocation8 + $0x70] sm:$0xf]  ;;  %v6312_v8 = vld [vmem:[#allocation8 + $0x74] sm:$0xf0] }
  0xe7   : > { %v8224_v42 = vsub.f32 %v644_v6, %v699_v39  ;;  %v6156_v12 = vor.u32 %v6312_v8, %v6155_v7  ;;  %v6304_v39 = vld [vmem:[#allocation8 + $0x34] sm:$0xf0]  ;;  %v6298_v7 = vld [vmem:[#allocation8 + $0x4] sm:$0xf0]  ;;  %v6297_v8 = vld [vmem:[#allocation8 + $0x4] sm:$0xf] }
  0xe8   : > { %v741_v55 = vmul.f32 %v8245_v53, %v8245_v53  ;;  %v742_v62 = vmul.f32 %v8256_v60, %v8256_v60  ;;  %v6124_v41 = vor.u32 %v6304_v39, %v6123_v38  ;;  %v6300_v56 = vld [vmem:[#allocation8 + $0x14] sm:$0xf0] }
  0xe9   : > { %v731_v46 = vmul.f32 %v8224_v42, %v8224_v42  ;;  %6347 = vmatpush.bf16.msra.mxu2 %v6156_v12  ;;  %1136 = vmatpush.bf16.msra.mxu0 %v6156_v12 }
  0xea   : > { %765 = vadd.xlane.f32.xlu1 %v739_v43  ;;  %666 = vadd.xlane.f32.xlu2 %v8230_v45  ;;  %v6125_v43 = vld [vmem:[#allocation8 + $0x38] sm:$0xf0] }
  0xeb   : > { %749 = vadd.xlane.f32.xlu0 %v731_v46  ;;  %v665_v52 = vpop.xlane.xlu0 %664  ;;  %v6128_v44 = vor.u32 %v6303_v40, %v6125_v43  ;;  %v6115_v46 = vld [vmem:[#allocation8 + $0x20] sm:$0xf] }
  0xec   : > { %v700_v57 = vmul.f32 %v8194_v18, %v665_v52  ;;  %v6117_v52 = vld [vmem:[#allocation8 + $0x28] sm:$0xf0] }
  0xed   : > { %6348 = vmatpush.bf16.msra.mxu2 %v6148_v17  ;;  %1137 = vmatpush.bf16.msra.mxu0 %v6148_v17 }
  0xee   : > { %v8259_v61 = vsub.f32 %v8183_v9, %v700_v57  ;;  %v6311_v9 = vld [vmem:[#allocation8 + $0x74] sm:$0xf] }
  0xef   : > { %v6299_v57 = vld [vmem:[#allocation8 + $0x14] sm:$0xf] }
  0xf0   : > { %v732_v63 = vmul.f32 %v8259_v61, %v8259_v61 }
  0xf1   : > { %6349 = vmatpush.bf16.msra.mxu2 %v6140_v25  ;;  %1138 = vmatpush.bf16.msra.mxu0 %v6140_v25 }
  0xf2   : > { %767 = vadd.xlane.f32.xlu2 %v740_v49  ;;  %747 = vadd.xlane.f32.xlu1 %v730_v50  ;;  %v6302_v49 = vld [vmem:[#allocation8 + $0x24] sm:$0xf0]  ;;  %v6301_v50 = vld [vmem:[#allocation8 + $0x24] sm:$0xf] }
  0xf3   : > { %v687_v59 = vpop.xlane.xlu0 %686  ;;  %v6116_v51 = vor.u32 %v6302_v49, %v6115_v46  ;;  %v6120_v54 = vor.u32 %v6301_v50, %v6117_v52  ;;  %v985_v49 = vld [vmem:[#allocation5] sm:$0x1] }
  0xf4   : > { %v711_v0 = vmul.f32 %v8194_v18, %v687_v59 }
  0xf5   : > { %6350 = vmatpush.bf16.msra.mxu2 %v6132_v32  ;;  %1139 = vmatpush.bf16.msra.mxu0 %v6132_v32 }
  0xf6   : > { %v8267_v1 = vsub.f32 %v8187_v10, %v711_v0  ;;  %v6157_v10 = vld [vmem:[#allocation8 + $0x78] sm:$0xf0] }
  0xf7   : > { %v6160_v13 = vor.u32 %v6311_v9, %v6157_v10  ;;  %v6101_v10 = vld [vmem:[#allocation8 + $0x8] sm:$0xf0] }
  0xf8   : > { %v743_v3 = vmul.f32 %v8267_v1, %v8267_v1 }
  0xf9   : > { %6355 = vmatpush.bf16.msra.mxu3 %v6160_v13  ;;  %1185 = vmatpush.bf16.msra.mxu1 %v6160_v13  ;;  %v6104_v13 = vor.u32 %v6297_v8, %v6101_v10 }
  0xfa   : > { %670 = vadd.xlane.f32.xlu2 %v8252_v58  ;;  %769 = vadd.xlane.f32.xlu1 %v741_v55  ;;  %v6107_v55 = vld [vmem:[#allocation8 + $0x10] sm:$0xf] }
  0xfb   : > { %v669_v2 = vpop.xlane.xlu0 %668  ;;  %6351 = vmatpush.bf16.msra.mxu2 %v6124_v41  ;;  %1140 = vmatpush.bf16.msra.mxu0 %v6124_v41  ;;  %v6108_v59 = vor.u32 %v6300_v56, %v6107_v55  ;;  %v986_v56 = vadd.f32 1.0, %v985_v49 }
  0xfc   : > { %v702_v4 = vmul.f32 %v8194_v18, %v669_v2 }
  0xfe   : > { %v8273_v5 = vsub.f32 %v8191_v11, %v702_v4  ;;  %v6149_v11 = vld [vmem:[#allocation8 + $0x68] sm:$0xf0] }
  0xff   : > { %v6152_v19 = vor.u32 %v6309_v16, %v6149_v11  ;;  %6352 = vmatpush.bf16.msra.mxu2 %v6116_v51  ;;  %1141 = vmatpush.bf16.msra.mxu0 %v6116_v51 }
 0x100   : > { %v734_v6 = vmul.f32 %v8273_v5, %v8273_v5 }
 0x101   : > { %6356 = vmatpush.bf16.msra.mxu3 %v6152_v19  ;;  %1186 = vmatpush.bf16.msra.mxu1 %v6152_v19 }
 0x102   : > { %771 = vadd.xlane.f32.xlu2 %v742_v62  ;;  %751 = vadd.xlane.f32.xlu1 %v732_v63  ;;  %v6109_v62 = vld [vmem:[#allocation8 + $0x18] sm:$0xf0] }
 0x103   : > { %v6112_v2 = vor.u32 %v6299_v57, %v6109_v62  ;;  %6353 = vmatpush.bf16.msra.mxu2 %v6108_v59  ;;  %1142 = vmatpush.bf16.msra.mxu0 %v6108_v59 }
 0x105   : > { %6357 = vmatpush.bf16.msra.mxu3 %v6144_v27  ;;  %1187 = vmatpush.bf16.msra.mxu1 %v6144_v27 }
 0x109   : > { %6358 = vmatpush.bf16.msra.mxu3 %v6136_v37  ;;  %1188 = vmatpush.bf16.msra.mxu1 %v6136_v37 }
 0x10a   : > { %773 = vadd.xlane.f32.xlu2 %v743_v3 }
 0x10d   : > { %6359 = vmatpush.bf16.msra.mxu3 %v6128_v44  ;;  %1189 = vmatpush.bf16.msra.mxu1 %v6128_v44 }
 0x111   : > { %6360 = vmatpush.bf16.msra.mxu3 %v6120_v54  ;;  %1190 = vmatpush.bf16.msra.mxu1 %v6120_v54 }
 0x112   : > { %755 = vadd.xlane.f32.xlu2 %v734_v6  ;;  %v6099_v6 = vld [vmem:[#allocation8] sm:$0xf] }
 0x113   : > { %v6100_v12 = vor.u32 %v6298_v7, %v6099_v6  ;;  %v8321_v7 = vperm.slane %v986_v56, 0 }
 0x115   : > { %6361 = vmatpush.bf16.msra.mxu3 %v6112_v2  ;;  %1191 = vmatpush.bf16.msra.mxu1 %v6112_v2 }
 0x116   : > { %6354 = vmatpush.bf16.msra.mxu2 %v6100_v12  ;;  %1143 = vmatpush.bf16.msra.mxu0 %v6100_v12 }
 0x119   : > { %6362 = vmatpush.bf16.msra.mxu3 %v6104_v13  ;;  %1192 = vmatpush.bf16.msra.mxu1 %v6104_v13 }
 0x14d   : > { %v762_v63 = vpop.xlane.xlu1 %761 }
 0x14e   : > { %v746_v0 = vpop.xlane.xlu0 %745  ;;  %v785_v3 = vmul.f32 %v762_v63, %v8194_v18 }
 0x14f   : > { %v777_v4 = vmul.f32 %v746_v0, %v8194_v18 }
 0x150   : > { %v801_v9 = vadd.f32 1e-05, %v785_v3 }
 0x151   : > { %v8279_v14 = vadd.f32 1e-05, %v777_v4 }
 0x152   : > { %6503 = vrsqrt.f32 %v801_v9  ;;  %vm895_vm2 = vweird.f32 %v801_v9 }
 0x153   : > { %6505 = vrsqrt.f32 %v8279_v14  ;;  %vm815_vm7 = vweird.f32 %v8279_v14 }
 0x155   : > { %v689_v15 = vpop.xlane.xlu1 %688  ;;  %v764_v16 = vpop.xlane.xlu2 %763 }
 0x156   : > { %v712_v17 = vmul.f32 %v8194_v18, %v689_v15  ;;  %v673_v11 = vpop.xlane.xlu0 %672  ;;  %v786_v19 = vmul.f32 %v764_v16, %v8194_v18 }
 0x157   : > { %v704_v39 = vmul.f32 %v8194_v18, %v673_v11 }
 0x158   : > { %v6504_v20 = vpop.eup %6503  ;;  %v8285_v21 = vsub.f32 %v8211_v33, %v712_v17  ;;  %v802_v22 = vadd.f32 1e-05, %v786_v19 }
 0x159   : > { %v890_v25 = vmul.f32 %v6504_v20, %v801_v9  ;;  %v8289_v28 = vpop.eup %6505  ;;  %vm896_vm1 = vweird.f32 %v6504_v20  ;;  %v8306_v54 = vsub.f32 %v8216_v35, %v704_v39 }
 0x15a   : > { %6507 = vrsqrt.f32 %v802_v22  ;;  %v744_v27 = vmul.f32 %v8285_v21, %v8285_v21  ;;  %v810_v41 = vmul.f32 %v8289_v28, %v8279_v14  ;;  %vm8311_vm3 = vmor %vm895_vm2, %vm896_vm1  ;;  %vm905_vm5 = vweird.f32 %v802_v22 }
 0x15b   : > { %v891_v26 = vmul.f32 %v6504_v20, %v890_v25  ;;  %v736_v6 = vmul.f32 %v8306_v54, %v8306_v54  ;;  %vm816_vm8 = vweird.f32 %v8289_v28 }
 0x15c   : > { %775 = vadd.xlane.f32.xlu0 %v744_v27  ;;  %v811_v57 = vmul.f32 %v8289_v28, %v810_v41  ;;  %v8339_v27 = vld [vmem:[#allocation7] ss:$0 sm:$0xff]  ;;  %vm8356_vm9 = vmor %vm815_vm7, %vm816_vm8 }
 0x15d   : > { %v892_v29 = vmul.f32 0.5, %v891_v26  ;;  %v766_v30 = vpop.xlane.xlu1 %765  ;;  %v667_v32 = vpop.xlane.xlu2 %666 }
 0x15e   : > { %v787_v34 = vmul.f32 %v766_v30, %v8194_v18  ;;  %v750_v37 = vpop.xlane.xlu0 %749  ;;  %v701_v38 = vmul.f32 %v8194_v18, %v667_v32  ;;  %v812_v9 = vmul.f32 0.5, %v811_v57 }
 0x15f   : > { %v893_v33 = vsub.f32 1.5, %v892_v29  ;;  %v779_v44 = vmul.f32 %v750_v37, %v8194_v18 }
 0x160   : > { %v6508_v40 = vpop.eup %6507  ;;  %v8296_v43 = vadd.f32 1e-05, %v787_v34  ;;  %v8300_v46 = vsub.f32 %v8230_v45, %v701_v38  ;;  %v813_v19 = vsub.f32 1.5, %v812_v9 }
 0x161   : > { %v900_v50 = vmul.f32 %v6508_v40, %v802_v22  ;;  %v894_v51 = vmul.f32 %v6504_v20, %v893_v33  ;;  %v8309_v59 = vadd.f32 1e-05, %v779_v44  ;;  %vm906_vm4 = vweird.f32 %v6508_v40 }
 0x162   : > { %6509 = vrsqrt.f32 %v8296_v43  ;;  %v733_v52 = vmul.f32 %v8300_v46, %v8300_v46  ;;  %vm907_vm6 = vmor %vm905_vm5, %vm906_vm4  ;;  %v814_v38 = vmul.f32 %v8289_v28, %v813_v19  ;;  %vm915_vm11 = vweird.f32 %v8296_v43 }
 0x163   : > { %v901_v55 = vmul.f32 %v6508_v40, %v900_v50  ;;  %v898_v2 = vsel %vm8311_vm3, %v6504_v20, %v894_v51  ;;  %6511 = vrsqrt.f32 %v8309_v59  ;;  %vm835_vm3 = vweird.f32 %v8309_v59 }
 0x164   : > { %753 = vadd.xlane.f32.xlu1 %v733_v52  ;;  %v977_v13 = vmul.f32 %v898_v2, %v8198_v23  ;;  %v818_v56 = vsel %vm8356_vm9, %v8289_v28, %v814_v38 }
 0x165   : > { %v902_v62 = vmul.f32 0.5, %v901_v55  ;;  %v748_v63 = vpop.xlane.xlu1 %747  ;;  %v768_v0 = vpop.xlane.xlu2 %767 }
 0x166   : > { %v778_v35 = vmul.f32 %v748_v63, %v8194_v18  ;;  %v788_v3 = vmul.f32 %v768_v0, %v8194_v18  ;;  %v998_v26 = vmul.f32 %v8321_v7, %v977_v13 }
 0x167   : > { %v903_v4 = vsub.f32 1.5, %v902_v62 }
 0x168   : > { %v8323_v8 = vpop.eup %6509  ;;  %v8326_v12 = vadd.f32 1e-05, %v778_v35  ;;  %v8328_v10 = vadd.f32 1e-05, %v788_v3  ;;  %v1018_v51 = vadd.f32 %v8339_v27, %v998_v26 }
 0x169   : > { %v904_v15 = vmul.f32 %v6508_v40, %v903_v4  ;;  %v910_v16 = vmul.f32 %v8323_v8, %v8296_v43  ;;  %v8341_v29 = vpop.eup %6511  ;;  %vm916_vm10 = vweird.f32 %v8323_v8 }
 0x16a   : > { %6513 = vrsqrt.f32 %v8326_v12  ;;  %v830_v49 = vmul.f32 %v8341_v29, %v8309_v59  ;;  %vm8376_vm12 = vmor %vm915_vm11, %vm916_vm10  ;;  %vm825_vm13 = vweird.f32 %v8326_v12  ;;  %vm925_vm1 = vweird.f32 %v8328_v10 }
 0x16b   : > { %v908_v17 = vsel %vm907_vm6, %v6508_v40, %v904_v15  ;;  %v911_v11 = vmul.f32 %v8323_v8, %v910_v16  ;;  %6515 = vrsqrt.f32 %v8328_v10  ;;  %vm836_vm4 = vweird.f32 %v8341_v29 }
 0x16c   : > { %v978_v20 = vmul.f32 %v908_v17, %v8207_v31  ;;  %759 = vadd.xlane.f32.xlu1 %v736_v6  ;;  %v831_v63 = vmul.f32 %v8341_v29, %v830_v49  ;;  %v969_v6 = vmul.f32 %v818_v56, %v8200_v24  ;;  %vm8418_vm7 = vmor %vm835_vm3, %vm836_vm4 }
 0x16d   : > { %v912_v23 = vmul.f32 0.5, %v911_v11  ;;  %v770_v25 = vpop.xlane.xlu1 %769  ;;  %v671_v22 = vpop.xlane.xlu2 %670 }
 0x16e   : > { %v789_v30 = vmul.f32 %v770_v25, %v8194_v18  ;;  %v703_v32 = vmul.f32 %v8194_v18, %v671_v22  ;;  %v999_v31 = vmul.f32 %v8321_v7, %v978_v20  ;;  %v832_v11 = vmul.f32 0.5, %v831_v63 }
 0x16f   : > { %v913_v34 = vsub.f32 1.5, %v912_v23 }
 0x170   : > { %v6514_v37 = vpop.eup %6513  ;;  %v8348_v33 = vadd.f32 1e-05, %v789_v30  ;;  %v8351_v39 = vsub.f32 %v8252_v58, %v703_v32  ;;  %v1019_v40 = vadd.f32 %v8339_v27, %v999_v31  ;;  %v833_v30 = vsub.f32 1.5, %v832_v11 }
 0x171   : > { %v6516_v41 = vpop.eup %6515  ;;  %v820_v50 = vmul.f32 %v6514_v37, %v8326_v12  ;;  %v914_v52 = vmul.f32 %v8323_v8, %v913_v34  ;;  %vm826_vm14 = vweird.f32 %v6514_v37 }
 0x172   : > { %v920_v58 = vmul.f32 %v6516_v41, %v8328_v10  ;;  %6517 = vrsqrt.f32 %v8348_v33  ;;  %v8368_v55 = vpack.c.bf16 %v1019_v40, %v1018_v51  ;;  %v735_v45 = vmul.f32 %v8351_v39, %v8351_v39  ;;  %vm8392_vm15 = vmor %vm825_vm13, %vm826_vm14  ;;  %v6205_v51 = vld [vmem:[#allocation10 + $0x58] sm:$0xf0] }
 0x173   : > { %v821_v14 = vmul.f32 %v6514_v37, %v820_v50  ;;  %v918_v2 = vsel %vm8376_vm12, %v8323_v8, %v914_v52  ;;  %vm926_vm0 = vweird.f32 %v6516_v41  ;;  %vm935_vm5 = vweird.f32 %v8348_v33 }
 0x174   : > { %v921_v57 = vmul.f32 %v6516_v41, %v920_v58  ;;  %1164 = vmatmul.bf16.vlgmr.msra.gmra.mxu2 %v8368_v55  ;;  %1213 = vmatmul.bf16.vlgmr.msra.gmra.mxu3 %v8368_v55  ;;  %v979_v8 = vmul.f32 %v918_v2, %v8219_v36  ;;  %vm927_vm2 = vmor %vm925_vm1, %vm926_vm0  ;;  %v990_v36 = vmul.f32 %v8321_v7, %v969_v6  ;;  %v6195_v58 = vld [vmem:[#allocation10 + $0x40] sm:$0xf] }
 0x175   : > { %v822_v0 = vmul.f32 0.5, %v821_v14  ;;  %v752_v28 = vpop.xlane.xlu1 %751  ;;  %v772_v43 = vpop.xlane.xlu2 %771  ;;  %757 = vadd.xlane.f32.xlu0 %v735_v45  ;;  %v834_v44 = vmul.f32 %v8341_v29, %v833_v30 }
 0x176   : > { %v922_v35 = vmul.f32 0.5, %v921_v57  ;;  %v780_v3 = vmul.f32 %v752_v28, %v8194_v18  ;;  %v790_v4 = vmul.f32 %v772_v43, %v8194_v18  ;;  %v1000_v34 = vmul.f32 %v8321_v7, %v979_v8 }
 0x177   : > { %v823_v9 = vsub.f32 1.5, %v822_v0  ;;  %v838_v62 = vsel %vm8418_vm7, %v8341_v29, %v834_v44  ;;  %v6203_v44 = vld [vmem:[#allocation10 + $0x50] sm:$0xf] }
 0x178   : > { %v8390_v12 = vpop.eup %6517  ;;  %v923_v15 = vsub.f32 1.5, %v922_v35  ;;  %v796_v16 = vadd.f32 1e-05, %v780_v3  ;;  %v806_v17 = vadd.f32 1e-05, %v790_v4  ;;  %v1020_v59 = vadd.f32 %v8339_v27, %v1000_v34 }
 0x179   : > { %v824_v19 = vmul.f32 %v6514_v37, %v823_v9  ;;  %v930_v20 = vmul.f32 %v8390_v12, %v8348_v33  ;;  %vm936_vm6 = vweird.f32 %v8390_v12  ;;  %v971_v29 = vmul.f32 %v838_v62, %v8224_v42 }
 0x17a   : > { %v924_v23 = vmul.f32 %v6516_v41, %v923_v15  ;;  %6519 = vrsqrt.f32 %v796_v16  ;;  %vm8423_vm8 = vmor %vm935_vm5, %vm936_vm6  ;;  %vm845_vm9 = vweird.f32 %v796_v16  ;;  %vm945_vm11 = vweird.f32 %v806_v17 }
 0x17b   : > { %v828_v24 = vsel %vm8392_vm15, %v6514_v37, %v824_v19  ;;  %v931_v25 = vmul.f32 %v8390_v12, %v930_v20  ;;  %6521 = vrsqrt.f32 %v806_v17  ;;  %v992_v13 = vmul.f32 %v8321_v7, %v971_v29  ;;  %v6320_v29 = vld [vmem:[#allocation10 + $0x34] sm:$0xf0] }
 0x17c   : > { %v970_v22 = vmul.f32 %v828_v24, %v8234_v47  ;;  %v928_v26 = vsel %vm927_vm2, %v6516_v41, %v924_v23  ;;  %v1010_v47 = vadd.f32 %v8339_v27, %v990_v36  ;;  %v6327_v36 = vld [vmem:[#allocation10 + $0x74] sm:$0xf] }
 0x17d   : > { %v980_v32 = vmul.f32 %v928_v26, %v8237_v48  ;;  %v932_v31 = vmul.f32 0.5, %v931_v25  ;;  %v1012_v8 = vadd.f32 %v8339_v27, %v992_v13  ;;  %v6328_v26 = vld [vmem:[#allocation10 + $0x74] sm:$0xf0] }
 0x17e   : > { %v991_v10 = vmul.f32 %v8321_v7, %v970_v22  ;;  %v6219_v22 = vld [vmem:[#allocation10 + $0x70] sm:$0xf] }
 0x17f   : > { %v933_v37 = vsub.f32 1.5, %v932_v31  ;;  %v1001_v38 = vmul.f32 %v8321_v7, %v980_v32  ;;  %v6220_v30 = vor.u32 %v6328_v26, %v6219_v22  ;;  %v6221_v32 = vld [vmem:[#allocation10 + $0x78] sm:$0xf0]  ;;  %v6171_v26 = vld [vmem:[#allocation10 + $0x10] sm:$0xf] }
 0x180   : > { %v6520_v40 = vpop.eup %6519  ;;  %v1011_v48 = vadd.f32 %v8339_v27, %v991_v10  ;;  %v6224_v31 = vor.u32 %v6327_v36, %v6221_v32  ;;  %v6211_v10 = vld [vmem:[#allocation10 + $0x60] sm:$0xf]  ;;  %v6316_v36 = vld [vmem:[#allocation10 + $0x14] sm:$0xf0] }
 0x181   : > { %v6522_v41 = vpop.eup %6521  ;;  %v840_v49 = vmul.f32 %v6520_v40, %v796_v16  ;;  %v1021_v50 = vadd.f32 %v8339_v27, %v1001_v38  ;;  %v934_v33 = vmul.f32 %v8390_v12, %v933_v37  ;;  %vm846_vm10 = vweird.f32 %v6520_v40  ;;  %1336 = vmatpush.bf16.msrb.mxu2 %v6220_v30  ;;  %v6326_v37 = vld [vmem:[#allocation10 + $0x64] sm:$0xf0]  ;;  %v6325_v38 = vld [vmem:[#allocation10 + $0x64] sm:$0xf] }
 0x182   : > { %v940_v52 = vmul.f32 %v6522_v41, %v806_v17  ;;  %v8427_v56 = vpack.c.bf16 %v1011_v48, %v1010_v47  ;;  %vm946_vm12 = vweird.f32 %v6522_v41  ;;  %vm847_vm13 = vmor %vm845_vm9, %vm846_vm10  ;;  %1385 = vmatpush.bf16.msrb.mxu3 %v6224_v31  ;;  %v6213_v47 = vld [vmem:[#allocation10 + $0x68] sm:$0xf0]  ;;  %v6172_v32 = vor.u32 %v6316_v36, %v6171_v26  ;;  %v6315_v31 = vld [vmem:[#allocation10 + $0x14] sm:$0xf] }
 0x183   : > { %v841_v14 = vmul.f32 %v6520_v40, %v840_v49  ;;  %v8429_v57 = vpack.c.bf16 %v1021_v50, %v1020_v59  ;;  %v938_v0 = vsel %vm8423_vm8, %v8390_v12, %v934_v33  ;;  %vm947_vm14 = vmor %vm945_vm11, %vm946_vm12  ;;  %v6216_v48 = vor.u32 %v6325_v38, %v6213_v47  ;;  %v6324_v49 = vld [vmem:[#allocation10 + $0x54] sm:$0xf0]  ;;  %v6323_v59 = vld [vmem:[#allocation10 + $0x54] sm:$0xf] }
 0x184   : > { %v941_v45 = vmul.f32 %v6522_v41, %v940_v52  ;;  %1144 = vmatmul.bf16.vlgmr.msra.gmra.mxu0 %v8427_v56  ;;  %1193 = vmatmul.bf16.vlgmr.msra.gmra.mxu1 %v8427_v56  ;;  %v981_v35 = vmul.f32 %v938_v0, %v8245_v53  ;;  %v6204_v50 = vor.u32 %v6324_v49, %v6203_v44  ;;  %v6197_v0 = vld [vmem:[#allocation10 + $0x48] sm:$0xf0]  ;;  %v6163_v49 = vld [vmem:[#allocation10] sm:$0xf] }
 0x185   : > { %v842_v63 = vmul.f32 0.5, %v841_v14  ;;  %1169 = vmatmul.bf16.gmra.mxu2 %v8429_v57  ;;  %1218 = vmatmul.bf16.gmra.mxu3 %v8429_v57  ;;  %v6208_v52 = vor.u32 %v6323_v59, %v6205_v51  ;;  %v6322_v14 = vld [vmem:[#allocation10 + $0x44] sm:$0xf0]  ;;  %v6313_v51 = vld [vmem:[#allocation10 + $0x4] sm:$0xf] }
 0x186   : > { %v942_v28 = vmul.f32 0.5, %v941_v45  ;;  %v1002_v16 = vmul.f32 %v8321_v7, %v981_v35  ;;  %1386 = vmatpush.bf16.msrb.mxu3 %v6216_v48  ;;  %v6321_v45 = vld [vmem:[#allocation10 + $0x44] sm:$0xf]  ;;  %v6314_v59 = vld [vmem:[#allocation10 + $0x4] sm:$0xf0] }
 0x187   : > { %v843_v43 = vsub.f32 1.5, %v842_v63  ;;  %v6196_v63 = vor.u32 %v6322_v14, %v6195_v58 }
 0x188   : > { %v943_v2 = vsub.f32 1.5, %v942_v28  ;;  %v1022_v11 = vadd.f32 %v8339_v27, %v1002_v16  ;;  %v6200_v28 = vor.u32 %v6321_v45, %v6197_v0  ;;  %v6318_v16 = vld [vmem:[#allocation10 + $0x24] sm:$0xf0] }
 0x189   : > { %v844_v3 = vmul.f32 %v6520_v40, %v843_v43  ;;  %v6187_v43 = vld [vmem:[#allocation10 + $0x30] sm:$0xf] }
 0x18a   : > { %v944_v4 = vmul.f32 %v6522_v41, %v943_v2  ;;  %1387 = vmatpush.bf16.msrb.mxu3 %v6208_v52  ;;  %v6319_v2 = vld [vmem:[#allocation10 + $0x34] sm:$0xf]  ;;  %v6165_v52 = vld [vmem:[#allocation10 + $0x8] sm:$0xf0] }
 0x18b   : > { %v848_v6 = vsel %vm847_vm13, %v6520_v40, %v844_v3  ;;  %v6212_v40 = vor.u32 %v6326_v37, %v6211_v10  ;;  %v6188_v3 = vor.u32 %v6320_v29, %v6187_v43 }
 0x18c   : > { %v972_v9 = vmul.f32 %v848_v6, %v8259_v61  ;;  %v948_v12 = vsel %vm947_vm14, %v6522_v41, %v944_v4  ;;  %v6189_v4 = vld [vmem:[#allocation10 + $0x38] sm:$0xf0] }
 0x18d   : > { %v982_v15 = vmul.f32 %v948_v12, %v8256_v60  ;;  %v774_v60 = vpop.xlane.xlu2 %773  ;;  %1337 = vmatpush.bf16.msrb.mxu2 %v6212_v40  ;;  %v6192_v12 = vor.u32 %v6319_v2, %v6189_v4 }
 0x18e   : > { %v993_v17 = vmul.f32 %v8321_v7, %v972_v9  ;;  %v791_v23 = vmul.f32 %v774_v60, %v8194_v18  ;;  %1388 = vmatpush.bf16.msrb.mxu3 %v6200_v28 }
 0x18f   : > { %v1003_v42 = vmul.f32 %v8321_v7, %v982_v15  ;;  %v6179_v15 = vld [vmem:[#allocation10 + $0x20] sm:$0xf] }
 0x190   : > { %v1013_v53 = vadd.f32 %v8339_v27, %v993_v17  ;;  %v8462_v24 = vadd.f32 1e-05, %v791_v23  ;;  %v6317_v17 = vld [vmem:[#allocation10 + $0x24] sm:$0xf] }
 0x191   : > { %v1023_v19 = vadd.f32 %v8339_v27, %v1003_v42  ;;  %1338 = vmatpush.bf16.msrb.mxu2 %v6204_v50 }
 0x192   : > { %v8453_v61 = vpack.c.bf16 %v1013_v53, %v1012_v8  ;;  %6523 = vrsqrt.f32 %v8462_v24  ;;  %1389 = vmatpush.bf16.msrb.mxu3 %v6192_v12  ;;  %vm955_vm15 = vweird.f32 %v8462_v24 }
 0x193   : > { %v8455_v20 = vpack.c.bf16 %v1023_v19, %v1022_v11  ;;  %v6180_v11 = vor.u32 %v6318_v16, %v6179_v15  ;;  %v6181_v19 = vld [vmem:[#allocation10 + $0x28] sm:$0xf0] }
 0x194   : > { %1149 = vmatmul.bf16.gmra.mxu0 %v8453_v61  ;;  %1198 = vmatmul.bf16.gmra.mxu1 %v8453_v61  ;;  %v6184_v60 = vor.u32 %v6317_v17, %v6181_v19 }
 0x195   : > { %1174 = vmatmul.bf16.gmra.mxu2 %v8455_v20  ;;  %1223 = vmatmul.bf16.gmra.mxu3 %v8455_v20  ;;  %v756_v25 = vpop.xlane.xlu2 %755 }
 0x196   : > { %v782_v34 = vmul.f32 %v756_v25, %v8194_v18  ;;  %1339 = vmatpush.bf16.msrb.mxu2 %v6196_v63  ;;  %1390 = vmatpush.bf16.msrb.mxu3 %v6184_v60 }
 0x198   : > { %v8466_v41 = vadd.f32 1e-05, %v782_v34  ;;  %v8468_v33 = vpop.eup %6523  ;;  %v6173_v34 = vld [vmem:[#allocation10 + $0x18] sm:$0xf0] }
 0x199   : > { %v950_v62 = vmul.f32 %v8468_v33, %v8462_v24  ;;  %vm956_vm0 = vweird.f32 %v8468_v33  ;;  %v6176_v10 = vor.u32 %v6315_v31, %v6173_v34  ;;  %v6164_v24 = vor.u32 %v6314_v59, %v6163_v49  ;;  %v8538_v49 = vld [vmem:[#allocation11 + $0x90] sm:$0xff] }
 0x19a   : > { %6525 = vrsqrt.f32 %v8466_v41  ;;  %1340 = vmatpush.bf16.msrb.mxu2 %v6188_v3  ;;  %vm8484_vm1 = vmor %vm955_vm15, %vm956_vm0  ;;  %vm865_vm2 = vweird.f32 %v8466_v41 }
 0x19b   : > { %v951_v35 = vmul.f32 %v8468_v33, %v950_v62  ;;  %1391 = vmatpush.bf16.msrb.mxu3 %v6176_v10  ;;  %v6168_v62 = vor.u32 %v6313_v51, %v6165_v52  ;;  %v8543_v52 = vld [vmem:[#allocation11 + $0x200] sm:$0xff] }
 0x19d   : > { %v952_v42 = vmul.f32 0.5, %v951_v35 }
 0x19e   : > { %1341 = vmatpush.bf16.msrb.mxu2 %v6180_v11 }
 0x19f   : > { %v953_v23 = vsub.f32 1.5, %v952_v42  ;;  %1392 = vmatpush.bf16.msrb.mxu3 %v6168_v62  ;;  %v8553_v62 = vld [vmem:[#allocation11 + $0x208] sm:$0xff] }
 0x1a0   : > { %v8474_v6 = vpop.eup %6525 }
 0x1a1   : > { %v860_v8 = vmul.f32 %v8474_v6, %v8466_v41  ;;  %v954_v40 = vmul.f32 %v8468_v33, %v953_v23  ;;  %vm866_vm3 = vweird.f32 %v8474_v6 }
 0x1a2   : > { %1342 = vmatpush.bf16.msrb.mxu2 %v6172_v32  ;;  %vm8498_vm5 = vmor %vm865_vm2, %vm866_vm3 }
 0x1a3   : > { %v861_v25 = vmul.f32 %v8474_v6, %v860_v8  ;;  %v958_v58 = vsel %vm8484_vm1, %v8468_v33, %v954_v40 }
 0x1a4   : > { %v983_v43 = vmul.f32 %v958_v58, %v8267_v1 }
 0x1a5   : > { %v862_v47 = vmul.f32 0.5, %v861_v25 }
 0x1a6   : > { %1343 = vmatpush.bf16.msrb.mxu2 %v6164_v24  ;;  %v1004_v1 = vmul.f32 %v8321_v7, %v983_v43 }
 0x1a7   : > { %v863_v14 = vsub.f32 1.5, %v862_v47 }
 0x1a8   : > { %v1024_v19 = vadd.f32 %v8339_v27, %v1004_v1 }
 0x1a9   : > { %v864_v33 = vmul.f32 %v8474_v6, %v863_v14  ;;  %v8548_v14 = vld [vmem:[#allocation11 + $0x98] sm:$0xff] }
 0x1ab   : > { %v868_v12 = vsel %vm8498_vm5, %v8474_v6, %v864_v33 }
 0x1cf   : > { %v776_v9 = vpop.xlane.xlu0 %775 }
 0x1d0   : > { %v792_v13 = vmul.f32 %v776_v9, %v8194_v18 }
 0x1d2   : > { %v808_v53 = vadd.f32 1e-05, %v792_v13 }
 0x1d4   : > { %6527 = vrsqrt.f32 %v808_v53  ;;  %vm965_vm6 = vweird.f32 %v808_v53 }
 0x1d7   : > { %v754_v22 = vpop.xlane.xlu1 %753 }
 0x1d8   : > { %v781_v30 = vmul.f32 %v754_v22, %v8194_v18 }
 0x1da   : > { %v797_v37 = vadd.f32 1e-05, %v781_v30  ;;  %v6528_v38 = vpop.eup %6527 }
 0x1db   : > { %v960_v44 = vmul.f32 %v6528_v38, %v808_v53  ;;  %vm966_vm4 = vweird.f32 %v6528_v38  ;;  %v974_v53 = vmul.f32 %v868_v12, %v8273_v5 }
 0x1dc   : > { %6529 = vrsqrt.f32 %v797_v37  ;;  %vm967_vm7 = vmor %vm965_vm6, %vm966_vm4  ;;  %vm855_vm9 = vweird.f32 %v797_v37 }
 0x1dd   : > { %v961_v50 = vmul.f32 %v6528_v38, %v960_v44 }
 0x1df   : > { %v760_v45 = vpop.xlane.xlu1 %759  ;;  %v962_v63 = vmul.f32 0.5, %v961_v50  ;;  %v1474_v50 = vlaneseq }
 0x1e0   : > { %v784_v0 = vmul.f32 %v760_v45, %v8194_v18 }
 0x1e1   : > { %v963_v29 = vsub.f32 1.5, %v962_v63 }
 0x1e2   : > { %v6530_v28 = vpop.eup %6529  ;;  %v8495_v2 = vadd.f32 1e-05, %v784_v0 }
 0x1e3   : > { %v850_v35 = vmul.f32 %v6530_v28, %v797_v37  ;;  %v964_v4 = vmul.f32 %v6528_v38, %v963_v29  ;;  %vm856_vm8 = vweird.f32 %v6530_v28  ;;  %v1434_v29 = vld [vmem:[%s13329_s8] sm:$0x3] }
 0x1e4   : > { %6531 = vrsqrt.f32 %v8495_v2  ;;  %vm857_vm10 = vmor %vm855_vm9, %vm856_vm8  ;;  %vm885_vm11 = vweird.f32 %v8495_v2 }
 0x1e5   : > { %v851_v41 = vmul.f32 %v6530_v28, %v850_v35  ;;  %v968_v9 = vsel %vm967_vm7, %v6528_v38, %v964_v4 }
 0x1e6   : > { %v984_v13 = vmul.f32 %v968_v9, %v8285_v21  ;;  %v8585_v9 = vperm.slane %v1434_v29, 0 }
 0x1e7   : > { %v852_v15 = vmul.f32 0.5, %v851_v41 }
 0x1e8   : > { %v758_v17 = vpop.xlane.xlu0 %757  ;;  %v1005_v42 = vmul.f32 %v8321_v7, %v984_v13  ;;  %13775 = vst [vmem:[#allocation32_spill] sm:$0xff] %v8585_v9  ;;  %v8589_v13 = vld [vmem:[#allocation11 + $0xa0] sm:$0xff] }
 0x1e9   : > { %v853_v16 = vsub.f32 1.5, %v852_v15  ;;  %v783_v11 = vmul.f32 %v758_v17, %v8194_v18  ;;  %v995_v18 = vmul.f32 %v8321_v7, %v974_v53  ;;  %v8592_v15 = vld [vmem:[#allocation11 + $0x210] sm:$0xff]  ;;  %v8594_v17 = vperm.slane %v1434_v29, 1 }
 0x1ea   : > { %v8509_v8 = vpop.eup %6531  ;;  %v1025_v21 = vadd.f32 %v8339_v27, %v1005_v42 }
 0x1eb   : > { %v854_v60 = vmul.f32 %v6530_v28, %v853_v16  ;;  %v880_v6 = vmul.f32 %v8509_v8, %v8495_v2  ;;  %v799_v23 = vadd.f32 1e-05, %v783_v11  ;;  %v1015_v31 = vadd.f32 %v8339_v27, %v995_v18  ;;  %13776 = vst [vmem:[#allocation33_spill] sm:$0xff] %v8594_v17  ;;  %v8606_v11 = vld [vmem:[#allocation11 + $0xa8] sm:$0xff] }
 0x1ec   : > { %v8517_v22 = vpack.c.bf16 %v1025_v21, %v1024_v19  ;;  %vm886_vm12 = vweird.f32 %v8509_v8  ;;  %v8570_v2 = vshrl.u32 %v1474_v50, 7  ;;  %13777 = vst [vmem:[#allocation34_spill] sm:$0xff] %v8606_v11  ;;  %v8611_v21 = vld [vmem:[#allocation11 + $0x20] sm:$0xff]  ;;  %v8656_v50 = vld [vmem:[#allocation11 + $0x28] sm:$0xff] }
 0x1ed   : > { %v858_v25 = vsel %vm857_vm10, %v6530_v28, %v854_v60  ;;  %v881_v5 = vmul.f32 %v8509_v8, %v880_v6  ;;  %6533 = vrsqrt.f32 %v799_v23  ;;  %vm8572_vm14 = vmor %vm885_vm11, %vm886_vm12  ;;  %vm875_vm15 = vweird.f32 %v799_v23 }
 0x1ee   : > { %v973_v26 = vmul.f32 %v858_v25, %v8300_v46  ;;  %1179 = vmatmul.bf16.gmra.mxu2 %v8517_v22  ;;  %1228 = vmatmul.bf16.gmra.mxu3 %v8517_v22  ;;  %v1050_v46 = vld [vmem:[%s13326_s5] sm:$0x3]  ;;  %vm1476_vm1 = vcmp.lt.s32.totalorder %v8570_v2, 1  ;;  %vm1702_vm2 = vcmp.lt.s32.totalorder %v8570_v2, 7  ;;  %vm4511_vm7 = vcmp.lt.s32.totalorder %v8570_v2, 2 }
 0x1ef   : > { %v882_v30 = vmul.f32 0.5, %v881_v5  ;;  %v8532_v38 = vperm.slane %v1050_v46, 0  ;;  %v8534_v40 = vperm.slane %v1050_v46, 1  ;;  %v8632_v46 = vld [vmem:[#allocation11 + $0x300] sm:$0xff]  ;;  %vm4656_vm8 = vcmp.lt.s32.totalorder %v8570_v2, 4 }
 0x1f0   : > { %v994_v36 = vmul.f32 %v8321_v7, %v973_v26 }
 0x1f1   : > { %13765 = vst [vmem:[#allocation24_spill] sm:$0xff] %v8532_v38  ;;  %v883_v47 = vsub.f32 1.5, %v882_v30  ;;  %v8624_v30 = vld [vmem:[#allocation11 + $0x190] sm:$0xff] }
 0x1f2   : > { %v1014_v32 = vadd.f32 %v8339_v27, %v994_v36  ;;  %13766 = vst [vmem:[#allocation25_spill] sm:$0xff] %v8534_v40  ;;  %v8622_v36 = vld [vmem:[#allocation11 + $0x110] sm:$0xff] }
 0x1f3   : > { %v6534_v34 = vpop.eup %6533  ;;  %v884_v45 = vmul.f32 %v8509_v8, %v883_v47 }
 0x1f4   : > { %v8530_v10 = vpack.c.bf16 %v1015_v31, %v1014_v32  ;;  %v870_v37 = vmul.f32 %v6534_v34, %v799_v23  ;;  %vm876_vm13 = vweird.f32 %v6534_v34  ;;  %v8615_v23 = vld [vmem:[#allocation11 + $0x388] sm:$0xff]  ;;  %v8630_v31 = vld [vmem:[#allocation11 + $0x280] sm:$0xff] }
 0x1f5   : > { %v888_v4 = vsel %vm8572_vm14, %v8509_v8, %v884_v45  ;;  %vm877_vm0 = vmor %vm875_vm15, %vm876_vm13  ;;  %13779 = vst [vmem:[#allocation36_spill] sm:$0xff] %v8615_v23  ;;  %v8660_v45 = vld [vmem:[#allocation11 + $0x198] sm:$0xff] }
 0x1f6   : > { %1154 = vmatmul.bf16.gmra.mxu0 %v8530_v10  ;;  %1203 = vmatmul.bf16.gmra.mxu1 %v8530_v10  ;;  %v871_v48 = vmul.f32 %v6534_v34, %v870_v37  ;;  %v976_v42 = vmul.f32 %v888_v4, %v8306_v54  ;;  %v8613_v54 = vld [vmem:[#allocation11 + $0x218] sm:$0xff]  ;;  %13783 = vst [vmem:[#allocation40_spill] sm:$0xff] %v8660_v45 }
 0x1f7   : > { %v1165_v44 = vpop.f32.mrf.mxu2  ;;  %v1214_v59 = vpop.f32.mrf.mxu3  ;;  %13778 = vst [vmem:[#allocation35_spill] sm:$0xff] %v8613_v54 }
 0x1f8   : > { %v872_v24 = vmul.f32 0.5, %v871_v48  ;;  %v8541_v51 = vadd.f32 %v1165_v44, %v8532_v38  ;;  %v8546_v58 = vadd.f32 %v1214_v59, %v8534_v40 }
 0x1fa   : > { %13767 = vst [vmem:[#allocation26_spill] sm:$0xff] %v8541_v51  ;;  %v873_v63 = vsub.f32 1.5, %v872_v24  ;;  %v8557_v0 = vmul.f32 %v8538_v49, %v8541_v51  ;;  %v8561_v28 = vmul.f32 %v8543_v52, %v8541_v51  ;;  %v8565_v43 = vmul.f32 %v8548_v14, %v8546_v58  ;;  %v8658_v24 = vld [vmem:[#allocation11 + $0x118] sm:$0xff] }
 0x1fb   : > { %13768 = vst [vmem:[#allocation27_spill] sm:$0xff] %v8546_v58  ;;  %v8578_v3 = vmul.f32 %v8553_v62, %v8546_v58  ;;  %v13342_v19 = vrot.slane %v8541_v51, 1  ;;  %v13346_v60 = vrot.slane %v8546_v58, 7  ;;  %v13348_v6 = vrot.slane %v8546_v58, 1 }
 0x1fc   : > { %13769 = vst [vmem:[#allocation28_spill] sm:$0xff] %v8557_v0  ;;  %v874_v35 = vmul.f32 %v6534_v34, %v873_v63  ;;  %v8787_v0 = vld [vmem:[#allocation11 + $0x128] sm:$0xff] }
 0x1fd   : > { %13770 = vst [vmem:[#allocation29_spill] sm:$0xff] %v8561_v28 }
 0x1fe   : > { %13771 = vst [vmem:[#allocation30_spill] sm:$0xff] %v8565_v43  ;;  %v878_v41 = vsel %vm877_vm0, %v6534_v34, %v874_v35  ;;  %1344 = vmatmul.bf16.vlgmr.msrb.gmra.mxu2 %v8427_v56  ;;  %1393 = vmatmul.bf16.vlgmr.msrb.gmra.mxu3 %v8427_v56  ;;  %v13343_v56 = vrot.slane %v8541_v51, 7 }
 0x1ff   : > { %13774 = vst [vmem:[#allocation31_spill] sm:$0xff] %v8578_v3  ;;  %v975_v1 = vmul.f32 %v878_v41, %v8351_v39  ;;  %v1167_v12 = vpop.f32.mrf.mxu2  ;;  %v1216_v16 = vpop.f32.mrf.mxu3  ;;  %v8601_v39 = vld [vmem:[#allocation11 + $0x380] sm:$0xff] }
 0x200   : > { %v8599_v8 = vadd.f32 %v1167_v12, %v8532_v38  ;;  %v8604_v53 = vadd.f32 %v1216_v16, %v8534_v40  ;;  %13782 = vst [vmem:[#allocation39_spill] sm:$0xff] %v8658_v24  ;;  %v8684_v12 = vld [vmem:[#allocation11 + $0x308] sm:$0xff] }
 0x201   : > { %v996_v25 = vmul.f32 %v8321_v7, %v975_v1  ;;  %v8682_v1 = vld [vmem:[#allocation11 + $0x288] sm:$0xff]  ;;  %13790 = vst [vmem:[#allocation47_spill] sm:$0xff] %v8684_v12 }
 0x202   : > { %v13345_v26 = vrot.slane %v8599_v8, 7  ;;  %v1626_v5 = vmul.f32 %v8589_v13, %v8599_v8  ;;  %v13344_v18 = vrot.slane %v8599_v8, 1  ;;  %v8628_v32 = vmul.f32 %v8592_v15, %v8599_v8  ;;  %13789 = vst [vmem:[#allocation46_spill] sm:$0xff] %v8682_v1 }
 0x203   : > { %v8636_v34 = vmul.f32 %v8601_v39, %v8599_v8  ;;  %v13347_v37 = vrot.slane %v8604_v53, 7  ;;  %v1627_v47 = vmul.f32 %v8606_v11, %v8604_v53  ;;  %v13349_v48 = vrot.slane %v8604_v53, 1  ;;  %13814 = vst [vmem:[#allocation67_spill] sm:$0xff] %v8787_v0 }
 0x204   : > { %13780 = vst [vmem:[#allocation37_spill] sm:$0xff] %v8628_v32  ;;  %v1489_v44 = vsel %vm1476_vm1, %v13343_v56, %v13345_v26  ;;  %v8654_v59 = vsel %vm1702_vm2, %v13342_v19, %v13344_v18  ;;  %v8664_v63 = vmul.f32 %v8613_v54, %v8604_v53  ;;  %v8668_v29 = vmul.f32 %v8615_v23, %v8604_v53 }
 0x205   : > { %13781 = vst [vmem:[#allocation38_spill] sm:$0xff] %v8636_v34  ;;  %v1545_v33 = vmul.f32 %v8611_v21, %v1489_v44  ;;  %v8673_v35 = vmul.f32 %v8622_v36, %v8654_v59  ;;  %v8676_v4 = vmul.f32 %v8624_v30, %v1489_v44  ;;  %v8680_v41 = vmul.f32 %v8630_v31, %v8654_v59 }
 0x206   : > { %13784 = vst [vmem:[#allocation41_spill] sm:$0xff] %v8664_v63  ;;  %v8687_v16 = vmul.f32 %v8632_v46, %v1489_v44  ;;  %v1490_v19 = vsel %vm1476_vm1, %v13346_v60, %v13347_v37  ;;  %v8701_v56 = vsel %vm1702_vm2, %v13348_v6, %v13349_v48  ;;  %v997_v18 = vmul.f32 %v8321_v7, %v976_v42 }
 0x207   : > { %13785 = vst [vmem:[#allocation42_spill] sm:$0xff] %v8668_v29  ;;  %v1577_v44 = vadd.f32 %v1545_v33, %v8585_v9  ;;  %v1546_v26 = vmul.f32 %v8656_v50, %v1490_v19  ;;  %v8708_v29 = vmul.f32 %v8658_v24, %v8701_v56  ;;  %v8711_v60 = vmul.f32 %v8660_v45, %v1490_v19 }
 0x208   : > { %13786 = vst [vmem:[#allocation43_spill] sm:$0xff] %v8673_v35  ;;  %v8715_v37 = vmul.f32 %v8682_v1, %v8701_v56  ;;  %v8718_v6 = vmul.f32 %v8684_v12, %v1490_v19  ;;  %v1016_v42 = vadd.f32 %v8339_v27, %v996_v25  ;;  %v1017_v33 = vadd.f32 %v8339_v27, %v997_v18  ;;  %v1170_v63 = vpop.f32.mrf.mxu2  ;;  %v1219_v34 = vpop.f32.mrf.mxu3  ;;  %v8732_v19 = vld [vmem:[#allocation11 + $0x390] sm:$0xff]  ;;  %v8737_v25 = vld [vmem:[#allocation11 + $0xb8] sm:$0xff]  ;;  %v8842_v1 = vld [vmem:[#allocation11 + $0xc0] sm:$0xff] }
 0x209   : > { %13787 = vst [vmem:[#allocation44_spill] sm:$0xff] %v8676_v4  ;;  %v1658_v48 = vadd.f32 %v1626_v5, %v1577_v44  ;;  %v1578_v7 = vadd.f32 %v1546_v26, %v8594_v17  ;;  %v8727_v4 = vld [vmem:[#allocation11 + $0x220] sm:$0xff]  ;;  %v8735_v26 = vadd.f32 %v1219_v34, %v8534_v40  ;;  %v8741_v27 = vld [vmem:[#allocation11 + $0x30] sm:$0xff]  ;;  %v8743_v5 = vld [vmem:[#allocation11 + $0x228] sm:$0xff]  ;;  %v13811_v35 = vrot.slane %v8599_v8, 1 }
 0x20a   : > { %13788 = vst [vmem:[#allocation45_spill] sm:$0xff] %v8680_v41  ;;  %v8723_v32 = vpack.c.bf16 %v1017_v33, %v1016_v42  ;;  %v8745_v18 = vld [vmem:[#allocation11 + $0x398] sm:$0xff]  ;;  %v8751_v44 = vld [vmem:[#allocation11 + $0x120] sm:$0xff]  ;;  %v8757_v33 = vld [vmem:[#allocation11 + $0x290] sm:$0xff]  ;;  %v13809_v41 = vrot.slane %v8599_v8, 7 }
 0x20b   : > { %13791 = vst [vmem:[#allocation48_spill] sm:$0xff] %v8687_v16  ;;  %v1659_v16 = vadd.f32 %v1627_v47, %v1578_v7  ;;  %v8753_v7 = vld [vmem:[#allocation11 + $0x1a0] sm:$0xff]  ;;  %v1629_v3 = vmul.f32 %v8737_v25, %v8735_v26  ;;  %v8785_v34 = vld [vmem:[#allocation11 + $0x38] sm:$0xff] }
 0x20c   : > { %13792 = vst [vmem:[#allocation49_spill] sm:$0xff] %v8708_v29  ;;  %1159 = vmatmul.bf16.gmra.mxu0 %v8723_v32  ;;  %1208 = vmatmul.bf16.gmra.mxu1 %v8723_v32  ;;  %v1935_v29 = vmul.f32 %v8743_v5, %v8735_v26 }
 0x20d   : > { %13793 = vst [vmem:[#allocation50_spill] sm:$0xff] %v8711_v60  ;;  %v8725_v60 = vld [vmem:[#allocation11 + $0xb0] sm:$0xff] }
 0x20e   : > { %13794 = vst [vmem:[#allocation51_spill] sm:$0xff] %v8715_v37  ;;  %v8730_v37 = vadd.f32 %v1170_v63, %v8532_v38  ;;  %1349 = vmatmul.bf16.gmra.mxu2 %v8453_v61  ;;  %1398 = vmatmul.bf16.gmra.mxu3 %v8453_v61 }
 0x20f   : > { %13795 = vst [vmem:[#allocation52_spill] sm:$0xff] %v8718_v6  ;;  %v8761_v6 = vld [vmem:[#allocation11 + $0x310] sm:$0xff] }
 0x210   : > { %13796 = vst [vmem:[#allocation53_spill] sm:$0xff] %v8725_v60  ;;  %v1628_v63 = vmul.f32 %v8725_v60, %v8730_v37  ;;  %v1934_v42 = vmul.f32 %v8727_v4, %v8730_v37  ;;  %v8765_v47 = vmul.f32 %v8732_v19, %v8730_v37  ;;  %v13808_v43 = vrot.slane %v8730_v37, 7  ;;  %v1172_v12 = vpop.f32.mrf.mxu2 }
 0x211   : > { %13797 = vst [vmem:[#allocation54_spill] sm:$0xff] %v8727_v4  ;;  %v13810_v28 = vrot.slane %v8730_v37, 1  ;;  %v13822_v4 = vrot.slane %v8604_v53, 7  ;;  %v13823_v60 = vrot.slane %v8735_v26, 1 }
 0x212   : > { %13798 = vst [vmem:[#allocation55_spill] sm:$0xff] %v8732_v19  ;;  %v1487_v61 = vsel %vm1476_vm1, %v13809_v41, %v13808_v43  ;;  %v8805_v19 = vld [vmem:[#allocation11 + $0x298] sm:$0xff] }
 0x213   : > { %13799 = vst [vmem:[#allocation56_spill] sm:$0xff] %v8737_v25  ;;  %v8793_v25 = vmul.f32 %v8745_v18, %v8735_v26  ;;  %v1547_v43 = vmul.f32 %v8741_v27, %v1487_v61  ;;  %v1853_v41 = vmul.f32 %v8753_v7, %v1487_v61 }
 0x214   : > { %13800 = vst [vmem:[#allocation57_spill] sm:$0xff] %v8741_v27 }
 0x215   : > { %13801 = vst [vmem:[#allocation58_spill] sm:$0xff] %v8743_v5  ;;  %v8807_v5 = vld [vmem:[#allocation11 + $0x318] sm:$0xff] }
 0x216   : > { %13802 = vst [vmem:[#allocation59_spill] sm:$0xff] %v8745_v18  ;;  %v8810_v18 = vmul.f32 %v8761_v6, %v1487_v61 }
 0x217   : > { %13803 = vst [vmem:[#allocation60_spill] sm:$0xff] %v8751_v44 }
 0x218   : > { %13804 = vst [vmem:[#allocation61_spill] sm:$0xff] %v8753_v7 }
 0x219   : > { %13805 = vst [vmem:[#allocation62_spill] sm:$0xff] %v8757_v33 }
 0x21a   : > { %13806 = vst [vmem:[#allocation63_spill] sm:$0xff] %v8761_v6 }
 0x21b   : > { %13807 = vst [vmem:[#allocation64_spill] sm:$0xff] %v8765_v47  ;;  %v8783_v47 = vsel %vm1702_vm2, %v13811_v35, %v13810_v28  ;;  %v8803_v35 = vld [vmem:[#allocation11 + $0x1a8] sm:$0xff] }
 0x21c   : > { %13812 = vst [vmem:[#allocation65_spill] sm:$0xff] %v8783_v47  ;;  %v1772_v8 = vmul.f32 %v8751_v44, %v8783_v47  ;;  %v8801_v28 = vmul.f32 %v8757_v33, %v8783_v47  ;;  %v13824_v47 = vrot.slane %v8604_v53, 1  ;;  %v1579_v33 = vadd.f32 %v1547_v43, %v8585_v9 }
 0x21d   : > { %13813 = vst [vmem:[#allocation66_spill] sm:$0xff] %v8785_v34 }
 0x21e   : > { %13815 = vst [vmem:[#allocation68_spill] sm:$0xff] %v8793_v25  ;;  %v13821_v25 = vrot.slane %v8735_v26, 7  ;;  %v1804_v44 = vadd.f32 %v1772_v8, %v1658_v48  ;;  %1354 = vmatmul.bf16.gmra.mxu2 %v8530_v10  ;;  %1403 = vmatmul.bf16.gmra.mxu3 %v8530_v10 }
 0x21f   : > { %13816 = vst [vmem:[#allocation69_spill] sm:$0xff] %v8801_v28  ;;  %v8824_v28 = vsel %vm1702_vm2, %v13824_v47, %v13823_v60 }
 0x220   : > { %13817 = vst [vmem:[#allocation70_spill] sm:$0xff] %v8803_v35  ;;  %v1488_v7 = vsel %vm1476_vm1, %v13822_v4, %v13821_v25  ;;  %v8833_v4 = vmul.f32 %v8805_v19, %v8824_v28  ;;  %v1660_v25 = vadd.f32 %v1628_v63, %v1579_v33  ;;  %v1885_v60 = vadd.f32 %v1853_v41, %v1804_v44  ;;  %v8851_v44 = vld [vmem:[#allocation11 + $0xc8] sm:$0xff] }
 0x221   : > { %13818 = vst [vmem:[#allocation71_spill] sm:$0xff] %v8805_v19  ;;  %v1548_v61 = vmul.f32 %v8785_v34, %v1488_v7  ;;  %v1854_v6 = vmul.f32 %v8803_v35, %v1488_v7  ;;  %v8836_v53 = vmul.f32 %v8807_v5, %v1488_v7  ;;  %v8840_v35 = vadd.f32 %v1172_v12, %v8532_v38  ;;  %v8846_v7 = vld [vmem:[#allocation11 + $0x3a0] sm:$0xff]  ;;  %v8858_v12 = vld [vmem:[#allocation11 + $0x1b0] sm:$0xff] }
 0x222   : > { %13819 = vst [vmem:[#allocation72_spill] sm:$0xff] %v8807_v5  ;;  %v1966_v48 = vadd.f32 %v1934_v42, %v1885_v60  ;;  %v8869_v42 = vld [vmem:[#allocation11 + $0x320] sm:$0xff]  ;;  %v13837_v41 = vrot.slane %v8730_v37, 7  ;;  %v8880_v60 = vld [vmem:[#allocation11 + $0x48] sm:$0xff] }
 0x223   : > { %13820 = vst [vmem:[#allocation73_spill] sm:$0xff] %v8810_v18  ;;  %v1773_v18 = vmul.f32 %v8787_v0, %v8824_v28  ;;  %v1580_v47 = vadd.f32 %v1548_v61, %v8594_v17  ;;  %v1221_v0 = vpop.f32.mrf.mxu3  ;;  %v2177_v33 = vmul.f32 %v8846_v7, %v8840_v35  ;;  %v8897_v61 = vld [vmem:[#allocation11 + $0x238] sm:$0xff]  ;;  %v8912_v5 = vld [vmem:[#allocation11 + $0x328] sm:$0xff] }
 0x224   : > { %13825 = vst [vmem:[#allocation74_spill] sm:$0xff] %v8824_v28  ;;  %v8844_v28 = vld [vmem:[#allocation11 + $0x230] sm:$0xff]  ;;  %v8849_v63 = vadd.f32 %v1221_v0, %v8534_v40 }
 0x225   : > { %13826 = vst [vmem:[#allocation75_spill] sm:$0xff] %v8833_v4  ;;  %v1805_v43 = vadd.f32 %v1773_v18, %v1659_v16  ;;  %v1661_v8 = vadd.f32 %v1629_v3, %v1580_v47  ;;  %v13370_v3 = vrot.slane %v8840_v35, 7  ;;  %v1692_v16 = vrot.slane %v8840_v35, 1  ;;  %v8863_v18 = vld [vmem:[#allocation11 + $0x130] sm:$0xff] }
 0x226   : > { %13827 = vst [vmem:[#allocation76_spill] sm:$0xff] %v8836_v53  ;;  %v1936_v0 = vmul.f32 %v8844_v28, %v8840_v35  ;;  %v1631_v47 = vmul.f32 %v8851_v44, %v8849_v63  ;;  %v8885_v53 = vld [vmem:[#allocation11 + $0x1b8] sm:$0xff]  ;;  %v13846_v45 = vrot.slane %v8849_v63, 1 }
 0x227   : > { %v1886_v34 = vadd.f32 %v1854_v6, %v1805_v43  ;;  %13828 = vst [vmem:[#allocation77_spill] sm:$0xff] %v8842_v1  ;;  %v8854_v6 = vld [vmem:[#allocation11 + $0x40] sm:$0xff]  ;;  %v1485_v10 = vsel %vm1476_vm1, %v13837_v41, %v13370_v3  ;;  %v8895_v3 = vld [vmem:[#allocation11 + $0x138] sm:$0xff] }
 0x228   : > { %13829 = vst [vmem:[#allocation78_spill] sm:$0xff] %v8844_v28  ;;  %v1549_v4 = vmul.f32 %v8854_v6, %v1485_v10  ;;  %v1855_v41 = vmul.f32 %v8858_v12, %v1485_v10 }
 0x229   : > { %v1967_v27 = vadd.f32 %v1935_v29, %v1886_v34  ;;  %13830 = vst [vmem:[#allocation79_spill] sm:$0xff] %v8846_v7  ;;  %v1630_v29 = vmul.f32 %v8842_v1, %v8840_v35  ;;  %v8867_v34 = vld [vmem:[#allocation11 + $0x2a0] sm:$0xff]  ;;  %v13840_v7 = vrot.slane %v8730_v37, 1  ;;  %v2096_v1 = vmul.f32 %v8869_v42, %v1485_v10 }
 0x22a   : > { %13831 = vst [vmem:[#allocation80_spill] sm:$0xff] %v8851_v44  ;;  %v13844_v37 = vrot.slane %v8849_v63, 7  ;;  %v1581_v19 = vadd.f32 %v1549_v4, %v8585_v9  ;;  %v1937_v4 = vmul.f32 %v8897_v61, %v8849_v63 }
 0x22b   : > { %13832 = vst [vmem:[#allocation81_spill] sm:$0xff] %v8854_v6  ;;  %v8892_v28 = vsel %vm1702_vm2, %v13840_v7, %v1692_v16  ;;  %v13845_v6 = vrot.slane %v8735_v26, 7 }
 0x22c   : > { %13833 = vst [vmem:[#allocation82_spill] sm:$0xff] %v8858_v12  ;;  %v1774_v44 = vmul.f32 %v8863_v18, %v8892_v28  ;;  %v2015_v43 = vmul.f32 %v8867_v34, %v8892_v28  ;;  %v8910_v12 = vld [vmem:[#allocation11 + $0x2a8] sm:$0xff] }
 0x22d   : > { %13834 = vst [vmem:[#allocation83_spill] sm:$0xff] %v8863_v18  ;;  %v1486_v7 = vsel %vm1476_vm1, %v13845_v6, %v13844_v37 }
 0x22e   : > { %13835 = vst [vmem:[#allocation84_spill] sm:$0xff] %v8867_v34  ;;  %v1550_v18 = vmul.f32 %v8880_v60, %v1486_v7  ;;  %v8925_v34 = vld [vmem:[#allocation11 + $0x3a8] sm:$0xff]  ;;  %v1806_v6 = vadd.f32 %v1774_v44, %v1660_v25  ;;  %v2047_v37 = vadd.f32 %v2015_v43, %v1966_v48  ;;  %1359 = vmatmul.bf16.gmra.mxu2 %v8723_v32 }
 0x22f   : > { %13836 = vst [vmem:[#allocation85_spill] sm:$0xff] %v8869_v42  ;;  %v1856_v42 = vmul.f32 %v8885_v53, %v1486_v7  ;;  %v2178_v25 = vmul.f32 %v8925_v34, %v8849_v63  ;;  %1408 = vmatmul.bf16.gmra.mxu3 %v8723_v32 }
 0x230   : > { %13838 = vst [vmem:[#allocation86_spill] sm:$0xff] %v8880_v60  ;;  %v1662_v60 = vadd.f32 %v1630_v29, %v1581_v19  ;;  %v1582_v24 = vadd.f32 %v1550_v18, %v8594_v17  ;;  %v1175_v18 = vpop.f32.mrf.mxu2 }
 0x231   : > { %13839 = vst [vmem:[#allocation87_spill] sm:$0xff] %v8885_v53  ;;  %v2128_v53 = vadd.f32 %v2096_v1, %v2047_v37  ;;  %v8938_v17 = vadd.f32 %v1175_v18, %v8532_v38 }
 0x232   : > { %13841 = vst [vmem:[#allocation88_spill] sm:$0xff] %v8892_v28  ;;  %v13847_v28 = vrot.slane %v8735_v26, 1  ;;  %v1663_v48 = vadd.f32 %v1631_v47, %v1582_v24  ;;  %v1744_v24 = vld [vmem:[#allocation11 + $0x140] sm:$0xff] }
 0x233   : > { %13842 = vst [vmem:[#allocation89_spill] sm:$0xff] %v8895_v3  ;;  %v1694_v1 = vrot.slane %v8938_v17, 1 }
 0x234   : > { %13843 = vst [vmem:[#allocation90_spill] sm:$0xff] %v8897_v61  ;;  %v8922_v10 = vsel %vm1702_vm2, %v13847_v28, %v13846_v45  ;;  %v2097_v45 = vmul.f32 %v8912_v5, %v1486_v7  ;;  %v1887_v28 = vadd.f32 %v1855_v41, %v1806_v6  ;;  %v1906_v7 = vld [vmem:[#allocation11 + $0x240] sm:$0xff]  ;;  %v2147_v6 = vld [vmem:[#allocation11 + $0x3b0] sm:$0xff] }
 0x235   : > { %13848 = vst [vmem:[#allocation91_spill] sm:$0xff] %v8922_v10  ;;  %v1775_v23 = vmul.f32 %v8895_v3, %v8922_v10  ;;  %v2016_v26 = vmul.f32 %v8910_v12, %v8922_v10  ;;  %v2209_v3 = vadd.f32 %v2177_v33, %v2128_v53  ;;  %v1825_v53 = vld [vmem:[#allocation11 + $0x1c0] sm:$0xff]  ;;  %v1709_v32 = vsel %vm1702_vm2, %v1692_v16, %v1694_v1 }
 0x236   : > { %v1968_v43 = vadd.f32 %v1936_v0, %v1887_v28  ;;  %v1224_v0 = vpop.f32.mrf.mxu3  ;;  %v1776_v33 = vmul.f32 %v1744_v24, %v1709_v32  ;;  %v2179_v24 = vmul.f32 %v2147_v6, %v8938_v17 }
 0x237   : > { %v1807_v54 = vadd.f32 %v1775_v23, %v1661_v8  ;;  %v2048_v44 = vadd.f32 %v2016_v26, %v1967_v27  ;;  %v1466_v23 = vrot.slane %v8938_v17, 7  ;;  %v1985_v27 = vld [vmem:[#allocation11 + $0x2b0] sm:$0xff]  ;;  %v2226_v8 = vld [vmem:[#allocation11 + $0x420] sm:$0xff]  ;;  %v8956_v37 = vadd.f32 %v1224_v0, %v8534_v40 }
 0x238   : > { %v2258_v47 = vmul.f32 %v2226_v8, %v1709_v32  ;;  %v1986_v8 = vld [vmem:[#allocation11 + $0x2b8] sm:$0xff]  ;;  %v13851_v0 = vrot.slane %v8849_v63, 7 }
 0x239   : > { %v1888_v11 = vadd.f32 %v1856_v42, %v1807_v54  ;;  %v2129_v61 = vadd.f32 %v2097_v45, %v2048_v44  ;;  %v2066_v42 = vld [vmem:[#allocation11 + $0x330] sm:$0xff]  ;;  %v1467_v28 = vrot.slane %v8956_v37, 7  ;;  %v1695_v16 = vrot.slane %v8956_v37, 1 }
 0x23a   : > { %v8959_v45 = vadd.f32 %v2258_v47, %v2209_v3  ;;  %v1938_v44 = vmul.f32 %v1906_v7, %v8938_v17  ;;  %v2148_v7 = vld [vmem:[#allocation11 + $0x3b8] sm:$0xff] }
 0x23b   : > { %v1969_v19 = vadd.f32 %v1937_v4, %v1888_v11  ;;  %v2210_v29 = vadd.f32 %v2178_v25, %v2129_v61  ;;  %v13849_v11 = vrot.slane %v8840_v35, 7  ;;  %v2017_v61 = vmul.f32 %v1985_v27, %v1709_v32  ;;  %v1745_v27 = vld [vmem:[#allocation11 + $0x148] sm:$0xff] }
 0x23c   : > { %v1808_v35 = vadd.f32 %v1776_v33, %v1662_v60  ;;  %v8975_v32 = vsel %vm1476_vm1, %v13851_v0, %v1467_v28  ;;  %v2067_v33 = vld [vmem:[#allocation11 + $0x338] sm:$0xff] }
 0x23d   : > { %v8950_v54 = vsel %vm1476_vm1, %v13849_v11, %v1466_v23  ;;  %v2049_v4 = vadd.f32 %v2017_v61, %v1968_v43  ;;  %v13850_v11 = vrot.slane %v8849_v63, 1  ;;  %v2227_v43 = vld [vmem:[#allocation11 + $0x428] sm:$0xff] }
 0x23e   : > { %v1857_v41 = vmul.f32 %v1825_v53, %v8950_v54  ;;  %v2098_v26 = vmul.f32 %v2066_v42, %v8950_v54  ;;  %v1826_v42 = vld [vmem:[#allocation11 + $0x1c8] sm:$0xff]  ;;  %1364 = vmatmul.bf16.gmra.mxu2 %v8368_v55 }
 0x23f   : > { %v1710_v60 = vsel %vm1702_vm2, %v13850_v11, %v1695_v16  ;;  %1413 = vmatmul.bf16.gmra.mxu3 %v8368_v55 }
 0x240   : > { %v1889_v25 = vadd.f32 %v1857_v41, %v1808_v35  ;;  %v2130_v18 = vadd.f32 %v2098_v26, %v2049_v4  ;;  %v1777_v61 = vmul.f32 %v1745_v27, %v1710_v60  ;;  %v2018_v47 = vmul.f32 %v1986_v8, %v1710_v60  ;;  %v1907_v41 = vld [vmem:[#allocation11 + $0x248] sm:$0xff] }
 0x241   : > { %v2259_v6 = vmul.f32 %v2227_v43, %v1710_v60  ;;  %v1858_v4 = vmul.f32 %v1826_v42, %v8975_v32  ;;  %v2180_v27 = vmul.f32 %v2148_v7, %v8956_v37 }
 0x242   : > { %v1970_v3 = vadd.f32 %v1938_v44, %v1889_v25  ;;  %v2211_v53 = vadd.f32 %v2179_v24, %v2130_v18  ;;  %v1809_v35 = vadd.f32 %v1777_v61, %v1663_v48  ;;  %v2050_v26 = vadd.f32 %v2018_v47, %v1969_v19  ;;  %v1177_v48 = vpop.f32.mrf.mxu2  ;;  %v2149_v47 = vld [vmem:[#allocation11 + $0x3c0] sm:$0xff] }
 0x243   : > { %v2099_v25 = vmul.f32 %v2067_v33, %v8975_v32  ;;  %v8980_v63 = vadd.f32 %v2259_v6, %v2210_v29  ;;  %v1939_v18 = vmul.f32 %v1907_v41, %v8956_v37  ;;  %v8986_v60 = vadd.f32 %v1177_v48, %v8532_v38  ;;  %v1987_v29 = vld [vmem:[#allocation11 + $0x2c0] sm:$0xff]  ;;  %v2228_v41 = vld [vmem:[#allocation11 + $0x430] sm:$0xff] }
 0x244   : > { %v1890_v44 = vadd.f32 %v1858_v4, %v1809_v35  ;;  %v2068_v33 = vld [vmem:[#allocation11 + $0x340] sm:$0xff] }
 0x245   : > { %v2131_v24 = vadd.f32 %v2099_v25, %v2050_v26  ;;  %v13397_v19 = vrot.slane %v8986_v60, 1  ;;  %v13393_v43 = vrot.slane %v8986_v60, 7  ;;  %v2181_v6 = vmul.f32 %v2149_v47, %v8986_v60  ;;  %v1226_v26 = vpop.f32.mrf.mxu3 }
 0x246   : > { %v1971_v8 = vadd.f32 %v1939_v18, %v1890_v44  ;;  %v1988_v44 = vld [vmem:[#allocation11 + $0x2c8] sm:$0xff]  ;;  %v2229_v18 = vld [vmem:[#allocation11 + $0x438] sm:$0xff] }
 0x247   : > { %v2212_v11 = vadd.f32 %v2180_v27, %v2131_v24  ;;  %v8994_v55 = vsel %vm1702_vm2, %v1694_v1, %v13397_v19  ;;  %v9004_v0 = vsel %vm1476_vm1, %v1466_v23, %v13393_v43  ;;  %v9015_v23 = vadd.f32 %v1226_v26, %v8534_v40 }
 0x248   : > { %v2019_v42 = vmul.f32 %v1987_v29, %v8994_v55  ;;  %v2100_v1 = vmul.f32 %v2068_v33, %v9004_v0  ;;  %v2150_v29 = vld [vmem:[#allocation11 + $0x3c8] sm:$0xff] }
 0x249   : > { %13852 = vst [vmem:[#allocation92_spill] sm:$0xff] %v9015_v23  ;;  %v13394_v25 = vrot.slane %v9015_v23, 1 }
 0x24a   : > { %v2051_v61 = vadd.f32 %v2019_v42, %v1970_v3  ;;  %v13392_v3 = vrot.slane %v9015_v23, 7 }
 0x24c   : > { %v2132_v7 = vadd.f32 %v2100_v1, %v2051_v61  ;;  %v9033_v24 = vsel %vm1476_vm1, %v1467_v28, %v13392_v3  ;;  %v2182_v1 = vmul.f32 %v2150_v29, %v9015_v23  ;;  %v2322_v28 = vsub.f32 0.0, %v8959_v45 }
 0x24e   : > { %1369 = vmatmul.bf16.gmra.mxu2 %v8429_v57  ;;  %v9010_v35 = vadd.f32 %v2181_v6, %v2132_v7  ;;  %v1145_v7 = vpop.f32.mrf.mxu0  ;;  %v2323_v6 = vsub.f32 0.0, %v8980_v63 }
 0x24f   : > { %1418 = vmatmul.bf16.gmra.mxu3 %v8429_v57  ;;  %v2260_v57 = vmul.f32 %v2228_v41, %v8994_v55  ;;  %v2374_v41 = vmul.f32 1.442695, %v2322_v28 }
 0x251   : > { %v9012_v4 = vadd.f32 %v2260_v57, %v2211_v53  ;;  %v9025_v53 = vsel %vm1702_vm2, %v1695_v16, %v13394_v25  ;;  %6535 = vpow2.f32 %v2374_v41 }
 0x252   : > { %13853 = vst [vmem:[#allocation93_spill] sm:$0xff] %v9025_v53  ;;  %v2020_v27 = vmul.f32 %v1988_v44, %v9025_v53  ;;  %v2261_v48 = vmul.f32 %v2229_v18, %v9025_v53  ;;  %v13928_v53 = vld [vmem:[#allocation63_spill] sm:$0xff] }
 0x254   : > { %v2052_v42 = vadd.f32 %v2020_v27, %v1971_v8  ;;  %v9038_v61 = vadd.f32 %v2261_v48, %v2212_v11  ;;  %v2376_v8 = vmul.f32 1.442695, %v2323_v6  ;;  %v1194_v11 = vpop.f32.mrf.mxu1  ;;  %v2155_v27 = vld [vmem:[#allocation11 + $0x3f0] sm:$0xff] }
 0x255   : > { %v9058_v6 = vmul.f32 %v2155_v27, %v8541_v51 }
 0x256   : > { %6537 = vpow2.f32 %v2376_v8  ;;  %v1147_v26 = vpop.f32.mrf.mxu0 }
 0x257   : > { %v6536_v57 = vpop.eup %6535  ;;  %v9048_v18 = vadd.f32 %v1147_v26, %v8532_v38  ;;  %13855 = vst [vmem:[#allocation95_spill] sm:$0xff] %v9058_v6 }
 0x258   : > { %v2418_v44 = vadd.f32 1.0, %v6536_v57  ;;  %v9067_v57 = vadd.f32 %v1194_v11, %v8534_v40 }
 0x259   : > { %v13396_v48 = vrot.slane %v9048_v18, 7 }
 0x25a   : > { %6539 = vrcp.f32 %v2418_v44  ;;  %13857 = vst [vmem:[#allocation97_spill] sm:$0xff] %v9067_v57  ;;  %v2532_v44 = vld [vmem:[#allocation13] sm:$0x3] }
 0x25b   : > { %v9104_v19 = vperm.slane %v2532_v44, 0 }
 0x25c   : > { %v1196_v28 = vpop.f32.mrf.mxu1 }
 0x25d   : > { %v9084_v11 = vadd.f32 %v1196_v28, %v8534_v40  ;;  %13865 = vst [vmem:[#allocation105_spill] sm:$0xff] %v9104_v19 }
 0x25e   : > { %1374 = vmatmul.bf16.gmra.mxu2 %v8455_v20 }
 0x25f   : > { %1423 = vmatmul.bf16.gmra.mxu3 %v8455_v20  ;;  %v2069_v20 = vld [vmem:[#allocation11 + $0x348] sm:$0xff] }
 0x260   : > { %v2101_v33 = vmul.f32 %v2069_v20, %v9033_v24  ;;  %v6538_v20 = vpop.eup %6537 }
 0x261   : > { %v2419_v29 = vadd.f32 1.0, %v6538_v20  ;;  %v6540_v41 = vpop.eup %6539 }
 0x262   : > { %v2133_v16 = vadd.f32 %v2101_v33, %v2052_v42  ;;  %v2156_v42 = vld [vmem:[#allocation11 + $0x3f8] sm:$0xff]  ;;  %v2236_v33 = vld [vmem:[#allocation11 + $0x470] sm:$0xff] }
 0x263   : > { %v9064_v8 = vmul.f32 %v2156_v42, %v8546_v58  ;;  %6541 = vrcp.f32 %v2419_v29  ;;  %v9076_v20 = vmul.f32 %v2236_v33, %v8654_v59  ;;  %v9092_v29 = vmul.f32 %v6540_v41, %v8959_v45 }
 0x264   : > { %v9041_v47 = vadd.f32 %v2182_v1, %v2133_v16  ;;  %v9054_v16 = vld [vmem:[#allocation11 + $0x478] sm:$0xff]  ;;  %v9109_v45 = vmul.f32 %v8548_v14, %v9067_v57  ;;  %v9159_v14 = vmul.f32 %v8601_v39, %v9048_v18  ;;  %v1199_v6 = vpop.f32.mrf.mxu1  ;;  %v13881_v39 = vrot.slane %v8986_v60, 1 }
 0x265   : > { %13856 = vst [vmem:[#allocation96_spill] sm:$0xff] %v9064_v8  ;;  %v9080_v3 = vmul.f32 %v9054_v16, %v8701_v56 }
 0x266   : > { %13858 = vst [vmem:[#allocation98_spill] sm:$0xff] %v9076_v20  ;;  %v13877_v20 = vrot.slane %v9067_v57, 7 }
 0x267   : > { %13859 = vst [vmem:[#allocation99_spill] sm:$0xff] %v9080_v3 }
 0x268   : > { %13861 = vst [vmem:[#allocation101_spill] sm:$0xff] %v9092_v29 }
 0x269   : > { %13866 = vst [vmem:[#allocation106_spill] sm:$0xff] %v9109_v45  ;;  %v6542_v41 = vpop.eup %6541 }
 0x26a   : > { %13875 = vst [vmem:[#allocation113_spill] sm:$0xff] %v9159_v14 }
 0x26e   : > { %1379 = vmatmul.bf16.gmra.mxu2 %v8517_v22 }
 0x26f   : > { %1428 = vmatmul.bf16.gmra.mxu3 %v8517_v22  ;;  %v9051_v22 = vadd.f32 %v1145_v7, %v8532_v38  ;;  %v2494_v7 = vld [vmem:[%s13330_s9] sm:$0x3] }
 0x270   : > { %v9094_v59 = vperm.slane %v2494_v7, 0 }
 0x271   : > { %13854 = vst [vmem:[#allocation94_spill] sm:$0xff] %v9051_v22  ;;  %v13395_v1 = vrot.slane %v9051_v22, 7  ;;  %v9088_v25 = vmul.f32 %v8538_v49, %v9051_v22  ;;  %v9098_v56 = vmul.f32 %v8543_v52, %v9051_v22  ;;  %v1180_v49 = vpop.f32.mrf.mxu2  ;;  %v9114_v52 = vmul.f32 %v8553_v62, %v9067_v57 }
 0x272   : > { %13862 = vst [vmem:[#allocation102_spill] sm:$0xff] %v9094_v59  ;;  %v13870_v10 = vrot.slane %v9051_v22, 1  ;;  %v9127_v3 = vadd.f32 %v1180_v49, %v8532_v38  ;;  %v1610_v62 = vmul.f32 %v8589_v13, %v9048_v18  ;;  %v9140_v58 = vmul.f32 %v9094_v59, %v9092_v29 }
 0x273   : > { %v1505_v26 = vsel %vm1476_vm1, %v13395_v1, %v13396_v48  ;;  %13860 = vst [vmem:[#allocation100_spill] sm:$0xff] %v9088_v25  ;;  %v9101_v48 = vmul.f32 %v2155_v27, %v9051_v22  ;;  %v1150_v1 = vpop.f32.mrf.mxu0  ;;  %v9117_v27 = vmul.f32 %v2156_v42, %v9067_v57  ;;  %v9136_v42 = vmul.f32 %v8592_v15, %v9048_v18  ;;  %v13896_v25 = vld [vmem:[#allocation39_spill] sm:$0xff] }
 0x274   : > { %13863 = vst [vmem:[#allocation103_spill] sm:$0xff] %v9098_v56  ;;  %v1529_v28 = vmul.f32 %v8611_v21, %v1505_v26  ;;  %v13869_v21 = vrot.slane %v9048_v18, 1  ;;  %v9132_v8 = vmul.f32 %v8624_v30, %v1505_v26  ;;  %v9144_v49 = vadd.f32 %v1150_v1, %v8532_v38  ;;  %v1229_v1 = vpop.f32.mrf.mxu3  ;;  %v13895_v56 = vld [vmem:[#allocation33_spill] sm:$0xff] }
 0x275   : > { %13864 = vst [vmem:[#allocation104_spill] sm:$0xff] %v9101_v48  ;;  %v9155_v15 = vmul.f32 %v8632_v46, %v1505_v26  ;;  %v9171_v46 = vperm.slane %v2494_v7, 1  ;;  %v13880_v26 = vrot.slane %v9127_v3, 1  ;;  %v9193_v45 = vadd.f32 %v1229_v1, %v8534_v40 }
 0x276   : > { %13867 = vst [vmem:[#allocation107_spill] sm:$0xff] %v9114_v52  ;;  %v1731_v43 = vsel %vm1702_vm2, %v13870_v10, %v13869_v21  ;;  %v1561_v10 = vadd.f32 %v1529_v28, %v8585_v9  ;;  %v9148_v21 = vmul.f32 %v9104_v19, %v9092_v29  ;;  %v1673_v28 = vrot.slane %v9084_v11, 1 }
 0x277   : > { %13868 = vst [vmem:[#allocation108_spill] sm:$0xff] %v9117_v27  ;;  %v9152_v30 = vmul.f32 %v8622_v36, %v1731_v43  ;;  %v9169_v36 = vmul.f32 %v6542_v41, %v8980_v63  ;;  %v9179_v14 = vsel %vm1702_vm2, %v13881_v39, %v13880_v26  ;;  %v9184_v51 = vmul.f32 %v2236_v33, %v1731_v43  ;;  %v2230_v63 = vld [vmem:[#allocation11 + $0x440] sm:$0xff] }
 0x278   : > { %13871 = vst [vmem:[#allocation109_spill] sm:$0xff] %v9132_v8  ;;  %v2324_v52 = vsub.f32 0.0, %v9012_v4  ;;  %v1642_v26 = vadd.f32 %v1610_v62, %v1561_v10  ;;  %v2262_v33 = vmul.f32 %v2230_v63, %v9179_v14  ;;  %v13888_v7 = vrot.slane %v9067_v57, 1  ;;  %v13913_v57 = vld [vmem:[#allocation60_spill] sm:$0xff] }
 0x279   : > { %13872 = vst [vmem:[#allocation110_spill] sm:$0xff] %v9136_v42  ;;  %v13876_v42 = vrot.slane %v9084_v11, 7  ;;  %v9209_v62 = vmul.f32 %v9171_v46, %v9169_v36  ;;  %v13891_v10 = vsub.f32 0.0, %v9140_v58 }
 0x27a   : > { %13873 = vst [vmem:[#allocation111_spill] sm:$0xff] %v9152_v30  ;;  %v1732_v41 = vsel %vm1702_vm2, %v13888_v7, %v1673_v28  ;;  %v13892_v7 = vrot.slane %v9144_v49, 7  ;;  %v2378_v8 = vmul.f32 1.442695, %v2324_v52  ;;  %v13904_v52 = vrot.slane %v9144_v49, 1 }
 0x27b   : > { %13874 = vst [vmem:[#allocation112_spill] sm:$0xff] %v9155_v15  ;;  %v1506_v13 = vsel %vm1476_vm1, %v13877_v20, %v13876_v42  ;;  %v9182_v15 = vmul.f32 %v8630_v31, %v1731_v43  ;;  %v9187_v42 = vperm.slane %v2532_v44, 1  ;;  %v9197_v43 = vadd.f32 %v1199_v6, %v8534_v40  ;;  %v13887_v44 = vld [vmem:[#allocation34_spill] sm:$0xff] }
 0x27c   : > { %13878 = vst [vmem:[#allocation114_spill] sm:$0xff] %v9169_v36  ;;  %v1530_v31 = vmul.f32 %v8656_v50, %v1506_v13  ;;  %v1611_v39 = vmul.f32 %v13887_v44, %v9084_v11  ;;  %v13889_v50 = vld [vmem:[#allocation35_spill] sm:$0xff]  ;;  %v2692_v1 = vand.u32 2147483647, %v13891_v10  ;;  %v9222_v44 = vadd.f32 %v2262_v33, %v9010_v35  ;;  %v13898_v35 = vld [vmem:[#allocation36_spill] sm:$0xff]  ;;  %v13906_v10 = vld [vmem:[#allocation57_spill] sm:$0xff] }
 0x27d   : > { %13879 = vst [vmem:[#allocation115_spill] sm:$0xff] %v9171_v46  ;;  %v9213_v6 = vmul.f32 %v13889_v50, %v9084_v11  ;;  %v9219_v63 = vmul.f32 %v9187_v42, %v9169_v36  ;;  %v13893_v20 = vrot.slane %v9048_v18, 7  ;;  %v13894_v50 = vsub.f32 0.0, %v9148_v21 }
 0x27e   : > { %13882 = vst [vmem:[#allocation116_spill] sm:$0xff] %v9179_v14  ;;  %v1562_v30 = vadd.f32 %v1530_v31, %v13895_v56  ;;  %v9235_v27 = vmul.f32 %v13896_v25, %v1732_v41  ;;  %v9239_v33 = vmul.f32 %v13898_v35, %v9084_v11  ;;  %6543 = vpow2.f32 %v2378_v8 }
 0x27f   : > { %13883 = vst [vmem:[#allocation117_spill] sm:$0xff] %v9182_v15  ;;  %v1503_v15 = vsel %vm1476_vm1, %v13893_v20, %v13892_v7  ;;  %v13902_v20 = vld [vmem:[#allocation46_spill] sm:$0xff] }
 0x280   : > { %13884 = vst [vmem:[#allocation118_spill] sm:$0xff] %v9184_v51  ;;  %v13900_v51 = vld [vmem:[#allocation40_spill] sm:$0xff]  ;;  %v9246_v7 = vmul.f32 %v13902_v20, %v1732_v41  ;;  %v1531_v35 = vmul.f32 %v13906_v10, %v1503_v15  ;;  %v1643_v10 = vadd.f32 %v1611_v39, %v1562_v30  ;;  %v1152_v30 = vpop.f32.mrf.mxu0 }
 0x281   : > { %13885 = vst [vmem:[#allocation119_spill] sm:$0xff] %v9187_v42  ;;  %v9243_v48 = vmul.f32 %v13900_v51, %v1506_v13  ;;  %v13907_v51 = vrot.slane %v9193_v45, 1  ;;  %v9306_v14 = vadd.f32 %v1152_v30, %v8532_v38  ;;  %v2570_v30 = vld [vmem:[%s13934_s11] sm:$0x3]  ;;  %s7827_s11 = scalar_lea.hbm %s7826_s1, 128 }
 0x282   : > { %13886 = vst [vmem:[#allocation120_spill] sm:$0xff] %v9193_v45  ;;  %v13914_v45 = vrot.slane %v9197_v43, 1  ;;  %p7828_p1 = scmp.ne.s32.totalorder %s7826_s1, %s7827_s11 }
 0x283   : > { %13890 = vst [vmem:[#allocation34_spill] sm:$0xff] %v9213_v6  ;;  %v3012_v6 = vand.u32 2147483647, %v13894_v50  ;;  %v13905_v50 = vrot.slane %v9048_v18, 1  ;;  %v13910_v18 = vld [vmem:[#allocation47_spill] sm:$0xff] }
 0x284   : > { %13897 = vst [vmem:[#allocation35_spill] sm:$0xff] %v9235_v27  ;;  %v9266_v27 = vmul.f32 %v13910_v18, %v1506_v13  ;;  %v13916_v13 = vld [vmem:[#allocation54_spill] sm:$0xff]  ;;  %p7829_p3 = pnand %p7828_p1, %p8105_p5 }
 0x285   : > { %13899 = vst [vmem:[#allocation39_spill] sm:$0xff] %v9239_v33  ;;  %v1729_v25 = vsel %vm1702_vm2, %v13905_v50, %v13904_v52  ;;  %v2724_v33 = vsub.f32 0.0, %v2692_v1  ;;  %v3044_v50 = vsub.f32 0.0, %v3012_v6  ;;  %v9270_v1 = vmul.f32 %v9054_v16, %v1732_v41 }
 0x286   : > { %13901 = vst [vmem:[#allocation36_spill] sm:$0xff] %v9243_v48  ;;  %v13908_v48 = vrot.slane %v9015_v23, 1  ;;  %v1756_v31 = vmul.f32 %v13913_v57, %v1729_v25  ;;  %v1918_v18 = vmul.f32 %v13916_v13, %v9144_v49  ;;  %v13917_v6 = vsub.f32 0.0, %v9209_v62  ;;  %v13918_v57 = vld [vmem:[#allocation55_spill] sm:$0xff]  ;;  %p7830_p4 = pneg %p7829_p3 }
 0x287   : > { %13903 = vst [vmem:[#allocation40_spill] sm:$0xff] %v9246_v7  ;;  %v2231_v7 = vld [vmem:[#allocation11 + $0x448] sm:$0xff]  ;;  %v1563_v41 = vadd.f32 %v1531_v35, %v8585_v9  ;;  %v9287_v39 = vmul.f32 %v13918_v57, %v9144_v49  ;;  %v2776_v52 = vmul.f32 1.442695, %v2724_v33  ;;  %v13922_v13 = vrot.slane %v9084_v11, 7  ;;  %v13926_v33 = vld [vmem:[#allocation62_spill] sm:$0xff]  ;;  %v6544_v11 = vpop.eup %6543 }
 0x288   : > { %v9263_v20 = vsel %vm1702_vm2, %v13908_v48, %v13907_v51  ;;  %13911 = vst [vmem:[#allocation57_spill] sm:$0xff] %v9266_v27  ;;  %v1730_v48 = vsel %vm1702_vm2, %v1673_v28, %v13914_v45  ;;  %v13915_v51 = vld [vmem:[#allocation53_spill] sm:$0xff]  ;;  %v2693_v8 = vand.u32 2147483647, %v13917_v6  ;;  %v13920_v45 = vsub.f32 0.0, %v9219_v63  ;;  %v13923_v27 = vld [vmem:[#allocation67_spill] sm:$0xff] }
 0x289   : > { %13909 = vst [vmem:[#allocation46_spill] sm:$0xff] %v9263_v20  ;;  %v1612_v22 = vmul.f32 %v13915_v51, %v9144_v49  ;;  %v2263_v16 = vmul.f32 %v2231_v7, %v9263_v20  ;;  %v13921_v51 = vrot.slane %v9197_v43, 7  ;;  %v3096_v7 = vmul.f32 1.442695, %v3044_v50  ;;  %v13925_v57 = vld [vmem:[#allocation61_spill] sm:$0xff] }
 0x28a   : > { %13912 = vst [vmem:[#allocation47_spill] sm:$0xff] %v9270_v1  ;;  %v3013_v28 = vand.u32 2147483647, %v13920_v45  ;;  %v1757_v1 = vmul.f32 %v13923_v27, %v1730_v48  ;;  %v1788_v20 = vadd.f32 %v1756_v31, %v1642_v26  ;;  %v9303_v42 = vmul.f32 %v13926_v33, %v1729_v25  ;;  %v2222_v45 = vld [vmem:[#allocation11 + $0x400] sm:$0xff]  ;;  %v1519_v50 = vld [vmem:[#allocation11 + $0x50] sm:$0xff] }
 0x28b   : > { %13919 = vst [vmem:[#allocation60_spill] sm:$0xff] %v9287_v39  ;;  %v1504_v6 = vsel %vm1476_vm1, %v13922_v13, %v13921_v51  ;;  %v9299_v35 = vadd.f32 %v2263_v16, %v9041_v47  ;;  %v1837_v39 = vmul.f32 %v13925_v57, %v1503_v15  ;;  %v9309_v23 = vmul.f32 %v13928_v53, %v1503_v15  ;;  %v13931_v27 = vld [vmem:[#allocation56_spill] sm:$0xff]  ;;  %v13932_v31 = vld [vmem:[#allocation66_spill] sm:$0xff] }
 0x28c   : > { %13927 = vst [vmem:[#allocation54_spill] sm:$0xff] %v9303_v42  ;;  %v9311_v51 = vmul.f32 %v2222_v45, %v1729_v25  ;;  %v1613_v47 = vmul.f32 %v13931_v27, %v9197_v43  ;;  %v2725_v26 = vsub.f32 0.0, %v2693_v8  ;;  %v1532_v16 = vmul.f32 %v13932_v31, %v1504_v6  ;;  %v13933_v13 = vld [vmem:[#allocation58_spill] sm:$0xff]  ;;  %v13935_v25 = vld [vmem:[#allocation59_spill] sm:$0xff] }
 0x28d   : > { %13924 = vst [vmem:[#allocation53_spill] sm:$0xff] %v9299_v35  ;;  %v1919_v57 = vmul.f32 %v13933_v13, %v9197_v43  ;;  %6545 = vpow2.f32 %v2776_v52  ;;  %v3045_v33 = vsub.f32 0.0, %v3013_v28  ;;  %v9321_v53 = vadd.f32 %v1612_v22, %v1563_v41  ;;  %v1520_v8 = vld [vmem:[#allocation11 + $0x58] sm:$0xff] }
 0x28e   : > { %13929 = vst [vmem:[#allocation55_spill] sm:$0xff] %v9309_v23  ;;  %v1789_v15 = vadd.f32 %v1757_v1, %v1643_v10  ;;  %v9325_v45 = vmul.f32 %v13935_v25, %v9197_v43  ;;  %6547 = vpow2.f32 %v3096_v7  ;;  %v1869_v27 = vadd.f32 %v1837_v39, %v1788_v20  ;;  %v13937_v42 = vld [vmem:[#allocation70_spill] sm:$0xff]  ;;  %v13939_v41 = vld [vmem:[#allocation71_spill] sm:$0xff]  ;;  %v2223_v7 = vld [vmem:[#allocation11 + $0x408] sm:$0xff] }
 0x28f   : > { %13930 = vst [vmem:[#allocation67_spill] sm:$0xff] %v9311_v51  ;;  %v1551_v31 = vmul.f32 %v1519_v50, %v8950_v54  ;;  %v1201_v51 = vpop.f32.mrf.mxu1  ;;  %v2420_v23 = vadd.f32 1.0, %v6544_v11  ;;  %v1838_v35 = vmul.f32 %v13937_v42, %v1504_v6  ;;  %v9330_v52 = vperm.slane %v2570_v30, 0  ;;  %v13941_v50 = vld [vmem:[#allocation72_spill] sm:$0xff]  ;;  %v1600_v42 = vld [vmem:[#allocation11 + $0xd0] sm:$0xff] }
 0x290   : > { %13936 = vst [vmem:[#allocation61_spill] sm:$0xff] %v9325_v45  ;;  %v2778_v22 = vmul.f32 1.442695, %v2725_v26  ;;  %v1564_v1 = vadd.f32 %v1532_v16, %v13895_v56  ;;  %v9335_v28 = vmul.f32 %v13939_v41, %v1730_v48  ;;  %v1552_v20 = vmul.f32 %v1520_v8, %v8975_v32 }
 0x291   : > { %13938 = vst [vmem:[#allocation62_spill] sm:$0xff] %v9330_v52  ;;  %v3098_v54 = vmul.f32 1.442695, %v3045_v33  ;;  %v1870_v39 = vadd.f32 %v1838_v35, %v1789_v15  ;;  %v9339_v25 = vmul.f32 %v13941_v50, %v1504_v6  ;;  %v9341_v11 = vmul.f32 %v2223_v7, %v1730_v48  ;;  %v1601_v35 = vld [vmem:[#allocation11 + $0xd8] sm:$0xff] }
 0x292   : > { %13940 = vst [vmem:[#allocation63_spill] sm:$0xff] %v9335_v28  ;;  %v9344_v26 = vadd.f32 %v1201_v51, %v8534_v40  ;;  %v1950_v13 = vadd.f32 %v1918_v18, %v1869_v27  ;;  %v1583_v16 = vadd.f32 %v1551_v31, %v8585_v9  ;;  %v13945_v41 = vrot.slane %v9306_v14, 7  ;;  %v13961_v28 = vld [vmem:[#allocation86_spill] sm:$0xff] }
 0x293   : > { %13942 = vst [vmem:[#allocation56_spill] sm:$0xff] %v9339_v25  ;;  %v6546_v10 = vpop.eup %6545  ;;  %v13946_v45 = vrot.slane %v9144_v49, 7  ;;  %6549 = vrcp.f32 %v2420_v23  ;;  %v9355_v48 = vmul.f32 %v9330_v52, %v9092_v29  ;;  %v13947_v51 = vrot.slane %v9306_v14, 1  ;;  %v13959_v25 = vld [vmem:[#allocation82_spill] sm:$0xff] }
 0x294   : > { %13943 = vst [vmem:[#allocation66_spill] sm:$0xff] %v9341_v11  ;;  %v6548_v6 = vpop.eup %6547  ;;  %6551 = vpow2.f32 %v2778_v22  ;;  %v13948_v18 = vrot.slane %v9144_v49, 1  ;;  %v2325_v15 = vsub.f32 0.0, %v9038_v61  ;;  %v9364_v8 = vadd.f32 %v1613_v47, %v1564_v1 }
 0x295   : > { %13944 = vst [vmem:[#allocation58_spill] sm:$0xff] %v9344_v26  ;;  %v1501_v32 = vsel %vm1476_vm1, %v13946_v45, %v13945_v41  ;;  %v1632_v23 = vmul.f32 %v1600_v42, %v8938_v17  ;;  %v1584_v45 = vadd.f32 %v1552_v20, %v13895_v56  ;;  %6553 = vpow2.f32 %v3098_v54  ;;  %v13949_v41 = vld [vmem:[#allocation81_spill] sm:$0xff]  ;;  %v13951_v20 = vld [vmem:[#allocation84_spill] sm:$0xff] }
 0x296   : > { %v1727_v33 = vsel %vm1702_vm2, %v13948_v18, %v13947_v51  ;;  %v9368_v27 = vadd.f32 %v1919_v57, %v1870_v39  ;;  %v2820_v31 = vadd.f32 1.0, %v6546_v10  ;;  %v2326_v7 = vsub.f32 0.0, %v9222_v44  ;;  %v13950_v18 = vld [vmem:[#allocation83_spill] sm:$0xff] }
 0x297   : > { %v3140_v49 = vadd.f32 1.0, %v6548_v6  ;;  %v1633_v50 = vmul.f32 %v1601_v35, %v8956_v37  ;;  %v1533_v51 = vmul.f32 %v13949_v41, %v1501_v32  ;;  %v1758_v47 = vmul.f32 %v13950_v18, %v1727_v33  ;;  %v13953_v6 = vld [vmem:[#allocation77_spill] sm:$0xff]  ;;  %v13954_v37 = vld [vmem:[#allocation78_spill] sm:$0xff] }
 0x298   : > { %v9375_v1 = vadd.f32 %v1632_v23, %v1583_v16  ;;  %v13420_v17 = vsub.f32 0.0, %v9355_v48  ;;  %v1999_v54 = vmul.f32 %v13951_v20, %v1727_v33  ;;  %v2380_v57 = vmul.f32 1.442695, %v2325_v15  ;;  %v13955_v16 = vld [vmem:[#allocation79_spill] sm:$0xff] }
 0x299   : > { %v6550_v39 = vpop.eup %6549  ;;  %v9379_v10 = vadd.f32 %v1633_v50, %v1584_v45  ;;  %v9381_v42 = vperm.slane %v2570_v30, 1  ;;  %v1614_v22 = vmul.f32 %v13953_v6, %v9306_v14  ;;  %v1920_v35 = vmul.f32 %v13954_v37, %v9306_v14 }
 0x29a   : > { %v6552_v41 = vpop.eup %6551  ;;  %6555 = vlog2.f32 %v2820_v31  ;;  %v2161_v23 = vmul.f32 %v13955_v16, %v9306_v14  ;;  %v13956_v18 = vrot.slane %v9344_v26, 7  ;;  %v13957_v15 = vrot.slane %v9197_v43, 7 }
 0x29b   : > { %13952 = vst [vmem:[#allocation59_spill] sm:$0xff] %v9381_v42  ;;  %v2382_v30 = vmul.f32 1.442695, %v2326_v7  ;;  %v6554_v50 = vpop.eup %6553  ;;  %6557 = vlog2.f32 %v3140_v49  ;;  %v1565_v20 = vadd.f32 %v1533_v51, %v8585_v9  ;;  %v1790_v6 = vadd.f32 %v1758_v47, %v9321_v53  ;;  %v13960_v7 = vld [vmem:[#allocation85_spill] sm:$0xff] }
 0x29c   : > { %v1502_v45 = vsel %vm1476_vm1, %v13957_v15, %v13956_v18  ;;  %v3908_v31 = vand.u32 2147483647, %v13420_v17  ;;  %v2031_v16 = vadd.f32 %v1999_v54, %v1950_v13  ;;  %v9401_v29 = vmul.f32 %v6550_v39, %v9012_v4  ;;  %v2224_v49 = vld [vmem:[#allocation11 + $0x410] sm:$0xff]  ;;  %v13964_v54 = vld [vmem:[#allocation80_spill] sm:$0xff] }
 0x29d   : > { %6559 = vpow2.f32 %v2380_v57  ;;  %v2821_v11 = vadd.f32 1.0, %v6552_v41  ;;  %v1839_v18 = vmul.f32 %v13959_v25, %v1501_v32  ;;  %v2080_v15 = vmul.f32 %v13960_v7, %v1501_v32 }
 0x29e   : > { %13958 = vst [vmem:[#allocation70_spill] sm:$0xff] %v9401_v29  ;;  %v1534_v51 = vmul.f32 %v13961_v28, %v1502_v45  ;;  %v9408_v53 = vmul.f32 %v9381_v42, %v9169_v36  ;;  %v3141_v47 = vadd.f32 1.0, %v6554_v50  ;;  %v9410_v37 = vmul.f32 %v2224_v49, %v1727_v33  ;;  %v1746_v49 = vld [vmem:[#allocation11 + $0x150] sm:$0xff] }
 0x29f   : > { %6561 = vpow2.f32 %v2382_v30  ;;  %v9412_v13 = vadd.f32 %v1614_v22, %v1565_v20  ;;  %v1871_v4 = vadd.f32 %v1839_v18, %v1790_v6  ;;  %v1615_v57 = vmul.f32 %v13964_v54, %v9344_v26  ;;  %v13967_v6 = vld [vmem:[#allocation87_spill] sm:$0xff] }
 0x2a0   : > { %13962 = vst [vmem:[#allocation71_spill] sm:$0xff] %v9410_v37  ;;  %v13965_v25 = vrot.slane %v9344_v26, 1  ;;  %v13966_v32 = vrot.slane %v9197_v43, 1  ;;  %v6556_v39 = vpop.eup %6555  ;;  %v3684_v41 = vmax.f32 %v9355_v48, 0.0  ;;  %v3940_v50 = vsub.f32 0.0, %v3908_v31  ;;  %v13968_v31 = vld [vmem:[#allocation89_spill] sm:$0xff] }
 0x2a1   : > { %13963 = vst [vmem:[#allocation72_spill] sm:$0xff] %v9412_v13  ;;  %v2112_v33 = vadd.f32 %v2080_v15, %v2031_v16  ;;  %v9425_v22 = vmul.f32 %v9094_v59, %v9401_v29  ;;  %v6558_v30 = vpop.eup %6557  ;;  %6563 = vlog2.f32 %v2821_v11  ;;  %v1566_v20 = vadd.f32 %v1534_v51, %v13895_v56  ;;  %v13970_v11 = vld [vmem:[#allocation90_spill] sm:$0xff] }
 0x2a2   : > { %v1728_v28 = vsel %vm1702_vm2, %v13966_v32, %v13965_v25  ;;  %v1840_v18 = vmul.f32 %v13967_v6, %v1502_v45  ;;  %v9431_v43 = vmul.f32 %v9104_v19, %v9401_v29  ;;  %6565 = vlog2.f32 %v3141_v47 }
 0x2a3   : > { %v6560_v7 = vpop.eup %6559  ;;  %v1759_v16 = vmul.f32 %v13968_v31, %v1728_v28  ;;  %v2000_v15 = vmul.f32 %v8910_v12, %v1728_v28  ;;  %v9436_v54 = vadd.f32 %v1920_v35, %v1871_v4  ;;  %v9440_v25 = vmul.f32 %v13970_v11, %v9344_v26 }
 0x2a4   : > { %v2081_v51 = vmul.f32 %v8912_v5, %v1502_v45  ;;  %v2162_v32 = vmul.f32 %v8925_v34, %v9344_v26  ;;  %v3716_v17 = vadd.f32 0.5, %v3684_v41  ;;  %v3992_v47 = vmul.f32 1.442695, %v3940_v50  ;;  %v2225_v41 = vld [vmem:[#allocation11 + $0x418] sm:$0xff] }
 0x2a5   : > { %13969 = vst [vmem:[#allocation81_spill] sm:$0xff] %v9436_v54  ;;  %v6562_v6 = vpop.eup %6561  ;;  %v9445_v36 = vadd.f32 %v2161_v23, %v2112_v33  ;;  %v2873_v12 = vmul.f32 0.6931472, %v6556_v39  ;;  %v3193_v35 = vmul.f32 0.6931472, %v6558_v30  ;;  %v2421_v37 = vadd.f32 1.0, %v6560_v7 }
 0x2a6   : > { %v13971_v11 = vsub.f32 0.0, %v9408_v53  ;;  %v9451_v5 = vadd.f32 %v1615_v57, %v1566_v20  ;;  %v1791_v34 = vadd.f32 %v1759_v16, %v9364_v8  ;;  %v2032_v45 = vadd.f32 %v2000_v15, %v9368_v27  ;;  %v1521_v7 = vld [vmem:[#allocation11 + $0x60] sm:$0xff] }
 0x2a7   : > { %v6564_v23 = vpop.eup %6563  ;;  %v13973_v50 = vsub.f32 0.0, %v9140_v58  ;;  %v13974_v39 = vsub.f32 0.0, %v9148_v21  ;;  %v9459_v31 = vmul.f32 %v2225_v41, %v1728_v28  ;;  %v2422_v4 = vadd.f32 1.0, %v6562_v6  ;;  %v1602_v6 = vld [vmem:[#allocation11 + $0xe0] sm:$0xff] }
 0x2a8   : > { %v3909_v54 = vand.u32 2147483647, %v13971_v11  ;;  %13972 = vst [vmem:[#allocation83_spill] sm:$0xff] %v9451_v5  ;;  %v6566_v13 = vpop.eup %6565  ;;  %v3748_v11 = vadd.f32 1e-08, %v3716_v17  ;;  %6567 = vpow2.f32 %v3992_v47  ;;  %v1778_v57 = vmul.f32 %v1746_v49, %v8994_v55  ;;  %v1827_v49 = vld [vmem:[#allocation11 + $0x1d0] sm:$0xff] }
 0x2a9   : > { %v2660_v33 = vmax.f32 %v13973_v50, 0.0  ;;  %v2980_v30 = vmax.f32 %v13974_v39, 0.0  ;;  %13975 = vst [vmem:[#allocation84_spill] sm:$0xff] %v9459_v31  ;;  %v13976_v8 = vsub.f32 0.0, %v9425_v22  ;;  %v13977_v58 = vsub.f32 0.0, %v9431_v43  ;;  %v1908_v39 = vld [vmem:[#allocation11 + $0x250] sm:$0xff] }
 0x2aa   : > { %6569 = vrcp.f32 %v2421_v37  ;;  %v3941_v21 = vsub.f32 0.0, %v3909_v54  ;;  %v1872_v50 = vadd.f32 %v1840_v18, %v1791_v34  ;;  %v2113_v28 = vadd.f32 %v2081_v51, %v2032_v45  ;;  %v13992_v5 = vld [vmem:[#allocation119_spill] sm:$0xff] }
 0x2ab   : > { %v2694_v27 = vand.u32 2147483647, %v13976_v8  ;;  %v2916_v20 = vadd.f32 %v2873_v12, %v2660_v33  ;;  %v3236_v16 = vadd.f32 %v3193_v35, %v2980_v30  ;;  %v3014_v15 = vand.u32 2147483647, %v13977_v58 }
 0x2ac   : > { %v1553_v41 = vmul.f32 %v1521_v7, %v9004_v0  ;;  %v2875_v17 = vmul.f32 0.6931472, %v6564_v23  ;;  %v3195_v47 = vmul.f32 0.6931472, %v6566_v13  ;;  %v3685_v55 = vmax.f32 %v9408_v53, 0.0  ;;  %v1182_v7 = vpop.f32.mrf.mxu2 }
 0x2ad   : > { %6571 = vrcp.f32 %v2422_v4  ;;  %v13978_v12 = vsub.f32 0.0, %v9209_v62  ;;  %v1810_v33 = vadd.f32 %v1778_v57, %v9375_v1  ;;  %v2726_v37 = vsub.f32 0.0, %v2694_v27 }
 0x2ae   : > { %6573 = vlog2.f32 %v3748_v11  ;;  %v9471_v54 = vsub.f32 %v2916_v20, %v3236_v16  ;;  %v13979_v18 = vsub.f32 0.0, %v9219_v63  ;;  %v3046_v34 = vsub.f32 0.0, %v3014_v15  ;;  %v6568_v13 = vpop.eup %6567 }
 0x2af   : > { %v2661_v35 = vmax.f32 %v13978_v12, 0.0  ;;  %v13422_v45 = vrot.slane %v9127_v3, 7  ;;  %v3994_v23 = vmul.f32 1.442695, %v3941_v21  ;;  %v1634_v30 = vmul.f32 %v1602_v6, %v8986_v60 }
 0x2b0   : > { %v2981_v51 = vmax.f32 %v13979_v18, 0.0  ;;  %v1859_v4 = vmul.f32 %v1827_v49, %v9004_v0  ;;  %v1940_v62 = vmul.f32 %v1908_v39, %v8986_v60  ;;  %v6570_v11 = vpop.eup %6569  ;;  %v3717_v8 = vadd.f32 0.5, %v3685_v55 }
 0x2b1   : > { %v2917_v1 = vadd.f32 %v2875_v17, %v2661_v35  ;;  %v1585_v27 = vadd.f32 %v1553_v41, %v8585_v9  ;;  %v9481_v63 = vadd.f32 %v9440_v25, %v1872_v50  ;;  %v9483_v20 = vadd.f32 %v2162_v32, %v2113_v28  ;;  %v1523_v41 = vld [vmem:[#allocation11 + $0x70] sm:$0xff] }
 0x2b2   : > { %v3237_v57 = vadd.f32 %v3195_v47, %v2981_v51  ;;  %v1891_v16 = vadd.f32 %v1859_v4, %v1810_v33  ;;  %v2780_v58 = vmul.f32 1.442695, %v2726_v37  ;;  %v3332_v21 = vand.u32 2147483647, %v9471_v54  ;;  %v1522_v33 = vld [vmem:[#allocation11 + $0x68] sm:$0xff]  ;;  %v1909_v4 = vld [vmem:[#allocation11 + $0x258] sm:$0xff] }
 0x2b3   : > { %13980 = vst [vmem:[#allocation77_spill] sm:$0xff] %v9481_v63  ;;  %v6572_v15 = vpop.eup %6571  ;;  %v3100_v0 = vmul.f32 1.442695, %v3046_v34  ;;  %v13982_v6 = vrot.slane %v8986_v60, 7  ;;  %v9495_v25 = vadd.f32 %v1182_v7, %v8532_v38  ;;  %v4036_v50 = vadd.f32 1.0, %v6568_v13  ;;  %v1603_v37 = vld [vmem:[#allocation11 + $0xe8] sm:$0xff] }
 0x2b4   : > { %13981 = vst [vmem:[#allocation78_spill] sm:$0xff] %v9483_v20  ;;  %v6574_v32 = vpop.eup %6573  ;;  %6575 = vpow2.f32 %v3994_v23  ;;  %v9499_v28 = vmul.f32 %v9330_v52, %v9401_v29  ;;  %v9502_v17 = vmul.f32 %v6570_v11, %v9038_v61  ;;  %v13985_v60 = vsub.f32 0.0, %v9355_v48  ;;  %v1747_v23 = vld [vmem:[#allocation11 + $0x158] sm:$0xff]  ;;  %v1831_v52 = vld [vmem:[#allocation11 + $0x1f0] sm:$0xff] }
 0x2b5   : > { %v9492_v39 = vsel %vm1476_vm1, %v13982_v6, %v13422_v45  ;;  %13983 = vst [vmem:[#allocation79_spill] sm:$0xff] %v9495_v25  ;;  %v9508_v55 = vsub.f32 %v2917_v1, %v3237_v57  ;;  %v3749_v49 = vadd.f32 1e-08, %v3717_v8  ;;  %v9510_v12 = vadd.f32 %v1634_v30, %v1585_v27  ;;  %v13988_v57 = vld [vmem:[#allocation92_spill] sm:$0xff]  ;;  %v1828_v27 = vld [vmem:[#allocation11 + $0x1d8] sm:$0xff] }
 0x2b6   : > { %13984 = vst [vmem:[#allocation82_spill] sm:$0xff] %v9502_v17  ;;  %v9506_v47 = vmax.f32 %v13985_v60, 0.0  ;;  %v9512_v35 = vadd.f32 %v1940_v62, %v1891_v16  ;;  %6577 = vpow2.f32 %v2780_v58  ;;  %v1555_v18 = vmul.f32 %v1523_v41, %v9492_v39  ;;  %v1604_v16 = vld [vmem:[#allocation11 + $0xf0] sm:$0xff]  ;;  %v1748_v41 = vld [vmem:[#allocation11 + $0x160] sm:$0xff] }
 0x2b7   : > { %v9516_v51 = vmul.f32 %v6572_v15, %v9222_v44  ;;  %v3364_v61 = vsub.f32 0.0, %v3332_v21  ;;  %v13987_v34 = vsub.f32 0.0, %v9408_v53  ;;  %6579 = vpow2.f32 %v3100_v0  ;;  %v13989_v15 = vld [vmem:[#allocation93_spill] sm:$0xff] }
 0x2b8   : > { %v13424_v30 = vrot.slane %v9495_v25, 1  ;;  %v9523_v62 = vmul.f32 0.6931472, %v6574_v32  ;;  %6581 = vlog2.f32 %v4036_v50  ;;  %v13427_v7 = vsub.f32 0.0, %v9499_v28 }
 0x2b9   : > { %13986 = vst [vmem:[#allocation85_spill] sm:$0xff] %v9516_v51  ;;  %v9520_v13 = vmax.f32 %v13987_v34, 0.0  ;;  %v9528_v11 = vmul.f32 %v9171_v46, %v9502_v17  ;;  %v3333_v44 = vand.u32 2147483647, %v9508_v55  ;;  %6583 = vlog2.f32 %v3749_v49 }
 0x2ba   : > { %v1554_v1 = vmul.f32 %v1522_v33, %v9033_v24  ;;  %v9533_v8 = vmul.f32 %v1603_v37, %v13988_v57  ;;  %v6576_v58 = vpop.eup %6575  ;;  %v1779_v21 = vmul.f32 %v1747_v23, %v13989_v15  ;;  %v9537_v0 = vmul.f32 %v1909_v4, %v13988_v57 }
 0x2bb   : > { %v1587_v6 = vadd.f32 %v1555_v18, %v8585_v9  ;;  %v9542_v32 = vmul.f32 %v9094_v59, %v9516_v51  ;;  %v3416_v50 = vmul.f32 1.442695, %v3364_v61  ;;  %v9546_v60 = vmul.f32 %v9104_v19, %v9516_v51  ;;  %v1750_v18 = vld [vmem:[#allocation11 + $0x170] sm:$0xff] }
 0x2bc   : > { %v13990_v33 = vrot.slane %v9127_v3, 1  ;;  %v6578_v34 = vpop.eup %6577  ;;  %v3910_v23 = vand.u32 2147483647, %v13427_v7  ;;  %v9560_v61 = vmul.f32 %v1828_v27, %v9033_v24  ;;  %v1636_v15 = vmul.f32 %v1604_v16, %v9127_v3 }
 0x2bd   : > { %v6580_v45 = vpop.eup %6579  ;;  %v3365_v49 = vsub.f32 0.0, %v3333_v44  ;;  %v4037_v29 = vadd.f32 1.0, %v6576_v58  ;;  %v9565_v31 = vadd.f32 %v1554_v1, %v13895_v56  ;;  %v9570_v9 = vmul.f32 %v13992_v5, %v9502_v17  ;;  %v14000_v5 = vld [vmem:[#allocation94_spill] sm:$0xff] }
 0x2be   : > { %v9555_v37 = vsel %vm1702_vm2, %v13990_v33, %v13424_v30  ;;  %v13991_v33 = vld [vmem:[#allocation116_spill] sm:$0xff]  ;;  %v6582_v63 = vpop.eup %6581  ;;  %v1668_v7 = vadd.f32 %v1636_v15, %v1587_v6  ;;  %6585 = vpow2.f32 %v3416_v50  ;;  %v2822_v16 = vadd.f32 1.0, %v6578_v34 }
 0x2bf   : > { %v1780_v30 = vmul.f32 %v1748_v41, %v13991_v33  ;;  %v1782_v27 = vmul.f32 %v1750_v18, %v9555_v37  ;;  %v6584_v4 = vpop.eup %6583  ;;  %v13993_v1 = vrot.slane %v9495_v25, 7  ;;  %v13994_v58 = vrot.slane %v9127_v3, 7  ;;  %v1829_v18 = vld [vmem:[#allocation11 + $0x1e0] sm:$0xff] }
 0x2c0   : > { %v3142_v51 = vadd.f32 1.0, %v6580_v45  ;;  %v3942_v6 = vsub.f32 0.0, %v3910_v23  ;;  %v13996_v15 = vsub.f32 0.0, %v9528_v11  ;;  %v4089_v50 = vmul.f32 0.6931472, %v6582_v63 }
 0x2c1   : > { %v9581_v41 = vsel %vm1476_vm1, %v13994_v58, %v13993_v1  ;;  %v1814_v20 = vadd.f32 %v1782_v27, %v1668_v7  ;;  %v3418_v34 = vmul.f32 1.442695, %v3365_v49  ;;  %6587 = vlog2.f32 %v4037_v29  ;;  %v1910_v27 = vld [vmem:[#allocation11 + $0x260] sm:$0xff] }
 0x2c2   : > { %13995 = vst [vmem:[#allocation86_spill] sm:$0xff] %v9581_v41  ;;  %v2695_v24 = vand.u32 2147483647, %v13996_v15  ;;  %v1812_v44 = vadd.f32 %v1780_v30, %v9510_v12  ;;  %v9588_v26 = vmul.f32 %v9381_v42, %v9502_v17  ;;  %v13997_v58 = vsub.f32 0.0, %v9542_v32  ;;  %v1912_v12 = vld [vmem:[#allocation11 + $0x270] sm:$0xff]  ;;  %v1991_v1 = vld [vmem:[#allocation11 + $0x2e0] sm:$0xff] }
 0x2c3   : > { %v1863_v23 = vmul.f32 %v1831_v52, %v9581_v41  ;;  %6589 = vlog2.f32 %v2822_v16  ;;  %v1811_v15 = vadd.f32 %v1779_v21, %v9379_v10  ;;  %v1861_v63 = vmul.f32 %v1829_v18, %v9492_v39  ;;  %v1989_v21 = vld [vmem:[#allocation11 + $0x2d0] sm:$0xff] }
 0x2c4   : > { %v2696_v45 = vand.u32 2147483647, %v13997_v58  ;;  %v13998_v29 = vsub.f32 0.0, %v9546_v60  ;;  %6591 = vlog2.f32 %v3142_v51  ;;  %v3996_v30 = vmul.f32 1.442695, %v3942_v6  ;;  %v6586_v42 = vpop.eup %6585 }
 0x2c5   : > { %v2727_v49 = vsub.f32 0.0, %v2695_v24  ;;  %v1895_v17 = vadd.f32 %v1863_v23, %v1814_v20  ;;  %v9599_v58 = vadd.f32 %v4089_v50, %v9506_v47  ;;  %6593 = vpow2.f32 %v3418_v34 }
 0x2c6   : > { %v3016_v7 = vand.u32 2147483647, %v13998_v29  ;;  %v9601_v52 = vmul.f32 0.6931472, %v6584_v4  ;;  %v1893_v10 = vadd.f32 %v1861_v63, %v1812_v44  ;;  %v13999_v16 = vsub.f32 0.0, %v9570_v9  ;;  %v1993_v44 = vld [vmem:[#allocation11 + $0x2f0] sm:$0xff] }
 0x2c7   : > { %v2728_v51 = vsub.f32 0.0, %v2696_v45  ;;  %v1944_v24 = vmul.f32 %v1912_v12, %v9495_v25  ;;  %v6588_v6 = vpop.eup %6587  ;;  %v1942_v20 = vmul.f32 %v1910_v27, %v9127_v3  ;;  %v14001_v47 = vrot.slane %v14000_v5, 1 }
 0x2c8   : > { %v3015_v18 = vand.u32 2147483647, %v13999_v16  ;;  %v3048_v23 = vsub.f32 0.0, %v3016_v7  ;;  %v14002_v50 = vrot.slane %v9495_v25, 1  ;;  %v2023_v34 = vmul.f32 %v1991_v1, %v9555_v37 }
 0x2c9   : > { %6595 = vpow2.f32 %v3996_v30  ;;  %v2782_v63 = vmul.f32 1.442695, %v2727_v49  ;;  %v2021_v45 = vmul.f32 %v1989_v21, %v13991_v33  ;;  %v1976_v12 = vadd.f32 %v1944_v24, %v1895_v17  ;;  %v6590_v16 = vpop.eup %6589  ;;  %v2072_v30 = vld [vmem:[#allocation11 + $0x360] sm:$0xff] }
 0x2ca   : > { %v9614_v4 = vsel %vm1702_vm2, %v14002_v50, %v14001_v47  ;;  %v3460_v29 = vadd.f32 1.0, %v6586_v42  ;;  %v4164_v7 = vsub.f32 0.0, %v9599_v58  ;;  %v9620_v27 = vadd.f32 %v9560_v61, %v1811_v15  ;;  %v6592_v19 = vpop.eup %6591  ;;  %v2070_v42 = vld [vmem:[#allocation11 + $0x350] sm:$0xff] }
 0x2cb   : > { %14003 = vst [vmem:[#allocation80_spill] sm:$0xff] %v9614_v4  ;;  %v1974_v46 = vadd.f32 %v1942_v20, %v1893_v10  ;;  %v14004_v47 = vsub.f32 0.0, %v9425_v22  ;;  %v3047_v59 = vsub.f32 0.0, %v3015_v18  ;;  %v2784_v56 = vmul.f32 1.442695, %v2728_v51  ;;  %v6594_v49 = vpop.eup %6593  ;;  %v2074_v10 = vld [vmem:[#allocation11 + $0x370] sm:$0xff] }
 0x2cc   : > { %v2025_v1 = vmul.f32 %v1993_v44, %v9614_v4  ;;  %v14005_v17 = vsub.f32 0.0, %v9588_v26  ;;  %v3104_v21 = vmul.f32 1.442695, %v3048_v23  ;;  %v14006_v58 = vrot.slane %v14000_v5, 7 }
 0x2cd   : > { %v2662_v50 = vmax.f32 %v14004_v47, 0.0  ;;  %v14007_v61 = vrot.slane %v9495_v25, 7  ;;  %v2055_v22 = vadd.f32 %v2023_v34, %v1974_v46  ;;  %v14009_v18 = vsub.f32 0.0, %v9431_v43  ;;  %v2153_v34 = vld [vmem:[#allocation11 + $0x3e0] sm:$0xff] }
 0x2ce   : > { %v3911_v33 = vand.u32 2147483647, %v14005_v17  ;;  %6597 = vpow2.f32 %v2782_v63  ;;  %v2053_v24 = vadd.f32 %v2021_v45, %v9512_v35  ;;  %v2057_v20 = vadd.f32 %v2025_v1, %v1976_v12  ;;  %v2232_v35 = vld [vmem:[#allocation11 + $0x450] sm:$0xff] }
 0x2cf   : > { %v9633_v15 = vsel %vm1476_vm1, %v14007_v61, %v14006_v58  ;;  %v2982_v51 = vmax.f32 %v14009_v18, 0.0  ;;  %6599 = vlog2.f32 %v3460_v29  ;;  %v2877_v44 = vmul.f32 0.6931472, %v6590_v16  ;;  %v6596_v47 = vpop.eup %6595  ;;  %v2151_v61 = vld [vmem:[#allocation11 + $0x3d0] sm:$0xff] }
 0x2d0   : > { %14008 = vst [vmem:[#allocation87_spill] sm:$0xff] %v9633_v15  ;;  %v3197_v23 = vmul.f32 0.6931472, %v6592_v19  ;;  %v2104_v5 = vmul.f32 %v2072_v30, %v9581_v41  ;;  %v3102_v17 = vmul.f32 1.442695, %v3047_v59  ;;  %v2102_v40 = vmul.f32 %v2070_v42, %v9492_v39  ;;  %v2234_v42 = vld [vmem:[#allocation11 + $0x460] sm:$0xff] }
 0x2d1   : > { %6601 = vpow2.f32 %v2784_v56  ;;  %v2106_v46 = vmul.f32 %v2074_v10, %v9633_v15  ;;  %v3461_v58 = vadd.f32 1.0, %v6594_v49  ;;  %v3943_v43 = vsub.f32 0.0, %v3911_v33  ;;  %v14010_v49 = vld [vmem:[#allocation53_spill] sm:$0xff]  ;;  %v2071_v15 = vld [vmem:[#allocation11 + $0x358] sm:$0xff] }
 0x2d2   : > { %6603 = vpow2.f32 %v3104_v21  ;;  %v2136_v63 = vadd.f32 %v2104_v5, %v2055_v22  ;;  %v3300_v29 = vmax.f32 %v9471_v54, 0.0  ;;  %v4091_v45 = vmul.f32 0.6931472, %v6588_v6 }
 0x2d3   : > { %v2134_v19 = vadd.f32 %v2102_v40, %v2053_v24  ;;  %v2138_v12 = vadd.f32 %v2106_v46, %v2057_v20  ;;  %v2918_v16 = vadd.f32 %v2877_v44, %v2662_v50  ;;  %v3238_v1 = vadd.f32 %v3197_v23, %v2982_v51  ;;  %v1155_v20 = vpop.f32.mrf.mxu0  ;;  %v14011_v44 = vld [vmem:[#allocation104_spill] sm:$0xff] }
 0x2d4   : > { %v4038_v59 = vadd.f32 1.0, %v6596_v47  ;;  %v2185_v39 = vmul.f32 %v2153_v34, %v9495_v25  ;;  %v6598_v56 = vpop.eup %6597  ;;  %6605 = vpow2.f32 %v3102_v17  ;;  %v2183_v30 = vmul.f32 %v2151_v61, %v9127_v3  ;;  %v1830_v25 = vld [vmem:[#allocation11 + $0x1e8] sm:$0xff] }
 0x2d5   : > { %v2327_v33 = vsub.f32 0.0, %v14010_v49  ;;  %v2264_v21 = vmul.f32 %v2232_v35, %v9555_v37  ;;  %v6600_v22 = vpop.eup %6599  ;;  %v9646_v10 = vadd.f32 1e-08, %v4164_v7  ;;  %6607 = vlog2.f32 %v3461_v58 }
 0x2d6   : > { %v3998_v40 = vmul.f32 1.442695, %v3943_v43  ;;  %v2217_v6 = vadd.f32 %v2185_v39, %v2136_v63  ;;  %v4133_v18 = vadd.f32 %v4091_v45, %v9520_v13  ;;  %v3686_v51 = vmax.f32 %v9499_v28, 0.0 }
 0x2d7   : > { %v6602_v50 = vpop.eup %6601  ;;  %v2215_v24 = vadd.f32 %v2183_v30, %v2134_v19  ;;  %v2219_v3 = vadd.f32 %v14011_v44, %v2138_v12  ;;  %v9651_v5 = vsub.f32 %v2918_v16, %v3238_v1  ;;  %v2823_v47 = vadd.f32 1.0, %v6598_v56  ;;  %v14012_v19 = vld [vmem:[#allocation118_spill] sm:$0xff] }
 0x2d8   : > { %v6604_v23 = vpop.eup %6603  ;;  %v3687_v37 = vmax.f32 %v9588_v26, 0.0  ;;  %v2266_v7 = vmul.f32 %v2234_v42, %v9614_v4  ;;  %v3513_v17 = vmul.f32 0.6931472, %v6600_v22  ;;  %6609 = vlog2.f32 %v4038_v59 }
 0x2d9   : > { %v2384_v46 = vmul.f32 1.442695, %v2327_v33  ;;  %v9655_v34 = vadd.f32 %v2264_v21, %v2215_v24  ;;  %6611 = vpow2.f32 %v3998_v40  ;;  %v2824_v13 = vadd.f32 1.0, %v6602_v50 }
 0x2da   : > { %v9658_v58 = vadd.f32 %v1155_v20, %v8532_v38  ;;  %v9660_v43 = vadd.f32 %v2266_v7, %v2217_v6  ;;  %v6606_v61 = vpop.eup %6605  ;;  %vm3652_vm3 = vcmp.ge.f32.partialorder %v9355_v48, 0.0  ;;  %vm3653_vm4 = vcmp.ge.f32.partialorder %v9408_v53, 0.0 }
 0x2db   : > { %v4165_v63 = vsub.f32 0.0, %v4133_v18  ;;  %v3718_v35 = vadd.f32 0.5, %v3686_v51  ;;  %v3144_v45 = vadd.f32 1.0, %v6604_v23  ;;  %v9665_v12 = vadd.f32 %v14012_v19, %v2219_v3  ;;  %v6608_v16 = vpop.eup %6607 }
 0x2dc   : > { %v3334_v1 = vand.u32 2147483647, %v9651_v5  ;;  %6613 = vlog2.f32 %v2823_v47  ;;  %v3719_v59 = vadd.f32 0.5, %v3687_v37  ;;  %v2328_v39 = vsub.f32 0.0, %v9655_v34 }
 0x2dd   : > { %v3556_v56 = vadd.f32 %v3513_v17, %v3300_v29  ;;  %6615 = vpow2.f32 %v2384_v46  ;;  %v2330_v30 = vsub.f32 0.0, %v9660_v43  ;;  %v2332_v33 = vsub.f32 0.0, %v9665_v12 }
 0x2de   : > { %v3143_v42 = vadd.f32 1.0, %v6606_v61  ;;  %6617 = vlog2.f32 %v2824_v13  ;;  %v13446_v21 = vrot.slane %v9658_v58, 1  ;;  %v2386_v22 = vmul.f32 1.442695, %v2328_v39  ;;  %v6610_v40 = vpop.eup %6609  ;;  %v7447_v39 = vld [vmem:[#allocation11 + $0x420] sm:$0xff] }
 0x2df   : > { %v3515_v6 = vmul.f32 0.6931472, %v6608_v16  ;;  %6619 = vlog2.f32 %v3144_v45  ;;  %v2390_v50 = vmul.f32 1.442695, %v2330_v30  ;;  %v2394_v18 = vmul.f32 1.442695, %v2332_v33  ;;  %v6612_v51 = vpop.eup %6611 }
 0x2e0   : > { %v4197_v24 = vadd.f32 1e-08, %v4165_v63  ;;  %v3366_v20 = vsub.f32 0.0, %v3334_v1  ;;  %v3750_v44 = vadd.f32 1e-08, %v3718_v35  ;;  %6621 = vpow2.f32 %v2386_v22  ;;  %v14015_v1 = vld [vmem:[#allocation120_spill] sm:$0xff] }
 0x2e1   : > { %v3301_v29 = vmax.f32 %v9508_v55, 0.0  ;;  %v9675_v3 = vadd.f32 %v9533_v8, %v9565_v31  ;;  %v3751_v23 = vadd.f32 1e-08, %v3719_v59  ;;  %6623 = vpow2.f32 %v2390_v50 }
 0x2e2   : > { %v6614_v47 = vpop.eup %6613  ;;  %v3588_v37 = vsub.f32 0.0, %v3556_v56  ;;  %v9679_v7 = vadd.f32 %v9537_v0, %v9620_v27  ;;  %6625 = vlog2.f32 %v3143_v42  ;;  %v14013_v17 = vrot.slane %v9306_v14, 1 }
 0x2e3   : > { %v6616_v13 = vpop.eup %6615  ;;  %v3557_v31 = vadd.f32 %v3515_v6, %v3301_v29  ;;  %v4093_v8 = vmul.f32 0.6931472, %v6610_v40  ;;  %v4039_v61 = vadd.f32 1.0, %v6612_v51  ;;  %6627 = vpow2.f32 %v2394_v18 }
 0x2e4   : > { %v9687_v46 = vsel %vm1702_vm2, %v14013_v17, %v13446_v21  ;;  %v6618_v63 = vpop.eup %6617  ;;  %v4228_v0 = vsel %vm3652_vm3, %v9523_v62, %v9646_v10  ;;  %v4229_v27 = vsel %vm3653_vm4, %v9601_v52, %v4197_v24  ;;  %v3420_v35 = vmul.f32 1.442695, %v3366_v20 }
 0x2e5   : > { %6629 = vlog2.f32 %v3750_v44  ;;  %v6620_v45 = vpop.eup %6619  ;;  %v14014_v19 = vsub.f32 0.0, %v9499_v28  ;;  %v13448_v59 = vrot.slane %v14015_v1, 7  ;;  %v2242_v56 = vmul.f32 %v7447_v39, %v9687_v46 }
 0x2e6   : > { %6631 = vlog2.f32 %v3751_v23  ;;  %v6622_v30 = vpop.eup %6621  ;;  %v3620_v48 = vadd.f32 %v3588_v37, %v9471_v54  ;;  %v9701_v62 = vadd.f32 1e-08, %v3588_v37  ;;  %v14017_v53 = vsub.f32 0.0, %v9528_v11 }
 0x2e7   : > { %v3878_v16 = vmax.f32 %v14014_v19, 0.0  ;;  %v14018_v10 = vsub.f32 0.0, %v9570_v9  ;;  %v6624_v42 = vpop.eup %6623  ;;  %v3589_v22 = vsub.f32 0.0, %v3557_v31  ;;  %6633 = vlog2.f32 %v4039_v61 }
 0x2e8   : > { %14016 = vst [vmem:[#allocation89_spill] sm:$0xff] %v9701_v62  ;;  %v2663_v52 = vmax.f32 %v14017_v53, 0.0  ;;  %v2424_v6 = vadd.f32 1.0, %v6622_v30  ;;  %v6626_v50 = vpop.eup %6625  ;;  %6635 = vpow2.f32 %v3420_v35  ;;  %v2881_v18 = vmul.f32 0.6931472, %v6618_v63  ;;  %v14055_v62 = vld [vmem:[#allocation78_spill] sm:$0xff] }
 0x2e9   : > { %v2983_v33 = vmax.f32 %v14018_v10, 0.0  ;;  %v4134_v40 = vadd.f32 %v4093_v8, %v3878_v16  ;;  %v3201_v51 = vmul.f32 0.6931472, %v6620_v45  ;;  %v2426_v24 = vadd.f32 1.0, %v6624_v42  ;;  %v6628_v20 = vpop.eup %6627  ;;  %v1524_v8 = vld [vmem:[#allocation11 + $0x78] sm:$0xff] }
 0x2ea   : > { %v14019_v54 = vrot.slane %v13988_v57, 7  ;;  %v2423_v9 = vadd.f32 1.0, %v6616_v13  ;;  %v9716_v44 = vadd.f32 %v2242_v56, %v9445_v36  ;;  %6637 = vrcp.f32 %v2424_v6 }
 0x2eb   : > { %v6630_v29 = vpop.eup %6629  ;;  %v14020_v23 = vsub.f32 0.0, %v9542_v32  ;;  %v14021_v17 = vsub.f32 0.0, %v9546_v60  ;;  %v2428_v61 = vadd.f32 1.0, %v6628_v20  ;;  %6639 = vrcp.f32 %v2426_v24  ;;  %v1231_v32 = vpop.f32.mrf.mxu3  ;;  %v1605_v24 = vld [vmem:[#allocation11 + $0xf8] sm:$0xff]  ;;  %v14026_v20 = vld [vmem:[#allocation25_spill] sm:$0xff] }
 0x2ec   : > { %v9713_v11 = vsel %vm1476_vm1, %v14019_v54, %v13448_v59  ;;  %v6632_v57 = vpop.eup %6631  ;;  %v3621_v63 = vadd.f32 %v3589_v22, %v9508_v55  ;;  %v9723_v35 = vadd.f32 1e-08, %v3589_v22  ;;  %v2879_v13 = vmul.f32 0.6931472, %v6614_v47 }
 0x2ed   : > { %v2664_v37 = vmax.f32 %v14020_v23, 0.0  ;;  %v2984_v31 = vmax.f32 %v14021_v17, 0.0  ;;  %v14023_v36 = vsub.f32 0.0, %v9588_v26  ;;  %v3199_v19 = vmul.f32 0.6931472, %v6626_v50  ;;  %v6634_v56 = vpop.eup %6633 }
 0x2ee   : > { %14022 = vst [vmem:[#allocation90_spill] sm:$0xff] %v9723_v35  ;;  %6641 = vrcp.f32 %v2428_v61  ;;  %v9727_v60 = vmul.f32 0.6931472, %v6630_v29  ;;  %v4166_v30 = vsub.f32 0.0, %v4134_v40  ;;  %v1556_v53 = vmul.f32 %v1524_v8, %v9713_v11  ;;  %v6636_v10 = vpop.eup %6635  ;;  %v1204_v40 = vpop.f32.mrf.mxu1 }
 0x2ef   : > { %v3879_v45 = vmax.f32 %v14023_v36, 0.0  ;;  %v2920_v16 = vadd.f32 %v2881_v18, %v2664_v37  ;;  %v3240_v39 = vadd.f32 %v3201_v51, %v2984_v31  ;;  %6643 = vrcp.f32 %v2423_v9  ;;  %v1749_v36 = vld [vmem:[#allocation11 + $0x168] sm:$0xff] }
 0x2f0   : > { %v9730_v55 = vadd.f32 %v4228_v0, %v3620_v48  ;;  %v9733_v42 = vmul.f32 0.6931472, %v6632_v57  ;;  %v2306_v22 = vsub.f32 0.0, %v9716_v44  ;;  %v6638_v6 = vpop.eup %6637  ;;  %v9736_v50 = vadd.f32 %v4229_v27, %v3621_v63  ;;  %v14030_v27 = vld [vmem:[#allocation33_spill] sm:$0xff]  ;;  %v14033_v63 = vld [vmem:[#allocation102_spill] sm:$0xff] }
 0x2f1   : > { %v2919_v51 = vadd.f32 %v2879_v13, %v2663_v52  ;;  %v9740_v54 = vadd.f32 %v1231_v32, %v14026_v20  ;;  %v6640_v9 = vpop.eup %6639  ;;  %v3239_v0 = vadd.f32 %v3199_v19, %v2983_v33  ;;  %v4095_v48 = vmul.f32 0.6931472, %v6634_v56 }
 0x2f2   : > { %14024 = vst [vmem:[#allocation92_spill] sm:$0xff] %v9730_v55  ;;  %v9742_v29 = vsub.f32 %v2920_v16, %v3240_v39  ;;  %v9745_v23 = vmul.f32 %v6638_v6, %v9655_v34  ;;  %v3462_v37 = vadd.f32 1.0, %v6636_v10  ;;  %v9747_v17 = vadd.f32 1e-08, %v4166_v30  ;;  %v14035_v16 = vld [vmem:[#allocation105_spill] sm:$0xff] }
 0x2f3   : > { %14025 = vst [vmem:[#allocation93_spill] sm:$0xff] %v9736_v50  ;;  %v1588_v31 = vadd.f32 %v1556_v53, %v14030_v27  ;;  %v9751_v52 = vmul.f32 %v6640_v9, %v9660_v43  ;;  %v1637_v61 = vmul.f32 %v1605_v24, %v14015_v1  ;;  %v2342_v57 = vmul.f32 1.442695, %v2306_v22 }
 0x2f4   : > { %14027 = vst [vmem:[#allocation116_spill] sm:$0xff] %v9740_v54  ;;  %v6642_v8 = vpop.eup %6641  ;;  %v9755_v33 = vadd.f32 %v1204_v40, %v14026_v20  ;;  %v9759_v13 = vmul.f32 %v14033_v63, %v9745_v23  ;;  %v9770_v39 = vmul.f32 %v14035_v16, %v9745_v23  ;;  %v13447_v32 = vrot.slane %v9740_v54, 1  ;;  %v14041_v20 = vld [vmem:[#allocation119_spill] sm:$0xff] }
 0x2f5   : > { %14028 = vst [vmem:[#allocation94_spill] sm:$0xff] %v9742_v29  ;;  %v6644_v34 = vpop.eup %6643  ;;  %v9762_v19 = vmul.f32 %v6642_v8, %v9665_v12  ;;  %v9766_v43 = vmul.f32 %v14033_v63, %v9751_v52  ;;  %v9773_v56 = vsub.f32 %v2919_v51, %v3239_v0  ;;  %v9775_v30 = vadd.f32 %v4095_v48, %v3879_v45  ;;  %v14036_v51 = vld [vmem:[#allocation46_spill] sm:$0xff] }
 0x2f6   : > { %14029 = vst [vmem:[#allocation53_spill] sm:$0xff] %v9745_v23  ;;  %v3336_v53 = vand.u32 2147483647, %v9742_v29  ;;  %v9780_v12 = vmul.f32 %v14035_v16, %v9751_v52  ;;  %6645 = vlog2.f32 %v3462_v37  ;;  %v1669_v10 = vadd.f32 %v1637_v61, %v1588_v31  ;;  %v1990_v45 = vld [vmem:[#allocation11 + $0x2d8] sm:$0xff] }
 0x2f7   : > { %14031 = vst [vmem:[#allocation104_spill] sm:$0xff] %v9751_v52  ;;  %v9784_v22 = vmul.f32 %v14033_v63, %v9762_v19  ;;  %v9788_v6 = vmul.f32 %v14035_v16, %v9762_v19  ;;  %v1781_v24 = vmul.f32 %v1749_v36, %v14036_v51  ;;  %v9792_v40 = vmul.f32 %v6644_v34, %v14010_v49  ;;  %v1751_v61 = vld [vmem:[#allocation11 + $0x178] sm:$0xff] }
 0x2f8   : > { %14032 = vst [vmem:[#allocation118_spill] sm:$0xff] %v9755_v33  ;;  %6647 = vpow2.f32 %v2342_v57  ;;  %v13449_v9 = vsub.f32 0.0, %v9759_v13  ;;  %v13450_v0 = vsub.f32 0.0, %v9766_v43  ;;  %v13461_v37 = vsub.f32 0.0, %v9770_v39 }
 0x2f9   : > { %14034 = vst [vmem:[#allocation120_spill] sm:$0xff] %v9762_v19  ;;  %v13451_v48 = vsub.f32 0.0, %v9784_v22  ;;  %v14038_v31 = vrot.slane %v14015_v1, 1  ;;  %v3368_v49 = vsub.f32 0.0, %v3336_v53  ;;  %v2022_v21 = vmul.f32 %v1990_v45, %v14036_v51 }
 0x2fa   : > { %14037 = vst [vmem:[#allocation46_spill] sm:$0xff] %v9792_v40  ;;  %v2698_v57 = vand.u32 2147483647, %v13449_v9  ;;  %v2700_v47 = vand.u32 2147483647, %v13450_v0  ;;  %v14040_v0 = vsub.f32 0.0, %v9780_v12  ;;  %v9830_v19 = vmul.f32 %v14041_v20, %v9792_v40 }
 0x2fb   : > { %v9804_v8 = vsel %vm1702_vm2, %v14038_v31, %v13447_v32  ;;  %v2702_v31 = vand.u32 2147483647, %v13451_v48  ;;  %v14039_v32 = vld [vmem:[#allocation115_spill] sm:$0xff]  ;;  %v3018_v18 = vand.u32 2147483647, %v13461_v37  ;;  %v14042_v9 = vsub.f32 0.0, %v9788_v6 }
 0x2fc   : > { %v9818_v53 = vmul.f32 %v14039_v32, %v9792_v40  ;;  %v2730_v59 = vsub.f32 0.0, %v2698_v57  ;;  %v1783_v34 = vmul.f32 %v1751_v61, %v9804_v8  ;;  %v9822_v36 = vpop.eup %6645  ;;  %v2732_v51 = vsub.f32 0.0, %v2700_v47 }
 0x2fd   : > { %v2734_v45 = vsub.f32 0.0, %v2702_v31  ;;  %v3020_v50 = vand.u32 2147483647, %v14040_v0  ;;  %v3424_v55 = vmul.f32 1.442695, %v3368_v49  ;;  %v3050_v47 = vsub.f32 0.0, %v3018_v18 }
 0x2fe   : > { %v6648_v48 = vpop.eup %6647  ;;  %v2788_v57 = vmul.f32 1.442695, %v2730_v59  ;;  %v3022_v61 = vand.u32 2147483647, %v14042_v9  ;;  %v2792_v52 = vmul.f32 1.442695, %v2732_v51 }
 0x2ff   : > { %v2796_v23 = vmul.f32 1.442695, %v2734_v45  ;;  %v3052_v31 = vsub.f32 0.0, %v3020_v50  ;;  %v14043_v0 = vrot.slane %v9740_v54, 7  ;;  %v14044_v49 = vrot.slane %v14015_v1, 7  ;;  %v1832_v59 = vld [vmem:[#allocation11 + $0x1f8] sm:$0xff] }
 0x300   : > { %6649 = vpow2.f32 %v2788_v57  ;;  %v3054_v37 = vsub.f32 0.0, %v3022_v61  ;;  %v3108_v9 = vmul.f32 1.442695, %v3050_v47  ;;  %v1815_v45 = vadd.f32 %v1783_v34, %v1669_v10  ;;  %v1911_v18 = vld [vmem:[#allocation11 + $0x268] sm:$0xff]  ;;  %v14047_v10 = vld [vmem:[#allocation58_spill] sm:$0xff] }
 0x301   : > { %v9841_v4 = vsel %vm1476_vm1, %v14044_v49, %v14043_v0  ;;  %6651 = vpow2.f32 %v2792_v52  ;;  %v3112_v51 = vmul.f32 1.442695, %v3052_v31  ;;  %v1813_v50 = vadd.f32 %v1781_v24, %v9675_v3  ;;  %v2152_v57 = vld [vmem:[#allocation11 + $0x3d8] sm:$0xff] }
 0x302   : > { %6653 = vpow2.f32 %v3424_v55  ;;  %v3116_v61 = vmul.f32 1.442695, %v3054_v37  ;;  %v3335_v38 = vand.u32 2147483647, %v9773_v56  ;;  %v2402_v41 = vadd.f32 1.0, %v6648_v48  ;;  %v1913_v37 = vld [vmem:[#allocation11 + $0x278] sm:$0xff] }
 0x303   : > { %6655 = vpow2.f32 %v2796_v23  ;;  %v1864_v0 = vmul.f32 %v1832_v59, %v9841_v4  ;;  %v1862_v49 = vmul.f32 %v1830_v25, %v9713_v11  ;;  %v14045_v52 = vsub.f32 0.0, %v9818_v53  ;;  %v1992_v25 = vld [vmem:[#allocation11 + $0x2e8] sm:$0xff] }
 0x304   : > { %v14046_v55 = vrot.slane %v9755_v33, 1  ;;  %v14048_v3 = vrot.slane %v14047_v10, 1  ;;  %6657 = vpow2.f32 %v3108_v9  ;;  %v1943_v48 = vmul.f32 %v1911_v18, %v14015_v1  ;;  %v7448_v9 = vld [vmem:[#allocation11 + $0x428] sm:$0xff] }
 0x305   : > { %v2697_v47 = vand.u32 2147483647, %v14045_v52  ;;  %v2054_v23 = vadd.f32 %v2022_v21, %v9679_v7  ;;  %6659 = vpow2.f32 %v3112_v51  ;;  %v1896_v34 = vadd.f32 %v1864_v0, %v1815_v45  ;;  %v14051_v0 = vld [vmem:[#allocation97_spill] sm:$0xff] }
 0x306   : > { %v9856_v24 = vsel %vm1702_vm2, %v14048_v3, %v14046_v55  ;;  %v6650_v31 = vpop.eup %6649  ;;  %v1894_v59 = vadd.f32 %v1862_v49, %v1813_v50  ;;  %v2103_v52 = vmul.f32 %v2071_v15, %v9713_v11  ;;  %v14050_v35 = vsub.f32 0.0, %v9830_v19 }
 0x307   : > { %14049 = vst [vmem:[#allocation121_spill] sm:$0xff] %v9856_v24  ;;  %6661 = vpow2.f32 %v3116_v61  ;;  %v6652_v55 = vpop.eup %6651  ;;  %v2243_v3 = vmul.f32 %v7448_v9, %v9856_v24  ;;  %v2826_v18 = vadd.f32 1.0, %v6650_v31  ;;  %v1945_v21 = vmul.f32 %v1913_v37, %v9740_v54 }
 0x308   : > { %v3017_v27 = vand.u32 2147483647, %v14050_v35  ;;  %6663 = vrcp.f32 %v2402_v41  ;;  %v6654_v7 = vpop.eup %6653  ;;  %v2729_v51 = vsub.f32 0.0, %v2697_v47  ;;  %v2828_v45 = vadd.f32 1.0, %v6652_v55  ;;  %v1994_v35 = vld [vmem:[#allocation11 + $0x2f8] sm:$0xff] }
 0x309   : > { %v14052_v50 = vrot.slane %v14051_v0, 1  ;;  %v14053_v15 = vrot.slane %v9740_v54, 1  ;;  %v2024_v41 = vmul.f32 %v1992_v25, %v9804_v8  ;;  %v6656_v61 = vpop.eup %6655  ;;  %v2135_v49 = vadd.f32 %v2103_v52, %v2054_v23 }
 0x30a   : > { %v2184_v31 = vmul.f32 %v2152_v57, %v14015_v1  ;;  %6665 = vlog2.f32 %v2826_v18  ;;  %v1977_v37 = vadd.f32 %v1945_v21, %v1896_v34  ;;  %v6658_v9 = vpop.eup %6657  ;;  %v1975_v47 = vadd.f32 %v1943_v48, %v1894_v59  ;;  %v2073_v57 = vld [vmem:[#allocation11 + $0x368] sm:$0xff]  ;;  %v2075_v48 = vld [vmem:[#allocation11 + $0x378] sm:$0xff] }
 0x30b   : > { %v9871_v11 = vsel %vm1702_vm2, %v14053_v15, %v14052_v50  ;;  %v3049_v55 = vsub.f32 0.0, %v3017_v27  ;;  %v2830_v40 = vadd.f32 1.0, %v6656_v61  ;;  %6667 = vlog2.f32 %v2828_v45  ;;  %v6660_v24 = vpop.eup %6659 }
 0x30c   : > { %14054 = vst [vmem:[#allocation97_spill] sm:$0xff] %v9871_v11  ;;  %v9876_v10 = vadd.f32 %v2243_v3, %v14055_v62  ;;  %v3146_v50 = vadd.f32 1.0, %v6658_v9  ;;  %v14056_v15 = vrot.slane %v14051_v0, 7  ;;  %v14057_v25 = vrot.slane %v9740_v54, 7 }
 0x30d   : > { %v2026_v1 = vmul.f32 %v1994_v35, %v9871_v11  ;;  %v6662_v27 = vpop.eup %6661  ;;  %v2786_v34 = vmul.f32 1.442695, %v2729_v51  ;;  %6669 = vlog2.f32 %v2830_v40  ;;  %v3148_v59 = vadd.f32 1.0, %v6660_v24  ;;  %v2154_v40 = vld [vmem:[#allocation11 + $0x3e8] sm:$0xff] }
 0x30e   : > { %v9884_v23 = vsel %vm1476_vm1, %v14057_v25, %v14056_v15  ;;  %v2056_v52 = vadd.f32 %v2024_v41, %v1975_v47  ;;  %v9887_v62 = vpop.eup %6663  ;;  %v3464_v3 = vadd.f32 1.0, %v6654_v7  ;;  %v3150_v18 = vadd.f32 1.0, %v6662_v27 }
 0x30f   : > { %6671 = vlog2.f32 %v3146_v50  ;;  %v2058_v21 = vadd.f32 %v2026_v1, %v1977_v37  ;;  %v3367_v45 = vsub.f32 0.0, %v3335_v38  ;;  %v2105_v0 = vmul.f32 %v2073_v57, %v9841_v4  ;;  %v2233_v50 = vld [vmem:[#allocation11 + $0x458] sm:$0xff] }
 0x310   : > { %6673 = vlog2.f32 %v3148_v59  ;;  %v2107_v61 = vmul.f32 %v2075_v48, %v9884_v23  ;;  %v6666_v35 = vpop.eup %6665  ;;  %v2216_v9 = vadd.f32 %v2184_v31, %v2135_v49  ;;  %v3106_v15 = vmul.f32 1.442695, %v3049_v55  ;;  %v2235_v49 = vld [vmem:[#allocation11 + $0x468] sm:$0xff] }
 0x311   : > { %v2307_v51 = vsub.f32 0.0, %v9876_v10  ;;  %6675 = vlog2.f32 %v3150_v18  ;;  %v6668_v24 = vpop.eup %6667  ;;  %v2885_v41 = vmul.f32 0.6931472, %v6666_v35  ;;  %v2137_v7 = vadd.f32 %v2105_v0, %v2056_v52  ;;  %v14064_v0 = vld [vmem:[#allocation108_spill] sm:$0xff] }
 0x312   : > { %6677 = vpow2.f32 %v2786_v34  ;;  %v2139_v47 = vadd.f32 %v2107_v61, %v2058_v21  ;;  %v14058_v38 = vsub.f32 0.0, %v9759_v13  ;;  %v14059_v25 = vsub.f32 0.0, %v9766_v43 }
 0x313   : > { %6679 = vlog2.f32 %v3464_v3  ;;  %v2889_v57 = vmul.f32 0.6931472, %v6668_v24  ;;  %v6670_v31 = vpop.eup %6669  ;;  %vm3654_vm5 = vcmp.ge.f32.partialorder %v9499_v28, 0.0  ;;  %v14060_v55 = vsub.f32 0.0, %v9784_v22 }
 0x314   : > { %v2666_v37 = vmax.f32 %v14058_v38, 0.0  ;;  %v2668_v1 = vmax.f32 %v14059_v25, 0.0  ;;  %v14061_v27 = vsub.f32 0.0, %v9770_v39  ;;  %v14062_v59 = vsub.f32 0.0, %v9780_v12 }
 0x315   : > { %v2670_v48 = vmax.f32 %v14060_v55, 0.0  ;;  %v2186_v13 = vmul.f32 %v2154_v40, %v9740_v54  ;;  %v6672_v3 = vpop.eup %6671  ;;  %v2893_v18 = vmul.f32 0.6931472, %v6670_v31  ;;  %v14063_v43 = vsub.f32 0.0, %v9788_v6  ;;  %v14065_v40 = vld [vmem:[#allocation47_spill] sm:$0xff] }
 0x316   : > { %v2986_v34 = vmax.f32 %v14061_v27, 0.0  ;;  %v2988_v52 = vmax.f32 %v14062_v59, 0.0  ;;  %v2220_v61 = vadd.f32 %v14064_v0, %v2139_v47  ;;  %v2265_v35 = vmul.f32 %v2233_v50, %v9804_v8  ;;  %v6674_v24 = vpop.eup %6673 }
 0x317   : > { %v2990_v21 = vmax.f32 %v14063_v43, 0.0  ;;  %v2922_v22 = vadd.f32 %v2885_v41, %v2666_v37  ;;  %v3205_v38 = vmul.f32 0.6931472, %v6672_v3  ;;  %v2218_v25 = vadd.f32 %v2186_v13, %v2137_v7  ;;  %v6676_v55 = vpop.eup %6675 }
 0x318   : > { %v2267_v39 = vmul.f32 %v2235_v49, %v9871_v11  ;;  %v2924_v12 = vadd.f32 %v2889_v57, %v2668_v1  ;;  %v3209_v27 = vmul.f32 0.6931472, %v6674_v24  ;;  %v9909_v59 = vadd.f32 %v2265_v35, %v2216_v9  ;;  %v6678_v6 = vpop.eup %6677 }
 0x319   : > { %v9912_v31 = vadd.f32 %v14065_v40, %v2220_v61  ;;  %v2926_v43 = vadd.f32 %v2893_v18, %v2670_v48  ;;  %v3213_v54 = vmul.f32 0.6931472, %v6676_v55  ;;  %v3242_v47 = vadd.f32 %v3205_v38, %v2986_v34  ;;  %v6680_v8 = vpop.eup %6679  ;;  %v14068_v40 = vld [vmem:[#allocation62_spill] sm:$0xff] }
 0x31a   : > { %v9914_v0 = vadd.f32 %v2267_v39, %v2218_v25  ;;  %v3422_v41 = vmul.f32 1.442695, %v3367_v45  ;;  %6681 = vpow2.f32 %v3106_v15  ;;  %v3244_v7 = vadd.f32 %v3209_v27, %v2988_v52  ;;  %v14067_v27 = vld [vmem:[#allocation85_spill] sm:$0xff] }
 0x31b   : > { %v2329_v50 = vsub.f32 0.0, %v9909_v59  ;;  %v3302_v37 = vmax.f32 %v9651_v5, 0.0  ;;  %v3246_v1 = vadd.f32 %v3213_v54, %v2990_v21  ;;  %v9918_v9 = vsub.f32 %v2922_v22, %v3242_v47 }
 0x31c   : > { %v2331_v57 = vsub.f32 0.0, %v9914_v0  ;;  %v4167_v49 = vsub.f32 0.0, %v9775_v30  ;;  %v9922_v48 = vsub.f32 %v2924_v12, %v3244_v7  ;;  %v2333_v34 = vsub.f32 0.0, %v9912_v31 }
 0x31d   : > { %v2388_v13 = vmul.f32 1.442695, %v2329_v50  ;;  %vm3655_vm6 = vcmp.ge.f32.partialorder %v9588_v26, 0.0  ;;  %v9928_v45 = vmul.f32 %v9887_v62, %v9716_v44  ;;  %v2344_v15 = vmul.f32 1.442695, %v2307_v51 }
 0x31e   : > { %v9930_v52 = vsub.f32 %v2926_v43, %v3246_v1  ;;  %v3338_v54 = vand.u32 2147483647, %v9918_v9  ;;  %v9937_v30 = vsel %vm3654_vm5, %v9727_v60, %v9747_v17  ;;  %6683 = vpow2.f32 %v3422_v41 }
 0x31f   : > { %14066 = vst [vmem:[#allocation78_spill] sm:$0xff] %v9928_v45  ;;  %v3340_v3 = vand.u32 2147483647, %v9922_v48  ;;  %v2392_v18 = vmul.f32 1.442695, %v2331_v57  ;;  %6685 = vpow2.f32 %v2388_v13  ;;  %v9944_v28 = vmul.f32 %v14033_v63, %v9928_v45 }
 0x320   : > { %v3517_v21 = vmul.f32 0.6931472, %v9822_v36  ;;  %v3342_v44 = vand.u32 2147483647, %v9930_v52  ;;  %v3370_v62 = vsub.f32 0.0, %v3338_v54  ;;  %v6682_v51 = vpop.eup %6681  ;;  %v2825_v38 = vadd.f32 1.0, %v6678_v6 }
 0x321   : > { %v4199_v61 = vadd.f32 1e-08, %v4167_v49  ;;  %v3372_v35 = vsub.f32 0.0, %v3340_v3  ;;  %6687 = vpow2.f32 %v2392_v18  ;;  %v2396_v24 = vmul.f32 1.442695, %v2333_v34 }
 0x322   : > { %6689 = vpow2.f32 %v2344_v15  ;;  %v3374_v60 = vsub.f32 0.0, %v3342_v44  ;;  %v3428_v17 = vmul.f32 1.442695, %v3370_v62  ;;  %v3521_v22 = vmul.f32 0.6931472, %v6680_v8  ;;  %v7449_v15 = vld [vmem:[#allocation11 + $0xd0] sm:$0xff] }
 0x323   : > { %v3432_v25 = vmul.f32 1.442695, %v3372_v35  ;;  %6691 = vpow2.f32 %v2396_v24  ;;  %v9946_v36 = vadd.f32 %v3517_v21, %v3302_v37  ;;  %v3145_v39 = vadd.f32 1.0, %v6682_v51  ;;  %v7450_v44 = vld [vmem:[#allocation11 + $0x240] sm:$0xff] }
 0x324   : > { %6693 = vpow2.f32 %v3428_v17  ;;  %v3436_v55 = vmul.f32 1.442695, %v3374_v60  ;;  %v6684_v12 = vpop.eup %6683  ;;  %v9950_v43 = vmul.f32 %v14068_v40, %v14067_v27  ;;  %v3304_v47 = vmax.f32 %v9742_v29, 0.0  ;;  %v7451_v17 = vld [vmem:[#allocation11 + $0x3b0] sm:$0xff] }
 0x325   : > { %v13476_v41 = vrot.slane %v9658_v58, 7  ;;  %6695 = vpow2.f32 %v3432_v25  ;;  %v6686_v7 = vpop.eup %6685  ;;  %v9957_v8 = vmul.f32 %v14035_v16, %v9928_v45  ;;  %v13480_v50 = vsub.f32 0.0, %v9944_v28 }
 0x326   : > { %6697 = vpow2.f32 %v3436_v55  ;;  %v9963_v1 = vsel %vm3655_vm6, %v9733_v42, %v4199_v61  ;;  %v9965_v57 = vadd.f32 %v3521_v22, %v3304_v47  ;;  %v2425_v49 = vadd.f32 1.0, %v6686_v7 }
 0x327   : > { %v6688_v37 = vpop.eup %6687  ;;  %6699 = vlog2.f32 %v2825_v38  ;;  %v13481_v13 = vsub.f32 0.0, %v9946_v36  ;;  %v9969_v54 = vmul.f32 %v7449_v15, %v9658_v58  ;;  %v13477_v21 = vsub.f32 0.0, %v9950_v43  ;;  %v7452_v15 = vld [vmem:[#allocation11 + $0x50] sm:$0xff] }
 0x328   : > { %14069 = vst [vmem:[#allocation108_spill] sm:$0xff] %v9965_v57  ;;  %v6690_v34 = vpop.eup %6689  ;;  %6701 = vlog2.f32 %v3145_v39  ;;  %v2427_v3 = vadd.f32 1.0, %v6688_v37  ;;  %v14070_v26 = vrot.slane %v9306_v14, 7  ;;  %v9981_v62 = vmul.f32 %v7450_v44, %v9658_v58  ;;  %v7453_v44 = vld [vmem:[#allocation11 + $0x140] sm:$0xff] }
 0x329   : > { %v6692_v18 = vpop.eup %6691  ;;  %6703 = vrcp.f32 %v2425_v49  ;;  %v2676_v61 = vand.u32 2147483647, %v13480_v50  ;;  %v13478_v35 = vsub.f32 0.0, %v9957_v8  ;;  %v13479_v14 = vsub.f32 0.0, %v9965_v57 }
 0x32a   : > { %v9978_v42 = vsel %vm1476_vm1, %v14070_v26, %v13476_v41  ;;  %v6694_v51 = vpop.eup %6693  ;;  %v2429_v24 = vadd.f32 1.0, %v6692_v18  ;;  %6705 = vrcp.f32 %v2427_v3  ;;  %v9988_v22 = vmul.f32 %v7451_v17, %v9658_v58 }
 0x32b   : > { %v6696_v60 = vpop.eup %6695  ;;  %v3466_v25 = vadd.f32 1.0, %v6694_v51  ;;  %v9993_v55 = vadd.f32 1e-08, %v13481_v13  ;;  %v3463_v47 = vadd.f32 1.0, %v6684_v12  ;;  %v9997_v49 = vand.u32 2147483647, %v13477_v21 }
 0x32c   : > { %v6698_v39 = vpop.eup %6697  ;;  %v3468_v7 = vadd.f32 1.0, %v6696_v60  ;;  %6707 = vrcp.f32 %v2429_v24  ;;  %v10000_v3 = vmul.f32 %v7452_v15, %v9978_v42  ;;  %v10003_v51 = vmul.f32 %v7453_v44, %v9687_v46  ;;  %v7454_v15 = vld [vmem:[#allocation11 + $0x2b0] sm:$0xff] }
 0x32d   : > { %v6700_v37 = vpop.eup %6699  ;;  %v3470_v18 = vadd.f32 1.0, %v6698_v39  ;;  %6709 = vlog2.f32 %v3466_v25  ;;  %v2708_v17 = vsub.f32 0.0, %v2676_v61  ;;  %v10007_v12 = vand.u32 2147483647, %v13478_v35 }
 0x32e   : > { %v6702_v26 = vpop.eup %6701  ;;  %6711 = vlog2.f32 %v3468_v7  ;;  %v10011_v60 = vadd.f32 1e-08, %v13479_v14  ;;  %v10014_v39 = vmul.f32 %v7454_v15, %v9687_v46  ;;  %v2403_v25 = vadd.f32 1.0, %v6690_v34 }
 0x32f   : > { %v6704_v24 = vpop.eup %6703  ;;  %6713 = vlog2.f32 %v3470_v18  ;;  %v13485_v44 = vrot.slane %v9993_v55, 7  ;;  %v2883_v61 = vmul.f32 0.6931472, %v6700_v37  ;;  %v14072_v35 = vsub.f32 0.0, %v9818_v53 }
 0x330   : > { %v6706_v41 = vpop.eup %6705  ;;  %6715 = vlog2.f32 %v3463_v47  ;;  %v10018_v21 = vmul.f32 %v6704_v24, %v9909_v59  ;;  %v3203_v50 = vmul.f32 0.6931472, %v6702_v26  ;;  %v14074_v34 = vsub.f32 0.0, %v9830_v19 }
 0x331   : > { %v2665_v14 = vmax.f32 %v14072_v35, 0.0  ;;  %v10024_v6 = vmul.f32 %v6706_v41, %v9914_v0  ;;  %v10028_v15 = vmul.f32 1.442695, %v2708_v17  ;;  %v3028_v47 = vsub.f32 0.0, %v10007_v12 }
 0x332   : > { %14071 = vst [vmem:[#allocation47_spill] sm:$0xff] %v10018_v21  ;;  %v6708_v46 = vpop.eup %6707  ;;  %v2985_v18 = vmax.f32 %v14074_v34, 0.0  ;;  %v10033_v59 = vmul.f32 %v14039_v32, %v10018_v21  ;;  %v4359_v53 = vrot.slane %v10011_v60, 7  ;;  %6717 = vrcp.f32 %v2403_v25 }
 0x333   : > { %14073 = vst [vmem:[#allocation122_spill] sm:$0xff] %v10024_v6  ;;  %v6710_v37 = vpop.eup %6709  ;;  %v10037_v35 = vmul.f32 %v6708_v46, %v9912_v31  ;;  %v10041_v0 = vmul.f32 %v14039_v32, %v10024_v6  ;;  %v2921_v41 = vadd.f32 %v2883_v61, %v2665_v14  ;;  %v3306_v26 = vmax.f32 %v9918_v9, 0.0 }
 0x334   : > { %v6712_v19 = vpop.eup %6711  ;;  %v3525_v17 = vmul.f32 0.6931472, %v6710_v37  ;;  %v13484_v12 = vsub.f32 0.0, %v10033_v59  ;;  %v3241_v34 = vadd.f32 %v3203_v50, %v2985_v18  ;;  %v3308_v13 = vmax.f32 %v9922_v48, 0.0 }
 0x335   : > { %14075 = vst [vmem:[#allocation123_spill] sm:$0xff] %v10037_v35  ;;  %v6714_v24 = vpop.eup %6713  ;;  %v3529_v38 = vmul.f32 0.6931472, %v6712_v19  ;;  %v10048_v31 = vmul.f32 %v14039_v32, %v10037_v35  ;;  %v3310_v46 = vmax.f32 %v9930_v52, 0.0  ;;  %v13488_v61 = vsub.f32 0.0, %v10041_v0 }
 0x336   : > { %v10050_v25 = vpop.eup %6715  ;;  %v3533_v7 = vmul.f32 0.6931472, %v6714_v24  ;;  %v3562_v14 = vadd.f32 %v3525_v17, %v3306_v26  ;;  %v4373_v50 = vsel %vm1476_vm1, %v13485_v44, %v4359_v53  ;;  %v2699_v19 = vand.u32 2147483647, %v13484_v12 }
 0x337   : > { %v3564_v18 = vadd.f32 %v3529_v38, %v3308_v13  ;;  %v13491_v37 = vsub.f32 0.0, %v10048_v31  ;;  %v10065_v24 = vmul.f32 %v14041_v20, %v10018_v21  ;;  %v2701_v26 = vand.u32 2147483647, %v13488_v61 }
 0x338   : > { %v10061_v27 = vadd.f32 %v3533_v7, %v3310_v46  ;;  %v3594_v16 = vsub.f32 0.0, %v3562_v14  ;;  %v6718_v17 = vpop.eup %6717  ;;  %v10071_v13 = vmul.f32 %v14041_v20, %v10024_v6  ;;  %v2731_v12 = vsub.f32 0.0, %v2699_v19 }
 0x339   : > { %v3596_v63 = vsub.f32 0.0, %v3564_v18  ;;  %v2703_v38 = vand.u32 2147483647, %v13491_v37  ;;  %v2733_v44 = vsub.f32 0.0, %v2701_v26  ;;  %v10086_v18 = vmul.f32 %v14041_v20, %v10037_v35 }
 0x33a   : > { %14076 = vst [vmem:[#allocation124_spill] sm:$0xff] %v10061_v27  ;;  %v13495_v7 = vsub.f32 0.0, %v10061_v27  ;;  %v10077_v46 = vadd.f32 %v3594_v16, %v9918_v9  ;;  %v4298_v14 = vadd.f32 1e-08, %v3594_v16  ;;  %v10089_v37 = vmul.f32 %v6718_v17, %v9876_v10 }
 0x33b   : > { %v10080_v21 = vadd.f32 %v3596_v63, %v9922_v48  ;;  %v10082_v61 = vadd.f32 1e-08, %v3596_v63  ;;  %v2735_v6 = vsub.f32 0.0, %v2703_v38  ;;  %v2790_v19 = vmul.f32 1.442695, %v2731_v12 }
 0x33c   : > { %14077 = vst [vmem:[#allocation125_spill] sm:$0xff] %v10077_v46  ;;  %v10094_v9 = vadd.f32 %v13495_v7, %v9930_v52  ;;  %v4361_v16 = vrot.slane %v4298_v14, 7  ;;  %v10097_v48 = vadd.f32 %v4373_v50, %v10011_v60  ;;  %v3064_v63 = vmul.f32 1.442695, %v3028_v47 }
 0x33d   : > { %14078 = vst [vmem:[#allocation126_spill] sm:$0xff] %v10080_v21  ;;  %v13494_v26 = vrot.slane %v10082_v61, 7  ;;  %v2794_v21 = vmul.f32 1.442695, %v2733_v44  ;;  %v2798_v35 = vmul.f32 1.442695, %v2735_v6  ;;  %v10104_v46 = vsub.f32 %v2921_v41, %v3241_v34 }
 0x33e   : > { %14079 = vst [vmem:[#allocation127_spill] sm:$0xff] %v10082_v61  ;;  %v4371_v38 = vsel %vm1476_vm1, %v4359_v53, %v4361_v16  ;;  %v13499_v10 = vsub.f32 0.0, %v10065_v24  ;;  %v13497_v17 = vsub.f32 0.0, %v10071_v13  ;;  %v13498_v47 = vsub.f32 0.0, %v10086_v18 }
 0x33f   : > { %14080 = vst [vmem:[#allocation128_spill] sm:$0xff] %v10089_v37  ;;  %v4369_v52 = vsel %vm1476_vm1, %v4361_v16, %v13494_v26  ;;  %v4457_v60 = vadd.f32 %v4371_v38, %v4298_v14  ;;  %v10113_v44 = vmul.f32 %v14039_v32, %v10089_v37  ;;  %v10117_v6 = vmul.f32 %v14041_v20, %v10089_v37  ;;  %v7456_v20 = vld [vmem:[#allocation11 + $0x330] sm:$0xff] }
 0x340   : > { %14081 = vst [vmem:[#allocation129_spill] sm:$0xff] %v10094_v9  ;;  %v10120_v53 = vadd.f32 %v4369_v52, %v10082_v61  ;;  %6719 = vpow2.f32 %v2790_v19  ;;  %v13496_v41 = vrot.slane %v10097_v48, 6  ;;  %v3019_v50 = vand.u32 2147483647, %v13499_v10 }
 0x341   : > { %14082 = vst [vmem:[#allocation130_spill] sm:$0xff] %v10097_v48  ;;  %v4505_v12 = vrot.slane %v4457_v60, 6  ;;  %6721 = vpow2.f32 %v2794_v21  ;;  %v3021_v14 = vand.u32 2147483647, %v13497_v17  ;;  %v14085_v16 = vsub.f32 0.0, %v9997_v49  ;;  %v14088_v17 = vld [vmem:[#allocation72_spill] sm:$0xff] }
 0x342   : > { %14083 = vst [vmem:[#allocation131_spill] sm:$0xff] %v10104_v46  ;;  %v13502_v34 = vrot.slane %v10120_v53, 6  ;;  %6723 = vpow2.f32 %v2798_v35  ;;  %v3023_v21 = vand.u32 2147483647, %v13498_v47  ;;  %v3051_v49 = vsub.f32 0.0, %v3019_v50 }
 0x343   : > { %14084 = vst [vmem:[#allocation132_spill] sm:$0xff] %v10120_v53  ;;  %v4000_v38 = vmul.f32 1.442695, %v14085_v16  ;;  %6725 = vpow2.f32 %v10028_v15  ;;  %v4516_v19 = vsel %vm4511_vm7, %v13496_v41, %v4505_v12  ;;  %v3337_v16 = vand.u32 2147483647, %v10104_v46 }
 0x344   : > { %6727 = vpow2.f32 %v3064_v63  ;;  %v4514_v35 = vsel %vm4511_vm7, %v4505_v12, %v13502_v34  ;;  %v10142_v52 = vadd.f32 %v4516_v19, %v4457_v60  ;;  %v3053_v26 = vsub.f32 0.0, %v3021_v14  ;;  %v7455_v63 = vld [vmem:[#allocation11 + $0x1c0] sm:$0xff] }
 0x345   : > { %v10146_v15 = vadd.f32 %v4514_v35, %v10120_v53  ;;  %v3055_v7 = vsub.f32 0.0, %v3023_v21  ;;  %v1792_v47 = vadd.f32 %v10003_v51, %v14088_v17  ;;  %v1841_v10 = vmul.f32 %v7455_v63, %v9978_v42  ;;  %v14089_v21 = vld [vmem:[#allocation81_spill] sm:$0xff] }
 0x346   : > { %14086 = vst [vmem:[#allocation133_spill] sm:$0xff] %v10142_v52  ;;  %v6720_v41 = vpop.eup %6719  ;;  %v13509_v50 = vrot.slane %v10142_v52, 4  ;;  %v3110_v35 = vmul.f32 1.442695, %v3051_v49  ;;  %v3114_v34 = vmul.f32 1.442695, %v3053_v26  ;;  %v2033_v9 = vadd.f32 %v10014_v39, %v14089_v21 }
 0x347   : > { %14087 = vst [vmem:[#allocation134_spill] sm:$0xff] %v10146_v15  ;;  %v6722_v12 = vpop.eup %6721  ;;  %v13508_v19 = vrot.slane %v10146_v15, 4  ;;  %v2082_v51 = vmul.f32 %v7456_v20, %v9978_v42  ;;  %v3118_v17 = vmul.f32 1.442695, %v3055_v7  ;;  %6729 = vpow2.f32 %v4000_v38  ;;  %v14092_v7 = vld [vmem:[#allocation32_spill] sm:$0xff] }
 0x348   : > { %v6724_v14 = vpop.eup %6723  ;;  %v3369_v60 = vsub.f32 0.0, %v3337_v16  ;;  %v2827_v49 = vadd.f32 1.0, %v6720_v41  ;;  %v14090_v39 = vsub.f32 0.0, %v10113_v44  ;;  %v2829_v42 = vadd.f32 1.0, %v6722_v12 }
 0x349   : > { %v6726_v63 = vpop.eup %6725  ;;  %v4659_v26 = vsel %vm4656_vm8, %v13509_v50, %v13508_v19  ;;  %6731 = vpow2.f32 %v3110_v35  ;;  %v1567_v38 = vadd.f32 %v10000_v3, %v14092_v7  ;;  %v14093_v16 = vsub.f32 0.0, %v10117_v6 }
 0x34a   : > { %v6728_v48 = vpop.eup %6727  ;;  %v2677_v21 = vand.u32 2147483647, %v14090_v39  ;;  %v10168_v20 = vadd.f32 %v4659_v26, %v10146_v15  ;;  %v2831_v52 = vadd.f32 1.0, %v6724_v14  ;;  %6733 = vpow2.f32 %v3114_v34  ;;  %v14095_v15 = vld [vmem:[#allocation58_spill] sm:$0xff] }
 0x34b   : > { %v2997_v32 = vand.u32 2147483647, %v14093_v16  ;;  %v1873_v53 = vadd.f32 %v1841_v10, %v1792_v47  ;;  %v2114_v19 = vadd.f32 %v2082_v51, %v2033_v9  ;;  %v2804_v41 = vadd.f32 1.0, %v6726_v63 }
 0x34c   : > { %14091 = vst [vmem:[#allocation72_spill] sm:$0xff] %v10168_v20  ;;  %6735 = vpow2.f32 %v3118_v17  ;;  %v3519_v50 = vmul.f32 0.6931472, %v10050_v25  ;;  %v3124_v39 = vadd.f32 1.0, %v6728_v48  ;;  %v14094_v26 = vrot.slane %v9755_v33, 7  ;;  %v7457_v48 = vld [vmem:[#allocation11 + $0xd8] sm:$0xff] }
 0x34d   : > { %v14096_v12 = vrot.slane %v14095_v15, 7  ;;  %6737 = vlog2.f32 %v2827_v49  ;;  %v14097_v3 = vsub.f32 0.0, %v9946_v36  ;;  %v3426_v34 = vmul.f32 1.442695, %v3369_v60  ;;  %v10184_v9 = vpop.eup %6729  ;;  %v7458_v36 = vld [vmem:[#allocation11 + $0x58] sm:$0xff] }
 0x34e   : > { %v2709_v10 = vsub.f32 0.0, %v2677_v21  ;;  %6739 = vlog2.f32 %v2829_v42  ;;  %v10187_v25 = vadd.f32 %v9969_v54, %v1567_v38  ;;  %v10190_v47 = vmul.f32 %v7457_v48, %v9755_v33  ;;  %v7459_v21 = vld [vmem:[#allocation11 + $0x1c8] sm:$0xff] }
 0x34f   : > { %v1500_v35 = vsel %vm1476_vm1, %v14096_v12, %v14094_v26  ;;  %v3622_v14 = vadd.f32 %v14097_v3, %v9651_v5  ;;  %v3029_v15 = vsub.f32 0.0, %v2997_v32  ;;  %6741 = vlog2.f32 %v2831_v52  ;;  %v6732_v51 = vpop.eup %6731  ;;  %v7460_v38 = vld [vmem:[#allocation11 + $0x248] sm:$0xff] }
 0x350   : > { %14098 = vst [vmem:[#allocation81_spill] sm:$0xff] %v10187_v25  ;;  %v10193_v17 = vadd.f32 %v9981_v62, %v1873_v53  ;;  %v10196_v5 = vadd.f32 %v9988_v22, %v2114_v19  ;;  %6743 = vlog2.f32 %v2804_v41  ;;  %v1536_v60 = vmul.f32 %v7458_v36, %v1500_v35  ;;  %v6734_v63 = vpop.eup %6733  ;;  %v14103_v12 = vld [vmem:[#allocation89_spill] sm:$0xff] }
 0x351   : > { %v14100_v54 = vmax.f32 %v9773_v56, 0.0  ;;  %6745 = vlog2.f32 %v3124_v39  ;;  %v10202_v42 = vmul.f32 %v7459_v21, %v1500_v35  ;;  %v3147_v32 = vadd.f32 1.0, %v6732_v51  ;;  %v14109_v21 = vld [vmem:[#allocation33_spill] sm:$0xff] }
 0x352   : > { %14099 = vst [vmem:[#allocation32_spill] sm:$0xff] %v10193_v17  ;;  %v6736_v52 = vpop.eup %6735  ;;  %v10205_v62 = vadd.f32 %v9937_v30, %v3622_v14  ;;  %6747 = vpow2.f32 %v3426_v34  ;;  %v2746_v22 = vmul.f32 1.442695, %v2709_v10  ;;  %v3149_v53 = vadd.f32 1.0, %v6734_v63  ;;  %v7461_v34 = vld [vmem:[#allocation11 + $0x148] sm:$0xff]  ;;  %v14107_v63 = vld [vmem:[#allocation59_spill] sm:$0xff] }
 0x353   : > { %v10200_v49 = vadd.f32 %v3519_v50, %v14100_v54  ;;  %v6738_v19 = vpop.eup %6737  ;;  %v10208_v16 = vmul.f32 %v7460_v38, %v9755_v33  ;;  %v3066_v41 = vmul.f32 1.442695, %v3029_v15  ;;  %v3151_v50 = vadd.f32 1.0, %v6736_v52  ;;  %v14105_v10 = vld [vmem:[#allocation121_spill] sm:$0xff]  ;;  %v14106_v15 = vld [vmem:[#allocation46_spill] sm:$0xff] }
 0x354   : > { %14101 = vst [vmem:[#allocation58_spill] sm:$0xff] %v10205_v62  ;;  %6749 = vlog2.f32 %v3147_v32  ;;  %v6740_v39 = vpop.eup %6739  ;;  %v14102_v26 = vrot.slane %v9993_v55, 7  ;;  %v14104_v3 = vrot.slane %v14103_v12, 7  ;;  %v3688_v14 = vmax.f32 %v9950_v43, 0.0  ;;  %v7462_v38 = vld [vmem:[#allocation11 + $0x338] sm:$0xff] }
 0x355   : > { %v1761_v48 = vmul.f32 %v7461_v34, %v14105_v10  ;;  %6751 = vlog2.f32 %v3149_v53  ;;  %v6742_v51 = vpop.eup %6741  ;;  %v10221_v54 = vmul.f32 %v14107_v63, %v14106_v15  ;;  %v10224_v32 = vadd.f32 %v1536_v60, %v14109_v21  ;;  %v7464_v15 = vld [vmem:[#allocation11 + $0x2b8] sm:$0xff] }
 0x356   : > { %v4375_v30 = vsel %vm1476_vm1, %v14104_v3, %v14102_v26  ;;  %6753 = vlog2.f32 %v3151_v50  ;;  %v6744_v52 = vpop.eup %6743  ;;  %v10226_v26 = vmul.f32 %v7462_v38, %v1500_v35  ;;  %v7463_v3 = vld [vmem:[#allocation11 + $0x3b8] sm:$0xff]  ;;  %v2887_v53 = vmul.f32 0.6931472, %v6738_v19 }
 0x357   : > { %14108 = vst [vmem:[#allocation121_spill] sm:$0xff] %v10221_v54  ;;  %v10229_v62 = vmul.f32 %v7463_v3, %v9755_v33  ;;  %6755 = vpow2.f32 %v2746_v22  ;;  %v6746_v34 = vpop.eup %6745  ;;  %v10232_v36 = vadd.f32 %v4375_v30, %v9993_v55  ;;  %v10235_v12 = vmul.f32 %v7464_v15, %v14105_v10  ;;  %v14111_v35 = vld [vmem:[#allocation83_spill] sm:$0xff] }
 0x358   : > { %6757 = vpow2.f32 %v3066_v41  ;;  %v2891_v60 = vmul.f32 0.6931472, %v6740_v39  ;;  %v6748_v50 = vpop.eup %6747  ;;  %v3720_v20 = vadd.f32 0.5, %v3688_v14  ;;  %v10238_v38 = vadd.f32 %v1761_v48, %v14111_v35 }
 0x359   : > { %14110 = vst [vmem:[#allocation59_spill] sm:$0xff] %v10232_v36  ;;  %v14112_v3 = vsub.f32 0.0, %v10033_v59  ;;  %v2895_v22 = vmul.f32 0.6931472, %v6742_v51  ;;  %v14113_v25 = vsub.f32 0.0, %v10200_v49  ;;  %v10249_v41 = vmul.f32 %v14068_v40, %v9928_v45  ;;  %v14165_v36 = vld [vmem:[#allocation97_spill] sm:$0xff] }
 0x35a   : > { %v6750_v19 = vpop.eup %6749  ;;  %v14114_v39 = vsub.f32 0.0, %v10041_v0  ;;  %v14115_v48 = vsub.f32 0.0, %v10048_v31  ;;  %v14116_v51 = vsub.f32 0.0, %v10065_v24  ;;  %v3465_v27 = vadd.f32 1.0, %v6748_v50 }
 0x35b   : > { %v2667_v61 = vmax.f32 %v14112_v3, 0.0  ;;  %v10244_v55 = vadd.f32 1e-08, %v14113_v25  ;;  %v6752_v10 = vpop.eup %6751  ;;  %v3207_v3 = vmul.f32 0.6931472, %v6750_v19  ;;  %v14117_v30 = vsub.f32 0.0, %v10071_v13 }
 0x35c   : > { %v2669_v14 = vmax.f32 %v14114_v39, 0.0  ;;  %v2671_v59 = vmax.f32 %v14115_v48, 0.0  ;;  %v2987_v35 = vmax.f32 %v14116_v51, 0.0  ;;  %v6754_v25 = vpop.eup %6753  ;;  %v3211_v45 = vmul.f32 0.6931472, %v6752_v10 }
 0x35d   : > { %v2923_v15 = vadd.f32 %v2887_v53, %v2667_v61  ;;  %v2989_v17 = vmax.f32 %v14117_v30, 0.0  ;;  %v6756_v57 = vpop.eup %6755  ;;  %v14118_v0 = vsub.f32 0.0, %v10086_v18  ;;  %v3215_v11 = vmul.f32 0.6931472, %v6754_v25 }
 0x35e   : > { %v2925_v33 = vadd.f32 %v2891_v60, %v2669_v14  ;;  %v2927_v29 = vadd.f32 %v2895_v22, %v2671_v59  ;;  %v3243_v31 = vadd.f32 %v3207_v3, %v2987_v35  ;;  %v6758_v48 = vpop.eup %6757  ;;  %v13522_v61 = vrot.slane %v10244_v55, 7 }
 0x35f   : > { %v2991_v39 = vmax.f32 %v14118_v0, 0.0  ;;  %v3689_v24 = vmax.f32 %v10221_v54, 0.0  ;;  %v14119_v53 = vsub.f32 0.0, %v10221_v54  ;;  %v3245_v60 = vadd.f32 %v3211_v45, %v2989_v17 }
 0x360   : > { %v2841_v19 = vmul.f32 0.6931472, %v6744_v52  ;;  %v13523_v13 = vsub.f32 0.0, %v10249_v41  ;;  %v10266_v14 = vsub.f32 %v2923_v15, %v3243_v31  ;;  %6759 = vlog2.f32 %v3465_v27 }
 0x361   : > { %v3913_v50 = vand.u32 2147483647, %v14119_v53  ;;  %v3247_v30 = vadd.f32 %v3215_v11, %v2991_v39  ;;  %v3161_v18 = vmul.f32 0.6931472, %v6746_v34  ;;  %v2805_v22 = vadd.f32 1.0, %v6756_v57 }
 0x362   : > { %v10268_v10 = vsub.f32 %v2925_v33, %v3245_v60  ;;  %v4040_v59 = vadd.f32 1.0, %v10184_v9  ;;  %v3125_v51 = vadd.f32 1.0, %v6758_v48  ;;  %v3339_v3 = vand.u32 2147483647, %v10266_v14  ;;  %v14122_v48 = vld [vmem:[#allocation77_spill] sm:$0xff] }
 0x363   : > { %v10271_v35 = vsub.f32 %v2927_v29, %v3247_v30  ;;  %v14120_v45 = vsub.f32 0.0, %v9944_v28  ;;  %v14121_v52 = vsub.f32 0.0, %v9957_v8  ;;  %v10280_v27 = vmul.f32 %v14107_v63, %v10089_v37 }
 0x364   : > { %v3341_v33 = vand.u32 2147483647, %v10268_v10  ;;  %v3721_v57 = vadd.f32 0.5, %v3689_v24  ;;  %v3892_v9 = vand.u32 2147483647, %v13523_v13  ;;  %v3371_v34 = vsub.f32 0.0, %v3339_v3 }
 0x365   : > { %v2644_v17 = vmax.f32 %v14120_v45, 0.0  ;;  %v2964_v11 = vmax.f32 %v14121_v52, 0.0  ;;  %v3343_v29 = vand.u32 2147483647, %v10271_v35  ;;  %6761 = vlog2.f32 %v2805_v22  ;;  %v14124_v22 = vld [vmem:[#allocation90_spill] sm:$0xff] }
 0x366   : > { %v3373_v28 = vsub.f32 0.0, %v3341_v33  ;;  %v3945_v0 = vsub.f32 0.0, %v3913_v50  ;;  %6763 = vlog2.f32 %v3125_v51  ;;  %v3430_v39 = vmul.f32 1.442695, %v3371_v34  ;;  %v6760_v31 = vpop.eup %6759  ;;  %v10307_v33 = vld [vmem:[#allocation11] sm:$0xff] }
 0x367   : > { %v2900_v15 = vadd.f32 %v2841_v19, %v2644_v17  ;;  %v3220_v25 = vadd.f32 %v3161_v18, %v2964_v11  ;;  %v3375_v8 = vsub.f32 0.0, %v3343_v29  ;;  %6765 = vlog2.f32 %v4040_v59 }
 0x368   : > { %v2034_v53 = vadd.f32 %v10235_v12, %v14122_v48  ;;  %v13520_v24 = vsub.f32 0.0, %v10280_v27  ;;  %v3434_v60 = vmul.f32 1.442695, %v3373_v28  ;;  %v3752_v30 = vadd.f32 1e-08, %v3720_v20 }
 0x369   : > { %v3924_v45 = vsub.f32 0.0, %v3892_v9  ;;  %6767 = vpow2.f32 %v3430_v39  ;;  %v3438_v3 = vmul.f32 1.442695, %v3375_v8  ;;  %v3753_v19 = vadd.f32 1e-08, %v3721_v57  ;;  %v10309_v57 = vld [vmem:[#allocation11 + $0x10] sm:$0xff] }
 0x36a   : > { %v10289_v18 = vsub.f32 %v2900_v15, %v3220_v25  ;;  %v10293_v50 = vadd.f32 %v10190_v47, %v10224_v32  ;;  %6769 = vpow2.f32 %v3434_v60  ;;  %v14125_v59 = vrot.slane %v14124_v22, 7 }
 0x36b   : > { %v3523_v51 = vmul.f32 0.6931472, %v6760_v31  ;;  %v4002_v20 = vmul.f32 1.442695, %v3945_v0  ;;  %6771 = vpow2.f32 %v3438_v3  ;;  %v6762_v17 = vpop.eup %6761  ;;  %v1874_v11 = vadd.f32 %v10202_v42, %v10238_v38  ;;  %v14130_v31 = vld [vmem:[#allocation86_spill] sm:$0xff] }
 0x36c   : > { %14123 = vst [vmem:[#allocation33_spill] sm:$0xff] %v10293_v50  ;;  %v4376_v12 = vsel %vm1476_vm1, %v14125_v59, %v13522_v61  ;;  %v2115_v47 = vadd.f32 %v10226_v26, %v2034_v53  ;;  %v3893_v32 = vand.u32 2147483647, %v13520_v24  ;;  %v6764_v9 = vpop.eup %6763  ;;  %6773 = vlog2.f32 %v3752_v30  ;;  %v14131_v53 = vld [vmem:[#allocation87_spill] sm:$0xff] }
 0x36d   : > { %v14126_v29 = vsub.f32 0.0, %v9950_v43  ;;  %v3305_v15 = vmax.f32 %v10104_v46, 0.0  ;;  %v3960_v25 = vmul.f32 1.442695, %v3924_v45  ;;  %v6766_v28 = vpop.eup %6765  ;;  %v14127_v42 = vsub.f32 0.0, %v10200_v49 }
 0x36e   : > { %v10318_v38 = vadd.f32 %v4376_v12, %v10244_v55  ;;  %6775 = vlog2.f32 %v3753_v19  ;;  %v3316_v0 = vand.u32 2147483647, %v10289_v18  ;;  %v1525_v48 = vmul.f32 %v10307_v33, %v14130_v31 }
 0x36f   : > { %v3880_v34 = vmax.f32 %v14126_v29, 0.0  ;;  %v3623_v26 = vadd.f32 %v14127_v42, %v9773_v56  ;;  %v6768_v8 = vpop.eup %6767  ;;  %v10321_v39 = vadd.f32 %v3523_v51, %v3305_v15  ;;  %6777 = vpow2.f32 %v4002_v20 }
 0x370   : > { %14128 = vst [vmem:[#allocation83_spill] sm:$0xff] %v10318_v38  ;;  %v1527_v60 = vmul.f32 %v10309_v57, %v14131_v53  ;;  %v6770_v30 = vpop.eup %6769  ;;  %v2843_v45 = vmul.f32 0.6931472, %v6762_v17  ;;  %v3163_v49 = vmul.f32 0.6931472, %v6764_v9  ;;  %v3925_v56 = vsub.f32 0.0, %v3893_v32 }
 0x371   : > { %14129 = vst [vmem:[#allocation77_spill] sm:$0xff] %v10321_v39  ;;  %v3467_v3 = vadd.f32 1.0, %v6768_v8  ;;  %v6772_v59 = vpop.eup %6771  ;;  %v4097_v12 = vmul.f32 0.6931472, %v6766_v28  ;;  %6779 = vpow2.f32 %v3960_v25  ;;  %v14132_v19 = vsub.f32 0.0, %v10113_v44  ;;  %v10334_v9 = vld [vmem:[#allocation11 + $0x80] sm:$0xff] }
 0x372   : > { %v3469_v51 = vadd.f32 1.0, %v6770_v30  ;;  %v3348_v15 = vsub.f32 0.0, %v3316_v0  ;;  %v14133_v20 = vsub.f32 0.0, %v10117_v6  ;;  %v3471_v31 = vadd.f32 1.0, %v6772_v59  ;;  %v6774_v52 = vpop.eup %6773  ;;  %v10336_v0 = vld [vmem:[#allocation11 + $0x180] sm:$0xff] }
 0x373   : > { %v2645_v29 = vmax.f32 %v14132_v19, 0.0  ;;  %6781 = vlog2.f32 %v3467_v3  ;;  %v13521_v24 = vsub.f32 0.0, %v10321_v39  ;;  %v1557_v17 = vadd.f32 %v1525_v48, %v14092_v7 }
 0x374   : > { %v2965_v42 = vmax.f32 %v14133_v20, 0.0  ;;  %v1559_v32 = vadd.f32 %v1527_v60, %v14092_v7  ;;  %6783 = vlog2.f32 %v3469_v51  ;;  %v6776_v25 = vpop.eup %6775  ;;  %v3962_v8 = vmul.f32 1.442695, %v3925_v56 }
 0x375   : > { %v2901_v44 = vadd.f32 %v2843_v45, %v2645_v29  ;;  %6785 = vlog2.f32 %v3471_v31  ;;  %v6778_v6 = vpop.eup %6777  ;;  %v10339_v30 = vadd.f32 %v9963_v1, %v3623_v26  ;;  %v4136_v3 = vadd.f32 %v4097_v12, %v3880_v34  ;;  %v14137_v12 = vld [vmem:[#allocation100_spill] sm:$0xff] }
 0x376   : > { %v3221_v28 = vadd.f32 %v3163_v49, %v2965_v42  ;;  %v3668_v59 = vmax.f32 %v10249_v41, 0.0  ;;  %v10343_v48 = vadd.f32 %v10208_v16, %v1874_v11  ;;  %v3384_v19 = vmul.f32 1.442695, %v3348_v15  ;;  %v14135_v49 = vld [vmem:[#allocation79_spill] sm:$0xff] }
 0x377   : > { %14134 = vst [vmem:[#allocation86_spill] sm:$0xff] %v10339_v30  ;;  %v10347_v45 = vadd.f32 %v10229_v62, %v2115_v47  ;;  %v1606_v56 = vmul.f32 %v10334_v9, %v14135_v49  ;;  %v6780_v29 = vpop.eup %6779  ;;  %v10351_v51 = vmul.f32 0.6931472, %v6774_v52  ;;  %v14136_v1 = vsub.f32 0.0, %v10221_v54  ;;  %v10366_v31 = vld [vmem:[#allocation11 + $0x100] sm:$0xff] }
 0x378   : > { %v4297_v16 = vadd.f32 1e-08, %v13521_v24  ;;  %v10361_v11 = vmul.f32 %v10336_v0, %v14131_v53  ;;  %v10363_v62 = vsub.f32 %v2901_v44, %v3221_v28  ;;  %6787 = vpow2.f32 %v3962_v8 }
 0x379   : > { %v10355_v34 = vmax.f32 %v14136_v1, 0.0  ;;  %v6782_v26 = vpop.eup %6781  ;;  %v1638_v47 = vadd.f32 %v1606_v56, %v1557_v17  ;;  %v1640_v15 = vadd.f32 %v14137_v12, %v1559_v32  ;;  %v4168_v20 = vsub.f32 0.0, %v4136_v3 }
 0x37a   : > { %v6784_v52 = vpop.eup %6783  ;;  %v3700_v42 = vadd.f32 0.5, %v3668_v59  ;;  %v3307_v49 = vmax.f32 %v10266_v14, 0.0  ;;  %v3527_v1 = vmul.f32 0.6931472, %v6782_v26  ;;  %v4041_v60 = vadd.f32 1.0, %v6778_v6  ;;  %v14138_v59 = vld [vmem:[#allocation80_spill] sm:$0xff] }
 0x37b   : > { %v6786_v24 = vpop.eup %6785  ;;  %6789 = vpow2.f32 %v3384_v19  ;;  %v3309_v53 = vmax.f32 %v10268_v10, 0.0  ;;  %v3531_v61 = vmul.f32 0.6931472, %v6784_v52  ;;  %v4360_v44 = vrot.slane %v4297_v16, 7 }
 0x37c   : > { %v3311_v28 = vmax.f32 %v10271_v35, 0.0  ;;  %v3535_v17 = vmul.f32 0.6931472, %v6786_v24  ;;  %v3563_v8 = vadd.f32 %v3527_v1, %v3307_v49  ;;  %v4020_v32 = vadd.f32 1.0, %v6780_v29  ;;  %v1157_v49 = vpop.f32.mrf.mxu0 }
 0x37d   : > { %v3317_v3 = vand.u32 2147483647, %v10363_v62  ;;  %v1752_v56 = vmul.f32 %v10366_v31, %v14138_v59  ;;  %v3565_v12 = vadd.f32 %v3531_v61, %v3309_v53  ;;  %v10374_v13 = vmul.f32 0.6931472, %v6776_v25 }
 0x37e   : > { %v14140_v6 = vsub.f32 0.0, %v10249_v41  ;;  %v10380_v26 = vadd.f32 %v3535_v17, %v3311_v28  ;;  %v3595_v52 = vsub.f32 0.0, %v3563_v8  ;;  %v6788_v30 = vpop.eup %6787  ;;  %v4200_v54 = vadd.f32 1e-08, %v4168_v20 }
 0x37f   : > { %14139 = vst [vmem:[#allocation87_spill] sm:$0xff] %v10374_v13  ;;  %6791 = vlog2.f32 %v4041_v60  ;;  %v3732_v24 = vadd.f32 1e-08, %v3700_v42  ;;  %v3597_v29 = vsub.f32 0.0, %v3565_v12  ;;  %v14142_v1 = vrot.slane %v10244_v55, 7 }
 0x380   : > { %v10378_v19 = vmax.f32 %v14140_v6, 0.0  ;;  %14141 = vst [vmem:[#allocation79_spill] sm:$0xff] %v10380_v26  ;;  %v13525_v25 = vsub.f32 0.0, %v10380_v26  ;;  %v10388_v53 = vadd.f32 %v3595_v52, %v10266_v14  ;;  %v4299_v59 = vadd.f32 1e-08, %v3595_v52  ;;  %v14147_v14 = vld [vmem:[#allocation24_spill] sm:$0xff] }
 0x381   : > { %v4374_v61 = vsel %vm1476_vm1, %v14142_v1, %v4360_v44  ;;  %v6790_v28 = vpop.eup %6789  ;;  %6793 = vlog2.f32 %v4020_v32  ;;  %v3349_v17 = vsub.f32 0.0, %v3317_v3  ;;  %v10391_v20 = vadd.f32 %v3597_v29, %v10268_v10  ;;  %v14149_v3 = vld [vmem:[#allocation53_spill] sm:$0xff]  ;;  %v14150_v1 = vld [vmem:[#allocation104_spill] sm:$0xff] }
 0x382   : > { %14143 = vst [vmem:[#allocation100_spill] sm:$0xff] %v10388_v53  ;;  %v10393_v60 = vadd.f32 1e-08, %v3597_v29  ;;  %vm3656_vm9 = vcmp.ge.f32.partialorder %v9950_v43, 0.0  ;;  %v4021_v55 = vadd.f32 1.0, %v6788_v30  ;;  %v10399_v42 = vadd.f32 %v13525_v25, %v10271_v35  ;;  %v10434_v53 = vld [vmem:[#allocation11 + $0x8] sm:$0xff] }
 0x383   : > { %14144 = vst [vmem:[#allocation80_spill] sm:$0xff] %v10391_v20  ;;  %v4362_v8 = vrot.slane %v4299_v59, 7  ;;  %v10402_v12 = vadd.f32 %v1157_v49, %v14147_v14  ;;  %v10404_v6 = vadd.f32 %v4374_v61, %v4297_v16  ;;  %v1784_v32 = vadd.f32 %v1752_v56, %v1638_v47  ;;  %v14151_v61 = vld [vmem:[#allocation120_spill] sm:$0xff] }
 0x384   : > { %14145 = vst [vmem:[#allocation135_spill] sm:$0xff] %v10393_v60  ;;  %v10408_v10 = vmul.f32 %v14068_v40, %v14149_v3  ;;  %v13528_v52 = vrot.slane %v10393_v60, 7  ;;  %v3444_v29 = vadd.f32 1.0, %v6790_v28  ;;  %v3669_v30 = vmax.f32 %v10280_v27, 0.0  ;;  %v14152_v3 = vld [vmem:[#allocation111_spill] sm:$0xff]  ;;  %v1160_v37 = vpop.f32.mrf.mxu0 }
 0x385   : > { %14146 = vst [vmem:[#allocation136_spill] sm:$0xff] %v10399_v42  ;;  %v10414_v35 = vmul.f32 %v14068_v40, %v14150_v1  ;;  %v4372_v49 = vsel %vm1476_vm1, %v4360_v44, %v4362_v8  ;;  %v6792_v25 = vpop.eup %6791  ;;  %v3386_v16 = vmul.f32 1.442695, %v3349_v17  ;;  %v10420_v47 = vmul.f32 %v14068_v40, %v14151_v61 }
 0x386   : > { %14148 = vst [vmem:[#allocation24_spill] sm:$0xff] %v10404_v6  ;;  %v4370_v56 = vsel %vm1476_vm1, %v4362_v8, %v13528_v52  ;;  %v4458_v28 = vadd.f32 %v4372_v49, %v4299_v59  ;;  %6795 = vlog2.f32 %v4021_v55  ;;  %v1786_v13 = vadd.f32 %v14152_v3, %v1640_v15  ;;  %v10439_v49 = vld [vmem:[#allocation11 + $0x18] sm:$0xff] }
 0x387   : > { %v10428_v1 = vadd.f32 %v4370_v56, %v10393_v60  ;;  %v13531_v44 = vrot.slane %v10402_v12, 1  ;;  %v6794_v42 = vpop.eup %6793  ;;  %v13526_v17 = vrot.slane %v10404_v6, 6  ;;  %v1865_v61 = vadd.f32 %v10361_v11, %v1784_v32 }
 0x388   : > { %v13529_v20 = vsub.f32 0.0, %v10408_v10  ;;  %v4506_v22 = vrot.slane %v4458_v28, 6  ;;  %v4099_v8 = vmul.f32 0.6931472, %v6792_v25  ;;  %6797 = vlog2.f32 %v3444_v29 }
 0x389   : > { %14153 = vst [vmem:[#allocation111_spill] sm:$0xff] %v10428_v1  ;;  %v13530_v59 = vsub.f32 0.0, %v10414_v35  ;;  %v13527_v15 = vrot.slane %v10428_v1, 6  ;;  %6799 = vpow2.f32 %v3386_v16  ;;  %v3701_v55 = vadd.f32 0.5, %v3669_v30 }
 0x38a   : > { %v13534_v3 = vsub.f32 0.0, %v10420_v47  ;;  %v4517_v11 = vsel %vm4511_vm7, %v13526_v17, %v4506_v22  ;;  %v1526_v32 = vmul.f32 %v10434_v53, %v9841_v4  ;;  %v14155_v30 = vrot.slane %v9658_v58, 1 }
 0x38b   : > { %v4515_v25 = vsel %vm4511_vm7, %v4506_v22, %v13527_v15  ;;  %v10451_v29 = vadd.f32 %v4517_v11, %v4458_v28  ;;  %v10464_v56 = vsel %vm3656_vm9, %v10351_v51, %v4200_v54  ;;  %v4057_v4 = vmul.f32 0.6931472, %v6794_v42  ;;  %v14157_v11 = vld [vmem:[#allocation103_spill] sm:$0xff]  ;;  %v10478_v54 = vld [vmem:[#allocation11 + $0x88] sm:$0xff] }
 0x38c   : > { %v10459_v16 = vsel %vm1702_vm2, %v14155_v30, %v13531_v44  ;;  %v3914_v17 = vand.u32 2147483647, %v13529_v20  ;;  %v10469_v22 = vadd.f32 %v4515_v25, %v10428_v1  ;;  %v6796_v28 = vpop.eup %6795  ;;  %6801 = vlog2.f32 %v3732_v24  ;;  %v7465_v25 = vld [vmem:[#allocation11 + $0x430] sm:$0xff] }
 0x38d   : > { %14154 = vst [vmem:[#allocation137_spill] sm:$0xff] %v10451_v29  ;;  %v1946_v15 = vadd.f32 %v14157_v11, %v1865_v61  ;;  %v3916_v30 = vand.u32 2147483647, %v13530_v59  ;;  %v1528_v52 = vmul.f32 %v10439_v49, %v9884_v23  ;;  %v3918_v43 = vand.u32 2147483647, %v13534_v3  ;;  %v14158_v59 = vld [vmem:[#allocation109_spill] sm:$0xff] }
 0x38e   : > { %14156 = vst [vmem:[#allocation138_spill] sm:$0xff] %v10469_v22  ;;  %v13542_v51 = vrot.slane %v10451_v29, 4  ;;  %v13543_v42 = vrot.slane %v10469_v22, 4  ;;  %v2244_v24 = vmul.f32 %v7465_v25, %v10459_v16  ;;  %v6798_v20 = vpop.eup %6797  ;;  %v4137_v61 = vadd.f32 %v4099_v8, %v10355_v34  ;;  %v14160_v34 = vld [vmem:[#allocation117_spill] sm:$0xff] }
 0x38f   : > { %v3733_v11 = vadd.f32 1e-08, %v3701_v55  ;;  %v10485_v44 = vadd.f32 %v14158_v59, %v1786_v13  ;;  %v1558_v39 = vadd.f32 %v1526_v32, %v14109_v21  ;;  %v6800_v46 = vpop.eup %6799  ;;  %v4116_v3 = vadd.f32 %v4057_v4, %v10378_v19  ;;  %v14162_v59 = vld [vmem:[#allocation116_spill] sm:$0xff] }
 0x390   : > { %v4059_v38 = vmul.f32 0.6931472, %v6796_v28  ;;  %v3946_v6 = vsub.f32 0.0, %v3914_v17  ;;  %v4660_v25 = vsel %vm4656_vm8, %v13542_v51, %v13543_v42  ;;  %v10496_v8 = vadd.f32 %v14160_v34, %v1946_v15  ;;  %v10506_v29 = vld [vmem:[#allocation11 + $0x108] sm:$0xff] }
 0x391   : > { %14159 = vst [vmem:[#allocation103_spill] sm:$0xff] %v10485_v44  ;;  %v3948_v13 = vsub.f32 0.0, %v3916_v30  ;;  %v1607_v55 = vmul.f32 %v10478_v54, %v14162_v59  ;;  %v10501_v32 = vadd.f32 %v4660_v25, %v10469_v22  ;;  %v14164_v19 = vsub.f32 0.0, %v10280_v27 }
 0x392   : > { %14161 = vst [vmem:[#allocation109_spill] sm:$0xff] %v10496_v8  ;;  %v3950_v4 = vsub.f32 0.0, %v3918_v43  ;;  %v1560_v28 = vadd.f32 %v1528_v52, %v14109_v21  ;;  %v10509_v51 = vadd.f32 %v2244_v24, %v10196_v5  ;;  %v6802_v15 = vpop.eup %6801  ;;  %v3481_v34 = vmul.f32 0.6931472, %v6798_v20  ;;  %v14166_v8 = vld [vmem:[#allocation106_spill] sm:$0xff] }
 0x393   : > { %14163 = vst [vmem:[#allocation117_spill] sm:$0xff] %v10501_v32  ;;  %v3861_v17 = vmax.f32 %v14164_v19, 0.0  ;;  %vm3636_vm10 = vcmp.ge.f32.partialorder %v10249_v41, 0.0  ;;  %v3445_v30 = vadd.f32 1.0, %v6800_v46  ;;  %6803 = vlog2.f32 %v3733_v11  ;;  %v10518_v46 = vld [vmem:[#allocation11 + $0x188] sm:$0xff] }
 0x394   : > { %v1639_v59 = vadd.f32 %v1607_v55, %v1558_v39  ;;  %v4148_v25 = vsub.f32 0.0, %v4116_v3  ;;  %v3690_v32 = vmax.f32 %v10408_v10, 0.0  ;;  %v4004_v19 = vmul.f32 1.442695, %v3946_v6  ;;  %v14168_v3 = vld [vmem:[#allocation108_spill] sm:$0xff] }
 0x395   : > { %v4117_v42 = vadd.f32 %v4059_v38, %v3861_v17  ;;  %v3284_v43 = vmax.f32 %v10289_v18, 0.0  ;;  %v3692_v52 = vmax.f32 %v10414_v35, 0.0  ;;  %v4008_v22 = vmul.f32 1.442695, %v3948_v13  ;;  %v14167_v38 = vld [vmem:[#allocation94_spill] sm:$0xff] }
 0x396   : > { %v1753_v5 = vmul.f32 %v10506_v29, %v14165_v36  ;;  %v4169_v24 = vsub.f32 0.0, %v4137_v61  ;;  %v4012_v20 = vmul.f32 1.442695, %v3950_v4  ;;  %v1641_v44 = vadd.f32 %v14166_v8, %v1560_v28  ;;  %v14170_v28 = vld [vmem:[#allocation35_spill] sm:$0xff] }
 0x397   : > { %v2308_v39 = vsub.f32 0.0, %v10509_v51  ;;  %v14169_v11 = vsub.f32 0.0, %v14168_v3  ;;  %v3540_v55 = vadd.f32 %v3481_v34, %v3284_v43  ;;  %6805 = vlog2.f32 %v3445_v30  ;;  %v1162_v34 = vpop.f32.mrf.mxu0 }
 0x398   : > { %v1785_v17 = vadd.f32 %v1753_v5, %v1639_v59  ;;  %v4180_v1 = vadd.f32 1e-08, %v4148_v25  ;;  %v4149_v13 = vsub.f32 0.0, %v4117_v42  ;;  %v3722_v60 = vadd.f32 0.5, %v3690_v32 }
 0x399   : > { %v3624_v6 = vadd.f32 %v14169_v11, %v14167_v38  ;;  %6807 = vpow2.f32 %v4004_v19  ;;  %v6804_v36 = vpop.eup %6803  ;;  %v3769_v61 = vmul.f32 0.6931472, %v6802_v15  ;;  %v3724_v4 = vadd.f32 0.5, %v3692_v52  ;;  %v1206_v15 = vpop.f32.mrf.mxu1  ;;  %v14176_v11 = vld [vmem:[#allocation107_spill] sm:$0xff] }
 0x39a   : > { %6809 = vpow2.f32 %v4008_v22  ;;  %v1834_v8 = vmul.f32 %v10518_v46, %v9884_v23  ;;  %v1787_v26 = vadd.f32 %v14170_v28, %v1641_v44  ;;  %v2346_v40 = vmul.f32 1.442695, %v2308_v39  ;;  %v14178_v28 = vld [vmem:[#allocation26_spill] sm:$0xff] }
 0x39b   : > { %6811 = vpow2.f32 %v4012_v20  ;;  %v10528_v38 = vadd.f32 %v1160_v37, %v14147_v14  ;;  %v10530_v30 = vadd.f32 1e-08, %v4169_v24  ;;  %v3572_v42 = vsub.f32 0.0, %v3540_v55  ;;  %v14173_v24 = vld [vmem:[#allocation36_spill] sm:$0xff] }
 0x39c   : > { %vm3637_vm11 = vcmp.ge.f32.partialorder %v10280_v27, 0.0  ;;  %v1866_v32 = vadd.f32 %v1834_v8, %v1785_v17  ;;  %v10534_v22 = vadd.f32 %v10464_v56, %v3624_v6  ;;  %v10538_v23 = vsel %vm3636_vm10, %v3769_v61, %v4180_v1  ;;  %v14175_v56 = vld [vmem:[#allocation25_spill] sm:$0xff] }
 0x39d   : > { %14171 = vst [vmem:[#allocation116_spill] sm:$0xff] %v10530_v30  ;;  %v4181_v44 = vadd.f32 1e-08, %v4149_v13  ;;  %v3754_v59 = vadd.f32 1e-08, %v3722_v60  ;;  %v6806_v25 = vpop.eup %6805  ;;  %v3694_v19 = vmax.f32 %v10420_v47, 0.0  ;;  %v10542_v52 = vadd.f32 %v1162_v34, %v14147_v14 }
 0x39e   : > { %14172 = vst [vmem:[#allocation97_spill] sm:$0xff] %v10534_v22  ;;  %v3771_v37 = vmul.f32 0.6931472, %v6804_v36  ;;  %v3756_v43 = vadd.f32 1e-08, %v3724_v4  ;;  %v10545_v20 = vadd.f32 %v14173_v24, %v1787_v26  ;;  %6813 = vpow2.f32 %v2346_v40  ;;  %v7466_v36 = vld [vmem:[#allocation11 + $0x2c0] sm:$0xff] }
 0x39f   : > { %v6808_v5 = vpop.eup %6807  ;;  %v10548_v39 = vadd.f32 %v1206_v15, %v14175_v56  ;;  %v1454_v41 = vrot.slane %v10528_v38, 7  ;;  %v10552_v60 = vadd.f32 %v3572_v42, %v10289_v18  ;;  %v3285_v3 = vmax.f32 %v10363_v62, 0.0 }
 0x3a0   : > { %14174 = vst [vmem:[#allocation106_spill] sm:$0xff] %v10545_v20  ;;  %v6810_v1 = vpop.eup %6809  ;;  %v10556_v6 = vadd.f32 %v14176_v11, %v1866_v32  ;;  %v1456_v14 = vrot.slane %v10542_v52, 7  ;;  %v10559_v26 = vadd.f32 1e-08, %v3572_v42  ;;  %v10563_v40 = vsel %vm3637_vm11, %v3771_v37, %v4181_v44  ;;  %v7467_v11 = vld [vmem:[#allocation11 + $0x70] sm:$0xff] }
 0x3a1   : > { %v6812_v55 = vpop.eup %6811  ;;  %6815 = vlog2.f32 %v3754_v59  ;;  %v1452_v17 = vrot.slane %v10402_v12, 7  ;;  %v3726_v13 = vadd.f32 0.5, %v3694_v19  ;;  %v4042_v18 = vadd.f32 1.0, %v6808_v5 }
 0x3a2   : > { %14177 = vst [vmem:[#allocation94_spill] sm:$0xff] %v10559_v26  ;;  %6817 = vlog2.f32 %v3756_v43  ;;  %v2003_v61 = vmul.f32 %v7466_v36, %v10459_v16  ;;  %v13552_v4 = vrot.slane %v10548_v39, 1  ;;  %v14179_v34 = vrot.slane %v14178_v28, 7 }
 0x3a3   : > { %v10570_v8 = vsel %vm1476_vm1, %v1452_v17, %v1454_v41  ;;  %v10580_v42 = vsel %vm1476_vm1, %v1454_v41, %v1456_v14  ;;  %v3483_v32 = vmul.f32 0.6931472, %v6806_v25  ;;  %v4044_v15 = vadd.f32 1.0, %v6810_v1  ;;  %v14181_v25 = vld [vmem:[#allocation32_spill] sm:$0xff] }
 0x3a4   : > { %v10576_v27 = vsel %vm1476_vm1, %v1456_v14, %v14179_v34  ;;  %v4046_v44 = vadd.f32 1.0, %v6812_v55  ;;  %v1541_v59 = vmul.f32 %v10307_v33, %v10580_v42  ;;  %v6814_v37 = vpop.eup %6813  ;;  %v14180_v19 = vrot.slane %v9658_v58, 7 }
 0x3a5   : > { %v1682_v5 = vrot.slane %v10528_v38, 1  ;;  %v1543_v24 = vmul.f32 %v10309_v57, %v10576_v27  ;;  %v1684_v41 = vrot.slane %v10542_v52, 1  ;;  %v2035_v1 = vadd.f32 %v2003_v61, %v14181_v25 }
 0x3a6   : > { %v10588_v43 = vsel %vm1476_vm1, %v14180_v19, %v1452_v17  ;;  %v1539_v14 = vmul.f32 %v7467_v11, %v10570_v8  ;;  %v1573_v33 = vadd.f32 %v1541_v59, %v14092_v7  ;;  %v1622_v58 = vmul.f32 %v10334_v9, %v10542_v52  ;;  %v14182_v17 = vld [vmem:[#allocation118_spill] sm:$0xff] }
 0x3a7   : > { %v10599_v55 = vpop.eup %6815  ;;  %6819 = vlog2.f32 %v4042_v18  ;;  %v14183_v36 = vrot.slane %v14182_v17, 1  ;;  %v1575_v61 = vadd.f32 %v1543_v24, %v14092_v7  ;;  %v14185_v34 = vrot.slane %v14178_v28, 1  ;;  %v7468_v18 = vld [vmem:[#allocation11 + $0x340] sm:$0xff] }
 0x3a8   : > { %v10616_v9 = vpop.eup %6817  ;;  %6821 = vlog2.f32 %v4044_v15  ;;  %v2084_v19 = vmul.f32 %v7468_v18, %v10588_v43  ;;  %v2404_v25 = vadd.f32 1.0, %v6814_v37  ;;  %v1654_v11 = vadd.f32 %v1622_v58, %v1573_v33  ;;  %v14187_v24 = vld [vmem:[#allocation28_spill] sm:$0xff]  ;;  %v7469_v18 = vld [vmem:[#allocation11 + $0x438] sm:$0xff] }
 0x3a9   : > { %v10607_v57 = vsel %vm1702_vm2, %v14183_v36, %v13552_v4  ;;  %v10614_v59 = vsel %vm1702_vm2, %v1684_v41, %v14185_v34  ;;  %v14186_v30 = vrot.slane %v10402_v12, 1  ;;  %v1656_v28 = vadd.f32 %v14187_v24, %v1575_v61  ;;  %v7471_v24 = vld [vmem:[#allocation11 + $0xf0] sm:$0xff] }
 0x3aa   : > { %14184 = vst [vmem:[#allocation108_spill] sm:$0xff] %v10607_v57  ;;  %v10628_v34 = vsel %vm1702_vm2, %v1682_v5, %v1684_v41  ;;  %v1768_v15 = vmul.f32 %v10366_v31, %v10614_v59  ;;  %v3541_v4 = vadd.f32 %v3483_v32, %v3285_v3  ;;  %v2116_v22 = vadd.f32 %v2084_v19, %v2035_v1  ;;  %v7472_v3 = vld [vmem:[#allocation11 + $0x440] sm:$0xff]  ;;  %v7473_v1 = vld [vmem:[#allocation11 + $0x170] sm:$0xff] }
 0x3ab   : > { %v10623_v36 = vsel %vm1702_vm2, %v14186_v30, %v1682_v5  ;;  %v2245_v37 = vmul.f32 %v7469_v18, %v10607_v57  ;;  %v1571_v33 = vadd.f32 %v1539_v14, %v14092_v7  ;;  %6823 = vlog2.f32 %v4046_v44  ;;  %v14188_v30 = vld [vmem:[#allocation43_spill] sm:$0xff] }
 0x3ac   : > { %v1800_v58 = vadd.f32 %v1768_v15, %v1654_v11  ;;  %v10635_v20 = vadd.f32 %v14188_v30, %v1656_v28  ;;  %v1849_v61 = vmul.f32 %v10336_v0, %v10576_v27  ;;  %v7470_v5 = vld [vmem:[#allocation11 + $0x3c0] sm:$0xff]  ;;  %v1620_v31 = vmul.f32 %v7471_v24, %v10528_v38  ;;  %v1209_v24 = vpop.f32.mrf.mxu1 }
 0x3ad   : > { %v2165_v41 = vmul.f32 %v7470_v5, %v10402_v12  ;;  %v2246_v32 = vmul.f32 %v7472_v3, %v10623_v36  ;;  %v1766_v14 = vmul.f32 %v7473_v1, %v10628_v34  ;;  %v6820_v44 = vpop.eup %6819  ;;  %v10645_v19 = vadd.f32 %v10538_v23, %v10552_v60 }
 0x3ae   : > { %14189 = vst [vmem:[#allocation35_spill] sm:$0xff] %v10635_v20  ;;  %6825 = vrcp.f32 %v2404_v25  ;;  %v1881_v0 = vadd.f32 %v1849_v61, %v1800_v58  ;;  %v6822_v28 = vpop.eup %6821  ;;  %v3758_v15 = vadd.f32 1e-08, %v3726_v13  ;;  %v10649_v30 = vadd.f32 %v2245_v37, %v10347_v45  ;;  %v14194_v25 = vld [vmem:[#allocation40_spill] sm:$0xff]  ;;  %v14196_v13 = vld [vmem:[#allocation29_spill] sm:$0xff] }
 0x3af   : > { %14190 = vst [vmem:[#allocation36_spill] sm:$0xff] %v10645_v19  ;;  %v2197_v18 = vadd.f32 %v2165_v41, %v2116_v22  ;;  %v1652_v5 = vadd.f32 %v1620_v31, %v1571_v33  ;;  %v3573_v3 = vsub.f32 0.0, %v3541_v4  ;;  %v14191_v1 = vsub.f32 0.0, %v10408_v10  ;;  %v7477_v19 = vld [vmem:[#allocation11 + $0x270] sm:$0xff] }
 0x3b0   : > { %v14192_v50 = vsub.f32 0.0, %v10414_v35  ;;  %v14193_v60 = vsub.f32 0.0, %v10420_v47  ;;  %v10659_v58 = vadd.f32 %v14194_v25, %v10556_v6  ;;  %v1962_v37 = vadd.f32 %v14196_v13, %v1881_v0 }
 0x3b1   : > { %v3882_v20 = vmax.f32 %v14191_v1, 0.0  ;;  %v10661_v22 = vadd.f32 %v2246_v32, %v2197_v18  ;;  %v1798_v45 = vadd.f32 %v1766_v14, %v1652_v5  ;;  %v6824_v33 = vpop.eup %6823  ;;  %v4101_v4 = vmul.f32 0.6931472, %v6820_v44 }
 0x3b2   : > { %v3884_v23 = vmax.f32 %v14192_v50, 0.0  ;;  %v3886_v11 = vmax.f32 %v14193_v60, 0.0  ;;  %14195 = vst [vmem:[#allocation25_spill] sm:$0xff] %v10659_v58  ;;  %v4105_v61 = vmul.f32 0.6931472, %v6822_v28  ;;  %v13553_v41 = vrot.slane %v10548_v39, 7 }
 0x3b3   : > { %v10666_v31 = vadd.f32 %v1209_v24, %v14175_v56  ;;  %6827 = vlog2.f32 %v3758_v15  ;;  %v7474_v50 = vld [vmem:[#allocation11 + $0x2c8] sm:$0xff]  ;;  %v2309_v6 = vsub.f32 0.0, %v10649_v30  ;;  %v7475_v60 = vld [vmem:[#allocation11 + $0x1f0] sm:$0xff]  ;;  %v3605_v0 = vadd.f32 %v3573_v3, %v10363_v62  ;;  %v7476_v28 = vld [vmem:[#allocation11 + $0x60] sm:$0xff] }
 0x3b4   : > { %v2004_v1 = vmul.f32 %v7474_v50, %v10607_v57  ;;  %v1847_v32 = vmul.f32 %v7475_v60, %v10580_v42  ;;  %v6826_v14 = vpop.eup %6825  ;;  %v10672_v18 = vadd.f32 1e-08, %v3573_v3  ;;  %v10675_v44 = vmul.f32 0.6931472, %v10599_v55  ;;  %v7480_v3 = vld [vmem:[#allocation11 + $0x348] sm:$0xff]  ;;  %v7486_v57 = vld [vmem:[#allocation11 + $0x370] sm:$0xff] }
 0x3b5   : > { %v1537_v5 = vmul.f32 %v7476_v28, %v10588_v43  ;;  %v10679_v15 = vmul.f32 0.6931472, %v10616_v9  ;;  %v4109_v24 = vmul.f32 0.6931472, %v6824_v33  ;;  %v2310_v25 = vsub.f32 0.0, %v10661_v22 }
 0x3b6   : > { %14197 = vst [vmem:[#allocation107_spill] sm:$0xff] %v10672_v18  ;;  %v1879_v13 = vadd.f32 %v1847_v32, %v1798_v45  ;;  %v4138_v50 = vadd.f32 %v4101_v4, %v3882_v20  ;;  %v4140_v60 = vadd.f32 %v4105_v61, %v3884_v23  ;;  %v14198_v62 = vrot.slane %v14182_v17, 7  ;;  %v14200_v23 = vld [vmem:[#allocation124_spill] sm:$0xff] }
 0x3b7   : > { %v10692_v28 = vmul.f32 %v6826_v14, %v10509_v51  ;;  %v2036_v9 = vadd.f32 %v2004_v1, %v10343_v48  ;;  %v2348_v33 = vmul.f32 1.442695, %v2309_v6  ;;  %v1928_v20 = vmul.f32 %v7477_v19, %v10542_v52  ;;  %v7478_v61 = vld [vmem:[#allocation11 + $0xe0] sm:$0xff] }
 0x3b8   : > { %v10688_v55 = vsel %vm1476_vm1, %v14198_v62, %v13553_v41  ;;  %v14201_v45 = vsub.f32 0.0, %v14200_v23  ;;  %v1569_v17 = vadd.f32 %v1537_v5, %v14092_v7  ;;  %v1618_v32 = vmul.f32 %v7478_v61, %v10402_v12  ;;  %v7479_v62 = vld [vmem:[#allocation11 + $0x150] sm:$0xff] }
 0x3b9   : > { %14199 = vst [vmem:[#allocation26_spill] sm:$0xff] %v10692_v28  ;;  %v1762_v41 = vmul.f32 %v7479_v62, %v10459_v16  ;;  %v6828_v51 = vpop.eup %6827  ;;  %v4142_v14 = vadd.f32 %v4109_v24, %v3886_v11  ;;  %v2085_v48 = vmul.f32 %v7480_v3, %v10688_v55  ;;  %v2350_v1 = vmul.f32 1.442695, %v2310_v25  ;;  %v14205_v16 = vld [vmem:[#allocation45_spill] sm:$0xff]  ;;  %v14207_v11 = vld [vmem:[#allocation102_spill] sm:$0xff] }
 0x3ba   : > { %v10698_v4 = vadd.f32 1e-08, %v14201_v45  ;;  %v1960_v6 = vadd.f32 %v1928_v20, %v1879_v13  ;;  %vm3658_vm12 = vcmp.ge.f32.partialorder %v10408_v10, 0.0  ;;  %v4170_v19 = vsub.f32 0.0, %v4138_v50  ;;  %v7481_v13 = vld [vmem:[#allocation11 + $0x2f0] sm:$0xff] }
 0x3bb   : > { %v4172_v23 = vsub.f32 0.0, %v4140_v60  ;;  %v14203_v45 = vrot.slane %v10666_v31, 1  ;;  %v14204_v7 = vrot.slane %v10548_v39, 1  ;;  %v10714_v61 = vadd.f32 %v14205_v16, %v1962_v37  ;;  %v14208_v3 = vld [vmem:[#allocation81_spill] sm:$0xff]  ;;  %v7482_v37 = vld [vmem:[#allocation11 + $0x160] sm:$0xff] }
 0x3bc   : > { %14202 = vst [vmem:[#allocation32_spill] sm:$0xff] %v10698_v4  ;;  %vm3660_vm13 = vcmp.ge.f32.partialorder %v10414_v35, 0.0  ;;  %v10719_v24 = vmul.f32 %v14207_v11, %v10692_v28  ;;  %v2117_v25 = vadd.f32 %v2085_v48, %v2036_v9  ;;  %6829 = vpow2.f32 %v2348_v33  ;;  %v14209_v62 = vld [vmem:[#allocation105_spill] sm:$0xff] }
 0x3bd   : > { %v10711_v5 = vsel %vm1702_vm2, %v14204_v7, %v14203_v45  ;;  %14206 = vst [vmem:[#allocation118_spill] sm:$0xff] %v10714_v61  ;;  %v2009_v50 = vmul.f32 %v7481_v13, %v10614_v59  ;;  %v1794_v20 = vadd.f32 %v1762_v41, %v14208_v3  ;;  %v10726_v45 = vmul.f32 %v14209_v62, %v10692_v28  ;;  %v7483_v16 = vld [vmem:[#allocation11 + $0x3c8] sm:$0xff]  ;;  %v7485_v3 = vld [vmem:[#allocation11 + $0x1d0] sm:$0xff] }
 0x3be   : > { %v1764_v7 = vmul.f32 %v7482_v37, %v10623_v36  ;;  %v2166_v61 = vmul.f32 %v7483_v16, %v10548_v39  ;;  %6831 = vpow2.f32 %v2350_v1  ;;  %v7484_v9 = vld [vmem:[#allocation11 + $0x448] sm:$0xff]  ;;  %v10732_v13 = vadd.f32 %v10563_v40, %v3605_v0 }
 0x3bf   : > { %v2247_v33 = vmul.f32 %v7484_v9, %v10711_v5  ;;  %v2041_v48 = vadd.f32 %v2009_v50, %v1960_v6  ;;  %v4174_v60 = vsub.f32 0.0, %v4142_v14  ;;  %v1650_v41 = vadd.f32 %v1618_v32, %v1569_v17  ;;  %v14212_v50 = vld [vmem:[#allocation127_spill] sm:$0xff]  ;;  %v7487_v9 = vld [vmem:[#allocation11 + $0x250] sm:$0xff] }
 0x3c0   : > { %14210 = vst [vmem:[#allocation28_spill] sm:$0xff] %v10732_v13  ;;  %v1843_v58 = vmul.f32 %v7485_v3, %v10588_v43  ;;  %v4202_v26 = vadd.f32 1e-08, %v4170_v19  ;;  %v13560_v28 = vsub.f32 0.0, %v10719_v24  ;;  %v2198_v37 = vadd.f32 %v2166_v61, %v2117_v25  ;;  %v14214_v25 = vld [vmem:[#allocation47_spill] sm:$0xff]  ;;  %v7491_v14 = vld [vmem:[#allocation11 + $0x2d0] sm:$0xff] }
 0x3c1   : > { %v2090_v16 = vmul.f32 %v7486_v57, %v10576_v27  ;;  %vm3662_vm14 = vcmp.ge.f32.partialorder %v10420_v47, 0.0  ;;  %v4204_v1 = vadd.f32 1e-08, %v4172_v23  ;;  %v14211_v6 = vrot.slane %v10698_v4, 7 }
 0x3c2   : > { %v14213_v40 = vrot.slane %v14212_v50, 7  ;;  %v13559_v17 = vsub.f32 0.0, %v10726_v45  ;;  %v1796_v43 = vadd.f32 %v1764_v7, %v1650_v41  ;;  %v6830_v32 = vpop.eup %6829  ;;  %v1875_v19 = vadd.f32 %v1843_v58, %v1794_v20  ;;  %v7488_v50 = vld [vmem:[#allocation11 + $0x1e0] sm:$0xff] }
 0x3c3   : > { %v10746_v61 = vadd.f32 %v2247_v33, %v2198_v37  ;;  %v2122_v27 = vadd.f32 %v2090_v16, %v2041_v48  ;;  %v3821_v57 = vmul.f32 0.6931472, %v6828_v51  ;;  %v10750_v23 = vmul.f32 %v14107_v63, %v14214_v25 }
 0x3c4   : > { %v4367_v0 = vsel %vm1476_vm1, %v14213_v40, %v14211_v6  ;;  %v1924_v3 = vmul.f32 %v7487_v9, %v10402_v12  ;;  %v1845_v6 = vmul.f32 %v7488_v50, %v10570_v8  ;;  %v6832_v40 = vpop.eup %6831  ;;  %v4206_v7 = vadd.f32 1e-08, %v4174_v60  ;;  %v14217_v60 = vld [vmem:[#allocation122_spill] sm:$0xff]  ;;  %v7489_v50 = vld [vmem:[#allocation11 + $0x260] sm:$0xff] }
 0x3c5   : > { %14215 = vst [vmem:[#allocation43_spill] sm:$0xff] %v10750_v23  ;;  %v4234_v58 = vsel %vm3658_vm12, %v10675_v44, %v4202_v26  ;;  %v10758_v20 = vadd.f32 %v4367_v0, %v10698_v4  ;;  %v2678_v51 = vand.u32 2147483647, %v13560_v28  ;;  %v4236_v33 = vsel %vm3660_vm13, %v10679_v15, %v4204_v1  ;;  %v14219_v44 = vld [vmem:[#allocation95_spill] sm:$0xff]  ;;  %v1211_v0 = vpop.f32.mrf.mxu1 }
 0x3c6   : > { %v2998_v12 = vand.u32 2147483647, %v13559_v17  ;;  %v2405_v48 = vadd.f32 1.0, %v6830_v32  ;;  %v1877_v41 = vadd.f32 %v1845_v6, %v1796_v43  ;;  %v10769_v37 = vmul.f32 %v14107_v63, %v14217_v60  ;;  %v7490_v1 = vld [vmem:[#allocation11 + $0x2e0] sm:$0xff] }
 0x3c7   : > { %14216 = vst [vmem:[#allocation40_spill] sm:$0xff] %v10758_v20  ;;  %v1956_v10 = vadd.f32 %v1924_v3, %v1875_v19  ;;  %v2311_v26 = vsub.f32 0.0, %v10746_v61  ;;  %v2203_v16 = vadd.f32 %v14219_v44, %v2122_v27  ;;  %v3691_v9 = vmax.f32 %v10750_v23, 0.0  ;;  %v14220_v3 = vld [vmem:[#allocation98_spill] sm:$0xff] }
 0x3c8   : > { %14218 = vst [vmem:[#allocation29_spill] sm:$0xff] %v10769_v37  ;;  %v1926_v35 = vmul.f32 %v7489_v50, %v10528_v38  ;;  %v2406_v15 = vadd.f32 1.0, %v6832_v40  ;;  %v2007_v32 = vmul.f32 %v7490_v1, %v10628_v34  ;;  %v2710_v6 = vsub.f32 0.0, %v2678_v51  ;;  %v14221_v50 = vld [vmem:[#allocation125_spill] sm:$0xff]  ;;  %v14223_v51 = vld [vmem:[#allocation123_spill] sm:$0xff] }
 0x3c9   : > { %v2005_v19 = vmul.f32 %v7491_v14, %v10623_v36  ;;  %v10779_v17 = vadd.f32 %v14220_v3, %v2203_v16  ;;  %v3030_v27 = vsub.f32 0.0, %v2998_v12  ;;  %6833 = vrcp.f32 %v2405_v48  ;;  %v14225_v14 = vld [vmem:[#allocation126_spill] sm:$0xff] }
 0x3ca   : > { %v1958_v44 = vadd.f32 %v1926_v35, %v1877_v41  ;;  %v10782_v28 = vadd.f32 %v1211_v0, %v14175_v56  ;;  %v10786_v40 = vsel %vm3662_vm14, %v3821_v57, %v4206_v7  ;;  %v10789_v1 = vadd.f32 %v4234_v58, %v14221_v50  ;;  %v14228_v58 = vld [vmem:[#allocation132_spill] sm:$0xff] }
 0x3cb   : > { %v10793_v43 = vmul.f32 %v14107_v63, %v14223_v51  ;;  %v2352_v36 = vmul.f32 1.442695, %v2311_v26  ;;  %v10796_v16 = vadd.f32 %v4236_v33, %v14225_v14  ;;  %v3723_v12 = vadd.f32 0.5, %v3691_v9  ;;  %v7492_v9 = vld [vmem:[#allocation11 + $0x360] sm:$0xff] }
 0x3cc   : > { %14222 = vst [vmem:[#allocation124_spill] sm:$0xff] %v10789_v1  ;;  %6835 = vrcp.f32 %v2406_v15  ;;  %v2039_v48 = vadd.f32 %v2007_v32, %v1958_v44  ;;  %v13562_v56 = vsub.f32 0.0, %v10750_v23  ;;  %v2748_v41 = vmul.f32 1.442695, %v2710_v6  ;;  %v7493_v6 = vld [vmem:[#allocation11 + $0x350] sm:$0xff] }
 0x3cd   : > { %14224 = vst [vmem:[#allocation45_spill] sm:$0xff] %v10793_v43  ;;  %v2037_v47 = vadd.f32 %v2005_v19, %v1956_v10  ;;  %v1457_v57 = vrot.slane %v10782_v28, 7  ;;  %v14227_v7 = vrot.slane %v10758_v20, 6  ;;  %v14229_v0 = vrot.slane %v14228_v58, 6 }
 0x3ce   : > { %14226 = vst [vmem:[#allocation81_spill] sm:$0xff] %v10796_v16  ;;  %v13561_v33 = vsub.f32 0.0, %v10769_v37  ;;  %v3068_v26 = vmul.f32 1.442695, %v3030_v27  ;;  %v2088_v15 = vmul.f32 %v7492_v9, %v10580_v42  ;;  %v2086_v10 = vmul.f32 %v7493_v6, %v10570_v8 }
 0x3cf   : > { %v10806_v35 = vsel %vm4511_vm7, %v14229_v0, %v14227_v7  ;;  %v13565_v19 = vrot.slane %v10666_v31, 7  ;;  %6837 = vpow2.f32 %v2352_v36  ;;  %v6834_v3 = vpop.eup %6833  ;;  %v3755_v44 = vadd.f32 1e-08, %v3723_v12  ;;  %v14231_v7 = vld [vmem:[#allocation27_spill] sm:$0xff] }
 0x3d0   : > { %14230 = vst [vmem:[#allocation127_spill] sm:$0xff] %v10806_v35  ;;  %v13563_v50 = vsub.f32 0.0, %v10793_v43  ;;  %v2120_v14 = vadd.f32 %v2088_v15, %v2039_v48  ;;  %v14232_v58 = vrot.slane %v14231_v7, 7  ;;  %v3915_v42 = vand.u32 2147483647, %v13562_v56  ;;  %v7494_v48 = vld [vmem:[#allocation11 + $0x3e0] sm:$0xff] }
 0x3d1   : > { %6839 = vpow2.f32 %v2748_v41  ;;  %v2118_v0 = vadd.f32 %v2086_v10, %v2037_v47  ;;  %v10826_v8 = vsel %vm1476_vm1, %v13565_v19, %v1457_v57  ;;  %v3917_v12 = vand.u32 2147483647, %v13561_v33  ;;  %v1250_v47 = vld [vmem:[%s14234_s22] sm:$0x3]  ;;  %v7496_v10 = vld [vmem:[#allocation11 + $0x450] sm:$0xff]  ;;  %s7831_s22 = scalar_lea.hbm %s14753_s26, 256 }
 0x3d2   : > { %v10818_v27 = vsel %vm1476_vm1, %v1457_v57, %v14232_v58  ;;  %v6836_v36 = vpop.eup %6835  ;;  %6841 = vpow2.f32 %v3068_v26  ;;  %v2169_v9 = vmul.f32 %v7494_v48, %v10542_v52  ;;  %v1542_v15 = vmul.f32 %v10434_v53, %v10826_v8  ;;  %v7495_v57 = vld [vmem:[#allocation11 + $0x3d0] sm:$0xff]  ;;  %p7833_p7 = scmp.lt.s32.totalorder %s7831_s22, %s7827_s11 }
 0x3d3   : > { %v10834_v41 = vmul.f32 %v6834_v3, %v10649_v30  ;;  %v2167_v6 = vmul.f32 %v7495_v57, %v10528_v38  ;;  %v2248_v58 = vmul.f32 %v7496_v10, %v10628_v34  ;;  %v1544_v26 = vmul.f32 %v10439_v49, %v10818_v27  ;;  %v7497_v57 = vld [vmem:[#allocation11 + $0x460] sm:$0xff] }
 0x3d4   : > { %v2201_v52 = vadd.f32 %v2169_v9, %v2120_v14  ;;  %v1574_v48 = vadd.f32 %v1542_v15, %v14109_v21  ;;  %v1623_v53 = vmul.f32 %v10478_v54, %v10782_v28  ;;  %v13564_v30 = vrot.slane %v10782_v28, 1  ;;  %p7834_p8 = por %p7833_p7, %p7832_p12 }
 0x3d5   : > { %14233 = vst [vmem:[#allocation95_spill] sm:$0xff] %v10834_v41  ;;  %v6838_v3 = vpop.eup %6837  ;;  %v3947_v33 = vsub.f32 0.0, %v3915_v42  ;;  %v2199_v56 = vadd.f32 %v2167_v6, %v2118_v0  ;;  %v10848_v32 = vmul.f32 %v6836_v36, %v10661_v22  ;;  %v1576_v38 = vadd.f32 %v1544_v26, %v14109_v21  ;;  %v14238_v22 = vld [vmem:[#allocation115_spill] sm:$0xff]  ;;  %v1345_v36 = vpop.f32.mrf.mxu2  ;;  %v14239_v6 = vld [vmem:[#allocation30_spill] sm:$0xff] }
 0x3d6   : > { %v10851_v34 = vperm.slane %v1250_v47, 0  ;;  %v2250_v49 = vmul.f32 %v7497_v57, %v10614_v59  ;;  %v1655_v14 = vadd.f32 %v1623_v53, %v1574_v48  ;;  %v14237_v9 = vrot.slane %v14231_v7, 1  ;;  %v14240_v26 = vld [vmem:[#allocation119_spill] sm:$0xff]  ;;  %p7835_p9 = pnand %p7834_p8, %p7830_p4 }
 0x3d7   : > { %14235 = vst [vmem:[#allocation98_spill] sm:$0xff] %v10848_v32  ;;  %v6840_v42 = vpop.eup %6839  ;;  %6843 = vlog2.f32 %v3755_v44  ;;  %v10864_v0 = vmul.f32 %v14238_v22, %v10834_v41  ;;  %v10866_v15 = vadd.f32 %v2248_v58, %v2199_v56  ;;  %v1657_v59 = vadd.f32 %v14239_v6, %v1576_v38  ;;  %v14241_v58 = vld [vmem:[#allocation49_spill] sm:$0xff] }
 0x3d8   : > { %14236 = vst [vmem:[#allocation125_spill] sm:$0xff] %v10851_v34  ;;  %v10860_v54 = vsel %vm1702_vm2, %v13564_v30, %v14237_v9  ;;  %v6842_v10 = vpop.eup %6841  ;;  %v3919_v7 = vand.u32 2147483647, %v13563_v50  ;;  %v10873_v48 = vmul.f32 %v14240_v26, %v10834_v41  ;;  %v2407_v53 = vadd.f32 1.0, %v6838_v3 }
 0x3d9   : > { %v10875_v57 = vadd.f32 %v2250_v49, %v2201_v52  ;;  %v3949_v44 = vsub.f32 0.0, %v3917_v12  ;;  %v10879_v9 = vmul.f32 %v14207_v11, %v10848_v32  ;;  %v1769_v56 = vmul.f32 %v10506_v29, %v10860_v54 }
 0x3da   : > { %v10884_v38 = vadd.f32 %v14241_v58, %v1657_v59  ;;  %v4006_v6 = vmul.f32 1.442695, %v3947_v33  ;;  %v10887_v50 = vadd.f32 %v1345_v36, %v10851_v34  ;;  %v10891_v3 = vmul.f32 %v14209_v62, %v10848_v32 }
 0x3db   : > { %v2316_v12 = vsub.f32 0.0, %v10779_v17  ;;  %v2312_v49 = vsub.f32 0.0, %v10866_v15  ;;  %v1801_v30 = vadd.f32 %v1769_v56, %v1655_v14  ;;  %v1850_v29 = vmul.f32 %v10518_v46, %v10818_v27 }
 0x3dc   : > { %14242 = vst [vmem:[#allocation126_spill] sm:$0xff] %v10884_v38  ;;  %v2806_v59 = vadd.f32 1.0, %v6840_v42  ;;  %6845 = vrcp.f32 %v2407_v53  ;;  %v2314_v36 = vsub.f32 0.0, %v10875_v57  ;;  %v3951_v19 = vsub.f32 0.0, %v3919_v7 }
 0x3dd   : > { %14243 = vst [vmem:[#allocation132_spill] sm:$0xff] %v10887_v50  ;;  %v10900_v58 = vpop.eup %6843  ;;  %v3126_v51 = vadd.f32 1.0, %v6842_v10  ;;  %v1882_v25 = vadd.f32 %v1850_v29, %v1801_v30  ;;  %v4010_v52 = vmul.f32 1.442695, %v3949_v44  ;;  %v10903_v16 = vperm.slane %v1250_v47, 1  ;;  %v14248_v30 = vld [vmem:[#allocation31_spill] sm:$0xff] }
 0x3de   : > { %14244 = vst [vmem:[#allocation27_spill] sm:$0xff] %v10900_v58  ;;  %v2362_v56 = vmul.f32 1.442695, %v2316_v12  ;;  %6847 = vpow2.f32 %v4006_v6  ;;  %v14246_v46 = vsub.f32 0.0, %v10864_v0  ;;  %v5403_v53 = vsub.f32 0.0, %v10887_v50  ;;  %v1394_v58 = vpop.f32.mrf.mxu3  ;;  %v7498_v29 = vld [vmem:[#allocation11 + $0x68] sm:$0xff] }
 0x3df   : > { %14245 = vst [vmem:[#allocation30_spill] sm:$0xff] %v10903_v16  ;;  %v2354_v33 = vmul.f32 1.442695, %v2312_v49  ;;  %6849 = vlog2.f32 %v2806_v59  ;;  %v14247_v7 = vsub.f32 0.0, %v10873_v48  ;;  %v2358_v60 = vmul.f32 1.442695, %v2314_v36 }
 0x3e0   : > { %v2679_v42 = vand.u32 2147483647, %v14246_v46  ;;  %v1963_v44 = vadd.f32 %v14248_v30, %v1882_v25  ;;  %v4014_v47 = vmul.f32 1.442695, %v3951_v19  ;;  %6851 = vlog2.f32 %v3126_v51  ;;  %v14253_v25 = vld [vmem:[#allocation51_spill] sm:$0xff]  ;;  %v14255_v30 = vld [vmem:[#allocation108_spill] sm:$0xff] }
 0x3e1   : > { %v2999_v10 = vand.u32 2147483647, %v14247_v7  ;;  %v1538_v12 = vmul.f32 %v7498_v29, %v10688_v55  ;;  %v14249_v6 = vsub.f32 0.0, %v10879_v9  ;;  %v14250_v1 = vsub.f32 0.0, %v10891_v3  ;;  %v7499_v19 = vld [vmem:[#allocation11 + $0x158] sm:$0xff] }
 0x3e2   : > { %v6846_v46 = vpop.eup %6845  ;;  %v14251_v59 = vrot.slane %v10666_v31, 7  ;;  %v14252_v7 = vrot.slane %v10548_v39, 7  ;;  %6853 = vpow2.f32 %v2362_v56  ;;  %v10926_v51 = vadd.f32 %v14253_v25, %v1963_v44  ;;  %v7500_v56 = vld [vmem:[#allocation11 + $0x78] sm:$0xff] }
 0x3e3   : > { %v2680_v14 = vand.u32 2147483647, %v14249_v6  ;;  %v3000_v49 = vand.u32 2147483647, %v14250_v1  ;;  %v1763_v29 = vmul.f32 %v7499_v19, %v14255_v30  ;;  %v2711_v6 = vsub.f32 0.0, %v2679_v42  ;;  %v7501_v42 = vld [vmem:[#allocation11 + $0xe8] sm:$0xff] }
 0x3e4   : > { %v10923_v36 = vsel %vm1476_vm1, %v14252_v7, %v14251_v59  ;;  %14254 = vst [vmem:[#allocation49_spill] sm:$0xff] %v10926_v51  ;;  %v10930_v50 = vadd.f32 %v1394_v58, %v10903_v16  ;;  %6855 = vpow2.f32 %v2354_v33  ;;  %v3031_v23 = vsub.f32 0.0, %v2999_v10  ;;  %v6848_v38 = vpop.eup %6847  ;;  %v7502_v33 = vld [vmem:[#allocation11 + $0x1d8] sm:$0xff] }
 0x3e5   : > { %v5435_v13 = vmul.f32 1.442695, %v5403_v53  ;;  %6857 = vpow2.f32 %v2358_v60  ;;  %v2712_v59 = vsub.f32 0.0, %v2680_v14  ;;  %v1540_v44 = vmul.f32 %v7500_v56, %v10923_v36  ;;  %v6850_v25 = vpop.eup %6849  ;;  %v14258_v14 = vld [vmem:[#allocation33_spill] sm:$0xff]  ;;  %v14259_v56 = vld [vmem:[#allocation26_spill] sm:$0xff] }
 0x3e6   : > { %14256 = vst [vmem:[#allocation31_spill] sm:$0xff] %v10930_v50  ;;  %6859 = vpow2.f32 %v4010_v52  ;;  %v10935_v7 = vmul.f32 %v6846_v46, %v10746_v61  ;;  %v10938_v58 = vmul.f32 %v7501_v42, %v10548_v39  ;;  %v1844_v10 = vmul.f32 %v7502_v33, %v10688_v55  ;;  %v6852_v60 = vpop.eup %6851 }
 0x3e7   : > { %6861 = vpow2.f32 %v4014_v47  ;;  %v3032_v53 = vsub.f32 0.0, %v3000_v49  ;;  %v10942_v52 = vadd.f32 %v1538_v12, %v14109_v21  ;;  %v1795_v19 = vadd.f32 %v1763_v29, %v14258_v14  ;;  %v14260_v47 = vld [vmem:[#allocation62_spill] sm:$0xff] }
 0x3e8   : > { %14257 = vst [vmem:[#allocation51_spill] sm:$0xff] %v10935_v7  ;;  %v2750_v30 = vmul.f32 1.442695, %v2711_v6  ;;  %v5404_v61 = vsub.f32 0.0, %v10930_v50  ;;  %v6854_v46 = vpop.eup %6853  ;;  %v10948_v1 = vmul.f32 %v14260_v47, %v14259_v56  ;;  %v3070_v42 = vmul.f32 1.442695, %v3031_v23 }
 0x3e9   : > { %6863 = vpow2.f32 %v5435_v13  ;;  %v14261_v51 = vrot.slane %v10782_v28, 1  ;;  %v14262_v55 = vrot.slane %v10666_v31, 1  ;;  %v14263_v29 = vsub.f32 0.0, %v10719_v24 }
 0x3ea   : > { %v6856_v49 = vpop.eup %6855  ;;  %v2752_v33 = vmul.f32 1.442695, %v2712_v59  ;;  %v1572_v14 = vadd.f32 %v1540_v44, %v14109_v21  ;;  %v10963_v56 = vmul.f32 %v14238_v22, %v10935_v7  ;;  %v2845_v23 = vmul.f32 0.6931472, %v6850_v25 }
 0x3eb   : > { %v10956_v12 = vsel %vm1702_vm2, %v14262_v55, %v14261_v51  ;;  %v2646_v6 = vmax.f32 %v14263_v29, 0.0  ;;  %v6858_v13 = vpop.eup %6857  ;;  %v3165_v50 = vmul.f32 0.6931472, %v6852_v60  ;;  %v3072_v4 = vmul.f32 1.442695, %v3032_v53  ;;  %v7503_v55 = vld [vmem:[#allocation11 + $0xf8] sm:$0xff] }
 0x3ec   : > { %v10967_v18 = vmul.f32 %v14240_v26, %v10935_v7  ;;  %v6860_v51 = vpop.eup %6859  ;;  %6865 = vpow2.f32 %v2750_v30  ;;  %v1621_v24 = vmul.f32 %v7503_v55, %v10666_v31  ;;  %v2412_v59 = vadd.f32 1.0, %v6854_v46  ;;  %v7504_v29 = vld [vmem:[#allocation11 + $0x178] sm:$0xff] }
 0x3ed   : > { %v1767_v21 = vmul.f32 %v7504_v29, %v10956_v12  ;;  %v6862_v44 = vpop.eup %6861  ;;  %v14264_v22 = vsub.f32 0.0, %v10726_v45  ;;  %v10975_v25 = vmul.f32 %v14107_v63, %v10834_v41  ;;  %6867 = vpow2.f32 %v3070_v42 }
 0x3ee   : > { %v2408_v53 = vadd.f32 1.0, %v6856_v49  ;;  %6869 = vpow2.f32 %v2752_v33  ;;  %v1653_v60 = vadd.f32 %v1621_v24, %v1572_v14  ;;  %v13581_v30 = vsub.f32 0.0, %v10963_v56 }
 0x3ef   : > { %v2966_v43 = vmax.f32 %v14264_v22, 0.0  ;;  %v2410_v26 = vadd.f32 1.0, %v6858_v13  ;;  %v6864_v55 = vpop.eup %6863  ;;  %v2902_v46 = vadd.f32 %v2845_v23, %v2646_v6  ;;  %6871 = vpow2.f32 %v3072_v4  ;;  %v7505_v4 = vld [vmem:[#allocation11 + $0x1f8] sm:$0xff] }
 0x3f0   : > { %v13580_v29 = vsub.f32 0.0, %v10967_v18  ;;  %v4043_v35 = vadd.f32 1.0, %v6848_v38  ;;  %v13583_v45 = vsub.f32 0.0, %v10948_v1  ;;  %6873 = vrcp.f32 %v2412_v59 }
 0x3f1   : > { %v3222_v37 = vadd.f32 %v3165_v50, %v2966_v43  ;;  %v1799_v22 = vadd.f32 %v1767_v21, %v1653_v60  ;;  %v4045_v41 = vadd.f32 1.0, %v6860_v51  ;;  %v3670_v42 = vmax.f32 %v10948_v1, 0.0 }
 0x3f2   : > { %v13582_v49 = vsub.f32 0.0, %v10975_v25  ;;  %6875 = vrcp.f32 %v2408_v53  ;;  %v6866_v33 = vpop.eup %6865  ;;  %v4047_v14 = vadd.f32 1.0, %v6862_v44  ;;  %v2681_v6 = vand.u32 2147483647, %v13581_v30 }
 0x3f3   : > { %6877 = vrcp.f32 %v2410_v26  ;;  %v1848_v43 = vmul.f32 %v7505_v4, %v10826_v8  ;;  %v6868_v50 = vpop.eup %6867  ;;  %v10985_v38 = vsub.f32 %v2902_v46, %v3222_v37  ;;  %v10987_v13 = vadd.f32 %v1844_v10, %v1795_v19  ;;  %v7506_v46 = vld [vmem:[#allocation11 + $0x278] sm:$0xff] }
 0x3f4   : > { %v5437_v23 = vmul.f32 1.442695, %v5404_v61  ;;  %v3001_v51 = vand.u32 2147483647, %v13580_v29  ;;  %v6870_v24 = vpop.eup %6869  ;;  %6879 = vlog2.f32 %v4043_v35  ;;  %v3894_v59 = vand.u32 2147483647, %v13583_v45 }
 0x3f5   : > { %v5499_v21 = vadd.f32 1.0, %v6864_v55  ;;  %v1880_v44 = vadd.f32 %v1848_v43, %v1799_v22  ;;  %v6872_v26 = vpop.eup %6871  ;;  %6881 = vlog2.f32 %v4045_v41  ;;  %v3702_v53 = vadd.f32 0.5, %v3670_v42 }
 0x3f6   : > { %v2807_v60 = vadd.f32 1.0, %v6866_v33  ;;  %v3895_v37 = vand.u32 2147483647, %v13582_v49  ;;  %v6874_v10 = vpop.eup %6873  ;;  %6883 = vlog2.f32 %v4047_v14  ;;  %v3127_v19 = vadd.f32 1.0, %v6868_v50 }
 0x3f7   : > { %v2713_v61 = vsub.f32 0.0, %v2681_v6  ;;  %v1929_v4 = vmul.f32 %v7506_v46, %v10782_v28  ;;  %v3318_v29 = vand.u32 2147483647, %v10985_v38  ;;  %6885 = vpow2.f32 %v5437_v23  ;;  %v7507_v23 = vld [vmem:[#allocation11 + $0x2f8] sm:$0xff] }
 0x3f8   : > { %v6876_v35 = vpop.eup %6875  ;;  %v2808_v55 = vadd.f32 1.0, %v6870_v24  ;;  %v3033_v22 = vsub.f32 0.0, %v3001_v51  ;;  %v3926_v41 = vsub.f32 0.0, %v3894_v59  ;;  %6887 = vrcp.f32 %v5499_v21 }
 0x3f9   : > { %v6878_v43 = vpop.eup %6877  ;;  %v3128_v42 = vadd.f32 1.0, %v6872_v26  ;;  %v1961_v33 = vadd.f32 %v1929_v4, %v1880_v44  ;;  %v3734_v30 = vadd.f32 1e-08, %v3702_v53  ;;  %6889 = vlog2.f32 %v2807_v60  ;;  %v7508_v53 = vld [vmem:[#allocation11 + $0x258] sm:$0xff] }
 0x3fa   : > { %v3927_v49 = vsub.f32 0.0, %v3895_v37  ;;  %v10998_v14 = vmul.f32 %v6874_v10, %v10779_v17  ;;  %v11000_v6 = vpop.eup %6879  ;;  %6891 = vlog2.f32 %v3127_v19  ;;  %v2754_v50 = vmul.f32 1.442695, %v2713_v61  ;;  %v7509_v61 = vld [vmem:[#allocation11 + $0x168] sm:$0xff] }
 0x3fb   : > { %14266 = vst [vmem:[#allocation33_spill] sm:$0xff] %v11000_v6  ;;  %v11003_v46 = vmul.f32 %v6876_v35, %v10866_v15  ;;  %v2010_v51 = vmul.f32 %v7507_v23, %v10860_v54  ;;  %v11006_v24 = vpop.eup %6881  ;;  %v3350_v59 = vsub.f32 0.0, %v3318_v29  ;;  %6893 = vlog2.f32 %v2808_v55  ;;  %v7510_v35 = vld [vmem:[#allocation11 + $0x378] sm:$0xff] }
 0x3fc   : > { %14265 = vst [vmem:[#allocation108_spill] sm:$0xff] %v10998_v14  ;;  %v3074_v21 = vmul.f32 1.442695, %v3033_v22  ;;  %v11009_v44 = vmul.f32 %v6878_v43, %v10875_v57  ;;  %v11011_v17 = vpop.eup %6883  ;;  %v3964_v26 = vmul.f32 1.442695, %v3926_v41  ;;  %v1925_v60 = vmul.f32 %v7508_v53, %v10548_v39 }
 0x3fd   : > { %14267 = vst [vmem:[#allocation139_spill] sm:$0xff] %v11003_v46  ;;  %6895 = vlog2.f32 %v3128_v42  ;;  %v2042_v15 = vadd.f32 %v2010_v51, %v1961_v33  ;;  %v6886_v37 = vpop.eup %6885  ;;  %v1651_v10 = vadd.f32 %v10938_v58, %v10942_v52  ;;  %v3966_v19 = vmul.f32 1.442695, %v3927_v49 }
 0x3fe   : > { %14268 = vst [vmem:[#allocation140_spill] sm:$0xff] %v11006_v24  ;;  %6897 = vlog2.f32 %v3734_v30  ;;  %v11018_v29 = vmul.f32 %v14207_v11, %v10998_v14  ;;  %v11020_v57 = vpop.eup %6887  ;;  %v1765_v4 = vmul.f32 %v7509_v61, %v10711_v5  ;;  %v11025_v39 = vmul.f32 %v14207_v11, %v11003_v46 }
 0x3ff   : > { %14269 = vst [vmem:[#allocation141_spill] sm:$0xff] %v11009_v44  ;;  %6899 = vpow2.f32 %v2754_v50  ;;  %v2091_v30 = vmul.f32 %v7510_v35, %v10818_v27  ;;  %v6890_v55 = vpop.eup %6889  ;;  %v3388_v58 = vmul.f32 1.442695, %v3350_v59  ;;  %v11029_v52 = vadd.f32 %v1925_v60, %v10987_v13  ;;  %v7512_v59 = vld [vmem:[#allocation11 + $0x268] sm:$0xff] }
 0x400   : > { %14270 = vst [vmem:[#allocation142_spill] sm:$0xff] %v11011_v17  ;;  %6901 = vpow2.f32 %v3074_v21  ;;  %v11033_v49 = vmul.f32 %v14207_v11, %v11009_v44  ;;  %v6892_v22 = vpop.eup %6891  ;;  %v11035_v43 = vadd.f32 1.0, %v6886_v37  ;;  %v11039_v41 = vmul.f32 %v14209_v62, %v11003_v46 }
 0x401   : > { %14271 = vst [vmem:[#allocation143_spill] sm:$0xff] %v11020_v57  ;;  %6903 = vpow2.f32 %v3964_v26  ;;  %v2123_v42 = vadd.f32 %v2091_v30, %v2042_v15  ;;  %v6894_v27 = vpop.eup %6893  ;;  %v14272_v33 = vsub.f32 0.0, %v10864_v0  ;;  %v14273_v13 = vsub.f32 0.0, %v10873_v48  ;;  %v7511_v15 = vld [vmem:[#allocation11 + $0x1e8] sm:$0xff] }
 0x402   : > { %v11047_v51 = vmul.f32 %v14209_v62, %v11009_v44  ;;  %6905 = vpow2.f32 %v3966_v19  ;;  %v1797_v26 = vadd.f32 %v1765_v4, %v1651_v10  ;;  %v11052_v53 = vmul.f32 %v14209_v62, %v10998_v14  ;;  %v14274_v19 = vld [vmem:[#allocation96_spill] sm:$0xff] }
 0x403   : > { %v2647_v50 = vmax.f32 %v14272_v33, 0.0  ;;  %v2967_v23 = vmax.f32 %v14273_v13, 0.0  ;;  %v6896_v21 = vpop.eup %6895  ;;  %6907 = vpow2.f32 %v3388_v58  ;;  %v2847_v48 = vmul.f32 0.6931472, %v6890_v55 }
 0x404   : > { %v11055_v0 = vpop.eup %6897  ;;  %v1846_v37 = vmul.f32 %v7511_v15, %v10923_v36  ;;  %v3167_v30 = vmul.f32 0.6931472, %v6892_v22  ;;  %v2849_v33 = vmul.f32 0.6931472, %v6894_v27  ;;  %v2204_v4 = vadd.f32 %v14274_v19, %v2123_v42 }
 0x405   : > { %v6900_v35 = vpop.eup %6899  ;;  %v3169_v45 = vmul.f32 0.6931472, %v6896_v21  ;;  %v1927_v60 = vmul.f32 %v7512_v59, %v10666_v31  ;;  %v14275_v58 = vsub.f32 0.0, %v11018_v29  ;;  %v14276_v61 = vsub.f32 0.0, %v10879_v9 }
 0x406   : > { %v6902_v13 = vpop.eup %6901  ;;  %v1878_v22 = vadd.f32 %v1846_v37, %v1797_v26  ;;  %v14277_v27 = vsub.f32 0.0, %v11025_v39  ;;  %v14278_v21 = vsub.f32 0.0, %v10891_v3  ;;  %v2809_v24 = vadd.f32 1.0, %v6900_v35 }
 0x407   : > { %v2686_v55 = vand.u32 2147483647, %v14275_v58  ;;  %v6904_v15 = vpop.eup %6903  ;;  %v2648_v17 = vmax.f32 %v14276_v61, 0.0  ;;  %v14279_v59 = vsub.f32 0.0, %v11033_v49  ;;  %v14280_v58 = vld [vmem:[#allocation99_spill] sm:$0xff]  ;;  %v2903_v11 = vadd.f32 %v2847_v48, %v2647_v50  ;;  %v7514_v50 = vld [vmem:[#allocation11 + $0x2e8] sm:$0xff] }
 0x408   : > { %v2682_v10 = vand.u32 2147483647, %v14277_v27  ;;  %v2968_v19 = vmax.f32 %v14278_v21, 0.0  ;;  %v11075_v62 = vadd.f32 %v14280_v58, %v2204_v4  ;;  %v6906_v57 = vpop.eup %6905  ;;  %v3223_v9 = vadd.f32 %v3167_v30, %v2967_v23  ;;  %v7513_v21 = vld [vmem:[#allocation11 + $0x2d8] sm:$0xff] }
 0x409   : > { %v2684_v6 = vand.u32 2147483647, %v14279_v59  ;;  %v3129_v61 = vadd.f32 1.0, %v6902_v13  ;;  %v14281_v26 = vsub.f32 0.0, %v11039_v41  ;;  %v6908_v27 = vpop.eup %6907  ;;  %v2904_v14 = vadd.f32 %v2849_v33, %v2648_v17  ;;  %v14284_v48 = vld [vmem:[#allocation79_spill] sm:$0xff] }
 0x40a   : > { %v3224_v42 = vadd.f32 %v3169_v45, %v2968_v19  ;;  %v2718_v44 = vsub.f32 0.0, %v2686_v55  ;;  %v14282_v3 = vsub.f32 0.0, %v11047_v51  ;;  %v2006_v59 = vmul.f32 %v7513_v21, %v10711_v5 }
 0x40b   : > { %v3002_v37 = vand.u32 2147483647, %v14281_v26  ;;  %v2714_v46 = vsub.f32 0.0, %v2682_v10  ;;  %v14283_v4 = vsub.f32 0.0, %v11052_v53  ;;  %v2008_v23 = vmul.f32 %v7514_v50, %v10956_v12 }
 0x40c   : > { %v3004_v35 = vand.u32 2147483647, %v14282_v3  ;;  %v14285_v30 = vsub.f32 0.0, %v14284_v48  ;;  %v4022_v17 = vadd.f32 1.0, %v6904_v15  ;;  %6909 = vlog2.f32 %v2809_v24 }
 0x40d   : > { %v3006_v58 = vand.u32 2147483647, %v14283_v4  ;;  %v2716_v45 = vsub.f32 0.0, %v2684_v6  ;;  %v11089_v33 = vsub.f32 %v2903_v11, %v3223_v9  ;;  %v1959_v55 = vadd.f32 %v1927_v60, %v1878_v22  ;;  %v7515_v22 = vld [vmem:[#allocation11 + $0x358] sm:$0xff] }
 0x40e   : > { %v11087_v13 = vadd.f32 1e-08, %v14285_v30  ;;  %6911 = vlog2.f32 %v3129_v61  ;;  %v3034_v19 = vsub.f32 0.0, %v3002_v37  ;;  %v3671_v5 = vmax.f32 %v10975_v25, 0.0 }
 0x40f   : > { %v11092_v10 = vsub.f32 %v2904_v14, %v3224_v42  ;;  %v2764_v26 = vmul.f32 1.442695, %v2718_v44  ;;  %v3036_v3 = vsub.f32 0.0, %v3004_v35  ;;  %v2038_v21 = vadd.f32 %v2006_v59, %v11029_v52  ;;  %v7516_v42 = vld [vmem:[#allocation11 + $0x368] sm:$0xff] }
 0x410   : > { %14286 = vst [vmem:[#allocation96_spill] sm:$0xff] %v11087_v13  ;;  %v2756_v4 = vmul.f32 1.442695, %v2714_v46  ;;  %v3038_v50 = vsub.f32 0.0, %v3006_v58  ;;  %v2040_v48 = vadd.f32 %v2008_v23, %v1959_v55  ;;  %v13592_v15 = vrot.slane %v11087_v13, 7 }
 0x411   : > { %v14287_v6 = vsub.f32 0.0, %v10948_v1  ;;  %6913 = vlog2.f32 %v4022_v17  ;;  %v2760_v24 = vmul.f32 1.442695, %v2716_v45  ;;  %v3319_v60 = vand.u32 2147483647, %v11089_v33  ;;  %v7517_v45 = vld [vmem:[#allocation11 + $0x3d8] sm:$0xff] }
 0x412   : > { %v2087_v14 = vmul.f32 %v7515_v22, %v10923_v36  ;;  %v3076_v44 = vmul.f32 1.442695, %v3034_v19  ;;  %v2089_v52 = vmul.f32 %v7516_v42, %v10826_v8  ;;  %v6910_v46 = vpop.eup %6909  ;;  %v3703_v9 = vadd.f32 0.5, %v3671_v5  ;;  %v7518_v8 = vld [vmem:[#allocation11 + $0x3e8] sm:$0xff]  ;;  %v7519_v5 = vld [vmem:[#allocation11 + $0x458] sm:$0xff] }
 0x413   : > { %v11098_v11 = vmax.f32 %v14287_v6, 0.0  ;;  %v3320_v61 = vand.u32 2147483647, %v11092_v10  ;;  %6915 = vpow2.f32 %v2764_v26  ;;  %v3080_v37 = vmul.f32 1.442695, %v3036_v3  ;;  %v7520_v42 = vld [vmem:[#allocation11 + $0x468] sm:$0xff] }
 0x414   : > { %v6912_v35 = vpop.eup %6911  ;;  %v2119_v59 = vadd.f32 %v2087_v14, %v2038_v21  ;;  %6917 = vpow2.f32 %v2756_v4  ;;  %v3084_v58 = vmul.f32 1.442695, %v3038_v50  ;;  %v2121_v23 = vadd.f32 %v2089_v52, %v2040_v48 }
 0x415   : > { %v3446_v30 = vadd.f32 1.0, %v6908_v27  ;;  %v4023_v17 = vadd.f32 1.0, %v6906_v57  ;;  %v2168_v36 = vmul.f32 %v7517_v45, %v10666_v31  ;;  %6919 = vpow2.f32 %v2760_v24 }
 0x416   : > { %v3351_v55 = vsub.f32 0.0, %v3319_v60  ;;  %6921 = vpow2.f32 %v3076_v44  ;;  %v2170_v19 = vmul.f32 %v7518_v8, %v10782_v28  ;;  %v2249_v26 = vmul.f32 %v7519_v5, %v10956_v12  ;;  %v1347_v44 = vpop.f32.mrf.mxu2 }
 0x417   : > { %v6914_v3 = vpop.eup %6913  ;;  %v3352_v6 = vsub.f32 0.0, %v3320_v61  ;;  %v2851_v21 = vmul.f32 0.6931472, %v6910_v46  ;;  %v3171_v4 = vmul.f32 0.6931472, %v6912_v35  ;;  %6923 = vpow2.f32 %v3080_v37 }
 0x418   : > { %v3735_v50 = vadd.f32 1e-08, %v3703_v9  ;;  %v2200_v27 = vadd.f32 %v2168_v36, %v2119_v59  ;;  %6925 = vpow2.f32 %v3084_v58  ;;  %v2202_v57 = vadd.f32 %v2170_v19, %v2121_v23 }
 0x419   : > { %v6916_v48 = vpop.eup %6915  ;;  %6927 = vlog2.f32 %v4023_v17  ;;  %v11109_v31 = vmul.f32 %v14260_v47, %v10848_v32  ;;  %v14288_v28 = vsub.f32 0.0, %v10963_v56  ;;  %v14289_v12 = vsub.f32 0.0, %v10967_v18  ;;  %v1396_v56 = vpop.f32.mrf.mxu3  ;;  %v14290_v18 = vld [vmem:[#allocation135_spill] sm:$0xff] }
 0x41a   : > { %v6918_v22 = vpop.eup %6917  ;;  %6929 = vlog2.f32 %v3446_v30  ;;  %v3390_v14 = vmul.f32 1.442695, %v3351_v55  ;;  %v2251_v52 = vmul.f32 %v7520_v42, %v10860_v54  ;;  %v11116_v46 = vadd.f32 %v2249_v26, %v2200_v27 }
 0x41b   : > { %v2649_v24 = vmax.f32 %v14288_v28, 0.0  ;;  %v2969_v60 = vmax.f32 %v14289_v12, 0.0  ;;  %v6920_v9 = vpop.eup %6919  ;;  %6931 = vrcp.f32 %v11035_v43  ;;  %v3392_v61 = vmul.f32 1.442695, %v3352_v6 }
 0x41c   : > { %v6922_v59 = vpop.eup %6921  ;;  %v14291_v58 = vrot.slane %v14290_v18, 7  ;;  %v11127_v54 = vmul.f32 %v14107_v63, %v10935_v7  ;;  %v2814_v30 = vadd.f32 1.0, %v6916_v48  ;;  %v11129_v17 = vadd.f32 %v2251_v52, %v2202_v57 }
 0x41d   : > { %v2905_v37 = vadd.f32 %v2851_v21, %v2649_v24  ;;  %v3225_v35 = vadd.f32 %v3171_v4, %v2969_v60  ;;  %v6924_v43 = vpop.eup %6923  ;;  %6933 = vlog2.f32 %v3735_v50  ;;  %v13594_v45 = vsub.f32 0.0, %v11109_v31 }
 0x41e   : > { %v4368_v23 = vsel %vm1476_vm1, %v14291_v58, %v13592_v15  ;;  %v11133_v36 = vadd.f32 %v1347_v44, %v10851_v34  ;;  %v2810_v55 = vadd.f32 1.0, %v6918_v22  ;;  %v6926_v8 = vpop.eup %6925  ;;  %6935 = vpow2.f32 %v3390_v14 }
 0x41f   : > { %v11136_v19 = vadd.f32 %v1396_v56, %v10903_v16  ;;  %v2812_v5 = vadd.f32 1.0, %v6920_v9  ;;  %v2313_v26 = vsub.f32 0.0, %v11116_v46  ;;  %v6928_v6 = vpop.eup %6927  ;;  %v4061_v21 = vmul.f32 0.6931472, %v6914_v3 }
 0x420   : > { %14292 = vst [vmem:[#allocation99_spill] sm:$0xff] %v11133_v36  ;;  %6937 = vpow2.f32 %v3392_v61  ;;  %v11139_v4 = vsub.f32 %v2905_v37, %v3225_v35  ;;  %v3130_v50 = vadd.f32 1.0, %v6922_v59  ;;  %v6930_v27 = vpop.eup %6929  ;;  %v13593_v57 = vsub.f32 0.0, %v11127_v54 }
 0x421   : > { %14293 = vst [vmem:[#allocation79_spill] sm:$0xff] %v11136_v19  ;;  %6939 = vlog2.f32 %v2814_v30  ;;  %v3132_v48 = vadd.f32 1.0, %v6924_v43  ;;  %v2315_v28 = vsub.f32 0.0, %v11129_v17  ;;  %v11143_v24 = vpop.eup %6931  ;;  %v3896_v12 = vand.u32 2147483647, %v13594_v45 }
 0x422   : > { %14294 = vst [vmem:[#allocation135_spill] sm:$0xff] %v11143_v24  ;;  %v5405_v60 = vsub.f32 0.0, %v11133_v36  ;;  %6941 = vlog2.f32 %v2810_v55  ;;  %v3134_v3 = vadd.f32 1.0, %v6926_v8  ;;  %v5406_v22 = vsub.f32 0.0, %v11136_v19 }
 0x423   : > { %6943 = vlog2.f32 %v2812_v5  ;;  %v2317_v14 = vsub.f32 0.0, %v11075_v62  ;;  %v2356_v44 = vmul.f32 1.442695, %v2313_v26  ;;  %v11150_v42 = vpop.eup %6933  ;;  %v3485_v52 = vmul.f32 0.6931472, %v6930_v27 }
 0x424   : > { %v4063_v9 = vmul.f32 0.6931472, %v6928_v6  ;;  %v3321_v61 = vand.u32 2147483647, %v11139_v4  ;;  %6945 = vlog2.f32 %v3130_v50  ;;  %v6936_v37 = vpop.eup %6935  ;;  %v14295_v35 = vsub.f32 0.0, %v10975_v25 }
 0x425   : > { %v3897_v59 = vand.u32 2147483647, %v13593_v57  ;;  %6947 = vlog2.f32 %v3132_v48  ;;  %v2360_v18 = vmul.f32 1.442695, %v2315_v28  ;;  %v3286_v30 = vmax.f32 %v10985_v38, 0.0  ;;  %v14297_v57 = vld [vmem:[#allocation129_spill] sm:$0xff] }
 0x426   : > { %v3863_v56 = vmax.f32 %v14295_v35, 0.0  ;;  %v6938_v58 = vpop.eup %6937  ;;  %v3928_v43 = vsub.f32 0.0, %v3896_v12  ;;  %v5439_v55 = vmul.f32 1.442695, %v5405_v60  ;;  %6949 = vlog2.f32 %v3134_v3 }
 0x427   : > { %v6940_v8 = vpop.eup %6939  ;;  %v11159_v5 = vadd.f32 %v4368_v23, %v11087_v13  ;;  %v4118_v26 = vadd.f32 %v4061_v21, %v11098_v11  ;;  %6951 = vpow2.f32 %v2356_v44  ;;  %v2364_v6 = vmul.f32 1.442695, %v2317_v14  ;;  %v14299_v11 = vld [vmem:[#allocation127_spill] sm:$0xff]  ;;  %v14301_v14 = vld [vmem:[#allocation29_spill] sm:$0xff] }
 0x428   : > { %v6942_v50 = vpop.eup %6941  ;;  %v11162_v27 = vadd.f32 %v3485_v52, %v3286_v30  ;;  %v11164_v35 = vadd.f32 %v4063_v9, %v3863_v56  ;;  %v3353_v48 = vsub.f32 0.0, %v3321_v61  ;;  %v5441_v28 = vmul.f32 1.442695, %v5406_v22  ;;  %v14304_v61 = vld [vmem:[#allocation45_spill] sm:$0xff] }
 0x429   : > { %14296 = vst [vmem:[#allocation144_spill] sm:$0xff] %v11159_v5  ;;  %v6944_v15 = vpop.eup %6943  ;;  %v11168_v12 = vadd.f32 %v10786_v40, %v14297_v57  ;;  %v3447_v60 = vadd.f32 1.0, %v6936_v37  ;;  %v3929_v3 = vsub.f32 0.0, %v3897_v59  ;;  %6953 = vpow2.f32 %v2360_v18 }
 0x42a   : > { %v6946_v23 = vpop.eup %6945  ;;  %v11172_v21 = vadd.f32 %v14299_v11, %v10758_v20  ;;  %v14302_v44 = vmax.f32 %v14301_v14, 0.0  ;;  %v3968_v9 = vmul.f32 1.442695, %v3928_v43  ;;  %6955 = vpow2.f32 %v5439_v55 }
 0x42b   : > { %14298 = vst [vmem:[#allocation129_spill] sm:$0xff] %v11168_v12  ;;  %v6948_v22 = vpop.eup %6947  ;;  %v14305_v56 = vmax.f32 %v14304_v61, 0.0  ;;  %v4150_v57 = vsub.f32 0.0, %v4118_v26  ;;  %6957 = vpow2.f32 %v2364_v6  ;;  %v3574_v59 = vsub.f32 0.0, %v11162_v27 }
 0x42c   : > { %14300 = vst [vmem:[#allocation127_spill] sm:$0xff] %v11172_v21  ;;  %v11176_v52 = vadd.f32 0.5, %v14302_v44  ;;  %v6950_v37 = vpop.eup %6949  ;;  %v4151_v18 = vsub.f32 0.0, %v11164_v35  ;;  %v3394_v11 = vmul.f32 1.442695, %v3353_v48  ;;  %6959 = vpow2.f32 %v5441_v28 }
 0x42d   : > { %v11180_v30 = vadd.f32 0.5, %v14305_v56  ;;  %v6952_v44 = vpop.eup %6951  ;;  %6961 = vlog2.f32 %v3447_v60  ;;  %v3970_v43 = vmul.f32 1.442695, %v3929_v3  ;;  %v2853_v55 = vmul.f32 0.6931472, %v6942_v50 }
 0x42e   : > { %14303 = vst [vmem:[#allocation145_spill] sm:$0xff] %v11176_v52  ;;  %v3173_v45 = vmul.f32 0.6931472, %v6946_v23  ;;  %vm3638_vm15 = vcmp.ge.f32.partialorder %v10948_v1, 0.0  ;;  %v3448_v56 = vadd.f32 1.0, %v6938_v58  ;;  %6963 = vpow2.f32 %v3968_v9 }
 0x42f   : > { %14306 = vst [vmem:[#allocation146_spill] sm:$0xff] %v11180_v30  ;;  %v2857_v12 = vmul.f32 0.6931472, %v6944_v15  ;;  %v3177_v40 = vmul.f32 0.6931472, %v6948_v22  ;;  %v6954_v26 = vpop.eup %6953  ;;  %v14307_v6 = vsub.f32 0.0, %v11025_v39  ;;  %6965 = vpow2.f32 %v3394_v11 }
 0x430   : > { %v2861_v27 = vmul.f32 0.6931472, %v6940_v8  ;;  %v14308_v35 = vsub.f32 0.0, %v11039_v41  ;;  %v3181_v28 = vmul.f32 0.6931472, %v6950_v37  ;;  %v6956_v32 = vpop.eup %6955  ;;  %v14309_v50 = vsub.f32 0.0, %v11033_v49 }
 0x431   : > { %v2650_v7 = vmax.f32 %v14307_v6, 0.0  ;;  %v14310_v3 = vsub.f32 0.0, %v11047_v51  ;;  %v2409_v23 = vadd.f32 1.0, %v6952_v44  ;;  %v6958_v15 = vpop.eup %6957  ;;  %v14311_v9 = vsub.f32 0.0, %v11018_v29  ;;  %v14314_v51 = vld [vmem:[#allocation111_spill] sm:$0xff] }
 0x432   : > { %v2970_v48 = vmax.f32 %v14308_v35, 0.0  ;;  %v2652_v60 = vmax.f32 %v14309_v50, 0.0  ;;  %v14312_v8 = vsub.f32 0.0, %v11052_v53  ;;  %v6960_v35 = vpop.eup %6959  ;;  %6967 = vpow2.f32 %v3970_v43 }
 0x433   : > { %v2972_v58 = vmax.f32 %v14310_v3, 0.0  ;;  %v2654_v22 = vmax.f32 %v14311_v9, 0.0  ;;  %v2906_v39 = vadd.f32 %v2853_v55, %v2650_v7  ;;  %v2411_v19 = vadd.f32 1.0, %v6954_v26  ;;  %v6962_v49 = vpop.eup %6961 }
 0x434   : > { %v2974_v6 = vmax.f32 %v14312_v8, 0.0  ;;  %v3226_v41 = vadd.f32 %v3173_v45, %v2970_v48  ;;  %v2908_v37 = vadd.f32 %v2857_v12, %v2652_v60  ;;  %v14313_v50 = vrot.slane %v11159_v5, 6  ;;  %v6964_v55 = vpop.eup %6963 }
 0x435   : > { %v3228_v11 = vadd.f32 %v3177_v40, %v2972_v58  ;;  %v14315_v3 = vrot.slane %v14314_v51, 6  ;;  %v4182_v29 = vadd.f32 1e-08, %v4150_v57  ;;  %v2910_v9 = vadd.f32 %v2861_v27, %v2654_v22  ;;  %v6966_v26 = vpop.eup %6965 }
 0x436   : > { %v3230_v7 = vadd.f32 %v3181_v28, %v2974_v6  ;;  %v3773_v53 = vmul.f32 0.6931472, %v11055_v0  ;;  %v11205_v45 = vadd.f32 1e-08, %v3574_v59  ;;  %v2413_v43 = vadd.f32 1.0, %v6958_v15 }
 0x437   : > { %v4513_v44 = vsel %vm4511_vm7, %v14315_v3, %v14313_v50  ;;  %6969 = vrcp.f32 %v2409_v23  ;;  %vm3639_vm0 = vcmp.ge.f32.partialorder %v10975_v25, 0.0  ;;  %v5501_v12 = vadd.f32 1.0, %v6956_v32  ;;  %v14318_v50 = vld [vmem:[#allocation94_spill] sm:$0xff] }
 0x438   : > { %6971 = vlog2.f32 %v3448_v56  ;;  %v11208_v40 = vsub.f32 %v2906_v39, %v3226_v41  ;;  %v11211_v48 = vadd.f32 %v4513_v44, %v11159_v5  ;;  %v4183_v57 = vadd.f32 1e-08, %v4151_v18  ;;  %v6968_v32 = vpop.eup %6967  ;;  %v14320_v44 = vld [vmem:[#allocation139_spill] sm:$0xff] }
 0x439   : > { %v11213_v27 = vsub.f32 %v2908_v37, %v3228_v11  ;;  %6973 = vrcp.f32 %v2411_v19  ;;  %v3606_v0 = vadd.f32 %v3574_v59, %v10985_v38  ;;  %v4214_v28 = vsel %vm3638_vm15, %v3773_v53, %v4182_v29 }
 0x43a   : > { %14316 = vst [vmem:[#allocation111_spill] sm:$0xff] %v11211_v48  ;;  %v3672_v60 = vmax.f32 %v11109_v31, 0.0  ;;  %v11219_v58 = vsub.f32 %v2910_v9, %v3230_v7  ;;  %v13600_v56 = vrot.slane %v11205_v45, 7  ;;  %v3487_v23 = vmul.f32 0.6931472, %v6962_v49  ;;  %v14321_v9 = vld [vmem:[#allocation141_spill] sm:$0xff] }
 0x43b   : > { %v3775_v15 = vmul.f32 0.6931472, %v11150_v42  ;;  %6975 = vrcp.f32 %v2413_v43  ;;  %v3287_v18 = vmax.f32 %v11089_v33, 0.0  ;;  %v4024_v22 = vadd.f32 1.0, %v6964_v55 }
 0x43c   : > { %6977 = vrcp.f32 %v5501_v12  ;;  %v3322_v38 = vand.u32 2147483647, %v11208_v40  ;;  %v3449_v59 = vadd.f32 1.0, %v6966_v26  ;;  %v5502_v39 = vadd.f32 1.0, %v6960_v35 }
 0x43d   : > { %v6970_v19 = vpop.eup %6969  ;;  %v11227_v1 = vsel %vm3639_vm0, %v3775_v15, %v4183_v57  ;;  %v3324_v8 = vand.u32 2147483647, %v11213_v27  ;;  %v11230_v41 = vadd.f32 %v4214_v28, %v3606_v0  ;;  %v3704_v42 = vadd.f32 0.5, %v3672_v60 }
 0x43e   : > { %v6972_v6 = vpop.eup %6971  ;;  %v4025_v37 = vadd.f32 1.0, %v6968_v32  ;;  %v3326_v11 = vand.u32 2147483647, %v11219_v58  ;;  %v14319_v51 = vrot.slane %v14318_v50, 7  ;;  %v11239_v3 = vadd.f32 %v3487_v23, %v3287_v18 }
 0x43f   : > { %14317 = vst [vmem:[#allocation147_spill] sm:$0xff] %v11230_v41  ;;  %v6974_v49 = vpop.eup %6973  ;;  %v3673_v35 = vmax.f32 %v11127_v54, 0.0  ;;  %v11244_v29 = vmul.f32 %v14260_v47, %v14320_v44  ;;  %6979 = vlog2.f32 %v4024_v22  ;;  %v11248_v7 = vmul.f32 %v14260_v47, %v14321_v9 }
 0x440   : > { %v4391_v25 = vsel %vm1476_vm1, %v14319_v51, %v13600_v56  ;;  %v3354_v55 = vsub.f32 0.0, %v3322_v38  ;;  %v11251_v53 = vmul.f32 %v6970_v19, %v11116_v46  ;;  %v3489_v12 = vmul.f32 0.6931472, %v6972_v6 }
 0x441   : > { %v6976_v43 = vpop.eup %6975  ;;  %v14323_v26 = vsub.f32 0.0, %v11109_v31  ;;  %6981 = vlog2.f32 %v3449_v59  ;;  %v3356_v0 = vsub.f32 0.0, %v3324_v8  ;;  %v3736_v60 = vadd.f32 1e-08, %v3704_v42  ;;  %v14327_v8 = vld [vmem:[#allocation115_spill] sm:$0xff] }
 0x442   : > { %14322 = vst [vmem:[#allocation148_spill] sm:$0xff] %v11251_v53  ;;  %v11257_v28 = vpop.eup %6977  ;;  %6983 = vlog2.f32 %v4025_v37  ;;  %v3358_v32 = vsub.f32 0.0, %v3326_v11  ;;  %v11260_v23 = vmul.f32 %v6974_v49, %v11129_v17  ;;  %v13599_v15 = vsub.f32 0.0, %v11239_v3  ;;  %v14328_v37 = vld [vmem:[#allocation119_spill] sm:$0xff] }
 0x443   : > { %v11255_v57 = vmax.f32 %v14323_v26, 0.0  ;;  %14324 = vst [vmem:[#allocation149_spill] sm:$0xff] %v11257_v28  ;;  %v3288_v46 = vmax.f32 %v11092_v10, 0.0  ;;  %v3705_v18 = vadd.f32 0.5, %v3673_v35  ;;  %v13598_v22 = vsub.f32 0.0, %v11244_v29 }
 0x444   : > { %14325 = vst [vmem:[#allocation150_spill] sm:$0xff] %v11260_v23  ;;  %v3396_v38 = vmul.f32 1.442695, %v3354_v55  ;;  %v13601_v19 = vsub.f32 0.0, %v11248_v7  ;;  %v11267_v59 = vmul.f32 %v6976_v43, %v11075_v62  ;;  %v11271_v6 = vmul.f32 %v14327_v8, %v11251_v53 }
 0x445   : > { %v11273_v42 = vadd.f32 %v3489_v12, %v3288_v46  ;;  %6985 = vrcp.f32 %v5502_v39  ;;  %v3400_v17 = vmul.f32 1.442695, %v3356_v0  ;;  %v11277_v11 = vmul.f32 %v14328_v37, %v11251_v53  ;;  %v6980_v49 = vpop.eup %6979 }
 0x446   : > { %14326 = vst [vmem:[#allocation151_spill] sm:$0xff] %v11267_v59  ;;  %v11280_v51 = vadd.f32 %v4391_v25, %v11205_v45  ;;  %6987 = vlog2.f32 %v3736_v60  ;;  %v3404_v35 = vmul.f32 1.442695, %v3358_v32  ;;  %v11284_v62 = vmul.f32 %v14327_v8, %v11260_v23 }
 0x447   : > { %v6982_v55 = vpop.eup %6981  ;;  %v11288_v43 = vadd.f32 1e-08, %v13599_v15  ;;  %v3737_v39 = vadd.f32 1e-08, %v3705_v18  ;;  %v3898_v12 = vand.u32 2147483647, %v13598_v22  ;;  %v11294_v26 = vmul.f32 %v14328_v37, %v11260_v23 }
 0x448   : > { %14329 = vst [vmem:[#allocation152_spill] sm:$0xff] %v11280_v51  ;;  %v6984_v25 = vpop.eup %6983  ;;  %6989 = vpow2.f32 %v3396_v38  ;;  %v3900_v0 = vand.u32 2147483647, %v13601_v19  ;;  %v11300_v60 = vmul.f32 %v14327_v8, %v11267_v59  ;;  %v11306_v18 = vmul.f32 %v14328_v37, %v11267_v59  ;;  %v14330_v38 = vld [vmem:[#allocation108_spill] sm:$0xff] }
 0x449   : > { %6991 = vpow2.f32 %v3400_v17  ;;  %v3491_v15 = vmul.f32 0.6931472, %v6982_v55  ;;  %v11311_v56 = vmul.f32 %v14260_v47, %v14330_v38  ;;  %v4065_v32 = vmul.f32 0.6931472, %v6980_v49 }
 0x44a   : > { %6993 = vpow2.f32 %v3404_v35  ;;  %v4067_v44 = vmul.f32 0.6931472, %v6984_v25  ;;  %v3930_v46 = vsub.f32 0.0, %v3898_v12  ;;  %v3289_v36 = vmax.f32 %v11139_v4, 0.0 }
 0x44b   : > { %v11314_v9 = vpop.eup %6985  ;;  %v3932_v22 = vsub.f32 0.0, %v3900_v0  ;;  %v14332_v38 = vsub.f32 0.0, %v11271_v6  ;;  %v14333_v35 = vsub.f32 0.0, %v11273_v42  ;;  %v14334_v49 = vsub.f32 0.0, %v11127_v54 }
 0x44c   : > { %14331 = vst [vmem:[#allocation153_spill] sm:$0xff] %v11314_v9  ;;  %v11317_v28 = vpop.eup %6987  ;;  %v14335_v17 = vsub.f32 0.0, %v11277_v11  ;;  %v11333_v14 = vadd.f32 %v3491_v15, %v3289_v36  ;;  %v4120_v52 = vadd.f32 %v4065_v32, %v11255_v57  ;;  %6995 = vlog2.f32 %v3737_v39 }
 0x44d   : > { %v2683_v24 = vand.u32 2147483647, %v14332_v38  ;;  %v11325_v19 = vadd.f32 1e-08, %v14333_v35  ;;  %v3865_v25 = vmax.f32 %v14334_v49, 0.0  ;;  %v14336_v38 = vsub.f32 0.0, %v11284_v62 }
 0x44e   : > { %v3003_v9 = vand.u32 2147483647, %v14335_v17  ;;  %v6990_v61 = vpop.eup %6989  ;;  %v3972_v49 = vmul.f32 1.442695, %v3930_v46  ;;  %v14337_v12 = vsub.f32 0.0, %v11294_v26  ;;  %v14338_v0 = vsub.f32 0.0, %v11300_v60 }
 0x44f   : > { %v2685_v30 = vand.u32 2147483647, %v14336_v38  ;;  %v6992_v35 = vpop.eup %6991  ;;  %v4121_v17 = vadd.f32 %v4067_v44, %v3865_v25  ;;  %v3976_v13 = vmul.f32 1.442695, %v3932_v22  ;;  %v2715_v15 = vsub.f32 0.0, %v2683_v24 }
 0x450   : > { %v3005_v48 = vand.u32 2147483647, %v14337_v12  ;;  %v6994_v5 = vpop.eup %6993  ;;  %v2687_v36 = vand.u32 2147483647, %v14338_v0  ;;  %v3450_v41 = vadd.f32 1.0, %v6990_v61  ;;  %v14339_v38 = vsub.f32 0.0, %v11306_v18 }
 0x451   : > { %v3035_v20 = vsub.f32 0.0, %v3003_v9  ;;  %v13608_v57 = vsub.f32 0.0, %v11333_v14  ;;  %v3452_v39 = vadd.f32 1.0, %v6992_v35  ;;  %v14340_v32 = vsub.f32 0.0, %v11311_v56 }
 0x452   : > { %v3007_v21 = vand.u32 2147483647, %v14339_v38  ;;  %v2717_v12 = vsub.f32 0.0, %v2685_v30  ;;  %v3454_v44 = vadd.f32 1.0, %v6994_v5  ;;  %v3674_v22 = vmax.f32 %v11244_v29, 0.0  ;;  %v6996_v55 = vpop.eup %6995 }
 0x453   : > { %v3902_v46 = vand.u32 2147483647, %v14340_v32  ;;  %6997 = vpow2.f32 %v3972_v49  ;;  %v3037_v25 = vsub.f32 0.0, %v3005_v48  ;;  %v3676_v24 = vmax.f32 %v11248_v7, 0.0 }
 0x454   : > { %6999 = vpow2.f32 %v3976_v13  ;;  %v2719_v61 = vsub.f32 0.0, %v2687_v36  ;;  %v2758_v0 = vmul.f32 1.442695, %v2715_v15  ;;  %v14341_v9 = vrot.slane %v11325_v19, 7  ;;  %v14345_v15 = vld [vmem:[#allocation107_spill] sm:$0xff] }
 0x455   : > { %v14342_v38 = vrot.slane %v11205_v45, 7  ;;  %7001 = vlog2.f32 %v3450_v41  ;;  %v3039_v30 = vsub.f32 0.0, %v3007_v21  ;;  %v3078_v5 = vmul.f32 1.442695, %v3035_v20 }
 0x456   : > { %v11359_v49 = vadd.f32 1e-08, %v13608_v57  ;;  %7003 = vlog2.f32 %v3452_v39  ;;  %v3934_v48 = vsub.f32 0.0, %v3902_v46  ;;  %v2762_v13 = vmul.f32 1.442695, %v2717_v12 }
 0x457   : > { %v4389_v35 = vsel %vm1476_vm1, %v14342_v38, %v14341_v9  ;;  %v14344_v36 = vrot.slane %v11288_v43, 7  ;;  %v14346_v32 = vrot.slane %v14345_v15, 7  ;;  %vm3640_vm2 = vcmp.ge.f32.partialorder %v11109_v31, 0.0 }
 0x458   : > { %14343 = vst [vmem:[#allocation154_spill] sm:$0xff] %v11359_v49  ;;  %v4152_v9 = vsub.f32 0.0, %v4120_v52  ;;  %7005 = vlog2.f32 %v3454_v44  ;;  %v3082_v21 = vmul.f32 1.442695, %v3037_v25  ;;  %v11369_v20 = vadd.f32 %v4389_v35, %v11325_v19 }
 0x459   : > { %v4392_v45 = vsel %vm1476_vm1, %v14346_v32, %v14344_v36  ;;  %v4153_v41 = vsub.f32 0.0, %v4121_v17  ;;  %7007 = vpow2.f32 %v2758_v0  ;;  %v2766_v39 = vmul.f32 1.442695, %v2719_v61  ;;  %v6998_v46 = vpop.eup %6997 }
 0x45a   : > { %v3678_v12 = vmax.f32 %v11311_v56, 0.0  ;;  %v3706_v38 = vadd.f32 0.5, %v3674_v22  ;;  %7009 = vpow2.f32 %v3078_v5  ;;  %v3086_v57 = vmul.f32 1.442695, %v3039_v30  ;;  %v7000_v15 = vpop.eup %6999 }
 0x45b   : > { %v13609_v36 = vrot.slane %v11359_v49, 7  ;;  %v3708_v32 = vadd.f32 0.5, %v3676_v24  ;;  %v3980_v50 = vmul.f32 1.442695, %v3934_v48  ;;  %7011 = vpow2.f32 %v2762_v13  ;;  %v7002_v52 = vpop.eup %7001 }
 0x45c   : > { %v14347_v17 = vsub.f32 0.0, %v11239_v3  ;;  %v3777_v61 = vmul.f32 0.6931472, %v11317_v28  ;;  %7013 = vpow2.f32 %v3082_v21  ;;  %v7004_v0 = vpop.eup %7003  ;;  %v11379_v22 = vadd.f32 %v4392_v45, %v11288_v43 }
 0x45d   : > { %v4184_v35 = vadd.f32 1e-08, %v4152_v9  ;;  %v13610_v30 = vrot.slane %v11369_v20, 6  ;;  %7015 = vpow2.f32 %v2766_v39  ;;  %v14349_v5 = vsub.f32 0.0, %v11273_v42 }
 0x45e   : > { %v3607_v25 = vadd.f32 %v14347_v17, %v11089_v33  ;;  %14348 = vst [vmem:[#allocation155_spill] sm:$0xff] %v11379_v22  ;;  %v7006_v24 = vpop.eup %7005  ;;  %v4185_v13 = vadd.f32 1e-08, %v4153_v41  ;;  %v3738_v44 = vadd.f32 1e-08, %v3706_v38  ;;  %7017 = vpow2.f32 %v3086_v57  ;;  %v1350_v57 = vpop.f32.mrf.mxu2 }
 0x45f   : > { %v3608_v48 = vadd.f32 %v14349_v5, %v11092_v10  ;;  %v7008_v33 = vpop.eup %7007  ;;  %v14350_v3 = vrot.slane %v11288_v43, 7  ;;  %v3710_v45 = vadd.f32 0.5, %v3678_v12  ;;  %v3740_v9 = vadd.f32 1e-08, %v3708_v32 }
 0x460   : > { %7019 = vpow2.f32 %v3980_v50  ;;  %v7010_v21 = vpop.eup %7009  ;;  %v11392_v39 = vadd.f32 %v11227_v1, %v3607_v25  ;;  %vm3641_vm3 = vcmp.ge.f32.partialorder %v11127_v54, 0.0  ;;  %v3779_v10 = vmul.f32 0.6931472, %v6996_v55 }
 0x461   : > { %v4390_v28 = vsel %vm1476_vm1, %v14350_v3, %v13609_v36  ;;  %v4026_v42 = vadd.f32 1.0, %v6998_v46  ;;  %v7012_v41 = vpop.eup %7011  ;;  %v13611_v38 = vrot.slane %v11379_v22, 6  ;;  %v4216_v43 = vsel %vm3640_vm2, %v3777_v61, %v4184_v35  ;;  %v1399_v46 = vpop.f32.mrf.mxu3 }
 0x462   : > { %14351 = vst [vmem:[#allocation156_spill] sm:$0xff] %v11392_v39  ;;  %v14352_v12 = vrot.slane %v11280_v51, 6  ;;  %v4028_v1 = vadd.f32 1.0, %v7000_v15  ;;  %v7014_v32 = vpop.eup %7013  ;;  %v4217_v17 = vsel %vm3641_vm3, %v3779_v10, %v4185_v13  ;;  %v11405_v54 = vadd.f32 %v4390_v28, %v11359_v49  ;;  %v14376_v49 = vld [vmem:[#allocation113_spill] sm:$0xff] }
 0x463   : > { %7021 = vlog2.f32 %v3738_v44  ;;  %v2811_v55 = vadd.f32 1.0, %v7008_v33  ;;  %v7016_v25 = vpop.eup %7015  ;;  %v11407_v5 = vadd.f32 %v4216_v43, %v3608_v48  ;;  %v3742_v31 = vadd.f32 1e-08, %v3710_v45 }
 0x464   : > { %v4534_v50 = vsel %vm4511_vm7, %v14352_v12, %v13610_v30  ;;  %14353 = vst [vmem:[#allocation157_spill] sm:$0xff] %v11405_v54  ;;  %7023 = vlog2.f32 %v3740_v9  ;;  %v3131_v61 = vadd.f32 1.0, %v7010_v21  ;;  %v7018_v35 = vpop.eup %7017  ;;  %v2813_v15 = vadd.f32 1.0, %v7012_v41 }
 0x465   : > { %14354 = vst [vmem:[#allocation158_spill] sm:$0xff] %v11407_v5  ;;  %v11410_v3 = vadd.f32 %v4534_v50, %v11369_v20  ;;  %7025 = vlog2.f32 %v4026_v42  ;;  %v11413_v13 = vadd.f32 %v1350_v57, %v10851_v34  ;;  %v3497_v10 = vmul.f32 0.6931472, %v7004_v0 }
 0x466   : > { %v7020_v28 = vpop.eup %7019  ;;  %7027 = vlog2.f32 %v4028_v1  ;;  %v3133_v44 = vadd.f32 1.0, %v7014_v32  ;;  %v11416_v33 = vadd.f32 %v1399_v46, %v10903_v16  ;;  %v13612_v48 = vrot.slane %v11405_v54, 6 }
 0x467   : > { %14355 = vst [vmem:[#allocation159_spill] sm:$0xff] %v11413_v13  ;;  %v3292_v45 = vmax.f32 %v11213_v27, 0.0  ;;  %v2815_v9 = vadd.f32 1.0, %v7016_v25  ;;  %7029 = vlog2.f32 %v2811_v55  ;;  %v3493_v21 = vmul.f32 0.6931472, %v7002_v52 }
 0x468   : > { %14356 = vst [vmem:[#allocation160_spill] sm:$0xff] %v11416_v33  ;;  %v3501_v43 = vmul.f32 0.6931472, %v7006_v24  ;;  %v3135_v42 = vadd.f32 1.0, %v7018_v35  ;;  %7031 = vlog2.f32 %v3131_v61  ;;  %v3290_v57 = vmax.f32 %v11208_v40, 0.0 }
 0x469   : > { %v7022_v41 = vpop.eup %7021  ;;  %v4030_v12 = vadd.f32 1.0, %v7020_v28  ;;  %7033 = vlog2.f32 %v2813_v15  ;;  %v5407_v0 = vsub.f32 0.0, %v11413_v13  ;;  %v3294_v1 = vmax.f32 %v11219_v58, 0.0  ;;  %v1352_v15 = vpop.f32.mrf.mxu2 }
 0x46a   : > { %v11422_v50 = vpop.eup %7023  ;;  %v11425_v32 = vadd.f32 %v3497_v10, %v3292_v45  ;;  %7035 = vlog2.f32 %v3133_v44  ;;  %v5408_v55 = vsub.f32 0.0, %v11416_v33  ;;  %v14357_v24 = vsub.f32 0.0, %v11333_v14  ;;  %v14359_v14 = vld [vmem:[#allocation103_spill] sm:$0xff] }
 0x46b   : > { %v7026_v52 = vpop.eup %7025  ;;  %v4535_v25 = vsel %vm4511_vm7, %v13611_v38, %v13612_v48  ;;  %v14358_v61 = vsub.f32 0.0, %v11244_v29  ;;  %7037 = vlog2.f32 %v2815_v9  ;;  %v11439_v10 = vadd.f32 %v3493_v21, %v3290_v57 }
 0x46c   : > { %v3609_v46 = vadd.f32 %v14357_v24, %v11139_v4  ;;  %v7028_v28 = vpop.eup %7027  ;;  %v11441_v44 = vadd.f32 %v3501_v43, %v3294_v1  ;;  %7039 = vlog2.f32 %v3135_v42  ;;  %v14360_v4 = vld [vmem:[#allocation110_spill] sm:$0xff]  ;;  %v14361_v36 = vsub.f32 0.0, %v11248_v7 }
 0x46d   : > { %v3866_v35 = vmax.f32 %v14358_v61, 0.0  ;;  %v1948_v45 = vadd.f32 %v14360_v4, %v14359_v14  ;;  %v7030_v24 = vpop.eup %7029  ;;  %v14362_v38 = vsub.f32 0.0, %v11311_v56  ;;  %7041 = vlog2.f32 %v4030_v12  ;;  %v14365_v43 = vld [vmem:[#allocation54_spill] sm:$0xff] }
 0x46e   : > { %v11447_v30 = vmax.f32 %v14361_v36, 0.0  ;;  %v5443_v9 = vmul.f32 1.442695, %v5407_v0  ;;  %v7032_v61 = vpop.eup %7031  ;;  %v5445_v42 = vmul.f32 1.442695, %v5408_v55  ;;  %v11456_v57 = vadd.f32 %v1352_v15, %v10851_v34 }
 0x46f   : > { %v11451_v48 = vmax.f32 %v14362_v38, 0.0  ;;  %v7034_v1 = vpop.eup %7033  ;;  %v11458_v14 = vadd.f32 %v4217_v17, %v3609_v46  ;;  %v11461_v36 = vadd.f32 %v4535_v25, %v11405_v54  ;;  %v11463_v4 = vmul.f32 0.6931472, %v7022_v41  ;;  %v14367_v41 = vld [vmem:[#allocation109_spill] sm:$0xff] }
 0x470   : > { %14363 = vst [vmem:[#allocation103_spill] sm:$0xff] %v11456_v57  ;;  %7043 = vlog2.f32 %v3742_v31  ;;  %v7036_v38 = vpop.eup %7035  ;;  %v4069_v21 = vmul.f32 0.6931472, %v7026_v52  ;;  %v2029_v55 = vadd.f32 %v14365_v43, %v1948_v45  ;;  %v4073_v15 = vmul.f32 0.6931472, %v7028_v28 }
 0x471   : > { %14364 = vst [vmem:[#allocation110_spill] sm:$0xff] %v11458_v14  ;;  %v7038_v33 = vpop.eup %7037  ;;  %v2855_v13 = vmul.f32 0.6931472, %v7030_v24  ;;  %v3175_v39 = vmul.f32 0.6931472, %v7032_v61  ;;  %7045 = vpow2.f32 %v5443_v9  ;;  %v14366_v46 = vsub.f32 0.0, %v11425_v32 }
 0x472   : > { %v7040_v17 = vpop.eup %7039  ;;  %7047 = vpow2.f32 %v5445_v42  ;;  %v5409_v31 = vsub.f32 0.0, %v11456_v57  ;;  %v14368_v14 = vld [vmem:[#allocation112_spill] sm:$0xff]  ;;  %v14369_v52 = vsub.f32 0.0, %v11271_v6  ;;  %v2859_v45 = vmul.f32 0.6931472, %v7034_v1 }
 0x473   : > { %v4284_v25 = vadd.f32 1e-08, %v14366_v46  ;;  %v2108_v12 = vadd.f32 %v14368_v14, %v14367_v41  ;;  %v7042_v22 = vpop.eup %7041  ;;  %v14370_v28 = vsub.f32 0.0, %v11277_v11  ;;  %v3179_v61 = vmul.f32 0.6931472, %v7036_v38 }
 0x474   : > { %v2651_v0 = vmax.f32 %v14369_v52, 0.0  ;;  %v14371_v9 = vsub.f32 0.0, %v11439_v10  ;;  %v14372_v46 = vsub.f32 0.0, %v11441_v44  ;;  %v14374_v57 = vsub.f32 0.0, %v11284_v62 }
 0x475   : > { %v2971_v24 = vmax.f32 %v14370_v28, 0.0  ;;  %v14375_v14 = vsub.f32 0.0, %v11294_v26  ;;  %v2863_v52 = vmul.f32 0.6931472, %v7038_v33  ;;  %v3183_v51 = vmul.f32 0.6931472, %v7040_v17 }
 0x476   : > { %v4282_v43 = vadd.f32 1e-08, %v14371_v9  ;;  %v11481_v42 = vadd.f32 1e-08, %v14372_v46  ;;  %v2653_v5 = vmax.f32 %v14374_v57, 0.0  ;;  %v7044_v6 = vpop.eup %7043  ;;  %v2907_v1 = vadd.f32 %v2855_v13, %v2651_v0 }
 0x477   : > { %v2973_v41 = vmax.f32 %v14375_v14, 0.0  ;;  %v3227_v11 = vadd.f32 %v3175_v39, %v2971_v24  ;;  %v4077_v28 = vmul.f32 0.6931472, %v7042_v22  ;;  %v4122_v38 = vadd.f32 %v4069_v21, %v3866_v35  ;;  %v7046_v37 = vpop.eup %7045  ;;  %v14379_v39 = vld [vmem:[#allocation55_spill] sm:$0xff] }
 0x478   : > { %14373 = vst [vmem:[#allocation54_spill] sm:$0xff] %v11481_v42  ;;  %v4347_v54 = vrot.slane %v4284_v25, 7  ;;  %v2189_v9 = vadd.f32 %v14376_v49, %v2108_v12  ;;  %v14377_v46 = vsub.f32 0.0, %v11300_v60  ;;  %v2909_v47 = vadd.f32 %v2859_v45, %v2653_v5  ;;  %v7048_v14 = vpop.eup %7047  ;;  %v1401_v5 = vpop.f32.mrf.mxu3 }
 0x479   : > { %v14378_v62 = vsub.f32 0.0, %v11306_v18  ;;  %v3229_v26 = vadd.f32 %v3179_v61, %v2973_v41  ;;  %v11493_v33 = vmul.f32 0.6931472, %v11422_v50  ;;  %v11495_v13 = vmul.f32 0.6931472, %v7044_v6  ;;  %v14380_v50 = vld [vmem:[#allocation67_spill] sm:$0xff] }
 0x47a   : > { %v2655_v8 = vmax.f32 %v14377_v46, 0.0  ;;  %v13625_v22 = vrot.slane %v11481_v42, 7  ;;  %v2110_v35 = vadd.f32 %v14379_v39, %v2029_v55  ;;  %v4345_v49 = vrot.slane %v4282_v43, 7 }
 0x47b   : > { %v2975_v57 = vmax.f32 %v14378_v62, 0.0  ;;  %v11499_v60 = vsub.f32 %v2907_v1, %v3227_v11  ;;  %v11503_v0 = vadd.f32 %v4073_v15, %v11447_v30  ;;  %v5447_v17 = vmul.f32 1.442695, %v5409_v31 }
 0x47c   : > { %v2911_v21 = vadd.f32 %v2863_v52, %v2655_v8  ;;  %v11506_v45 = vadd.f32 %v14380_v50, %v2189_v9  ;;  %v11509_v24 = vadd.f32 %v4077_v28, %v11451_v48  ;;  %v4154_v61 = vsub.f32 0.0, %v4122_v38  ;;  %v6335_v38 = vld [vmem:[#allocation16 + $0x30] sm:$0xff] }
 0x47d   : > { %v3231_v12 = vadd.f32 %v3183_v51, %v2975_v57  ;;  %v4385_v8 = vsel %vm1476_vm1, %v4345_v49, %v4347_v54  ;;  %v11513_v51 = vsub.f32 %v2909_v47, %v3229_v26  ;;  %v4383_v55 = vsel %vm1476_vm1, %v4347_v54, %v13625_v22  ;;  %v14382_v47 = vld [vmem:[#allocation60_spill] sm:$0xff]  ;;  %v6343_v50 = vld [vmem:[#allocation16 + $0x70] sm:$0xff] }
 0x47e   : > { %v11521_v30 = vmul.f32 %v14107_v63, %v11251_v53  ;;  %v5503_v15 = vadd.f32 1.0, %v7046_v37  ;;  %v11524_v31 = vadd.f32 %v1401_v5, %v10903_v16  ;;  %v3323_v41 = vand.u32 2147483647, %v11499_v60 }
 0x47f   : > { %v11526_v48 = vsub.f32 %v2911_v21, %v3231_v12  ;;  %v5504_v6 = vadd.f32 1.0, %v7048_v14  ;;  %v2191_v52 = vadd.f32 %v14382_v47, %v2110_v35  ;;  %v14383_v1 = vrot.slane %v11325_v19, 7  ;;  %v14385_v35 = vld [vmem:[#allocation71_spill] sm:$0xff] }
 0x480   : > { %14381 = vst [vmem:[#allocation109_spill] sm:$0xff] %v11524_v31  ;;  %v4443_v11 = vadd.f32 %v4385_v8, %v4284_v25  ;;  %v11536_v28 = vmul.f32 %v14107_v63, %v11260_v23  ;;  %v2302_v37 = vsub.f32 0.0, %v11506_v45  ;;  %v11541_v9 = vadd.f32 %v4383_v55, %v11481_v42  ;;  %v14395_v23 = vld [vmem:[#allocation39_spill] sm:$0xff] }
 0x481   : > { %v4387_v54 = vsel %vm1476_vm1, %v14383_v1, %v4345_v49  ;;  %v11545_v46 = vmul.f32 %v14107_v63, %v11267_v59  ;;  %v3325_v19 = vand.u32 2147483647, %v11513_v51  ;;  %v11548_v62 = vadd.f32 1e-08, %v4154_v61  ;;  %v14387_v1 = vld [vmem:[#allocation34_spill] sm:$0xff] }
 0x482   : > { %14384 = vst [vmem:[#allocation112_spill] sm:$0xff] %v11541_v9  ;;  %v13626_v25 = vsub.f32 0.0, %v11521_v30  ;;  %7049 = vrcp.f32 %v5503_v15  ;;  %v5410_v57 = vsub.f32 0.0, %v11524_v31  ;;  %v11552_v26 = vadd.f32 %v4387_v54, %v4282_v43  ;;  %v6336_v43 = vld [vmem:[#allocation16 + $0x38] sm:$0xff]  ;;  %v6342_v31 = vld [vmem:[#allocation16 + $0x68] sm:$0xff] }
 0x483   : > { %v3327_v14 = vand.u32 2147483647, %v11526_v48  ;;  %v3355_v39 = vsub.f32 0.0, %v3323_v41  ;;  %v11556_v49 = vadd.f32 %v14385_v35, %v2191_v52  ;;  %v4491_v21 = vrot.slane %v4443_v11, 6  ;;  %v6344_v15 = vld [vmem:[#allocation16 + $0x78] sm:$0xff]  ;;  %v14386_v52 = vld [vmem:[#allocation106_spill] sm:$0xff]  ;;  %5775 = vmatpush.bf16.msrb.mxu0 %v6336_v43 }
 0x484   : > { %v13628_v12 = vsub.f32 0.0, %v11536_v28  ;;  %7051 = vrcp.f32 %v5504_v6  ;;  %v2334_v5 = vmul.f32 1.442695, %v2302_v37  ;;  %v3357_v61 = vsub.f32 0.0, %v3325_v19  ;;  %v14388_v35 = vld [vmem:[#allocation25_spill] sm:$0xff]  ;;  %5824 = vmatpush.bf16.msrb.mxu1 %v6344_v15 }
 0x485   : > { %v3675_v8 = vmax.f32 %v11521_v30, 0.0  ;;  %v3677_v47 = vmax.f32 %v11536_v28, 0.0  ;;  %v3899_v41 = vand.u32 2147483647, %v13626_v25  ;;  %v1949_v54 = vadd.f32 %v14387_v1, %v14386_v52  ;;  %v14389_v6 = vld [vmem:[#allocation57_spill] sm:$0xff] }
 0x486   : > { %v2109_v37 = vadd.f32 %v14389_v6, %v14388_v35  ;;  %v4489_v22 = vrot.slane %v11552_v26, 6  ;;  %v3359_v19 = vsub.f32 0.0, %v3327_v14  ;;  %v3398_v18 = vmul.f32 1.442695, %v3355_v39 }
 0x487   : > { %7053 = vpow2.f32 %v5447_v17  ;;  %v3901_v25 = vand.u32 2147483647, %v13628_v12  ;;  %v5449_v59 = vmul.f32 1.442695, %v5410_v57  ;;  %v2304_v52 = vsub.f32 0.0, %v11556_v49  ;;  %v14394_v12 = vld [vmem:[#allocation63_spill] sm:$0xff]  ;;  %5776 = vmatpush.bf16.msrb.mxu0 %v6335_v38 }
 0x488   : > { %v11570_v55 = vpop.eup %7049  ;;  %7055 = vpow2.f32 %v2334_v5  ;;  %v4530_v1 = vsel %vm4511_vm7, %v4489_v22, %v4491_v21  ;;  %v3402_v35 = vmul.f32 1.442695, %v3357_v61  ;;  %v3707_v14 = vadd.f32 0.5, %v3675_v8  ;;  %5825 = vmatpush.bf16.msrb.mxu1 %v6343_v50 }
 0x489   : > { %14390 = vst [vmem:[#allocation113_spill] sm:$0xff] %v11570_v55  ;;  %v14391_v17 = vsub.f32 0.0, %v11545_v46  ;;  %vm3642_vm4 = vcmp.ge.f32.partialorder %v11244_v29, 0.0  ;;  %v14393_v15 = vrot.slane %v11541_v9, 6  ;;  %v3709_v6 = vadd.f32 0.5, %v3677_v47 }
 0x48a   : > { %v11579_v43 = vpop.eup %7051  ;;  %v2030_v5 = vadd.f32 %v14394_v12, %v1949_v54  ;;  %v2190_v42 = vadd.f32 %v14395_v23, %v2109_v37  ;;  %v4158_v61 = vsub.f32 0.0, %v11509_v24  ;;  %7057 = vpow2.f32 %v3398_v18  ;;  %v14400_v37 = vld [vmem:[#allocation66_spill] sm:$0xff] }
 0x48b   : > { %v3903_v39 = vand.u32 2147483647, %v14391_v17  ;;  %14392 = vst [vmem:[#allocation55_spill] sm:$0xff] %v11579_v43  ;;  %v4528_v57 = vsel %vm4511_vm7, %v4491_v21, %v14393_v15  ;;  %v3406_v8 = vmul.f32 1.442695, %v3359_v19  ;;  %v3931_v53 = vsub.f32 0.0, %v3899_v41 }
 0x48c   : > { %v6334_v17 = vld [vmem:[#allocation16 + $0x28] sm:$0xff]  ;;  %v14396_v43 = vrot.slane %v11369_v20, 6  ;;  %v11593_v21 = vadd.f32 %v4530_v1, %v4443_v11  ;;  %v3933_v47 = vsub.f32 0.0, %v3901_v25  ;;  %v2338_v12 = vmul.f32 1.442695, %v2304_v52  ;;  %v14399_v41 = vld [vmem:[#allocation56_spill] sm:$0xff]  ;;  %5826 = vmatpush.bf16.msrb.mxu1 %v6342_v31 }
 0x48d   : > { %v11595_v54 = vpop.eup %7053  ;;  %v11598_v23 = vadd.f32 %v4528_v57, %v11541_v9  ;;  %7059 = vpow2.f32 %v3402_v35  ;;  %v3739_v18 = vadd.f32 1e-08, %v3707_v14  ;;  %v3935_v24 = vsub.f32 0.0, %v3903_v39  ;;  %5777 = vmatpush.bf16.msrb.mxu0 %v6334_v17  ;;  %v6333_v1 = vld [vmem:[#allocation16 + $0x20] sm:$0xff]  ;;  %v14402_v15 = vld [vmem:[#allocation61_spill] sm:$0xff]  ;;  %v6332_v17 = vld [vmem:[#allocation16 + $0x18] sm:$0xff] }
 0x48e   : > { %v4532_v55 = vsel %vm4511_vm7, %v14396_v43, %v4489_v22  ;;  %14397 = vst [vmem:[#allocation67_spill] sm:$0xff] %v11595_v54  ;;  %v7056_v38 = vpop.eup %7055  ;;  %v3741_v50 = vadd.f32 1e-08, %v3709_v6  ;;  %7061 = vpow2.f32 %v5449_v59  ;;  %v2111_v20 = vadd.f32 %v14399_v41, %v2030_v5  ;;  %v6341_v35 = vld [vmem:[#allocation16 + $0x60] sm:$0xff] }
 0x48f   : > { %14398 = vst [vmem:[#allocation60_spill] sm:$0xff] %v11598_v23  ;;  %v11602_v19 = vadd.f32 %v14400_v37, %v2190_v42  ;;  %vm3644_vm5 = vcmp.ge.f32.partialorder %v11248_v7, 0.0  ;;  %v14401_v22 = vsub.f32 0.0, %v11503_v0  ;;  %v11608_v25 = vadd.f32 %v4532_v55, %v11552_v26  ;;  %v1355_v26 = vpop.f32.mrf.mxu2 }
 0x490   : > { %7063 = vpow2.f32 %v3406_v8  ;;  %v3974_v52 = vmul.f32 1.442695, %v3931_v53  ;;  %vm3646_vm6 = vcmp.ge.f32.partialorder %v11311_v56, 0.0  ;;  %v4190_v59 = vadd.f32 1e-08, %v4158_v61  ;;  %v7058_v39 = vpop.eup %7057  ;;  %v1404_v8 = vpop.f32.mrf.mxu3  ;;  %5827 = vmatpush.bf16.msrb.mxu1 %v6341_v35 }
 0x491   : > { %v4188_v11 = vadd.f32 1e-08, %v14401_v22  ;;  %v4636_v42 = vrot.slane %v11593_v21, 4  ;;  %v3978_v14 = vmul.f32 1.442695, %v3933_v47  ;;  %7065 = vpow2.f32 %v2338_v12  ;;  %5778 = vmatpush.bf16.msrb.mxu0 %v6333_v1  ;;  %v6340_v47 = vld [vmem:[#allocation16 + $0x58] sm:$0xff] }
 0x492   : > { %v13633_v0 = vrot.slane %v11598_v23, 4  ;;  %7067 = vlog2.f32 %v3739_v18  ;;  %v3982_v43 = vmul.f32 1.442695, %v3935_v24  ;;  %v2303_v55 = vsub.f32 0.0, %v11602_v19 }
 0x493   : > { %v3679_v53 = vmax.f32 %v11545_v46, 0.0  ;;  %7069 = vlog2.f32 %v3741_v50  ;;  %v2398_v31 = vadd.f32 1.0, %v7056_v38  ;;  %v2192_v57 = vadd.f32 %v14402_v15, %v2111_v20  ;;  %v7060_v6 = vpop.eup %7059 }
 0x494   : > { %v4218_v5 = vsel %vm3642_vm4, %v11463_v4, %v11548_v62  ;;  %v4634_v61 = vrot.slane %v11608_v25, 4  ;;  %7071 = vpow2.f32 %v3974_v52  ;;  %v2336_v12 = vmul.f32 1.442695, %v2303_v55  ;;  %v11621_v18 = vpop.eup %7061  ;;  %5828 = vmatpush.bf16.msrb.mxu1 %v6340_v47 }
 0x495   : > { %14403 = vst [vmem:[#allocation71_spill] sm:$0xff] %v11621_v18  ;;  %v14404_v24 = vsub.f32 0.0, %v11439_v10  ;;  %v14405_v50 = vsub.f32 0.0, %v11425_v32  ;;  %v3451_v4 = vadd.f32 1.0, %v7058_v39  ;;  %7073 = vpow2.f32 %v3978_v14  ;;  %5779 = vmatpush.bf16.msrb.mxu0 %v6332_v17  ;;  %v6339_v14 = vld [vmem:[#allocation16 + $0x50] sm:$0xff] }
 0x496   : > { %v7064_v62 = vpop.eup %7063  ;;  %v14406_v41 = vsub.f32 0.0, %v11441_v44  ;;  %v4673_v37 = vsel %vm4656_vm8, %v4636_v42, %v13633_v0  ;;  %v4675_v10 = vsel %vm4656_vm8, %v4634_v61, %v4636_v42  ;;  %7075 = vpow2.f32 %v3982_v43  ;;  %v6331_v42 = vld [vmem:[#allocation16 + $0x10] sm:$0xff] }
 0x497   : > { %v3610_v38 = vadd.f32 %v14404_v24, %v11208_v40  ;;  %v3612_v29 = vadd.f32 %v14405_v50, %v11213_v27  ;;  %v7066_v40 = vpop.eup %7065  ;;  %v3453_v22 = vadd.f32 1.0, %v7060_v6  ;;  %v3711_v32 = vadd.f32 0.5, %v3679_v53  ;;  %v14407_v27 = vld [vmem:[#allocation84_spill] sm:$0xff] }
 0x498   : > { %v3614_v20 = vadd.f32 %v14406_v41, %v11219_v58  ;;  %7077 = vrcp.f32 %v2398_v31  ;;  %v11639_v52 = vadd.f32 %v14407_v27, %v2192_v57  ;;  %v7068_v1 = vpop.eup %7067  ;;  %v14408_v44 = vrot.slane %v11410_v3, 4  ;;  %5829 = vmatpush.bf16.msrb.mxu1 %v6339_v14  ;;  %v6329_v14 = vld [vmem:[#allocation16] sm:$0xff] }
 0x499   : > { %v11646_v35 = vadd.f32 %v1355_v26, %v10851_v34  ;;  %v2400_v39 = vadd.f32 1.0, %v7066_v40  ;;  %7079 = vpow2.f32 %v2336_v12  ;;  %v7070_v43 = vpop.eup %7069  ;;  %v4220_v55 = vsel %vm3644_vm5, %v11493_v33, %v4188_v11  ;;  %5780 = vmatpush.bf16.msrb.mxu0 %v6331_v42  ;;  %v6338_v12 = vld [vmem:[#allocation16 + $0x48] sm:$0xff] }
 0x49a   : > { %v4677_v58 = vsel %vm4656_vm8, %v14408_v44, %v4634_v61  ;;  %v4733_v53 = vadd.f32 %v4675_v10, %v11593_v21  ;;  %v11653_v31 = vadd.f32 %v4673_v37, %v11598_v23  ;;  %7081 = vlog2.f32 %v3451_v4  ;;  %v7072_v15 = vpop.eup %7071  ;;  %v1406_v10 = vpop.f32.mrf.mxu3 }
 0x49b   : > { %14409 = vst [vmem:[#allocation106_spill] sm:$0xff] %v11646_v35  ;;  %v4222_v26 = vsel %vm3646_vm6, %v11495_v13, %v4190_v59  ;;  %v3455_v57 = vadd.f32 1.0, %v7064_v62  ;;  %v11659_v6 = vadd.f32 %v1404_v8, %v10903_v16  ;;  %7083 = vrcp.f32 %v2400_v39  ;;  %v7074_v61 = vpop.eup %7073  ;;  %v1357_v59 = vpop.f32.mrf.mxu2  ;;  %v6330_v8 = vld [vmem:[#allocation16 + $0x8] sm:$0xff]  ;;  %v6337_v39 = vld [vmem:[#allocation16 + $0x40] sm:$0xff] }
 0x49c   : > { %14410 = vst [vmem:[#allocation34_spill] sm:$0xff] %v11653_v31  ;;  %v11662_v7 = vadd.f32 %v4677_v58, %v11608_v25  ;;  %7085 = vlog2.f32 %v3453_v22  ;;  %v3743_v33 = vadd.f32 1e-08, %v3711_v32  ;;  %v2305_v21 = vsub.f32 0.0, %v11639_v52  ;;  %v7076_v11 = vpop.eup %7075  ;;  %5830 = vmatpush.bf16.msrb.mxu1 %v6338_v12 }
 0x49d   : > { %14411 = vst [vmem:[#allocation25_spill] sm:$0xff] %v11659_v6  ;;  %v11665_v17 = vadd.f32 %v4218_v5, %v3610_v38  ;;  %v11667_v47 = vadd.f32 %v4220_v55, %v3612_v29  ;;  %v11669_v56 = vadd.f32 %v4222_v26, %v3614_v20  ;;  %v5411_v13 = vsub.f32 0.0, %v11646_v35  ;;  %5781 = vmatpush.bf16.msrb.mxu0 %v6330_v8  ;;  %v14419_v55 = vld [vmem:[#allocation102_spill] sm:$0xff] }
 0x49e   : > { %v7078_v25 = vpop.eup %7077  ;;  %v11673_v24 = vadd.f32 %v4733_v53, %v11662_v7  ;;  %v11676_v50 = vadd.f32 %v11653_v31, %v4733_v53  ;;  %v14414_v5 = vsub.f32 0.0, %v11521_v30  ;;  %v14415_v29 = vsub.f32 0.0, %v11536_v28 }
 0x49f   : > { %v7080_v62 = vpop.eup %7079  ;;  %7087 = vlog2.f32 %v3455_v57  ;;  %v14416_v41 = vsub.f32 0.0, %v11545_v46  ;;  %v5412_v37 = vsub.f32 0.0, %v11659_v6  ;;  %v11692_v40 = vmul.f32 %v7078_v25, %v11506_v45  ;;  %v14420_v45 = vld [vmem:[#allocation105_spill] sm:$0xff] }
 0x4a0   : > { %14412 = vst [vmem:[#allocation57_spill] sm:$0xff] %v11673_v24  ;;  %v11680_v38 = vmax.f32 %v14414_v5, 0.0  ;;  %v11684_v4 = vmax.f32 %v14415_v29, 0.0  ;;  %v7082_v22 = vpop.eup %7081  ;;  %v11694_v32 = vmul.f32 0.6931472, %v7068_v1  ;;  %7089 = vlog2.f32 %v3743_v33  ;;  %5831 = vmatpush.bf16.msrb.mxu1 %v6337_v39 }
 0x4a1   : > { %14413 = vst [vmem:[#allocation63_spill] sm:$0xff] %v11676_v50  ;;  %v11688_v20 = vmax.f32 %v14416_v41, 0.0  ;;  %v11697_v27 = vadd.f32 %v1357_v59, %v10851_v34  ;;  %v2340_v44 = vmul.f32 1.442695, %v2305_v21  ;;  %v7084_v58 = vpop.eup %7083  ;;  %v5451_v42 = vmul.f32 1.442695, %v5411_v13  ;;  %5782 = vmatpush.bf16.msrb.mxu0 %v6329_v14 }
 0x4a2   : > { %14417 = vst [vmem:[#allocation39_spill] sm:$0xff] %v11692_v40  ;;  %v11701_v53 = vmul.f32 %v14419_v55, %v11692_v40  ;;  %v11705_v26 = vmul.f32 %v14420_v45, %v11692_v40  ;;  %v2399_v1 = vadd.f32 1.0, %v7080_v62  ;;  %v7086_v57 = vpop.eup %7085  ;;  %v11707_v33 = vmul.f32 0.6931472, %v7070_v43 }
 0x4a3   : > { %14418 = vst [vmem:[#allocation56_spill] sm:$0xff] %v11697_v27  ;;  %v4027_v59 = vadd.f32 1.0, %v7072_v15  ;;  %v11710_v21 = vadd.f32 %v1406_v10, %v10903_v16  ;;  %v11713_v13 = vmul.f32 %v7084_v58, %v11556_v49  ;;  %v4029_v8 = vadd.f32 1.0, %v7074_v61 }
 0x4a4   : > { %v11715_v12 = vmul.f32 1.442695, %v5412_v37  ;;  %v13634_v25 = vsub.f32 0.0, %v11701_v53  ;;  %v13635_v5 = vsub.f32 0.0, %v11705_v26  ;;  %v4031_v29 = vadd.f32 1.0, %v7076_v11 }
 0x4a5   : > { %14421 = vst [vmem:[#allocation66_spill] sm:$0xff] %v11710_v21  ;;  %v11721_v62 = vmul.f32 %v14419_v55, %v11713_v13  ;;  %v11725_v43 = vmul.f32 %v14420_v45, %v11713_v13  ;;  %7091 = vpow2.f32 %v2340_v44  ;;  %v7088_v15 = vpop.eup %7087  ;;  %v3495_v49 = vmul.f32 0.6931472, %v7082_v22 }
 0x4a6   : > { %14422 = vst [vmem:[#allocation61_spill] sm:$0xff] %v11713_v13  ;;  %v3499_v41 = vmul.f32 0.6931472, %v7086_v57  ;;  %v2672_v61 = vand.u32 2147483647, %v13634_v25  ;;  %7093 = vrcp.f32 %v2399_v1  ;;  %v7090_v37 = vpop.eup %7089  ;;  %v3291_v44 = vmax.f32 %v11499_v60, 0.0 }
 0x4a7   : > { %7095 = vlog2.f32 %v4027_v59  ;;  %v13641_v11 = vsub.f32 0.0, %v11721_v62  ;;  %v13643_v10 = vsub.f32 0.0, %v11725_v43  ;;  %v2992_v58 = vand.u32 2147483647, %v13635_v5  ;;  %v1360_v5 = vpop.f32.mrf.mxu2 }
 0x4a8   : > { %v3293_v22 = vmax.f32 %v11513_v51, 0.0  ;;  %v5413_v14 = vsub.f32 0.0, %v11697_v27  ;;  %v2704_v39 = vsub.f32 0.0, %v2672_v61  ;;  %v3503_v57 = vmul.f32 0.6931472, %v7088_v15 }
 0x4a9   : > { %7097 = vlog2.f32 %v4029_v8  ;;  %v2674_v1 = vand.u32 2147483647, %v13641_v11  ;;  %v2994_v59 = vand.u32 2147483647, %v13643_v10  ;;  %v11740_v0 = vadd.f32 %v3495_v49, %v3291_v44  ;;  %v14423_v11 = vld [vmem:[#allocation62_spill] sm:$0xff] }
 0x4aa   : > { %v11742_v25 = vadd.f32 %v3499_v41, %v3293_v22  ;;  %v2736_v31 = vmul.f32 1.442695, %v2704_v39  ;;  %v3024_v23 = vsub.f32 0.0, %v2992_v58  ;;  %7099 = vlog2.f32 %v4031_v29 }
 0x4ab   : > { %v7092_v9 = vpop.eup %7091  ;;  %v5414_v27 = vsub.f32 0.0, %v11710_v21  ;;  %v2706_v61 = vsub.f32 0.0, %v2674_v1  ;;  %v3026_v15 = vsub.f32 0.0, %v2994_v59  ;;  %v3295_v6 = vmax.f32 %v11526_v48, 0.0 }
 0x4ac   : > { %v7094_v8 = vpop.eup %7093  ;;  %v11748_v35 = vmul.f32 %v14423_v11, %v11692_v40  ;;  %7101 = vpow2.f32 %v2736_v31  ;;  %v3056_v49 = vmul.f32 1.442695, %v3024_v23  ;;  %v11751_v44 = vadd.f32 %v1360_v5, %v10851_v34 }
 0x4ad   : > { %v7096_v41 = vpop.eup %7095  ;;  %7103 = vpow2.f32 %v5451_v42  ;;  %v2740_v58 = vmul.f32 1.442695, %v2706_v61  ;;  %v3060_v29 = vmul.f32 1.442695, %v3026_v15  ;;  %v11753_v22 = vadd.f32 %v3503_v57, %v3295_v6 }
 0x4ae   : > { %14424 = vst [vmem:[#allocation84_spill] sm:$0xff] %v11751_v44  ;;  %v13649_v39 = vsub.f32 0.0, %v11740_v0  ;;  %v13650_v1 = vsub.f32 0.0, %v11742_v25  ;;  %7105 = vpow2.f32 %v3056_v49  ;;  %v11757_v10 = vmul.f32 0.6931472, %v7090_v37  ;;  %v14426_v37 = vld [vmem:[#allocation115_spill] sm:$0xff] }
 0x4af   : > { %v7098_v59 = vpop.eup %7097  ;;  %7107 = vpow2.f32 %v2740_v58  ;;  %v2401_v31 = vadd.f32 1.0, %v7092_v9  ;;  %v11760_v23 = vmul.f32 %v7094_v8, %v11602_v19  ;;  %v4071_v42 = vmul.f32 0.6931472, %v7096_v41  ;;  %v14427_v9 = vld [vmem:[#allocation119_spill] sm:$0xff] }
 0x4b0   : > { %v11762_v5 = vmul.f32 1.442695, %v5413_v14  ;;  %7109 = vpow2.f32 %v3060_v29  ;;  %v7100_v57 = vpop.eup %7099  ;;  %v11765_v61 = vmul.f32 1.442695, %v5414_v27  ;;  %v11769_v15 = vmul.f32 %v14423_v11, %v11713_v13 }
 0x4b1   : > { %v11773_v49 = vmul.f32 %v14426_v37, %v11760_v23  ;;  %v11777_v19 = vmul.f32 %v14427_v9, %v11760_v23  ;;  %v4283_v41 = vadd.f32 1e-08, %v13649_v39  ;;  %v11784_v27 = vadd.f32 1e-08, %v13650_v1 }
 0x4b2   : > { %14425 = vst [vmem:[#allocation161_spill] sm:$0xff] %v11765_v61  ;;  %v7102_v14 = vpop.eup %7101  ;;  %v5415_v58 = vsub.f32 0.0, %v11751_v44  ;;  %7111 = vrcp.f32 %v2401_v31  ;;  %v4075_v11 = vmul.f32 0.6931472, %v7098_v59  ;;  %v4079_v8 = vmul.f32 0.6931472, %v7100_v57 }
 0x4b3   : > { %v11787_v29 = vpop.eup %7103  ;;  %v2800_v6 = vadd.f32 1.0, %v7102_v14  ;;  %v13657_v21 = vsub.f32 0.0, %v11773_v49  ;;  %v11792_v45 = vadd.f32 %v4071_v42, %v11680_v38  ;;  %v14429_v39 = vsub.f32 0.0, %v11748_v35 }
 0x4b4   : > { %14428 = vst [vmem:[#allocation162_spill] sm:$0xff] %v11787_v29  ;;  %v7106_v40 = vpop.eup %7105  ;;  %v14430_v13 = vsub.f32 0.0, %v11753_v22  ;;  %v4346_v59 = vrot.slane %v4283_v41, 7  ;;  %v14432_v38 = vsub.f32 0.0, %v11777_v19  ;;  %v11809_v29 = vmul.f32 1.442695, %v5415_v58 }
 0x4b5   : > { %v3888_v1 = vand.u32 2147483647, %v14429_v39  ;;  %v7108_v55 = vpop.eup %7107  ;;  %7113 = vlog2.f32 %v2800_v6  ;;  %v3120_v44 = vadd.f32 1.0, %v7106_v40  ;;  %v2673_v31 = vand.u32 2147483647, %v13657_v21 }
 0x4b6   : > { %v7110_v14 = vpop.eup %7109  ;;  %v11801_v34 = vadd.f32 1e-08, %v14430_v13  ;;  %v2802_v57 = vadd.f32 1.0, %v7108_v55  ;;  %v2993_v42 = vand.u32 2147483647, %v14432_v38  ;;  %v4348_v39 = vrot.slane %v11784_v27, 7 }
 0x4b7   : > { %v3122_v16 = vadd.f32 1.0, %v7110_v14  ;;  %7115 = vlog2.f32 %v3120_v44  ;;  %v2705_v40 = vsub.f32 0.0, %v2673_v31  ;;  %v11807_v6 = vadd.f32 %v4075_v11, %v11684_v4  ;;  %14433 = vst [vmem:[#allocation164_spill] sm:$0xff] %v11809_v29  ;;  %v14435_v31 = vld [vmem:[#allocation154_spill] sm:$0xff] }
 0x4b8   : > { %14431 = vst [vmem:[#allocation163_spill] sm:$0xff] %v11801_v34  ;;  %7117 = vlog2.f32 %v2802_v57  ;;  %v3920_v21 = vsub.f32 0.0, %v3888_v1  ;;  %v7112_v18 = vpop.eup %7111  ;;  %v14434_v13 = vsub.f32 0.0, %v11769_v15  ;;  %v3025_v54 = vsub.f32 0.0, %v2993_v42 }
 0x4b9   : > { %7119 = vlog2.f32 %v3122_v16  ;;  %v2738_v61 = vmul.f32 1.442695, %v2705_v40  ;;  %v11814_v38 = vadd.f32 %v4079_v8, %v11688_v20  ;;  %v4155_v44 = vsub.f32 0.0, %v11792_v45 }
 0x4ba   : > { %v3890_v55 = vand.u32 2147483647, %v14434_v13  ;;  %v14436_v14 = vrot.slane %v14435_v31, 7  ;;  %v11822_v11 = vmul.f32 %v7112_v18, %v11639_v52  ;;  %v4386_v58 = vsel %vm1476_vm1, %v4346_v59, %v4348_v39 }
 0x4bb   : > { %v7114_v1 = vpop.eup %7113  ;;  %v14437_v57 = vsub.f32 0.0, %v11701_v53  ;;  %7121 = vpow2.f32 %v2738_v61  ;;  %v3952_v45 = vmul.f32 1.442695, %v3920_v21  ;;  %v14438_v13 = vsub.f32 0.0, %v11705_v26 }
 0x4bc   : > { %v4388_v4 = vsel %vm1476_vm1, %v14436_v14, %v4346_v59  ;;  %v2833_v8 = vmul.f32 0.6931472, %v7114_v1  ;;  %v11831_v42 = vmul.f32 %v14426_v37, %v11822_v11  ;;  %v11835_v18 = vmul.f32 %v14427_v9, %v11822_v11 }
 0x4bd   : > { %v2640_v20 = vmax.f32 %v14437_v57, 0.0  ;;  %v7116_v52 = vpop.eup %7115  ;;  %v11837_v40 = vadd.f32 %v4388_v4, %v4283_v41  ;;  %v2960_v59 = vmax.f32 %v14438_v13, 0.0  ;;  %v3922_v31 = vsub.f32 0.0, %v3890_v55 }
 0x4be   : > { %v3058_v53 = vmul.f32 1.442695, %v3025_v54  ;;  %v7118_v14 = vpop.eup %7117  ;;  %v3153_v1 = vmul.f32 0.6931472, %v7116_v52  ;;  %v2611_v21 = vsub.f32 0.0, %v11831_v42  ;;  %v14439_v37 = vrot.slane %v11801_v34, 7 }
 0x4bf   : > { %v2896_v61 = vadd.f32 %v2833_v8, %v2640_v20  ;;  %v7120_v16 = vpop.eup %7119  ;;  %v14440_v41 = vsub.f32 0.0, %v11721_v62  ;;  %v2837_v26 = vmul.f32 0.6931472, %v7118_v14  ;;  %v14441_v55 = vsub.f32 0.0, %v11725_v43 }
 0x4c0   : > { %v4384_v9 = vsel %vm1476_vm1, %v4348_v39, %v14439_v37  ;;  %v3157_v13 = vmul.f32 0.6931472, %v7120_v16  ;;  %v3216_v20 = vadd.f32 %v3153_v1, %v2960_v59  ;;  %7123 = vpow2.f32 %v3952_v45 }
 0x4c1   : > { %v2642_v4 = vmax.f32 %v14440_v41, 0.0  ;;  %v2962_v54 = vmax.f32 %v14441_v55, 0.0  ;;  %v2675_v8 = vand.u32 2147483647, %v2611_v21  ;;  %v7122_v52 = vpop.eup %7121  ;;  %vm3643_vm9 = vcmp.ge.f32.partialorder %v11521_v30, 0.0 }
 0x4c2   : > { %v3956_v29 = vmul.f32 1.442695, %v3922_v31  ;;  %v14442_v37 = vsub.f32 0.0, %v11835_v18  ;;  %7125 = vpow2.f32 %v3058_v53  ;;  %vm3645_vm10 = vcmp.ge.f32.partialorder %v11536_v28, 0.0 }
 0x4c3   : > { %v2898_v57 = vadd.f32 %v2837_v26, %v2642_v4  ;;  %v3218_v62 = vadd.f32 %v3157_v13, %v2962_v54  ;;  %v11857_v43 = vsub.f32 %v2896_v61, %v3216_v20  ;;  %v2707_v16 = vsub.f32 0.0, %v2675_v8 }
 0x4c4   : > { %v2995_v39 = vand.u32 2147483647, %v14442_v37  ;;  %v2801_v59 = vadd.f32 1.0, %v7122_v52  ;;  %vm3647_vm11 = vcmp.ge.f32.partialorder %v11545_v46, 0.0  ;;  %v4157_v45 = vsub.f32 0.0, %v11807_v6 }
 0x4c5   : > { %v4159_v14 = vsub.f32 0.0, %v11814_v38  ;;  %v4444_v1 = vadd.f32 %v4386_v58, %v11784_v27  ;;  %v11864_v41 = vadd.f32 %v4384_v9, %v11801_v34  ;;  %7127 = vpow2.f32 %v11715_v12 }
 0x4c6   : > { %v3027_v31 = vsub.f32 0.0, %v2995_v39  ;;  %v11867_v53 = vsub.f32 %v2898_v57, %v3218_v62  ;;  %v3312_v61 = vand.u32 2147483647, %v11857_v43  ;;  %v4490_v4 = vrot.slane %v11837_v40, 6  ;;  %v7124_v6 = vpop.eup %7123  ;;  %v14445_v39 = vld [vmem:[#allocation157_spill] sm:$0xff] }
 0x4c7   : > { %14443 = vst [vmem:[#allocation154_spill] sm:$0xff] %v11864_v41  ;;  %v2742_v26 = vmul.f32 1.442695, %v2707_v16  ;;  %7129 = vlog2.f32 %v2801_v59  ;;  %v4187_v54 = vadd.f32 1e-08, %v4155_v44  ;;  %v4492_v20 = vrot.slane %v4444_v1, 6 }
 0x4c8   : > { %v3062_v55 = vmul.f32 1.442695, %v3027_v31  ;;  %v3314_v38 = vand.u32 2147483647, %v11867_v53  ;;  %v3344_v27 = vsub.f32 0.0, %v3312_v61  ;;  %7131 = vpow2.f32 %v3956_v29  ;;  %v7126_v58 = vpop.eup %7125 }
 0x4c9   : > { %v4189_v9 = vadd.f32 1e-08, %v4157_v45  ;;  %v4191_v13 = vadd.f32 1e-08, %v4159_v14  ;;  %7133 = vpow2.f32 %v2742_v26  ;;  %v13660_v12 = vrot.slane %v11864_v41, 6 }
 0x4ca   : > { %v3346_v57 = vsub.f32 0.0, %v3314_v38  ;;  %v3376_v8 = vmul.f32 1.442695, %v3344_v27  ;;  %7135 = vpow2.f32 %v3062_v55  ;;  %v14444_v52 = vsub.f32 0.0, %v11740_v0 }
 0x4cb   : > { %v14446_v44 = vrot.slane %v14445_v39, 6  ;;  %7137 = vpow2.f32 %v11762_v5  ;;  %v3121_v29 = vadd.f32 1.0, %v7126_v58  ;;  %v11881_v16 = vpop.eup %7127  ;;  %v4219_v59 = vsel %vm3643_vm9, %v11694_v32, %v4187_v54 }
 0x4cc   : > { %v3611_v37 = vadd.f32 %v14444_v52, %v11499_v60  ;;  %7139 = vpow2.f32 %v3376_v8  ;;  %v3380_v45 = vmul.f32 1.442695, %v3346_v57  ;;  %v11888_v0 = vmul.f32 %v14107_v63, %v11760_v23 }
 0x4cd   : > { %v4533_v62 = vsel %vm4511_vm7, %v14446_v44, %v4490_v4  ;;  %v7130_v60 = vpop.eup %7129  ;;  %v4221_v14 = vsel %vm3645_vm10, %v11707_v33, %v4189_v9  ;;  %v4531_v5 = vsel %vm4511_vm7, %v4490_v4, %v4492_v20  ;;  %v4016_v31 = vadd.f32 1.0, %v7124_v6 }
 0x4ce   : > { %7141 = vlog2.f32 %v3121_v29  ;;  %v7132_v61 = vpop.eup %7131  ;;  %v4223_v30 = vsel %vm3647_vm11, %v11757_v10, %v4191_v13  ;;  %v4529_v32 = vsel %vm4511_vm7, %v4492_v20, %v13660_v12  ;;  %v11903_v26 = vadd.f32 %v4533_v62, %v11837_v40 }
 0x4cf   : > { %7143 = vpow2.f32 %v3380_v45  ;;  %v7134_v28 = vpop.eup %7133  ;;  %v14447_v33 = vsub.f32 0.0, %v11742_v25  ;;  %v14448_v55 = vsub.f32 0.0, %v11753_v22  ;;  %v11911_v46 = vadd.f32 %v4219_v59, %v3611_v37 }
 0x4d0   : > { %v3664_v10 = vmax.f32 %v11748_v35, 0.0  ;;  %v7136_v54 = vpop.eup %7135  ;;  %v11914_v38 = vadd.f32 %v4531_v5, %v4444_v1  ;;  %v2803_v27 = vadd.f32 1.0, %v7134_v28  ;;  %v2835_v40 = vmul.f32 0.6931472, %v7130_v60 }
 0x4d1   : > { %v3613_v4 = vadd.f32 %v14447_v33, %v11513_v51  ;;  %v3615_v6 = vadd.f32 %v14448_v55, %v11526_v48  ;;  %v13662_v58 = vsub.f32 0.0, %v11888_v0  ;;  %v11917_v9 = vpop.eup %7137  ;;  %v11920_v25 = vadd.f32 %v4529_v32, %v11864_v41 }
 0x4d2   : > { %7145 = vlog2.f32 %v4016_v31  ;;  %v11924_v51 = vmul.f32 %v14107_v63, %v11822_v11  ;;  %v3123_v48 = vadd.f32 1.0, %v7136_v54  ;;  %v7140_v22 = vpop.eup %7139  ;;  %v4635_v13 = vrot.slane %v11903_v26, 4 }
 0x4d3   : > { %14449 = vst [vmem:[#allocation157_spill] sm:$0xff] %v11920_v25  ;;  %v4018_v1 = vadd.f32 1.0, %v7132_v61  ;;  %v14450_v20 = vsub.f32 0.0, %v11773_v49  ;;  %7147 = vlog2.f32 %v2803_v27  ;;  %v3440_v52 = vadd.f32 1.0, %v7140_v22 }
 0x4d4   : > { %v7142_v8 = vpop.eup %7141  ;;  %v3666_v37 = vmax.f32 %v11769_v15, 0.0  ;;  %v3696_v39 = vadd.f32 0.5, %v3664_v10  ;;  %7149 = vlog2.f32 %v3123_v48  ;;  %v14451_v29 = vsub.f32 0.0, %v11777_v19 }
 0x4d5   : > { %v2641_v57 = vmax.f32 %v14450_v20, 0.0  ;;  %v7144_v44 = vpop.eup %7143  ;;  %v3155_v45 = vmul.f32 0.6931472, %v7142_v8  ;;  %v3889_v60 = vand.u32 2147483647, %v13662_v58  ;;  %v11934_v5 = vadd.f32 %v4221_v14, %v3613_v4 }
 0x4d6   : > { %v2961_v59 = vmax.f32 %v14451_v29, 0.0  ;;  %v3442_v49 = vadd.f32 1.0, %v7144_v44  ;;  %7151 = vlog2.f32 %v3440_v52  ;;  %v13661_v31 = vsub.f32 0.0, %v11924_v51  ;;  %v14457_v29 = vld [vmem:[#allocation44_spill] sm:$0xff] }
 0x4d7   : > { %v2897_v62 = vadd.f32 %v2835_v40, %v2641_v57  ;;  %v11937_v61 = vadd.f32 %v4223_v30, %v3615_v6  ;;  %v13663_v32 = vrot.slane %v11914_v38, 4  ;;  %7153 = vlog2.f32 %v4018_v1 }
 0x4d8   : > { %v3217_v28 = vadd.f32 %v3155_v45, %v2961_v59  ;;  %v7146_v33 = vpop.eup %7145  ;;  %v14452_v55 = vrot.slane %v11461_v36, 4  ;;  %7155 = vlog2.f32 %v3442_v49  ;;  %v3698_v4 = vadd.f32 0.5, %v3666_v37 }
 0x4d9   : > { %v7148_v10 = vpop.eup %7147  ;;  %v3728_v54 = vadd.f32 1e-08, %v3696_v39  ;;  %v14453_v30 = vsub.f32 0.0, %v11748_v35  ;;  %v3921_v40 = vsub.f32 0.0, %v3889_v60  ;;  %v14454_v22 = vsub.f32 0.0, %v11769_v15 }
 0x4da   : > { %v4678_v14 = vsel %vm4656_vm8, %v14452_v55, %v4635_v13  ;;  %v11949_v27 = vsub.f32 %v2897_v62, %v3217_v28  ;;  %v7150_v48 = vpop.eup %7149  ;;  %v2643_v20 = vmax.f32 %v2611_v21, 0.0  ;;  %v2839_v57 = vmul.f32 0.6931472, %v7148_v10  ;;  %v14456_v62 = vld [vmem:[#allocation35_spill] sm:$0xff] }
 0x4db   : > { %v3856_v6 = vmax.f32 %v14453_v30, 0.0  ;;  %v3858_v1 = vmax.f32 %v14454_v22, 0.0  ;;  %v3891_v8 = vand.u32 2147483647, %v13661_v31  ;;  %v14455_v52 = vsub.f32 0.0, %v11835_v18 }
 0x4dc   : > { %v3159_v39 = vmul.f32 0.6931472, %v7150_v48  ;;  %v3313_v44 = vand.u32 2147483647, %v11949_v27  ;;  %v1883_v59 = vadd.f32 %v14457_v29, %v14456_v62  ;;  %v7152_v45 = vpop.eup %7151  ;;  %v3280_v60 = vmax.f32 %v11857_v43, 0.0 }
 0x4dd   : > { %v2963_v37 = vmax.f32 %v14455_v52, 0.0  ;;  %v3730_v49 = vadd.f32 1e-08, %v3698_v4  ;;  %v4049_v28 = vmul.f32 0.6931472, %v7146_v33  ;;  %v2899_v42 = vadd.f32 %v2839_v57, %v2643_v20  ;;  %v7154_v21 = vpop.eup %7153  ;;  %v14458_v52 = vld [vmem:[#allocation37_spill] sm:$0xff] }
 0x4de   : > { %v3473_v55 = vmul.f32 0.6931472, %v7152_v45  ;;  %v3345_v30 = vsub.f32 0.0, %v3313_v44  ;;  %v3954_v22 = vmul.f32 1.442695, %v3921_v40  ;;  %v7156_v12 = vpop.eup %7155  ;;  %v3282_v18 = vmax.f32 %v11867_v53, 0.0 }
 0x4df   : > { %v3219_v10 = vadd.f32 %v3159_v39, %v2963_v37  ;;  %7157 = vlog2.f32 %v3728_v54  ;;  %v3923_v48 = vsub.f32 0.0, %v3891_v8  ;;  %v1964_v31 = vadd.f32 %v14458_v52, %v1883_v59  ;;  %v14459_v57 = vld [vmem:[#allocation69_spill] sm:$0xff]  ;;  %v14460_v8 = vld [vmem:[#allocation118_spill] sm:$0xff]  ;;  %v14461_v44 = vld [vmem:[#allocation48_spill] sm:$0xff] }
 0x4e0   : > { %v3477_v58 = vmul.f32 0.6931472, %v7156_v12  ;;  %v11965_v62 = vadd.f32 %v3473_v55, %v3280_v60  ;;  %v3378_v4 = vmul.f32 1.442695, %v3345_v30  ;;  %7159 = vlog2.f32 %v3730_v49  ;;  %v14462_v45 = vld [vmem:[#allocation73_spill] sm:$0xff]  ;;  %v14463_v55 = vld [vmem:[#allocation38_spill] sm:$0xff] }
 0x4e1   : > { %v11967_v29 = vsub.f32 %v2899_v42, %v3219_v10  ;;  %v4053_v33 = vmul.f32 0.6931472, %v7154_v21  ;;  %v4112_v20 = vadd.f32 %v4049_v28, %v3856_v6  ;;  %v2045_v37 = vadd.f32 %v14459_v57, %v1964_v31  ;;  %v14464_v30 = vld [vmem:[#allocation64_spill] sm:$0xff] }
 0x4e2   : > { %v11970_v39 = vadd.f32 %v3477_v58, %v3282_v18  ;;  %v13665_v40 = vsub.f32 0.0, %v11965_v62  ;;  %7161 = vpow2.f32 %v3954_v22  ;;  %v3665_v12 = vmax.f32 %v11888_v0, 0.0 }
 0x4e3   : > { %v3315_v54 = vand.u32 2147483647, %v11967_v29  ;;  %7163 = vpow2.f32 %v3378_v4  ;;  %v2124_v59 = vadd.f32 %v14461_v44, %v14460_v8  ;;  %v2126_v60 = vadd.f32 %v14462_v45, %v2045_v37  ;;  %v14465_v8 = vld [vmem:[#allocation32_spill] sm:$0xff] }
 0x4e4   : > { %v13664_v49 = vsub.f32 0.0, %v11970_v39  ;;  %v4272_v31 = vadd.f32 1e-08, %v13665_v40  ;;  %v3958_v6 = vmul.f32 1.442695, %v3923_v48  ;;  %v4114_v42 = vadd.f32 %v4053_v33, %v3858_v1 }
 0x4e5   : > { %v3347_v58 = vsub.f32 0.0, %v3315_v54  ;;  %v7158_v28 = vpop.eup %7157  ;;  %v4144_v21 = vsub.f32 0.0, %v4112_v20  ;;  %v11982_v10 = vadd.f32 %v14463_v55, %v2124_v59  ;;  %v11985_v22 = vadd.f32 %v14464_v30, %v2126_v60 }
 0x4e6   : > { %v11993_v18 = vsel %vm4656_vm8, %v4635_v13, %v13663_v32  ;;  %v4274_v48 = vadd.f32 1e-08, %v13664_v49  ;;  %vm4319_vm12 = vcmp.ge.s32.totalorder %v8570_v2, 1  ;;  %v4335_v1 = vrot.slane %v4272_v31, 7  ;;  %v7160_v52 = vpop.eup %7159 }
 0x4e7   : > { %v11999_v4 = vadd.f32 %v4678_v14, %v11903_v26  ;;  %vm3632_vm13 = vcmp.ge.f32.partialorder %v11748_v35, 0.0  ;;  %v3382_v33 = vmul.f32 1.442695, %v3347_v58  ;;  %v3697_v20 = vadd.f32 0.5, %v3665_v12  ;;  %v14467_v14 = vld [vmem:[#allocation94_spill] sm:$0xff] }
 0x4e8   : > { %v7162_v57 = vpop.eup %7161  ;;  %v3761_v37 = vmul.f32 0.6931472, %v7158_v28  ;;  %v4337_v54 = vrot.slane %v4274_v48, 7  ;;  %v14466_v13 = vrot.slane %v14465_v8, 7  ;;  %7165 = vpow2.f32 %v3958_v6 }
 0x4e9   : > { %v7164_v59 = vpop.eup %7163  ;;  %v4146_v45 = vsub.f32 0.0, %v4114_v42  ;;  %v4176_v60 = vadd.f32 1e-08, %v4144_v21  ;;  %7167 = vpow2.f32 %v3382_v33  ;;  %v14468_v55 = vrot.slane %v14467_v14, 7 }
 0x4ea   : > { %v4397_v44 = vsel %vm1476_vm1, %v14466_v13, %v4335_v1  ;;  %v4395_v58 = vsel %vm1476_vm1, %v4335_v1, %v4337_v54  ;;  %v3441_v30 = vadd.f32 1.0, %v7164_v59  ;;  %v3765_v8 = vmul.f32 0.6931472, %v7160_v52  ;;  %v14469_v52 = vld [vmem:[#allocation40_spill] sm:$0xff]  ;;  %v14471_v59 = vld [vmem:[#allocation127_spill] sm:$0xff] }
 0x4eb   : > { %v4399_v26 = vsel %vm4319_vm12, %v4397_v44, 0.0  ;;  %v4393_v12 = vsel %vm1476_vm1, %v4337_v54, %v14468_v55  ;;  %v4433_v13 = vadd.f32 %v4395_v58, %v4274_v48  ;;  %v12015_v42 = vadd.f32 1e-08, %v3697_v20 }
 0x4ec   : > { %v4431_v28 = vadd.f32 %v4399_v26, %v4272_v31  ;;  %v4435_v6 = vadd.f32 %v4393_v12, %v14467_v14  ;;  %vm4463_vm14 = vcmp.ge.s32.totalorder %v8570_v2, 2  ;;  %7169 = vlog2.f32 %v3441_v30  ;;  %v14472_v12 = vld [vmem:[#allocation152_spill] sm:$0xff] }
 0x4ed   : > { %vm3634_vm15 = vcmp.ge.f32.partialorder %v11769_v15, 0.0  ;;  %v4178_v44 = vadd.f32 1e-08, %v4146_v45  ;;  %v4481_v55 = vrot.slane %v4433_v13, 6  ;;  %v4017_v1 = vadd.f32 1.0, %v7162_v57 }
 0x4ee   : > { %v4479_v21 = vrot.slane %v4431_v28, 6  ;;  %v4483_v32 = vrot.slane %v4435_v6, 6  ;;  %v7166_v31 = vpop.eup %7165  ;;  %v4208_v48 = vsel %vm3632_vm13, %v3761_v37, %v4176_v60  ;;  %v14470_v54 = vrot.slane %v14469_v52, 6 }
 0x4ef   : > { %vm4608_vm0 = vcmp.ge.s32.totalorder %v8570_v2, 4  ;;  %v7168_v14 = vpop.eup %7167  ;;  %v14473_v58 = vrot.slane %v14472_v12, 6  ;;  %v3281_v33 = vmax.f32 %v11949_v27, 0.0  ;;  %v4019_v26 = vadd.f32 1.0, %v7166_v31 }
 0x4f0   : > { %v4542_v20 = vsel %vm4511_vm7, %v14470_v54, %v4479_v21  ;;  %v4538_v57 = vsel %vm4511_vm7, %v4481_v55, %v4483_v32  ;;  %v4540_v35 = vsel %vm4511_vm7, %v4479_v21, %v4481_v55  ;;  %v3443_v19 = vadd.f32 1.0, %v7168_v14 }
 0x4f1   : > { %v4536_v45 = vsel %vm4511_vm7, %v4483_v32, %v14473_v58  ;;  %v4544_v37 = vsel %vm4463_vm14, %v4542_v20, 0.0  ;;  %v4578_v30 = vadd.f32 %v4540_v35, %v4433_v13  ;;  %v4580_v52 = vadd.f32 %v4538_v57, %v4435_v6 }
 0x4f2   : > { %v4576_v60 = vadd.f32 %v4544_v37, %v4431_v28  ;;  %v4582_v54 = vadd.f32 %v4536_v45, %v14472_v12  ;;  %7171 = vlog2.f32 %v4017_v1  ;;  %v7170_v58 = vpop.eup %7169  ;;  %v14474_v21 = vsub.f32 0.0, %v11965_v62 }
 0x4f3   : > { %v4626_v40 = vrot.slane %v4578_v30, 4  ;;  %v4628_v32 = vrot.slane %v4580_v52, 4  ;;  %v14475_v28 = vsub.f32 0.0, %v11970_v39  ;;  %v3475_v6 = vmul.f32 0.6931472, %v7170_v58 }
 0x4f4   : > { %v4624_v49 = vrot.slane %v4576_v60, 4  ;;  %v4630_v41 = vrot.slane %v4582_v54, 4  ;;  %v3600_v55 = vadd.f32 %v14474_v21, %v11857_v43  ;;  %7173 = vlog2.f32 %v3443_v19 }
 0x4f5   : > { %v3602_v13 = vadd.f32 %v14475_v28, %v11867_v53  ;;  %v14476_v20 = vrot.slane %v11410_v3, 4  ;;  %v4683_v14 = vsel %vm4656_vm8, %v4626_v40, %v4628_v32  ;;  %v14477_v62 = vrot.slane %v14471_v59, 4  ;;  %v14485_v28 = vld [vmem:[#allocation36_spill] sm:$0xff] }
 0x4f6   : > { %v4681_v31 = vsel %vm4656_vm8, %v4628_v32, %v4630_v41  ;;  %v4685_v43 = vsel %vm4656_vm8, %v4624_v49, %v4626_v40  ;;  %v4725_v39 = vadd.f32 %v4683_v14, %v4580_v52  ;;  %v4210_v45 = vsel %vm3634_vm15, %v3765_v8, %v4178_v44 }
 0x4f7   : > { %v4679_v1 = vsel %vm4656_vm8, %v4630_v41, %v14476_v20  ;;  %v4687_v53 = vsel %vm4656_vm8, %v14477_v62, %v4624_v49  ;;  %v4723_v19 = vadd.f32 %v4685_v43, %v4578_v30  ;;  %v4727_v12 = vadd.f32 %v4681_v31, %v4582_v54 }
 0x4f8   : > { %v4689_v41 = vsel %vm4608_vm0, %v4687_v53, 0.0  ;;  %v4729_v57 = vadd.f32 %v4679_v1, %v11410_v3  ;;  %v12065_v35 = vadd.f32 %v3475_v6, %v3281_v33  ;;  %v7172_v37 = vpop.eup %7171  ;;  %7175 = vlog2.f32 %v4019_v26 }
 0x4f9   : > { %v12067_v40 = vadd.f32 %v4689_v41, %v4576_v60  ;;  %v4805_v58 = vadd.f32 %v4725_v39, %v4723_v19  ;;  %v4807_v32 = vadd.f32 %v4727_v12, %v4725_v39  ;;  %v4240_v49 = vadd.f32 %v4208_v48, %v3600_v55 }
 0x4fa   : > { %v4809_v30 = vadd.f32 %v4729_v57, %v4727_v12  ;;  %v4811_v52 = vadd.f32 %v11662_v7, %v4729_v57  ;;  %v3283_v15 = vmax.f32 %v11967_v29, 0.0  ;;  %v7174_v8 = vpop.eup %7173  ;;  %v4242_v44 = vadd.f32 %v4210_v45, %v3602_v13 }
 0x4fb   : > { %14478 = vst [vmem:[#allocation35_spill] sm:$0xff] %v12067_v40  ;;  %v12072_v54 = vadd.f32 %v4723_v19, %v12067_v40  ;;  %v12075_v3 = vadd.f32 %v4805_v58, %v12067_v40  ;;  %v13668_v33 = vsub.f32 0.0, %v12065_v35  ;;  %v12086_v7 = vsub.f32 %v4240_v49, %v12067_v40 }
 0x4fc   : > { %v12078_v60 = vadd.f32 %v4809_v30, %v4805_v58  ;;  %v12080_v21 = vadd.f32 %v4811_v52, %v4807_v32  ;;  %v12083_v48 = vadd.f32 %v11673_v24, %v4809_v30  ;;  %v3479_v6 = vmul.f32 0.6931472, %v7174_v8  ;;  %v14494_v58 = vld [vmem:[#allocation147_spill] sm:$0xff] }
 0x4fd   : > { %14479 = vst [vmem:[#allocation44_spill] sm:$0xff] %v12072_v54  ;;  %v12089_v26 = vadd.f32 %v4807_v32, %v12072_v54  ;;  %v12092_v55 = vsub.f32 %v4242_v44, %v12072_v54  ;;  %v12096_v13 = vsub.f32 %v14485_v28, %v12075_v3  ;;  %v14486_v20 = vrot.slane %v11920_v25, 4  ;;  %v14497_v28 = vld [vmem:[#allocation158_spill] sm:$0xff] }
 0x4fe   : > { %14480 = vst [vmem:[#allocation37_spill] sm:$0xff] %v12075_v3  ;;  %v14487_v1 = vrot.slane %v11914_v38, 4  ;;  %v4734_v14 = vadd.f32 %v11993_v18, %v11914_v38  ;;  %v12107_v43 = vadd.f32 %v11676_v50, %v4811_v52  ;;  %v4051_v62 = vmul.f32 0.6931472, %v7172_v37  ;;  %v7176_v53 = vpop.eup %7175 }
 0x4ff   : > { %14481 = vst [vmem:[#allocation69_spill] sm:$0xff] %v12078_v60  ;;  %v12111_v19 = vadd.f32 %v12078_v60, %v12067_v40  ;;  %v5105_v39 = vmax.f32 %v12086_v7, %v12092_v55  ;;  %v12115_v12 = vadd.f32 %v3479_v6, %v3283_v15  ;;  %v14490_v45 = vsub.f32 0.0, %v11888_v0 }
 0x500   : > { %14482 = vst [vmem:[#allocation118_spill] sm:$0xff] %v12080_v21  ;;  %v4674_v31 = vsel %vm4656_vm8, %v14487_v1, %v14486_v20  ;;  %v12121_v38 = vadd.f32 %v12080_v21, %v12072_v54  ;;  %v12125_v18 = vadd.f32 %v12083_v48, %v12075_v3  ;;  %v14493_v57 = vmax.f32 %v11924_v51, 0.0  ;;  %v7522_v3 = vld [vmem:[#allocation11 + $0x410] sm:$0xff]  ;;  %v14506_v54 = vld [vmem:[#allocation88_spill] sm:$0xff] }
 0x501   : > { %14483 = vst [vmem:[#allocation48_spill] sm:$0xff] %v12083_v48  ;;  %v3857_v41 = vmax.f32 %v14490_v45, 0.0  ;;  %7177 = vlog2.f32 %v12015_v42  ;;  %v12132_v32 = vsub.f32 %v14494_v58, %v12089_v26  ;;  %v5106_v49 = vmax.f32 %v5105_v39, %v12096_v13  ;;  %v14514_v48 = vld [vmem:[#allocation41_spill] sm:$0xff] }
 0x502   : > { %14484 = vst [vmem:[#allocation73_spill] sm:$0xff] %v12089_v26  ;;  %v3699_v37 = vadd.f32 0.5, %v14493_v57  ;;  %v13667_v30 = vsub.f32 0.0, %v12115_v12  ;;  %v4273_v52 = vadd.f32 1e-08, %v13668_v33  ;;  %v12139_v15 = vadd.f32 %v4674_v31, %v11920_v25 }
 0x503   : > { %14488 = vst [vmem:[#allocation38_spill] sm:$0xff] %v12107_v43  ;;  %v12143_v8 = vadd.f32 %v12107_v43, %v12089_v26  ;;  %v4055_v44 = vmul.f32 0.6931472, %v7176_v53  ;;  %v4113_v42 = vadd.f32 %v4051_v62, %v3857_v41  ;;  %v12147_v6 = vsub.f32 %v14497_v28, %v12111_v19  ;;  %v14500_v28 = vld [vmem:[#allocation96_spill] sm:$0xff] }
 0x504   : > { %14489 = vst [vmem:[#allocation64_spill] sm:$0xff] %v12111_v19  ;;  %v5107_v20 = vmax.f32 %v5106_v49, %v12132_v32  ;;  %v4275_v1 = vadd.f32 1e-08, %v13667_v30  ;;  %v4336_v39 = vrot.slane %v4273_v52, 7  ;;  %v12153_v45 = vadd.f32 %v4734_v14, %v11999_v4  ;;  %v14502_v19 = vld [vmem:[#allocation107_spill] sm:$0xff] }
 0x505   : > { %14491 = vst [vmem:[#allocation32_spill] sm:$0xff] %v12121_v38  ;;  %v12157_v31 = vsub.f32 %v11665_v17, %v12121_v38  ;;  %v3731_v57 = vadd.f32 1e-08, %v3699_v37  ;;  %v14499_v62 = vsub.f32 0.0, %v11924_v51  ;;  %v12163_v41 = vsub.f32 %v11667_v47, %v12125_v18 }
 0x506   : > { %14492 = vst [vmem:[#allocation94_spill] sm:$0xff] %v12125_v18  ;;  %v5108_v58 = vmax.f32 %v5107_v20, %v12147_v6  ;;  %v4338_v49 = vrot.slane %v4275_v1, 7  ;;  %v14501_v30 = vrot.slane %v14500_v28, 7  ;;  %v12172_v17 = vsub.f32 %v11669_v56, %v12143_v8 }
 0x507   : > { %14495 = vst [vmem:[#allocation40_spill] sm:$0xff] %v12139_v15  ;;  %v3859_v53 = vmax.f32 %v14499_v62, 0.0  ;;  %v7178_v25 = vpop.eup %7177  ;;  %v4145_v34 = vsub.f32 0.0, %v4113_v42  ;;  %v14503_v20 = vrot.slane %v14502_v19, 7  ;;  %v12184_v18 = vadd.f32 %v12139_v15, %v4734_v14  ;;  %v7521_v42 = vld [vmem:[#allocation11 + $0x400] sm:$0xff] }
 0x508   : > { %14496 = vst [vmem:[#allocation127_spill] sm:$0xff] %v12143_v8  ;;  %v4398_v33 = vsel %vm1476_vm1, %v14501_v30, %v4336_v39  ;;  %v5109_v47 = vmax.f32 %v5108_v58, %v12157_v31  ;;  %v4396_v30 = vsel %vm1476_vm1, %v4336_v39, %v4338_v49  ;;  %7179 = vlog2.f32 %v3731_v57  ;;  %v14511_v57 = vld [vmem:[#allocation155_spill] sm:$0xff] }
 0x509   : > { %14498 = vst [vmem:[#allocation152_spill] sm:$0xff] %v12153_v45  ;;  %v4115_v37 = vadd.f32 %v4055_v44, %v3859_v53  ;;  %v4400_v62 = vsel %vm4319_vm12, %v4398_v33, 0.0  ;;  %v4394_v28 = vsel %vm1476_vm1, %v4338_v49, %v14503_v20  ;;  %v4434_v56 = vadd.f32 %v4396_v30, %v4275_v1  ;;  %v14505_v53 = vld [vmem:[#allocation65_spill] sm:$0xff]  ;;  %v14507_v1 = vld [vmem:[#allocation144_spill] sm:$0xff]  ;;  %v14510_v30 = vld [vmem:[#allocation50_spill] sm:$0xff] }
 0x50a   : > { %v4432_v26 = vadd.f32 %v4400_v62, %v4273_v52  ;;  %14504 = vst [vmem:[#allocation36_spill] sm:$0xff] %v12184_v18  ;;  %v4436_v44 = vadd.f32 %v4394_v28, %v14502_v19  ;;  %v2254_v33 = vmul.f32 %v7521_v42, %v14505_v53  ;;  %v5110_v58 = vmax.f32 %v5109_v47, %v12163_v41  ;;  %v14509_v28 = vld [vmem:[#allocation126_spill] sm:$0xff] }
 0x50b   : > { %v2256_v20 = vmul.f32 %v7522_v3, %v14506_v54  ;;  %v3763_v40 = vmul.f32 0.6931472, %v7178_v25  ;;  %v4147_v43 = vsub.f32 0.0, %v4115_v37  ;;  %v4482_v39 = vrot.slane %v4434_v56, 6 }
 0x50c   : > { %v4480_v38 = vrot.slane %v4432_v26, 6  ;;  %v4484_v52 = vrot.slane %v4436_v44, 6  ;;  %v5111_v14 = vmax.f32 %v5110_v58, %v12172_v17  ;;  %v4177_v49 = vadd.f32 1e-08, %v4145_v34 }
 0x50d   : > { %v14508_v62 = vrot.slane %v14507_v1, 6  ;;  %v1884_v47 = vadd.f32 %v14510_v30, %v14509_v28  ;;  %v14512_v42 = vrot.slane %v14511_v57, 6  ;;  %v14513_v30 = vld [vmem:[#allocation111_spill] sm:$0xff]  ;;  %vm3633_vm2 = vcmp.ge.f32.partialorder %v11888_v0, 0.0 }
 0x50e   : > { %v4539_v25 = vsel %vm4511_vm7, %v4482_v39, %v4484_v52  ;;  %v4541_v3 = vsel %vm4511_vm7, %v4480_v38, %v4482_v39  ;;  %v5112_v37 = vrot.slane %v5111_v14, 4  ;;  %v13685_v15 = vrot.slane %v14513_v30, 4  ;;  %v7180_v21 = vpop.eup %7179 }
 0x50f   : > { %v4543_v19 = vsel %vm4511_vm7, %v14508_v62, %v4480_v38  ;;  %v4537_v54 = vsel %vm4511_vm7, %v4484_v52, %v14512_v42  ;;  %v4579_v58 = vadd.f32 %v4541_v3, %v4434_v56  ;;  %v4581_v1 = vadd.f32 %v4539_v25, %v4436_v44  ;;  %v14515_v56 = vld [vmem:[#allocation75_spill] sm:$0xff] }
 0x510   : > { %v4545_v34 = vsel %vm4463_vm14, %v4543_v19, 0.0  ;;  %v4179_v62 = vadd.f32 1e-08, %v4147_v43  ;;  %v4583_v28 = vadd.f32 %v4537_v54, %v14511_v57  ;;  %v1965_v42 = vadd.f32 %v14514_v48, %v1884_v47 }
 0x511   : > { %v4577_v53 = vadd.f32 %v4545_v34, %v4432_v26  ;;  %v5113_v60 = vmax.f32 %v5111_v14, %v5112_v37  ;;  %v4627_v50 = vrot.slane %v4579_v58, 4  ;;  %v4629_v24 = vrot.slane %v4581_v1, 4 }
 0x512   : > { %v4631_v38 = vrot.slane %v4583_v28, 4  ;;  %v12211_v39 = vadd.f32 %v2254_v33, %v11982_v10  ;;  %v12214_v26 = vadd.f32 %v2256_v20, %v11985_v22  ;;  %v12217_v43 = vadd.f32 %v14515_v56, %v1965_v42  ;;  %v14520_v56 = vld [vmem:[#allocation49_spill] sm:$0xff] }
 0x513   : > { %v4625_v52 = vrot.slane %v4577_v53, 4  ;;  %v5114_v44 = vrot.slane %v5113_v60, 2  ;;  %v4684_v19 = vsel %vm4656_vm8, %v4627_v50, %v4629_v24  ;;  %v14516_v10 = vrot.slane %v11461_v36, 4 }
 0x514   : > { %v4682_v33 = vsel %vm4656_vm8, %v4629_v24, %v4631_v38  ;;  %v14518_v25 = vsub.f32 0.0, %v12115_v12  ;;  %v4726_v34 = vadd.f32 %v4684_v19, %v4581_v1  ;;  %v3767_v37 = vmul.f32 0.6931472, %v7180_v21  ;;  %v14521_v24 = vld [vmem:[#allocation52_spill] sm:$0xff]  ;;  %v14523_v19 = vld [vmem:[#allocation91_spill] sm:$0xff] }
 0x515   : > { %v4686_v48 = vsel %vm4656_vm8, %v4625_v52, %v4627_v50  ;;  %v4688_v14 = vsel %vm4656_vm8, %v13685_v15, %v4625_v52  ;;  %v4680_v22 = vsel %vm4656_vm8, %v4631_v38, %v14516_v10  ;;  %v5115_v57 = vmax.f32 %v5113_v60, %v5114_v44  ;;  %v7523_v12 = vld [vmem:[#allocation11 + $0x408] sm:$0xff]  ;;  %v7524_v44 = vld [vmem:[#allocation11 + $0x418] sm:$0xff] }
 0x516   : > { %v4690_v20 = vsel %vm4608_vm0, %v4688_v14, 0.0  ;;  %v4724_v47 = vadd.f32 %v4686_v48, %v4579_v58  ;;  %v14517_v50 = vsub.f32 0.0, %v12065_v35  ;;  %v3603_v3 = vadd.f32 %v14518_v25, %v11967_v29  ;;  %v14522_v29 = vld [vmem:[#allocation74_spill] sm:$0xff] }
 0x517   : > { %v12241_v42 = vadd.f32 %v4690_v20, %v4577_v53  ;;  %v4728_v52 = vadd.f32 %v4682_v33, %v4583_v28  ;;  %v2125_v38 = vadd.f32 %v14521_v24, %v14520_v56  ;;  %v5116_v10 = vrot.slane %v5115_v57, 1 }
 0x518   : > { %v3601_v54 = vadd.f32 %v14517_v50, %v11949_v27  ;;  %vm3635_vm3 = vcmp.ge.f32.partialorder %v11924_v51, 0.0  ;;  %v4730_v35 = vadd.f32 %v4680_v22, %v11461_v36  ;;  %v4209_v27 = vsel %vm3633_vm2, %v3763_v40, %v4177_v49 }
 0x519   : > { %14519 = vst [vmem:[#allocation147_spill] sm:$0xff] %v12241_v42  ;;  %v4211_v60 = vsel %vm3635_vm3, %v3767_v37, %v4179_v62  ;;  %v4806_v58 = vadd.f32 %v4726_v34, %v4724_v47  ;;  %v2255_v1 = vmul.f32 %v7523_v12, %v14522_v29  ;;  %v12249_v21 = vmax.f32 %v5115_v57, %v5116_v10 }
 0x51a   : > { %v4241_v53 = vadd.f32 %v4209_v27, %v3601_v54  ;;  %v4243_v28 = vadd.f32 %v4211_v60, %v3603_v3  ;;  %v2257_v48 = vmul.f32 %v7524_v44, %v14523_v19  ;;  %v12253_v14 = vadd.f32 %v4724_v47, %v12241_v42  ;;  %v1409_v27 = vpop.f32.mrf.mxu3  ;;  %v14536_v44 = vld [vmem:[#allocation42_spill] sm:$0xff] }
 0x51b   : > { %v4808_v0 = vadd.f32 %v4728_v52, %v4726_v34  ;;  %v4812_v51 = vadd.f32 %v11999_v4, %v4730_v35  ;;  %v2318_v36 = vsub.f32 0.0, %v12211_v39  ;;  %v5157_v40 = vsub.f32 %v12086_v7, %v12249_v21 }
 0x51c   : > { %14524 = vst [vmem:[#allocation158_spill] sm:$0xff] %v12253_v14  ;;  %v5159_v49 = vsub.f32 %v12092_v55, %v12249_v21  ;;  %v5161_v62 = vsub.f32 %v12096_v13, %v12249_v21  ;;  %v4810_v22 = vadd.f32 %v4730_v35, %v4728_v52  ;;  %v5163_v33 = vsub.f32 %v12132_v32, %v12249_v21 }
 0x51d   : > { %v12266_v20 = vadd.f32 %v4806_v58, %v12241_v42  ;;  %v12269_v4 = vsub.f32 %v4241_v53, %v12241_v42  ;;  %v2320_v47 = vsub.f32 0.0, %v12214_v26  ;;  %v5165_v7 = vsub.f32 %v12147_v6, %v12249_v21  ;;  %v14535_v53 = vld [vmem:[#allocation76_spill] sm:$0xff] }
 0x51e   : > { %v5189_v57 = vmul.f32 1.442695, %v5157_v40  ;;  %v5193_v55 = vmul.f32 1.442695, %v5159_v49  ;;  %v12274_v50 = vadd.f32 %v4810_v22, %v4806_v58  ;;  %v5167_v13 = vsub.f32 %v12157_v31, %v12249_v21  ;;  %v14530_v31 = vld [vmem:[#allocation28_spill] sm:$0xff] }
 0x51f   : > { %14525 = vst [vmem:[#allocation96_spill] sm:$0xff] %v12266_v20  ;;  %v5197_v54 = vmul.f32 1.442695, %v5161_v62  ;;  %v12278_v32 = vadd.f32 %v4812_v51, %v4808_v0  ;;  %v12281_v25 = vsub.f32 %v4243_v28, %v12253_v14  ;;  %v5169_v3 = vsub.f32 %v12163_v41, %v12249_v21 }
 0x520   : > { %14526 = vst [vmem:[#allocation107_spill] sm:$0xff] %v12274_v50  ;;  %7181 = vpow2.f32 %v5189_v57  ;;  %v12286_v34 = vadd.f32 %v12153_v45, %v4810_v22  ;;  %v2366_v6 = vmul.f32 1.442695, %v2318_v36  ;;  %v5201_v37 = vmul.f32 1.442695, %v5163_v33  ;;  %v14538_v22 = vld [vmem:[#allocation68_spill] sm:$0xff] }
 0x521   : > { %14527 = vst [vmem:[#allocation65_spill] sm:$0xff] %v12278_v32  ;;  %7183 = vpow2.f32 %v5193_v55  ;;  %v12289_v52 = vadd.f32 %v4808_v0, %v12253_v14  ;;  %v12293_v56 = vsub.f32 %v14530_v31, %v12266_v20  ;;  %v5171_v24 = vsub.f32 %v12172_v17, %v12249_v21  ;;  %v14537_v0 = vld [vmem:[#allocation156_spill] sm:$0xff]  ;;  %v14578_v45 = vld [vmem:[#allocation99_spill] sm:$0xff] }
 0x522   : > { %14528 = vst [vmem:[#allocation88_spill] sm:$0xff] %v12286_v34  ;;  %v5205_v10 = vmul.f32 1.442695, %v5165_v7  ;;  %v12298_v41 = vadd.f32 %v12184_v18, %v4812_v51  ;;  %v12302_v35 = vadd.f32 %v12274_v50, %v12241_v42  ;;  %7185 = vpow2.f32 %v5197_v54 }
 0x523   : > { %14529 = vst [vmem:[#allocation144_spill] sm:$0xff] %v12289_v52  ;;  %v5209_v60 = vmul.f32 1.442695, %v5167_v13  ;;  %v12306_v58 = vadd.f32 %v12278_v32, %v12253_v14  ;;  %v5118_v12 = vmax.f32 %v12269_v4, %v12281_v25  ;;  %v5213_v29 = vmul.f32 1.442695, %v5169_v3 }
 0x524   : > { %14531 = vst [vmem:[#allocation126_spill] sm:$0xff] %v12298_v41  ;;  %v12312_v17 = vadd.f32 %v12286_v34, %v12266_v20  ;;  %v2127_v28 = vadd.f32 %v14535_v53, %v12217_v43  ;;  %v2206_v19 = vadd.f32 %v14536_v44, %v2125_v38  ;;  %7187 = vpow2.f32 %v5201_v37  ;;  %v14539_v38 = vld [vmem:[#allocation110_spill] sm:$0xff] }
 0x525   : > { %14532 = vst [vmem:[#allocation50_spill] sm:$0xff] %v12302_v35  ;;  %v12319_v51 = vsub.f32 %v14537_v0, %v12289_v52  ;;  %v5119_v36 = vmax.f32 %v5118_v12, %v12293_v56  ;;  %v2370_v40 = vmul.f32 1.442695, %v2320_v47  ;;  %7189 = vpow2.f32 %v5205_v10  ;;  %v14540_v10 = vld [vmem:[#allocation145_spill] sm:$0xff]  ;;  %v14544_v0 = vld [vmem:[#allocation43_spill] sm:$0xff] }
 0x526   : > { %14533 = vst [vmem:[#allocation155_spill] sm:$0xff] %v12306_v58  ;;  %v7182_v49 = vpop.eup %7181  ;;  %v5217_v62 = vmul.f32 1.442695, %v5171_v24  ;;  %v2208_v33 = vadd.f32 %v14538_v22, %v2127_v28  ;;  %v12323_v7 = vadd.f32 %v2255_v1, %v2206_v19  ;;  %7191 = vpow2.f32 %v5209_v60  ;;  %v14543_v12 = vld [vmem:[#allocation161_spill] sm:$0xff]  ;;  %v1362_v22 = vpop.f32.mrf.mxu2 }
 0x527   : > { %14534 = vst [vmem:[#allocation41_spill] sm:$0xff] %v12312_v17  ;;  %v7184_v57 = vpop.eup %7183  ;;  %v12327_v43 = vadd.f32 %v12298_v41, %v12289_v52  ;;  %v12331_v55 = vsub.f32 %v14539_v38, %v12302_v35  ;;  %v5120_v13 = vmax.f32 %v5119_v36, %v12319_v51  ;;  %7193 = vpow2.f32 %v2366_v6  ;;  %v14542_v6 = vld [vmem:[#allocation67_spill] sm:$0xff] }
 0x528   : > { %v5253_v47 = vadd.f32 %v7184_v57, %v7182_v49  ;;  %v12334_v54 = vadd.f32 %v2257_v48, %v2208_v33  ;;  %v2319_v3 = vsub.f32 0.0, %v12323_v7  ;;  %v7186_v1 = vpop.eup %7185  ;;  %v12339_v37 = vsub.f32 %v11911_v46, %v12306_v58  ;;  %v14546_v49 = vld [vmem:[#allocation164_spill] sm:$0xff]  ;;  %v14556_v58 = vld [vmem:[#allocation45_spill] sm:$0xff] }
 0x529   : > { %v12343_v31 = vsub.f32 %v11934_v5, %v12312_v17  ;;  %v5121_v24 = vmax.f32 %v5120_v13, %v12331_v55  ;;  %7195 = vpow2.f32 %v2370_v40  ;;  %v12347_v60 = vadd.f32 1e-08, %v14540_v10 }
 0x52a   : > { %v5505_v48 = vadd.f32 1.0, %v14542_v6  ;;  %7197 = vpow2.f32 %v14543_v12  ;;  %v5254_v53 = vadd.f32 %v7186_v1, %v5253_v47  ;;  %v7188_v28 = vpop.eup %7187  ;;  %v12353_v46 = vsub.f32 %v11937_v61, %v12327_v43  ;;  %v14549_v61 = vld [vmem:[#allocation29_spill] sm:$0xff]  ;;  %v14551_v12 = vld [vmem:[#allocation71_spill] sm:$0xff] }
 0x52b   : > { %14541 = vst [vmem:[#allocation75_spill] sm:$0xff] %v12347_v60  ;;  %7199 = vpow2.f32 %v5213_v29  ;;  %v5122_v5 = vmax.f32 %v5121_v24, %v12339_v37  ;;  %v2321_v44 = vsub.f32 0.0, %v12334_v54  ;;  %v7190_v19 = vpop.eup %7189  ;;  %v14545_v36 = vsub.f32 0.0, %v14544_v0  ;;  %v14547_v29 = vld [vmem:[#allocation146_spill] sm:$0xff]  ;;  %v1411_v24 = vpop.f32.mrf.mxu3 }
 0x52c   : > { %7201 = vpow2.f32 %v14546_v49  ;;  %v5255_v33 = vadd.f32 %v7188_v28, %v5254_v53  ;;  %v2368_v57 = vmul.f32 1.442695, %v2319_v3  ;;  %v7192_v38 = vpop.eup %7191  ;;  %v12363_v13 = vadd.f32 1e-08, %v14547_v29  ;;  %v14552_v49 = vld [vmem:[#allocation30_spill] sm:$0xff]  ;;  %v14554_v28 = vld [vmem:[#allocation125_spill] sm:$0xff] }
 0x52d   : > { %v12359_v40 = vmax.f32 %v14545_v36, 0.0  ;;  %v14550_v47 = vsub.f32 0.0, %v14549_v61  ;;  %7203 = vpow2.f32 %v5217_v62  ;;  %v5123_v10 = vmax.f32 %v5122_v5, %v12343_v31  ;;  %v7194_v6 = vpop.eup %7193 }
 0x52e   : > { %14548 = vst [vmem:[#allocation49_spill] sm:$0xff] %v12363_v13  ;;  %7205 = vrcp.f32 %v5505_v48  ;;  %v5506_v36 = vadd.f32 1.0, %v14551_v12  ;;  %v12372_v15 = vadd.f32 %v1409_v27, %v14552_v49  ;;  %v5256_v3 = vadd.f32 %v7190_v19, %v5255_v33  ;;  %v14559_v19 = vld [vmem:[#allocation162_spill] sm:$0xff] }
 0x52f   : > { %v12367_v1 = vmax.f32 %v14550_v47, 0.0  ;;  %v7196_v53 = vpop.eup %7195  ;;  %v12375_v29 = vadd.f32 %v1362_v22, %v14554_v28  ;;  %v5124_v35 = vmax.f32 %v5123_v10, %v12353_v46  ;;  %v2414_v47 = vadd.f32 1.0, %v7194_v6 }
 0x530   : > { %14553 = vst [vmem:[#allocation52_spill] sm:$0xff] %v12372_v15  ;;  %v2372_v52 = vmul.f32 1.442695, %v2321_v44  ;;  %v7198_v17 = vpop.eup %7197  ;;  %v12379_v62 = vadd.f32 %v1411_v24, %v14552_v49  ;;  %v5257_v5 = vadd.f32 %v7192_v38, %v5256_v3  ;;  %v2416_v48 = vadd.f32 1.0, %v7196_v53  ;;  %v14560_v49 = vld [vmem:[#allocation33_spill] sm:$0xff] }
 0x531   : > { %7207 = vpow2.f32 %v2368_v57  ;;  %v7200_v12 = vpop.eup %7199  ;;  %v14557_v27 = vsub.f32 0.0, %v14556_v58  ;;  %v5507_v33 = vadd.f32 1.0, %v14559_v19  ;;  %v5125_v22 = vrot.slane %v5124_v35, 4  ;;  %v14579_v58 = vld [vmem:[#allocation149_spill] sm:$0xff] }
 0x532   : > { %14555 = vst [vmem:[#allocation74_spill] sm:$0xff] %v12379_v62  ;;  %7209 = vrcp.f32 %v2414_v47  ;;  %v7202_v28 = vpop.eup %7201  ;;  %v5508_v10 = vadd.f32 1.0, %v11881_v16  ;;  %v5416_v44 = vsub.f32 0.0, %v12372_v15  ;;  %v5258_v6 = vadd.f32 %v7200_v12, %v5257_v5  ;;  %v14561_v12 = vld [vmem:[#allocation140_spill] sm:$0xff] }
 0x533   : > { %v12383_v20 = vmax.f32 %v14557_v27, 0.0  ;;  %7211 = vrcp.f32 %v2416_v48  ;;  %v7204_v24 = vpop.eup %7203  ;;  %v5509_v38 = vadd.f32 1.0, %v11917_v9  ;;  %v5417_v57 = vsub.f32 0.0, %v12375_v29 }
 0x534   : > { %v5126_v3 = vmax.f32 %v5124_v35, %v5125_v22  ;;  %7213 = vpow2.f32 %v2372_v52  ;;  %v12390_v53 = vpop.eup %7205  ;;  %v5510_v27 = vadd.f32 1.0, %v7198_v17  ;;  %v5418_v47 = vsub.f32 0.0, %v12379_v62  ;;  %v14562_v52 = vld [vmem:[#allocation142_spill] sm:$0xff]  ;;  %v12494_v62 = vld [vmem:[#allocation14] sm:$0x3] }
 0x535   : > { %14558 = vst [vmem:[#allocation91_spill] sm:$0xff] %v12383_v20  ;;  %7215 = vrcp.f32 %v5506_v36  ;;  %v5259_v19 = vadd.f32 %v7204_v24, %v5258_v6  ;;  %v4103_v16 = vmul.f32 0.6931472, %v14560_v49  ;;  %v5511_v14 = vadd.f32 1.0, %v7202_v28 }
 0x536   : > { %7217 = vrcp.f32 %v5507_v33  ;;  %v5127_v5 = vrot.slane %v5126_v3, 2  ;;  %v4107_v42 = vmul.f32 0.6931472, %v14561_v12  ;;  %v5461_v9 = vmul.f32 1.442695, %v5416_v44 }
 0x537   : > { %v7208_v48 = vpop.eup %7207  ;;  %7219 = vrcp.f32 %v5508_v10  ;;  %v5260_v41 = vrot.slane %v5259_v19, 4  ;;  %v12396_v22 = vmul.f32 0.6931472, %v14562_v52  ;;  %v5463_v17 = vmul.f32 1.442695, %v5417_v57 }
 0x538   : > { %v7210_v35 = vpop.eup %7209  ;;  %7221 = vrcp.f32 %v5509_v38  ;;  %v5128_v36 = vmax.f32 %v5126_v3, %v5127_v5  ;;  %v5465_v6 = vmul.f32 1.442695, %v5418_v47  ;;  %v12402_v24 = vadd.f32 %v4103_v16, %v12359_v40  ;;  %v14569_v40 = vld [vmem:[#allocation132_spill] sm:$0xff] }
 0x539   : > { %14563 = vst [vmem:[#allocation28_spill] sm:$0xff] %v12396_v22  ;;  %v7212_v34 = vpop.eup %7211  ;;  %7223 = vrcp.f32 %v5510_v27  ;;  %v5261_v49 = vadd.f32 %v5260_v41, %v5259_v19  ;;  %v12399_v28 = vmul.f32 %v7210_v35, %v12211_v39  ;;  %v12410_v38 = vadd.f32 %v4107_v42, %v12367_v1  ;;  %v14568_v41 = vld [vmem:[#allocation102_spill] sm:$0xff]  ;;  %v14570_v27 = vld [vmem:[#allocation143_spill] sm:$0xff]  ;;  %v14571_v1 = vld [vmem:[#allocation105_spill] sm:$0xff] }
 0x53a   : > { %v7214_v33 = vpop.eup %7213  ;;  %14565 = vst [vmem:[#allocation42_spill] sm:$0xff] %v12402_v24  ;;  %7225 = vrcp.f32 %v5511_v14  ;;  %v5129_v10 = vrot.slane %v5128_v36, 1  ;;  %v12405_v44 = vmul.f32 %v7212_v34, %v12214_v26  ;;  %v12420_v14 = vmul.f32 %v14570_v27, %v14569_v40 }
 0x53b   : > { %14564 = vst [vmem:[#allocation76_spill] sm:$0xff] %v12399_v28  ;;  %v12407_v12 = vpop.eup %7215  ;;  %7227 = vpow2.f32 %v5461_v9  ;;  %v5262_v57 = vrot.slane %v5261_v49, 2  ;;  %v12414_v39 = vmul.f32 %v14568_v41, %v12399_v28  ;;  %v2415_v34 = vadd.f32 1.0, %v7208_v48 }
 0x53c   : > { %14566 = vst [vmem:[#allocation156_spill] sm:$0xff] %v12405_v44  ;;  %v12416_v3 = vpop.eup %7217  ;;  %7229 = vpow2.f32 %v5463_v17  ;;  %v12422_v26 = vmax.f32 %v5128_v36, %v5129_v10  ;;  %v12428_v19 = vmul.f32 %v14571_v1, %v12399_v28  ;;  %v2417_v16 = vadd.f32 1.0, %v7214_v33 }
 0x53d   : > { %14567 = vst [vmem:[#allocation68_spill] sm:$0xff] %v12410_v38  ;;  %v12424_v47 = vpop.eup %7219  ;;  %7231 = vpow2.f32 %v5465_v6  ;;  %v5263_v42 = vadd.f32 %v5262_v57, %v5261_v49  ;;  %v12440_v52 = vmul.f32 %v14568_v41, %v12405_v44  ;;  %v12448_v49 = vmul.f32 %v14571_v1, %v12405_v44 }
 0x53e   : > { %v12430_v5 = vpop.eup %7221  ;;  %v5158_v9 = vsub.f32 %v12269_v4, %v12422_v26  ;;  %v5160_v35 = vsub.f32 %v12281_v25, %v12422_v26  ;;  %v5162_v48 = vsub.f32 %v12293_v56, %v12422_v26  ;;  %v5164_v6 = vsub.f32 %v12319_v51, %v12422_v26 }
 0x53f   : > { %v12442_v17 = vpop.eup %7223  ;;  %v5264_v36 = vrot.slane %v5263_v42, 1  ;;  %v5166_v56 = vsub.f32 %v12331_v55, %v12422_v26  ;;  %7233 = vrcp.f32 %v2415_v34  ;;  %v5168_v40 = vsub.f32 %v12339_v37, %v12422_v26 }
 0x540   : > { %v12451_v25 = vpop.eup %7225  ;;  %v5191_v33 = vmul.f32 1.442695, %v5158_v9  ;;  %v5195_v10 = vmul.f32 1.442695, %v5160_v35  ;;  %7235 = vrcp.f32 %v2417_v16  ;;  %v5170_v1 = vsub.f32 %v12343_v31, %v12422_v26  ;;  %v14573_v35 = vld [vmem:[#allocation31_spill] sm:$0xff] }
 0x541   : > { %v7228_v57 = vpop.eup %7227  ;;  %v5265_v41 = vadd.f32 %v5264_v36, %v5263_v42  ;;  %v5199_v4 = vmul.f32 1.442695, %v5162_v48  ;;  %v13699_v32 = vsub.f32 0.0, %v12440_v52  ;;  %v5203_v34 = vmul.f32 1.442695, %v5164_v6  ;;  %v14574_v36 = vld [vmem:[#allocation135_spill] sm:$0xff] }
 0x542   : > { %v7230_v27 = vpop.eup %7229  ;;  %7237 = vpow2.f32 %v5191_v33  ;;  %v14572_v42 = vsub.f32 0.0, %v12414_v39  ;;  %v12468_v16 = vmul.f32 %v14574_v36, %v14573_v35  ;;  %v5207_v51 = vmul.f32 1.442695, %v5166_v56  ;;  %v14575_v33 = vld [vmem:[#allocation62_spill] sm:$0xff] }
 0x543   : > { %v12461_v55 = vpop.eup %7231  ;;  %7239 = vlog2.f32 %v5265_v41  ;;  %v2690_v31 = vand.u32 2147483647, %v13699_v32  ;;  %v5211_v48 = vmul.f32 1.442695, %v5168_v40  ;;  %v12474_v50 = vmul.f32 %v14575_v33, %v12399_v28 }
 0x544   : > { %v2688_v9 = vand.u32 2147483647, %v14572_v42  ;;  %7241 = vpow2.f32 %v5195_v10  ;;  %v14576_v41 = vsub.f32 0.0, %v12428_v19  ;;  %v5215_v37 = vmul.f32 1.442695, %v5170_v1 }
 0x545   : > { %v12478_v18 = vpop.eup %7233  ;;  %7243 = vpow2.f32 %v5199_v4  ;;  %v2722_v35 = vsub.f32 0.0, %v2690_v31  ;;  %v14577_v10 = vsub.f32 0.0, %v12448_v49  ;;  %v12486_v40 = vmul.f32 %v14575_v33, %v12405_v44  ;;  %v14581_v44 = vld [vmem:[#allocation153_spill] sm:$0xff] }
 0x546   : > { %v2720_v6 = vsub.f32 0.0, %v2688_v9  ;;  %v3008_v42 = vand.u32 2147483647, %v14576_v41  ;;  %v12482_v36 = vpop.eup %7235  ;;  %7245 = vpow2.f32 %v5203_v34  ;;  %v5172_v41 = vsub.f32 %v12353_v46, %v12422_v26 }
 0x547   : > { %v3010_v56 = vand.u32 2147483647, %v14577_v10  ;;  %7247 = vpow2.f32 %v5207_v51  ;;  %v2772_v4 = vmul.f32 1.442695, %v2722_v35  ;;  %v12492_v10 = vmul.f32 %v14579_v58, %v14578_v45 }
 0x548   : > { %v2768_v32 = vmul.f32 1.442695, %v2720_v6  ;;  %v3040_v9 = vsub.f32 0.0, %v3008_v42  ;;  %v7238_v28 = vpop.eup %7237  ;;  %7249 = vpow2.f32 %v5211_v48  ;;  %v14580_v42 = vld [vmem:[#allocation79_spill] sm:$0xff]  ;;  %v5512_v35 = vadd.f32 1.0, %v7228_v57 }
 0x549   : > { %v3042_v1 = vsub.f32 0.0, %v3010_v56  ;;  %v7240_v31 = vpop.eup %7239  ;;  %v12499_v15 = vmul.f32 %v14581_v44, %v14580_v42  ;;  %7251 = vpow2.f32 %v5215_v37  ;;  %v13705_v45 = vsub.f32 0.0, %v12486_v40 }
 0x54a   : > { %v3088_v34 = vmul.f32 1.442695, %v3040_v9  ;;  %v7242_v6 = vpop.eup %7241  ;;  %v5306_v46 = vmul.f32 0.6931472, %v7240_v31  ;;  %7253 = vpow2.f32 %v2768_v32  ;;  %v12504_v48 = vperm.slane %v12494_v62, 0 }
 0x54b   : > { %14582 = vst [vmem:[#allocation110_spill] sm:$0xff] %v12499_v15  ;;  %v3092_v51 = vmul.f32 1.442695, %v3042_v1  ;;  %v5266_v56 = vadd.f32 %v7242_v6, %v7238_v28  ;;  %v7244_v58 = vpop.eup %7243  ;;  %v5219_v9 = vmul.f32 1.442695, %v5172_v41  ;;  %7255 = vpow2.f32 %v2772_v4  ;;  %v14587_v6 = vld [vmem:[#allocation59_spill] sm:$0xff] }
 0x54c   : > { %v5313_v61 = vadd.f32 %v5306_v46, %v12249_v21  ;;  %14583 = vst [vmem:[#allocation145_spill] sm:$0xff] %v12504_v48  ;;  %v7246_v33 = vpop.eup %7245  ;;  %v5513_v0 = vadd.f32 1.0, %v7230_v27  ;;  %7257 = vpow2.f32 %v3088_v34  ;;  %v14584_v37 = vsub.f32 0.0, %v12474_v50  ;;  %v14585_v21 = vld [vmem:[#allocation130_spill] sm:$0xff]  ;;  %v14589_v4 = vld [vmem:[#allocation159_spill] sm:$0xff]  ;;  %v14590_v34 = vld [vmem:[#allocation113_spill] sm:$0xff] }
 0x54d   : > { %v5267_v44 = vadd.f32 %v7244_v58, %v5266_v56  ;;  %v7248_v57 = vpop.eup %7247  ;;  %7259 = vpow2.f32 %v3092_v51  ;;  %v3906_v28 = vand.u32 2147483647, %v13705_v45  ;;  %v14586_v31 = vrot.slane %v14585_v21, 6  ;;  %v14591_v51 = vld [vmem:[#allocation160_spill] sm:$0xff]  ;;  %v14594_v45 = vld [vmem:[#allocation103_spill] sm:$0xff] }
 0x54e   : > { %v3904_v1 = vand.u32 2147483647, %v14584_v37  ;;  %v5317_v32 = vadd.f32 %v5313_v61, %v12143_v8  ;;  %v14588_v42 = vrot.slane %v14587_v6, 6  ;;  %v7250_v27 = vpop.eup %7249  ;;  %v12519_v46 = vmul.f32 %v14590_v34, %v14589_v4  ;;  %v14592_v37 = vld [vmem:[#allocation55_spill] sm:$0xff] }
 0x54f   : > { %7261 = vrcp.f32 %v5512_v35  ;;  %v5268_v56 = vadd.f32 %v7246_v33, %v5267_v44  ;;  %v7252_v61 = vpop.eup %7251  ;;  %v12523_v38 = vmul.f32 %v14592_v37, %v14591_v51  ;;  %v12527_v13 = vmul.f32 %v12390_v53, %v14594_v45 }
 0x550   : > { %v4518_v41 = vsel %vm4511_vm7, %v14588_v42, %v14586_v31  ;;  %v3936_v58 = vsub.f32 0.0, %v3904_v1  ;;  %v5321_v60 = vmul.f32 1.442695, %v5317_v32  ;;  %7263 = vpow2.f32 %v5219_v9  ;;  %v7254_v31 = vpop.eup %7253 }
 0x551   : > { %14593 = vst [vmem:[#allocation67_spill] sm:$0xff] %v12523_v38  ;;  %7265 = vrcp.f32 %v5513_v0  ;;  %v5269_v42 = vadd.f32 %v7248_v57, %v5268_v56  ;;  %v12530_v4 = vadd.f32 %v4518_v41, %v14585_v21  ;;  %v7256_v33 = vpop.eup %7255  ;;  %v2816_v35 = vadd.f32 1.0, %v7254_v31 }
 0x552   : > { %v3984_v24 = vmul.f32 1.442695, %v3936_v58  ;;  %7267 = vpow2.f32 %v5321_v60  ;;  %v3938_v44 = vsub.f32 0.0, %v3906_v28  ;;  %v12534_v1 = vmul.f32 %v12478_v18, %v12323_v7  ;;  %v7258_v34 = vpop.eup %7257  ;;  %v14598_v60 = vld [vmem:[#allocation115_spill] sm:$0xff] }
 0x553   : > { %14595 = vst [vmem:[#allocation161_spill] sm:$0xff] %v12530_v4  ;;  %v5270_v53 = vadd.f32 %v7250_v27, %v5269_v42  ;;  %v2818_v45 = vadd.f32 1.0, %v7256_v33  ;;  %v12538_v0 = vmul.f32 %v12482_v36, %v12334_v54  ;;  %v7260_v9 = vpop.eup %7259  ;;  %v5514_v57 = vadd.f32 1.0, %v12461_v55  ;;  %v14600_v36 = vld [vmem:[#allocation39_spill] sm:$0xff]  ;;  %v14601_v55 = vld [vmem:[#allocation61_spill] sm:$0xff] }
 0x554   : > { %14596 = vst [vmem:[#allocation164_spill] sm:$0xff] %v12534_v1  ;;  %7269 = vpow2.f32 %v3984_v24  ;;  %v3136_v32 = vadd.f32 1.0, %v7258_v34  ;;  %v12543_v28 = vmul.f32 %v14598_v60, %v12534_v1  ;;  %v3138_v7 = vadd.f32 1.0, %v7260_v9 }
 0x555   : > { %14597 = vst [vmem:[#allocation146_spill] sm:$0xff] %v12538_v0  ;;  %7271 = vlog2.f32 %v2816_v35  ;;  %v12545_v21 = vpop.eup %7261  ;;  %v5271_v18 = vadd.f32 %v7252_v61, %v5270_v53  ;;  %v12549_v24 = vmul.f32 %v14598_v60, %v12538_v0  ;;  %v5335_v41 = vmul.f32 %v12504_v48, %v14600_v36 }
 0x556   : > { %14599 = vst [vmem:[#allocation71_spill] sm:$0xff] %v12545_v21  ;;  %7273 = vlog2.f32 %v2818_v45  ;;  %v7264_v54 = vpop.eup %7263  ;;  %v5337_v27 = vmul.f32 %v12504_v48, %v14601_v55  ;;  %v3988_v56 = vmul.f32 1.442695, %v3938_v44  ;;  %v14602_v61 = vsub.f32 0.0, %v12414_v39 }
 0x557   : > { %7275 = vlog2.f32 %v3136_v32  ;;  %v12555_v58 = vpop.eup %7265  ;;  %v5272_v51 = vadd.f32 %v7264_v54, %v5271_v18  ;;  %v13706_v31 = vrot.slane %v12530_v4, 4  ;;  %v14603_v33 = vsub.f32 0.0, %v12440_v52  ;;  %v14606_v18 = vld [vmem:[#allocation133_spill] sm:$0xff] }
 0x558   : > { %v2656_v37 = vmax.f32 %v14602_v61, 0.0  ;;  %7277 = vlog2.f32 %v3138_v7  ;;  %v7268_v42 = vpop.eup %7267  ;;  %v14604_v34 = vsub.f32 0.0, %v12428_v19  ;;  %v14605_v45 = vsub.f32 0.0, %v12448_v49  ;;  %v14608_v49 = vld [vmem:[#allocation119_spill] sm:$0xff] }
 0x559   : > { %v2658_v35 = vmax.f32 %v14603_v33, 0.0  ;;  %v13707_v44 = vsub.f32 0.0, %v12543_v28  ;;  %v12567_v60 = vperm.slane %v7268_v42, 7  ;;  %v5273_v39 = vrot.slane %v5272_v51, 4 }
 0x55a   : > { %v2976_v53 = vmax.f32 %v14604_v34, 0.0  ;;  %v2978_v9 = vmax.f32 %v14605_v45, 0.0  ;;  %v7270_v32 = vpop.eup %7269  ;;  %v14607_v7 = vrot.slane %v14606_v18, 4  ;;  %v3680_v36 = vmax.f32 %v12474_v50, 0.0 }
 0x55b   : > { %v7272_v19 = vpop.eup %7271  ;;  %7279 = vpow2.f32 %v3988_v56  ;;  %v12579_v55 = vmul.f32 %v14608_v49, %v12534_v1  ;;  %v2689_v61 = vand.u32 2147483647, %v13707_v44  ;;  %v5371_v33 = vadd.f32 %v12567_v60, %v5335_v41 }
 0x55c   : > { %v4661_v52 = vsel %vm4656_vm8, %v13706_v31, %v14607_v7  ;;  %v7274_v42 = vpop.eup %7273  ;;  %v5373_v34 = vadd.f32 %v12567_v60, %v5337_v27  ;;  %v5274_v45 = vadd.f32 %v5273_v39, %v5272_v51  ;;  %v2865_v7 = vmul.f32 0.6931472, %v7272_v19 }
 0x55d   : > { %v7276_v31 = vpop.eup %7275  ;;  %v2869_v54 = vmul.f32 0.6931472, %v7274_v42  ;;  %v12586_v21 = vadd.f32 %v4661_v52, %v14606_v18  ;;  %v12590_v56 = vmul.f32 %v14608_v49, %v12538_v0  ;;  %v14609_v22 = vsub.f32 0.0, %v12549_v24  ;;  %v14610_v49 = vld [vmem:[#allocation72_spill] sm:$0xff] }
 0x55e   : > { %v7278_v44 = vpop.eup %7277  ;;  %v5595_v30 = vmul.f32 %v12420_v14, %v5371_v33  ;;  %v5597_v41 = vmul.f32 %v12492_v10, %v5373_v34  ;;  %v5275_v27 = vrot.slane %v5274_v45, 2  ;;  %v2912_v51 = vadd.f32 %v2865_v7, %v2656_v37  ;;  %v14611_v33 = vld [vmem:[#allocation78_spill] sm:$0xff] }
 0x55f   : > { %v2691_v20 = vand.u32 2147483647, %v14609_v22  ;;  %v2914_v39 = vadd.f32 %v2869_v54, %v2658_v35  ;;  %v3185_v19 = vmul.f32 0.6931472, %v7276_v31  ;;  %v3189_v42 = vmul.f32 0.6931472, %v7278_v44 }
 0x560   : > { %v2721_v8 = vsub.f32 0.0, %v2689_v61  ;;  %v5627_v18 = vpack.c.bf16 %v5597_v41, %v5595_v30  ;;  %v5276_v52 = vadd.f32 %v5275_v27, %v5274_v45  ;;  %v4032_v4 = vadd.f32 1.0, %v7270_v32 }
 0x561   : > { %v12598_v6 = vadd.f32 %v14610_v49, %v12586_v21  ;;  %v7280_v38 = vpop.eup %7279  ;;  %7281 = vrcp.f32 %v5514_v57  ;;  %v3232_v22 = vadd.f32 %v3185_v19, %v2976_v53  ;;  %v3234_v15 = vadd.f32 %v3189_v42, %v2978_v9 }
 0x562   : > { %v2770_v14 = vmul.f32 1.442695, %v2721_v8  ;;  %5783 = vmatmul.bf16.vlgmr.msrb.gmra.mxu0 %v5627_v18  ;;  %v5277_v10 = vrot.slane %v5276_v52, 1  ;;  %v5339_v37 = vmul.f32 %v12504_v48, %v14611_v33  ;;  %v3682_v31 = vmax.f32 %v12486_v40, 0.0  ;;  %v14613_v8 = vld [vmem:[#allocation134_spill] sm:$0xff] }
 0x563   : > { %v3712_v35 = vadd.f32 0.5, %v3680_v36  ;;  %v12603_v30 = vsub.f32 %v2912_v51, %v3232_v22  ;;  %v12605_v44 = vsub.f32 %v2914_v39, %v3234_v15  ;;  %v2723_v32 = vsub.f32 0.0, %v2691_v20  ;;  %v14615_v20 = vld [vmem:[#allocation26_spill] sm:$0xff] }
 0x564   : > { %v13715_v54 = vsub.f32 0.0, %v12579_v55  ;;  %v5278_v61 = vadd.f32 %v5277_v10, %v5276_v52  ;;  %7283 = vlog2.f32 %v4032_v4  ;;  %v14612_v57 = vrot.slane %v14471_v59, 4 }
 0x565   : > { %v14614_v53 = vrot.slane %v14613_v8, 4  ;;  %v13714_v34 = vsub.f32 0.0, %v12590_v56  ;;  %v3328_v36 = vand.u32 2147483647, %v12603_v30  ;;  %v3330_v45 = vand.u32 2147483647, %v12605_v44 }
 0x566   : > { %v4034_v15 = vadd.f32 1.0, %v7280_v38  ;;  %7285 = vpow2.f32 %v2770_v14  ;;  %v5341_v7 = vmul.f32 %v12504_v48, %v14615_v20  ;;  %v3714_v4 = vadd.f32 0.5, %v3682_v31  ;;  %v14618_v8 = vld [vmem:[#allocation25_spill] sm:$0xff]  ;;  %v14619_v20 = vld [vmem:[#allocation56_spill] sm:$0xff] }
 0x567   : > { %v4657_v9 = vsel %vm4656_vm8, %v14614_v53, %v14612_v57  ;;  %7287 = vlog2.f32 %v5278_v61  ;;  %v3744_v41 = vadd.f32 1e-08, %v3712_v35  ;;  %v12619_v27 = vpop.eup %7281  ;;  %v3360_v51 = vsub.f32 0.0, %v3328_v36  ;;  %v14616_v35 = vld [vmem:[#allocation109_spill] sm:$0xff] }
 0x568   : > { %v3362_v39 = vsub.f32 0.0, %v3330_v45  ;;  %v4751_v19 = vadd.f32 %v4657_v9, %v14471_v59  ;;  %v2774_v42 = vmul.f32 1.442695, %v2723_v32  ;;  %v5375_v18 = vadd.f32 %v12567_v60, %v5339_v37  ;;  %v14617_v37 = vld [vmem:[#allocation106_spill] sm:$0xff] }
 0x569   : > { %v5377_v52 = vadd.f32 %v12567_v60, %v5341_v7  ;;  %v3009_v38 = vand.u32 2147483647, %v13715_v54  ;;  %v3011_v22 = vand.u32 2147483647, %v13714_v34  ;;  %v3408_v14 = vmul.f32 1.442695, %v3360_v51 }
 0x56a   : > { %v3412_v10 = vmul.f32 1.442695, %v3362_v39  ;;  %7289 = vlog2.f32 %v4034_v15  ;;  %v12629_v33 = vadd.f32 %v4751_v19, %v14610_v49  ;;  %v7284_v31 = vpop.eup %7283  ;;  %v12633_v59 = vmul.f32 %v12407_v12, %v14616_v35  ;;  %v14620_v39 = vld [vmem:[#allocation66_spill] sm:$0xff] }
 0x56b   : > { %v12637_v32 = vmul.f32 %v12416_v3, %v14617_v37  ;;  %7291 = vpow2.f32 %v2774_v42  ;;  %v3041_v61 = vsub.f32 0.0, %v3009_v38  ;;  %v12641_v53 = vmul.f32 %v12424_v47, %v14618_v8 }
 0x56c   : > { %v7286_v57 = vpop.eup %7285  ;;  %7293 = vpow2.f32 %v3408_v14  ;;  %v3746_v9 = vadd.f32 1e-08, %v3714_v4  ;;  %v3043_v49 = vsub.f32 0.0, %v3011_v22  ;;  %v5599_v45 = vmul.f32 %v12519_v46, %v5375_v18 }
 0x56d   : > { %v7288_v36 = vpop.eup %7287  ;;  %v5601_v12 = vmul.f32 %v12527_v13, %v5377_v52  ;;  %7295 = vpow2.f32 %v3412_v10  ;;  %v3090_v15 = vmul.f32 1.442695, %v3041_v61  ;;  %v12647_v3 = vmul.f32 %v12430_v5, %v14619_v20  ;;  %v14621_v13 = vld [vmem:[#allocation84_spill] sm:$0xff]  ;;  %v14624_v10 = vld [vmem:[#allocation98_spill] sm:$0xff] }
 0x56e   : > { %v5308_v7 = vmul.f32 0.6931472, %v7288_v36  ;;  %7297 = vlog2.f32 %v3744_v41  ;;  %v3094_v51 = vmul.f32 1.442695, %v3043_v49  ;;  %v12651_v47 = vmul.f32 %v12442_v17, %v14620_v39  ;;  %v14622_v52 = vld [vmem:[#allocation128_spill] sm:$0xff] }
 0x56f   : > { %v12654_v4 = vperm.slane %v12494_v62, 1  ;;  %v2817_v19 = vadd.f32 1.0, %v7286_v57  ;;  %7299 = vpow2.f32 %v3090_v15  ;;  %v12658_v42 = vmul.f32 %v12451_v25, %v14621_v13  ;;  %v14625_v15 = vld [vmem:[#allocation51_spill] sm:$0xff] }
 0x570   : > { %v7290_v46 = vpop.eup %7289  ;;  %v5314_v5 = vadd.f32 %v5308_v7, %v12422_v26  ;;  %v12663_v41 = vmul.f32 %v14107_v63, %v12534_v1  ;;  %7301 = vpow2.f32 %v3094_v51  ;;  %v12667_v17 = vmul.f32 %v12555_v58, %v12375_v29  ;;  %v14623_v26 = vld [vmem:[#allocation95_spill] sm:$0xff] }
 0x571   : > { %v7292_v18 = vpop.eup %7291  ;;  %v5629_v62 = vpack.c.bf16 %v5601_v12, %v5599_v45  ;;  %v12671_v38 = vmul.f32 %v12654_v4, %v14622_v52  ;;  %7303 = vlog2.f32 %v3746_v9  ;;  %v12676_v14 = vmul.f32 %v12654_v4, %v14623_v26  ;;  %v14629_v26 = vld [vmem:[#allocation148_spill] sm:$0xff] }
 0x572   : > { %v7294_v25 = vpop.eup %7293  ;;  %v5318_v22 = vadd.f32 %v5314_v5, %v12327_v43  ;;  %v5343_v35 = vmul.f32 %v12504_v48, %v14624_v10  ;;  %v12682_v29 = vmul.f32 %v14107_v63, %v12538_v0  ;;  %v4081_v61 = vmul.f32 0.6931472, %v7284_v31 }
 0x573   : > { %v7296_v58 = vpop.eup %7295  ;;  %5788 = vmatmul.bf16.gmra.mxu0 %v5629_v62  ;;  %v3456_v37 = vadd.f32 1.0, %v7294_v25  ;;  %v4085_v57 = vmul.f32 0.6931472, %v7290_v46  ;;  %7305 = vlog2.f32 %v2817_v19  ;;  %v2819_v36 = vadd.f32 1.0, %v7292_v18  ;;  %v14628_v46 = vld [vmem:[#allocation139_spill] sm:$0xff] }
 0x574   : > { %v7298_v8 = vpop.eup %7297  ;;  %v5323_v9 = vmul.f32 1.442695, %v5318_v22  ;;  %v3458_v49 = vadd.f32 1.0, %v7296_v58  ;;  %v13713_v45 = vsub.f32 0.0, %v12663_v41  ;;  %v12687_v20 = vmul.f32 %v12654_v4, %v14625_v15 }
 0x575   : > { %v7300_v12 = vpop.eup %7299  ;;  %7307 = vlog2.f32 %v3456_v37  ;;  %v14626_v63 = vsub.f32 0.0, %v12474_v50  ;;  %v14627_v51 = vsub.f32 0.0, %v12486_v40  ;;  %v5336_v19 = vmul.f32 %v12654_v4, %v11760_v23 }
 0x576   : > { %v7302_v39 = vpop.eup %7301  ;;  %7309 = vpow2.f32 %v5323_v9  ;;  %v5345_v13 = vmul.f32 %v12504_v48, %v14628_v46  ;;  %v13712_v5 = vsub.f32 0.0, %v12682_v29  ;;  %v3137_v25 = vadd.f32 1.0, %v7300_v12  ;;  %v14631_v12 = vld [vmem:[#allocation108_spill] sm:$0xff] }
 0x577   : > { %v3872_v7 = vmax.f32 %v14626_v63, 0.0  ;;  %v3874_v31 = vmax.f32 %v14627_v51, 0.0  ;;  %v7304_v18 = vpop.eup %7303  ;;  %7311 = vlog2.f32 %v3458_v49  ;;  %v5338_v22 = vmul.f32 %v12654_v4, %v11822_v11  ;;  %v14630_v49 = vld [vmem:[#allocation141_spill] sm:$0xff] }
 0x578   : > { %v12702_v10 = vmul.f32 %v12654_v4, %v14629_v26  ;;  %7313 = vlog2.f32 %v2819_v36  ;;  %v3905_v23 = vand.u32 2147483647, %v13713_v45  ;;  %v5379_v37 = vadd.f32 %v12567_v60, %v5343_v35 }
 0x579   : > { %v4128_v62 = vadd.f32 %v4081_v61, %v3872_v7  ;;  %v4130_v52 = vadd.f32 %v4085_v57, %v3874_v31  ;;  %v7306_v58 = vpop.eup %7305  ;;  %v5381_v9 = vadd.f32 %v12567_v60, %v5345_v13  ;;  %v12710_v61 = vmul.f32 %v12504_v48, %v14630_v49 }
 0x57a   : > { %v3139_v57 = vadd.f32 1.0, %v7302_v39  ;;  %v12714_v11 = vmul.f32 %v12504_v48, %v14631_v12  ;;  %v3793_v15 = vmul.f32 0.6931472, %v7298_v8  ;;  %v3797_v63 = vmul.f32 0.6931472, %v7304_v18 }
 0x57b   : > { %v3907_v36 = vand.u32 2147483647, %v13712_v5  ;;  %v7308_v7 = vpop.eup %7307  ;;  %vm3648_vm4 = vcmp.ge.f32.partialorder %v12474_v50, 0.0  ;;  %v4160_v35 = vsub.f32 0.0, %v4128_v62  ;;  %v4162_v51 = vsub.f32 0.0, %v4130_v52 }
 0x57c   : > { %v14632_v31 = vsub.f32 0.0, %v12543_v28  ;;  %7315 = vlog2.f32 %v3137_v25  ;;  %v7310_v13 = vpop.eup %7309  ;;  %v3296_v39 = vmax.f32 %v12603_v30, 0.0  ;;  %v3505_v26 = vmul.f32 0.6931472, %v7308_v7 }
 0x57d   : > { %vm3650_vm5 = vcmp.ge.f32.partialorder %v12486_v40, 0.0  ;;  %v14633_v8 = vsub.f32 0.0, %v12549_v24  ;;  %v3937_v49 = vsub.f32 0.0, %v3905_v23  ;;  %v7312_v12 = vpop.eup %7311  ;;  %v12725_v5 = vperm.slane %v7310_v13, 7  ;;  %v14638_v40 = vld [vmem:[#allocation89_spill] sm:$0xff] }
 0x57e   : > { %v2657_v46 = vmax.f32 %v14632_v31, 0.0  ;;  %v5603_v62 = vmul.f32 %v12637_v32, %v5379_v37  ;;  %v5605_v52 = vmul.f32 %v12647_v3, %v5381_v9  ;;  %7317 = vlog2.f32 %v3139_v57  ;;  %v7314_v28 = vpop.eup %7313  ;;  %v14634_v37 = vld [vmem:[#allocation110_spill] sm:$0xff] }
 0x57f   : > { %v2659_v18 = vmax.f32 %v14633_v8, 0.0  ;;  %v3298_v25 = vmax.f32 %v12605_v44, 0.0  ;;  %v3509_v31 = vmul.f32 0.6931472, %v7312_v12  ;;  %v3552_v45 = vadd.f32 %v3505_v26, %v3296_v39 }
 0x580   : > { %v3939_v7 = vsub.f32 0.0, %v3907_v36  ;;  %v5372_v34 = vadd.f32 %v12725_v5, %v5336_v19  ;;  %v5374_v24 = vadd.f32 %v12725_v5, %v5338_v22  ;;  %v4192_v8 = vadd.f32 1e-08, %v4160_v35 }
 0x581   : > { %v4194_v23 = vadd.f32 1e-08, %v4162_v51  ;;  %v3554_v54 = vadd.f32 %v3509_v31, %v3298_v25  ;;  %v3584_v13 = vsub.f32 0.0, %v3552_v45  ;;  %v2867_v0 = vmul.f32 0.6931472, %v7306_v58  ;;  %v14637_v31 = vld [vmem:[#allocation67_spill] sm:$0xff] }
 0x582   : > { %v3986_v1 = vmul.f32 1.442695, %v3937_v49  ;;  %v7316_v32 = vpop.eup %7315  ;;  %v5596_v3 = vmul.f32 %v12468_v16, %v5372_v34  ;;  %v5598_v9 = vmul.f32 %v14634_v37, %v5374_v24  ;;  %v5631_v57 = vpack.c.bf16 %v5605_v52, %v5603_v62 }
 0x583   : > { %v2871_v48 = vmul.f32 0.6931472, %v7314_v28  ;;  %v3586_v12 = vsub.f32 0.0, %v3554_v54  ;;  %v14635_v36 = vsub.f32 0.0, %v12579_v55  ;;  %v14636_v19 = vsub.f32 0.0, %v12590_v56 }
 0x584   : > { %v3990_v35 = vmul.f32 1.442695, %v3939_v7  ;;  %v7318_v51 = vpop.eup %7317  ;;  %v5628_v26 = vpack.c.bf16 %v5598_v9, %v5596_v3  ;;  %v5376_v45 = vadd.f32 %v12725_v5, %v12671_v38  ;;  %v5378_v16 = vadd.f32 %v12725_v5, %v12676_v14  ;;  %5793 = vmatmul.bf16.gmra.mxu0 %v5631_v57 }
 0x585   : > { %v2977_v39 = vmax.f32 %v14635_v36, 0.0  ;;  %v2979_v22 = vmax.f32 %v14636_v19, 0.0  ;;  %v4288_v34 = vadd.f32 1e-08, %v3584_v13  ;;  %v4224_v54 = vsel %vm3648_vm4, %v3793_v15, %v4192_v8 }
 0x586   : > { %v4290_v58 = vadd.f32 1e-08, %v3586_v12  ;;  %v3187_v55 = vmul.f32 0.6931472, %v7316_v32  ;;  %v3681_v49 = vmax.f32 %v12663_v41, 0.0  ;;  %5832 = vmatmul.bf16.vlgmr.msrb.gmra.mxu1 %v5628_v26  ;;  %v4226_v56 = vsel %vm3650_vm5, %v3797_v63, %v4194_v23 }
 0x587   : > { %v2913_v62 = vadd.f32 %v2867_v0, %v2657_v46  ;;  %v2915_v52 = vadd.f32 %v2871_v48, %v2659_v18  ;;  %7319 = vpow2.f32 %v3986_v1  ;;  %v5380_v38 = vadd.f32 %v12725_v5, %v12687_v20  ;;  %v14640_v0 = vld [vmem:[#allocation54_spill] sm:$0xff] }
 0x588   : > { %v4351_v14 = vrot.slane %v4288_v34, 7  ;;  %v4353_v28 = vrot.slane %v4290_v58, 7  ;;  %v3191_v25 = vmul.f32 0.6931472, %v7318_v51  ;;  %v5600_v50 = vmul.f32 %v14637_v31, %v5376_v45  ;;  %v14642_v45 = vld [vmem:[#allocation112_spill] sm:$0xff] }
 0x589   : > { %v5602_v15 = vmul.f32 %v12633_v59, %v5378_v16  ;;  %v12753_v7 = vadd.f32 %v12725_v5, %v12702_v10  ;;  %7321 = vpow2.f32 %v3990_v35  ;;  %v14639_v63 = vrot.slane %v14638_v40, 7 }
 0x58a   : > { %v4379_v1 = vsel %vm1476_vm1, %v4351_v14, %v4353_v28  ;;  %v14641_v20 = vrot.slane %v14640_v0, 7  ;;  %v3233_v18 = vadd.f32 %v3187_v55, %v2977_v39  ;;  %v5383_v59 = vadd.f32 %v12567_v60, %v12710_v61 }
 0x58b   : > { %v4377_v48 = vsel %vm1476_vm1, %v4353_v28, %v14639_v63  ;;  %v5385_v10 = vadd.f32 %v12567_v60, %v12714_v11  ;;  %v4449_v8 = vadd.f32 %v4379_v1, %v4290_v58  ;;  %v12770_v23 = vmul.f32 %v12641_v53, %v5380_v38 }
 0x58c   : > { %v4381_v46 = vsel %vm1476_vm1, %v14641_v20, %v4351_v14  ;;  %v4451_v32 = vadd.f32 %v4377_v48, %v14638_v40  ;;  %v3235_v3 = vadd.f32 %v3191_v25, %v2979_v22  ;;  %v12773_v37 = vsub.f32 %v2913_v62, %v3233_v18  ;;  %v14646_v48 = vld [vmem:[#allocation60_spill] sm:$0xff] }
 0x58d   : > { %v4447_v24 = vadd.f32 %v4381_v46, %v4288_v34  ;;  %v7320_v9 = vpop.eup %7319  ;;  %v5630_v57 = vpack.c.bf16 %v5602_v15, %v5600_v50  ;;  %v3616_v36 = vadd.f32 %v3584_v13, %v12603_v30  ;;  %v4497_v19 = vrot.slane %v4449_v8, 6  ;;  %v14644_v13 = vld [vmem:[#allocation59_spill] sm:$0xff]  ;;  %v14648_v46 = vld [vmem:[#allocation161_spill] sm:$0xff] }
 0x58e   : > { %v3618_v61 = vadd.f32 %v3586_v12, %v12605_v44  ;;  %v4499_v35 = vrot.slane %v4451_v32, 6  ;;  %v12777_v60 = vsub.f32 %v2915_v52, %v3235_v3  ;;  %v3329_v11 = vand.u32 2147483647, %v12773_v37 }
 0x58f   : > { %v4495_v39 = vrot.slane %v4447_v24, 6  ;;  %v7322_v53 = vpop.eup %7321  ;;  %v5607_v51 = vmul.f32 %v12658_v42, %v5383_v59  ;;  %v5609_v22 = vmul.f32 %v12667_v17, %v5385_v10  ;;  %v14643_v16 = vrot.slane %v14642_v45, 6  ;;  %v14651_v45 = vld [vmem:[#allocation57_spill] sm:$0xff] }
 0x590   : > { %v14645_v44 = vrot.slane %v14644_v13, 6  ;;  %v4522_v34 = vsel %vm4511_vm7, %v4497_v19, %v4499_v35  ;;  %v12794_v55 = vadd.f32 %v4224_v54, %v3616_v36  ;;  %v3331_v52 = vand.u32 2147483647, %v12777_v60 }
 0x591   : > { %v4524_v26 = vsel %vm4511_vm7, %v4495_v39, %v4497_v19  ;;  %v4526_v30 = vsel %vm4511_vm7, %v14643_v16, %v4495_v39  ;;  %v4596_v17 = vadd.f32 %v4522_v34, %v4451_v32  ;;  %v4258_v38 = vadd.f32 %v4226_v56, %v3618_v61  ;;  %v14656_v34 = vld [vmem:[#allocation63_spill] sm:$0xff] }
 0x592   : > { %v4520_v12 = vsel %vm4511_vm7, %v4499_v35, %v14645_v44  ;;  %v4592_v58 = vadd.f32 %v4526_v30, %v4447_v24  ;;  %v4594_v42 = vadd.f32 %v4524_v26, %v4449_v8  ;;  %v3361_v25 = vsub.f32 0.0, %v3329_v11  ;;  %v14652_v30 = vld [vmem:[#allocation24_spill] sm:$0xff]  ;;  %v14654_v44 = vld [vmem:[#allocation83_spill] sm:$0xff] }
 0x593   : > { %v4598_v62 = vadd.f32 %v4520_v12, %v14644_v13  ;;  %v5633_v31 = vpack.c.bf16 %v5609_v22, %v5607_v51  ;;  %v4644_v50 = vrot.slane %v4596_v17, 4  ;;  %v3363_v40 = vsub.f32 0.0, %v3331_v52 }
 0x594   : > { %v4640_v14 = vrot.slane %v4592_v58, 4  ;;  %v4642_v28 = vrot.slane %v4594_v42, 4  ;;  %v14647_v1 = vrot.slane %v14646_v48, 4  ;;  %v3410_v0 = vmul.f32 1.442695, %v3361_v25  ;;  %v14658_v25 = vld [vmem:[#allocation118_spill] sm:$0xff] }
 0x595   : > { %v4646_v15 = vrot.slane %v4598_v62, 4  ;;  %v4033_v20 = vadd.f32 1.0, %v7320_v9  ;;  %5798 = vmatmul.bf16.gmra.mxu0 %v5633_v31  ;;  %v14649_v56 = vrot.slane %v14648_v46, 4  ;;  %v14650_v9 = vld [vmem:[#allocation34_spill] sm:$0xff]  ;;  %v3414_v19 = vmul.f32 1.442695, %v3363_v40 }
 0x596   : > { %v4669_v63 = vsel %vm4656_vm8, %v4640_v14, %v4642_v28  ;;  %v4671_v54 = vsel %vm4656_vm8, %v14647_v1, %v4640_v14  ;;  %v4667_v10 = vsel %vm4656_vm8, %v4642_v28, %v4644_v50  ;;  %5837 = vmatmul.bf16.gmra.mxu1 %v5630_v57  ;;  %7323 = vpow2.f32 %v3410_v0  ;;  %v14657_v14 = vld [vmem:[#allocation69_spill] sm:$0xff]  ;;  %v14660_v40 = vld [vmem:[#allocation38_spill] sm:$0xff] }
 0x597   : > { %v4663_v18 = vsel %vm4656_vm8, %v4646_v15, %v14649_v56  ;;  %v4665_v59 = vsel %vm4656_vm8, %v4644_v50, %v4646_v15  ;;  %v4737_v24 = vadd.f32 %v4671_v54, %v4592_v58  ;;  %v4739_v8 = vadd.f32 %v4669_v63, %v4594_v42  ;;  %v14659_v50 = vld [vmem:[#allocation48_spill] sm:$0xff]  ;;  %v14661_v56 = vld [vmem:[#allocation35_spill] sm:$0xff] }
 0x598   : > { %v4741_v32 = vadd.f32 %v4667_v10, %v4596_v17  ;;  %v4743_v3 = vadd.f32 %v4665_v59, %v4598_v62  ;;  %v4745_v36 = vadd.f32 %v4663_v18, %v14648_v46  ;;  %v4035_v61 = vadd.f32 1.0, %v7322_v53  ;;  %v14662_v59 = vld [vmem:[#allocation44_spill] sm:$0xff] }
 0x599   : > { %v4817_v39 = vadd.f32 %v4737_v24, %v14650_v9  ;;  %v4819_v35 = vadd.f32 %v4739_v8, %v4737_v24  ;;  %7325 = vpow2.f32 %v3414_v19  ;;  %v14653_v13 = vrot.slane %v14652_v30, 6 }
 0x59a   : > { %v4821_v11 = vadd.f32 %v4741_v32, %v4739_v8  ;;  %v4823_v51 = vadd.f32 %v4743_v3, %v4741_v32  ;;  %v4825_v22 = vadd.f32 %v4745_v36, %v4743_v3  ;;  %v4827_v26 = vadd.f32 %v12586_v21, %v4745_v36  ;;  %v14664_v32 = vld [vmem:[#allocation32_spill] sm:$0xff]  ;;  %v14665_v36 = vld [vmem:[#allocation94_spill] sm:$0xff] }
 0x59b   : > { %v4897_v16 = vadd.f32 %v4817_v39, %v14651_v45  ;;  %v14655_v12 = vrot.slane %v14654_v44, 6  ;;  %v4899_v58 = vadd.f32 %v4819_v35, %v14656_v34  ;;  %7327 = vlog2.f32 %v4033_v20 }
 0x59c   : > { %v4901_v42 = vadd.f32 %v4821_v11, %v4817_v39  ;;  %v4903_v53 = vadd.f32 %v4823_v51, %v4819_v35  ;;  %v4905_v17 = vadd.f32 %v4825_v22, %v4821_v11  ;;  %v4907_v62 = vadd.f32 %v4827_v26, %v4823_v51  ;;  %v7324_v1 = vpop.eup %7323  ;;  %v14666_v39 = vld [vmem:[#allocation127_spill] sm:$0xff]  ;;  %v14667_v51 = vld [vmem:[#allocation73_spill] sm:$0xff] }
 0x59d   : > { %v4519_v57 = vsel %vm4511_vm7, %v14655_v12, %v14653_v13  ;;  %v4909_v52 = vadd.f32 %v12598_v6, %v4825_v22  ;;  %v4911_v21 = vadd.f32 %v12629_v33, %v4827_v26  ;;  %v4977_v28 = vadd.f32 %v4897_v16, %v14657_v14  ;;  %v14663_v6 = vld [vmem:[#allocation37_spill] sm:$0xff]  ;;  %v14668_v26 = vld [vmem:[#allocation124_spill] sm:$0xff] }
 0x59e   : > { %v4979_v31 = vadd.f32 %v4899_v58, %v14658_v25  ;;  %v4981_v15 = vadd.f32 %v4901_v42, %v14659_v50  ;;  %v4983_v63 = vadd.f32 %v4903_v53, %v14660_v40  ;;  %v4985_v48 = vadd.f32 %v4905_v17, %v4897_v16  ;;  %v14669_v16 = vld [vmem:[#allocation81_spill] sm:$0xff]  ;;  %v14678_v25 = vld [vmem:[#allocation28_spill] sm:$0xff]  ;;  %v14679_v50 = vld [vmem:[#allocation58_spill] sm:$0xff] }
 0x59f   : > { %v4987_v54 = vadd.f32 %v4907_v62, %v4899_v58  ;;  %v4989_v0 = vadd.f32 %v4909_v52, %v4901_v42  ;;  %v4991_v46 = vadd.f32 %v4911_v21, %v4903_v53  ;;  %v5057_v18 = vadd.f32 %v4977_v28, %v14661_v56  ;;  %v7326_v8 = vpop.eup %7325  ;;  %v14670_v13 = vld [vmem:[#allocation129_spill] sm:$0xff]  ;;  %v14672_v58 = vld [vmem:[#allocation92_spill] sm:$0xff]  ;;  %v14673_v53 = vld [vmem:[#allocation111_spill] sm:$0xff] }
 0x5a0   : > { %v5059_v10 = vadd.f32 %v4979_v31, %v14662_v59  ;;  %v5061_v24 = vadd.f32 %v4981_v15, %v14663_v6  ;;  %v12833_v33 = vadd.f32 %v4519_v57, %v14652_v30  ;;  %v5606_v11 = vmul.f32 %v12651_v47, %v12753_v7  ;;  %v14671_v57 = vld [vmem:[#allocation64_spill] sm:$0xff]  ;;  %v14675_v62 = vld [vmem:[#allocation138_spill] sm:$0xff]  ;;  %v14677_v28 = vld [vmem:[#allocation91_spill] sm:$0xff] }
 0x5a1   : > { %v5067_v3 = vadd.f32 %v4987_v54, %v14664_v32  ;;  %v5069_v9 = vadd.f32 %v4989_v0, %v14665_v36  ;;  %v12838_v19 = vadd.f32 %v4991_v46, %v14666_v39  ;;  %v12841_v35 = vsub.f32 %v12794_v55, %v5057_v18  ;;  %v7328_v14 = vpop.eup %7327  ;;  %v14681_v54 = vld [vmem:[#allocation137_spill] sm:$0xff] }
 0x5a2   : > { %v5063_v22 = vadd.f32 %v4983_v63, %v14667_v51  ;;  %v12846_v20 = vsub.f32 %v4258_v38, %v5059_v10  ;;  %7329 = vlog2.f32 %v4035_v61  ;;  %v3457_v55 = vadd.f32 1.0, %v7324_v1  ;;  %v14680_v63 = vld [vmem:[#allocation42_spill] sm:$0xff]  ;;  %v14683_v59 = vld [vmem:[#allocation97_spill] sm:$0xff] }
 0x5a3   : > { %v12849_v45 = vsub.f32 %v14668_v26, %v5067_v3  ;;  %v12852_v30 = vsub.f32 %v14669_v16, %v5069_v9  ;;  %v12856_v12 = vsub.f32 %v14670_v13, %v12838_v19  ;;  %v5065_v34 = vadd.f32 %v4985_v48, %v14671_v57  ;;  %v14685_v32 = vld [vmem:[#allocation77_spill] sm:$0xff]  ;;  %v14687_v9 = vld [vmem:[#allocation75_spill] sm:$0xff]  ;;  %v14690_v26 = vld [vmem:[#allocation68_spill] sm:$0xff] }
 0x5a4   : > { %v12860_v47 = vsub.f32 %v14672_v58, %v5061_v24  ;;  %v5131_v7 = vmax.f32 %v12841_v35, %v12846_v20  ;;  %v3459_v38 = vadd.f32 1.0, %v7326_v8  ;;  %7331 = vlog2.f32 %v3457_v55  ;;  %v14684_v8 = vld [vmem:[#allocation131_spill] sm:$0xff]  ;;  %v14691_v58 = vld [vmem:[#allocation150_spill] sm:$0xff] }
 0x5a5   : > { %v3683_v61 = vmax.f32 %v12682_v29, 0.0  ;;  %v4649_v42 = vrot.slane %v12833_v33, 4  ;;  %v14674_v17 = vrot.slane %v14673_v53, 4  ;;  %v14676_v52 = vrot.slane %v14675_v62, 4 }
 0x5a6   : > { %v12874_v31 = vadd.f32 %v14678_v25, %v14677_v28  ;;  %v12877_v15 = vsub.f32 %v14679_v50, %v5063_v22  ;;  %v5132_v40 = vmax.f32 %v5131_v7, %v12860_v47  ;;  %7333 = vlog2.f32 %v3459_v38  ;;  %v14689_v22 = vld [vmem:[#allocation49_spill] sm:$0xff]  ;;  %v14692_v38 = vld [vmem:[#allocation151_spill] sm:$0xff] }
 0x5a7   : > { %v4658_v21 = vsel %vm4656_vm8, %v14676_v52, %v14674_v17  ;;  %v4171_v48 = vsub.f32 0.0, %v14680_v63  ;;  %v5632_v1 = vpack.c.bf16 %v5606_v11, %v12770_v23  ;;  %v14682_v0 = vrot.slane %v14681_v54, 4  ;;  %v14688_v11 = vld [vmem:[#allocation117_spill] sm:$0xff]  ;;  %v14693_v17 = vld [vmem:[#allocation43_spill] sm:$0xff] }
 0x5a8   : > { %v4752_v56 = vadd.f32 %v4658_v21, %v14673_v53  ;;  %v7330_v18 = vpop.eup %7329  ;;  %v12890_v10 = vsub.f32 %v14683_v59, %v5065_v34  ;;  %v5133_v6 = vmax.f32 %v5132_v40, %v12877_v15  ;;  %v3713_v24 = vadd.f32 0.5, %v3681_v49  ;;  %v14696_v59 = vld [vmem:[#allocation71_spill] sm:$0xff] }
 0x5a9   : > { %v4662_v46 = vsel %vm4656_vm8, %v4649_v42, %v14682_v0  ;;  %v14686_v3 = vsub.f32 0.0, %v14685_v32  ;;  %7335 = vlog2.f32 %v14687_v9  ;;  %5842 = vmatmul.bf16.gmra.mxu1 %v5632_v1  ;;  %v3715_v39 = vadd.f32 0.5, %v3683_v61 }
 0x5aa   : > { %v12896_v23 = vadd.f32 %v4662_v46, %v14681_v54  ;;  %v12905_v51 = vadd.f32 %v4752_v56, %v14688_v11  ;;  %7337 = vlog2.f32 %v14689_v22  ;;  %v4173_v16 = vsub.f32 0.0, %v14690_v26  ;;  %v7332_v55 = vpop.eup %7331  ;;  %v14694_v46 = vld [vmem:[#allocation29_spill] sm:$0xff]  ;;  %v14695_v56 = vld [vmem:[#allocation52_spill] sm:$0xff] }
 0x5ab   : > { %v12901_v36 = vadd.f32 %v14686_v3, %v14684_v8  ;;  %v5134_v49 = vmax.f32 %v5133_v6, %v12890_v10  ;;  %v4175_v57 = vsub.f32 0.0, %v12874_v31  ;;  %v4203_v34 = vadd.f32 1e-08, %v4171_v48 }
 0x5ac   : > { %v12912_v13 = vadd.f32 %v14688_v11, %v12896_v23  ;;  %v5348_v7 = vmul.f32 %v12654_v4, %v14691_v58  ;;  %v5350_v61 = vmul.f32 %v12654_v4, %v14692_v38  ;;  %v7334_v53 = vpop.eup %7333  ;;  %vm3659_vm6 = vcmp.ge.f32.partialorder %v14693_v17, 0.0  ;;  %v14700_v38 = vld [vmem:[#allocation45_spill] sm:$0xff] }
 0x5ad   : > { %v5135_v62 = vmax.f32 %v5134_v49, %v12849_v45  ;;  %v3297_v52 = vmax.f32 %v12773_v37, 0.0  ;;  %v3507_v21 = vmul.f32 0.6931472, %v7332_v55  ;;  %v3745_v28 = vadd.f32 1e-08, %v3713_v24  ;;  %v14697_v24 = vld [vmem:[#allocation74_spill] sm:$0xff] }
 0x5ae   : > { %v5384_v25 = vadd.f32 %v12725_v5, %v5348_v7  ;;  %v3299_v31 = vmax.f32 %v12777_v60, 0.0  ;;  %v3511_v50 = vmul.f32 0.6931472, %v7334_v53  ;;  %v3747_v40 = vadd.f32 1e-08, %v3715_v39 }
 0x5af   : > { %v5386_v63 = vadd.f32 %v12725_v5, %v5350_v61  ;;  %v5136_v48 = vmax.f32 %v5135_v62, %v12852_v30  ;;  %v12926_v1 = vadd.f32 %v3507_v21, %v3297_v52  ;;  %v4083_v54 = vmul.f32 0.6931472, %v7328_v14  ;;  %v7336_v0 = vpop.eup %7335  ;;  %v14701_v61 = vld [vmem:[#allocation27_spill] sm:$0xff] }
 0x5b0   : > { %vm3661_vm9 = vcmp.ge.f32.partialorder %v14694_v46, 0.0  ;;  %v5576_v6 = vmul.f32 %v14696_v59, %v14695_v56  ;;  %v5578_v8 = vmul.f32 %v12619_v27, %v14697_v24  ;;  %v12933_v32 = vadd.f32 %v3511_v50, %v3299_v31  ;;  %v7338_v9 = vpop.eup %7337  ;;  %v14702_v24 = vld [vmem:[#allocation163_spill] sm:$0xff] }
 0x5b1   : > { %v4087_v3 = vmul.f32 0.6931472, %v7330_v18  ;;  %v5137_v5 = vmax.f32 %v5136_v48, %v12856_v12  ;;  %v3585_v39 = vsub.f32 0.0, %v12926_v1  ;;  %7339 = vlog2.f32 %v3745_v28 }
 0x5b2   : > { %v14698_v14 = vsub.f32 0.0, %v12663_v41  ;;  %v5608_v22 = vmul.f32 %v5576_v6, %v5384_v25  ;;  %v3587_v26 = vsub.f32 0.0, %v12933_v32  ;;  %7341 = vlog2.f32 %v3747_v40 }
 0x5b3   : > { %v14699_v49 = vsub.f32 0.0, %v12682_v29  ;;  %v5610_v27 = vmul.f32 %v5578_v8, %v5386_v63  ;;  %v5138_v58 = vrot.slane %v5137_v5, 4  ;;  %v4289_v18 = vadd.f32 1e-08, %v3585_v39 }
 0x5b4   : > { %v3873_v11 = vmax.f32 %v14698_v14, 0.0  ;;  %vm3663_vm10 = vcmp.ge.f32.partialorder %v14700_v38, 0.0  ;;  %v3815_v53 = vmul.f32 0.6931472, %v14701_v61  ;;  %v4291_v52 = vadd.f32 1e-08, %v3587_v26 }
 0x5b5   : > { %v3875_v55 = vmax.f32 %v14699_v49, 0.0  ;;  %v3819_v21 = vmul.f32 0.6931472, %v7336_v0  ;;  %v4205_v28 = vadd.f32 1e-08, %v4173_v16  ;;  %v5139_v25 = vmax.f32 %v5137_v5, %v5138_v58  ;;  %v14704_v16 = vld [vmem:[#allocation90_spill] sm:$0xff] }
 0x5b6   : > { %v4129_v7 = vadd.f32 %v4083_v54, %v3873_v11  ;;  %v4352_v31 = vrot.slane %v4289_v18, 7  ;;  %v3823_v50 = vmul.f32 0.6931472, %v7338_v9  ;;  %v4207_v40 = vadd.f32 1e-08, %v4175_v57 }
 0x5b7   : > { %v4131_v62 = vadd.f32 %v4087_v3, %v3875_v55  ;;  %v4235_v63 = vsel %vm3659_vm6, %v3815_v53, %v4203_v34  ;;  %v4354_v48 = vrot.slane %v4291_v52, 7  ;;  %v7340_v54 = vpop.eup %7339  ;;  %v5634_v56 = vpack.c.bf16 %v5610_v27, %v5608_v22  ;;  %v14706_v27 = vld [vmem:[#allocation100_spill] sm:$0xff] }
 0x5b8   : > { %v5140_v59 = vrot.slane %v5139_v25, 2  ;;  %v4161_v6 = vsub.f32 0.0, %v4129_v7  ;;  %v14703_v8 = vrot.slane %v14702_v24, 7  ;;  %v7342_v14 = vpop.eup %7341  ;;  %v14705_v5 = vrot.slane %v14704_v16, 7  ;;  %v14707_v7 = vld [vmem:[#allocation80_spill] sm:$0xff] }
 0x5b9   : > { %v4163_v0 = vsub.f32 0.0, %v4131_v62  ;;  %v4380_v34 = vsel %vm1476_vm1, %v4352_v31, %v4354_v48  ;;  %v4237_v9 = vsel %vm3661_vm9, %v3819_v21, %v4205_v28  ;;  %v12965_v55 = vsel %vm3663_vm10, %v3823_v50, %v4207_v40  ;;  %5847 = vmatmul.bf16.gmra.mxu1 %v5634_v56 }
 0x5ba   : > { %v4382_v3 = vsel %vm1476_vm1, %v14703_v8, %v4352_v31  ;;  %v4378_v57 = vsel %vm1476_vm1, %v4354_v48, %v14705_v5  ;;  %v5141_v11 = vmax.f32 %v5139_v25, %v5140_v59  ;;  %v4450_v22 = vadd.f32 %v4380_v34, %v4291_v52  ;;  %v14708_v31 = vld [vmem:[#allocation154_spill] sm:$0xff] }
 0x5bb   : > { %v4448_v17 = vadd.f32 %v4382_v3, %v4289_v18  ;;  %v4452_v49 = vadd.f32 %v4378_v57, %v14704_v16  ;;  %v12968_v58 = vadd.f32 %v4235_v63, %v14706_v27  ;;  %v12971_v61 = vadd.f32 %v4237_v9, %v14707_v7 }
 0x5bc   : > { %v5142_v18 = vrot.slane %v5141_v11, 1  ;;  %v3795_v62 = vmul.f32 0.6931472, %v7340_v54  ;;  %v4498_v46 = vrot.slane %v4450_v22, 6  ;;  %v3799_v28 = vmul.f32 0.6931472, %v7342_v14 }
 0x5bd   : > { %v4496_v53 = vrot.slane %v4448_v17, 6  ;;  %v4500_v21 = vrot.slane %v4452_v49, 6  ;;  %v4193_v52 = vadd.f32 1e-08, %v4161_v6  ;;  %v4195_v25 = vadd.f32 1e-08, %v4163_v0 }
 0x5be   : > { %v14709_v48 = vrot.slane %v14708_v31, 6  ;;  %v12977_v50 = vmax.f32 %v5141_v11, %v5142_v18  ;;  %v14710_v40 = vrot.slane %v14654_v44, 6  ;;  %vm3649_vm1 = vcmp.ge.f32.partialorder %v12663_v41, 0.0  ;;  %v1365_v31 = vpop.f32.mrf.mxu2 }
 0x5bf   : > { %v4523_v54 = vsel %vm4511_vm7, %v4498_v46, %v4500_v21  ;;  %v4525_v56 = vsel %vm4511_vm7, %v4496_v53, %v4498_v46 }
 0x5c0   : > { %v4527_v38 = vsel %vm4511_vm7, %v14709_v48, %v4496_v53  ;;  %v4521_v63 = vsel %vm4511_vm7, %v4500_v21, %v14710_v40  ;;  %v4595_v6 = vadd.f32 %v4525_v56, %v4450_v22  ;;  %v4597_v24 = vadd.f32 %v4523_v54, %v4452_v49 }
 0x5c1   : > { %v4593_v59 = vadd.f32 %v4527_v38, %v4448_v17  ;;  %v4599_v8 = vadd.f32 %v4521_v63, %v14654_v44  ;;  %v5173_v3 = vsub.f32 %v12841_v35, %v12977_v50  ;;  %v5175_v14 = vsub.f32 %v12846_v20, %v12977_v50  ;;  %v14713_v38 = vld [vmem:[#allocation40_spill] sm:$0xff] }
 0x5c2   : > { %v5177_v0 = vsub.f32 %v12860_v47, %v12977_v50  ;;  %v5179_v16 = vsub.f32 %v12877_v15, %v12977_v50  ;;  %v5181_v5 = vsub.f32 %v12890_v10, %v12977_v50  ;;  %v5183_v57 = vsub.f32 %v12849_v45, %v12977_v50 }
 0x5c3   : > { %v5185_v44 = vsub.f32 %v12852_v30, %v12977_v50  ;;  %v5187_v35 = vsub.f32 %v12856_v12, %v12977_v50  ;;  %v5221_v34 = vmul.f32 1.442695, %v5173_v3  ;;  %v5225_v20 = vmul.f32 1.442695, %v5175_v14  ;;  %v14715_v14 = vld [vmem:[#allocation36_spill] sm:$0xff] }
 0x5c4   : > { %vm3651_vm7 = vcmp.ge.f32.partialorder %v12682_v29, 0.0  ;;  %v5229_v47 = vmul.f32 1.442695, %v5177_v0  ;;  %v3617_v15 = vadd.f32 %v3585_v39, %v12773_v37  ;;  %v4225_v10 = vsel %vm3649_vm1, %v3795_v62, %v4193_v52  ;;  %v14711_v29 = vld [vmem:[#allocation157_spill] sm:$0xff] }
 0x5c5   : > { %v13009_v17 = vsel %vm3651_vm7, %v3799_v28, %v4195_v25  ;;  %7343 = vpow2.f32 %v5221_v34  ;;  %v5233_v45 = vmul.f32 1.442695, %v5179_v16  ;;  %v5237_v30 = vmul.f32 1.442695, %v5181_v5 }
 0x5c6   : > { %v4641_v9 = vrot.slane %v4593_v59, 4  ;;  %7345 = vpow2.f32 %v5225_v20  ;;  %v4643_v12 = vrot.slane %v4595_v6, 4  ;;  %v4645_v11 = vrot.slane %v4597_v24, 4  ;;  %v14716_v20 = vld [vmem:[#allocation107_spill] sm:$0xff] }
 0x5c7   : > { %v4647_v22 = vrot.slane %v4599_v8, 4  ;;  %v5241_v49 = vmul.f32 1.442695, %v5183_v57  ;;  %v5245_v41 = vmul.f32 1.442695, %v5185_v44  ;;  %v14712_v7 = vrot.slane %v14711_v29, 4 }
 0x5c8   : > { %v5249_v27 = vmul.f32 1.442695, %v5187_v35  ;;  %7347 = vpow2.f32 %v5229_v47  ;;  %v4668_v53 = vsel %vm4656_vm8, %v4643_v12, %v4645_v11  ;;  %v4670_v18 = vsel %vm4656_vm8, %v4641_v9, %v4643_v12  ;;  %v14719_v12 = vld [vmem:[#allocation126_spill] sm:$0xff] }
 0x5c9   : > { %v4672_v1 = vsel %vm4656_vm8, %v14712_v7, %v4641_v9  ;;  %v4664_v37 = vsel %vm4656_vm8, %v4647_v22, %v4649_v42  ;;  %v4666_v39 = vsel %vm4656_vm8, %v4645_v11, %v4647_v22  ;;  %7349 = vpow2.f32 %v5233_v45  ;;  %v14720_v7 = vld [vmem:[#allocation147_spill] sm:$0xff] }
 0x5ca   : > { %v4738_v62 = vadd.f32 %v4672_v1, %v4593_v59  ;;  %v4742_v46 = vadd.f32 %v4668_v53, %v4597_v24  ;;  %7351 = vpow2.f32 %v5237_v30  ;;  %v4740_v21 = vadd.f32 %v4670_v18, %v4595_v6  ;;  %v14721_v1 = vld [vmem:[#allocation158_spill] sm:$0xff] }
 0x5cb   : > { %v4744_v28 = vadd.f32 %v4666_v39, %v4599_v8  ;;  %v4746_v52 = vadd.f32 %v4664_v37, %v12833_v33  ;;  %v7344_v25 = vpop.eup %7343  ;;  %7353 = vpow2.f32 %v5241_v49  ;;  %v3619_v42 = vadd.f32 %v3587_v26, %v12777_v60  ;;  %v14714_v33 = vld [vmem:[#allocation152_spill] sm:$0xff] }
 0x5cc   : > { %v4257_v48 = vadd.f32 %v4225_v10, %v3617_v15  ;;  %v4818_v40 = vadd.f32 %v4738_v62, %v14713_v38  ;;  %v7346_v63 = vpop.eup %7345  ;;  %7355 = vpow2.f32 %v5245_v41  ;;  %v4820_v2 = vadd.f32 %v4740_v21, %v4738_v62  ;;  %v14718_v10 = vld [vmem:[#allocation88_spill] sm:$0xff] }
 0x5cd   : > { %v4822_v54 = vadd.f32 %v4742_v46, %v4740_v21  ;;  %v4824_v56 = vadd.f32 %v4744_v28, %v4742_v46  ;;  %v5279_v59 = vadd.f32 %v7346_v63, %v7344_v25  ;;  %v4826_v6 = vadd.f32 %v4746_v52, %v4744_v28  ;;  %v14723_v62 = vld [vmem:[#allocation96_spill] sm:$0xff]  ;;  %v14724_v28 = vld [vmem:[#allocation155_spill] sm:$0xff]  ;;  %v14725_v25 = vld [vmem:[#allocation41_spill] sm:$0xff] }
 0x5ce   : > { %v4828_v24 = vadd.f32 %v12896_v23, %v4746_v52  ;;  %v4898_v8 = vadd.f32 %v4818_v40, %v14714_v33  ;;  %v7348_v3 = vpop.eup %7347  ;;  %7357 = vpow2.f32 %v5249_v27  ;;  %v4900_v0 = vadd.f32 %v4820_v2, %v14715_v14  ;;  %v14717_v23 = vld [vmem:[#allocation65_spill] sm:$0xff] }
 0x5cf   : > { %v4902_v32 = vadd.f32 %v4822_v54, %v4818_v40  ;;  %v4904_v60 = vadd.f32 %v4824_v56, %v4820_v2  ;;  %v7350_v26 = vpop.eup %7349  ;;  %v5280_v16 = vadd.f32 %v7348_v3, %v5279_v59  ;;  %v4906_v5 = vadd.f32 %v4826_v6, %v4822_v54  ;;  %v14726_v2 = vld [vmem:[#allocation121_spill] sm:$0xff]  ;;  %v1367_v54 = vpop.f32.mrf.mxu2  ;;  %v14730_v3 = vld [vmem:[#allocation50_spill] sm:$0xff] }
 0x5d0   : > { %v4908_v57 = vadd.f32 %v4828_v24, %v4824_v56  ;;  %v4910_v44 = vadd.f32 %v12912_v13, %v4826_v6  ;;  %v7352_v35 = vpop.eup %7351  ;;  %v4912_v34 = vadd.f32 %v12905_v51, %v4828_v24  ;;  %v4978_v47 = vadd.f32 %v4898_v8, %v14716_v20  ;;  %v14722_v51 = vld [vmem:[#allocation136_spill] sm:$0xff] }
 0x5d1   : > { %v4980_v15 = vadd.f32 %v4900_v0, %v14717_v23  ;;  %v4982_v45 = vadd.f32 %v4902_v32, %v14718_v10  ;;  %v7354_v30 = vpop.eup %7353  ;;  %v5281_v9 = vadd.f32 %v7350_v26, %v5280_v16  ;;  %v4984_v11 = vadd.f32 %v4904_v60, %v14719_v12  ;;  %v14732_v16 = vld [vmem:[#allocation125_spill] sm:$0xff] }
 0x5d2   : > { %v4986_v22 = vadd.f32 %v4906_v5, %v4898_v8  ;;  %v4988_v49 = vadd.f32 %v4908_v57, %v4900_v0  ;;  %v7356_v41 = vpop.eup %7355  ;;  %v4990_v27 = vadd.f32 %v4910_v44, %v4902_v32  ;;  %v4992_v29 = vadd.f32 %v4912_v34, %v4904_v60  ;;  %v14731_v0 = vld [vmem:[#allocation93_spill] sm:$0xff]  ;;  %v14733_v57 = vld [vmem:[#allocation86_spill] sm:$0xff] }
 0x5d3   : > { %v5058_v13 = vadd.f32 %v4978_v47, %v14720_v7  ;;  %v5060_v37 = vadd.f32 %v4980_v15, %v14721_v1  ;;  %v4271_v39 = vadd.f32 %v12965_v55, %v14722_v51  ;;  %v5282_v53 = vadd.f32 %v7352_v35, %v5281_v9  ;;  %v14727_v55 = vld [vmem:[#allocation144_spill] sm:$0xff] }
 0x5d4   : > { %v4259_v18 = vadd.f32 %v13009_v17, %v3619_v42  ;;  %v5062_v46 = vadd.f32 %v4982_v45, %v14723_v62  ;;  %v7358_v21 = vpop.eup %7357  ;;  %v5068_v52 = vadd.f32 %v4988_v49, %v14724_v28  ;;  %v5070_v38 = vadd.f32 %v4990_v27, %v14725_v25  ;;  %v14728_v17 = vld [vmem:[#allocation116_spill] sm:$0xff]  ;;  %v14729_v42 = vld [vmem:[#allocation87_spill] sm:$0xff] }
 0x5d5   : > { %v13048_v40 = vadd.f32 %v4992_v29, %v12327_v43  ;;  %v13050_v63 = vsub.f32 %v4257_v48, %v5058_v13  ;;  %vm3657_vm8 = vcmp.ge.f32.partialorder %v14726_v2, 0.0  ;;  %v5283_v56 = vadd.f32 %v7354_v30, %v5282_v53 }
 0x5d6   : > { %v5064_v59 = vadd.f32 %v4984_v11, %v14727_v55  ;;  %v13054_v6 = vsub.f32 %v4259_v18, %v5060_v37  ;;  %v4233_v24 = vsel %vm3657_vm8, %v14729_v42, %v14728_v17  ;;  %v13059_v33 = vsub.f32 %v12968_v58, %v5068_v52  ;;  %v13102_v42 = vpop.f32.mrf.mxu3 }
 0x5d7   : > { %v13062_v8 = vsub.f32 %v12971_v61, %v5070_v38  ;;  %v13065_v43 = vsub.f32 %v4271_v39, %v13048_v40  ;;  %v5284_v48 = vadd.f32 %v7356_v41, %v5283_v56  ;;  %v5066_v14 = vadd.f32 %v4986_v22, %v14730_v3 }
 0x5d8   : > { %v5094_v32 = vsub.f32 %v14731_v0, %v5062_v46  ;;  %v5144_v60 = vmax.f32 %v13050_v63, %v13054_v6  ;;  %v4265_v26 = vadd.f32 %v4233_v24, %v12901_v36  ;;  %v13073_v5 = vadd.f32 %v1365_v31, %v14732_v16  ;;  %v1370_v36 = vpop.f32.mrf.mxu2 }
 0x5d9   : > { %v5285_v58 = vadd.f32 %v7358_v21, %v5284_v48  ;;  %v5096_v61 = vsub.f32 %v14733_v57, %v5064_v59  ;;  %v13077_v35 = vadd.f32 %v1367_v54, %v14732_v16  ;;  %v13087_v52 = vadd.f32 %v1370_v36, %v14732_v16 }
 0x5da   : > { %v5145_v44 = vmax.f32 %v5144_v60, %v5094_v32  ;;  %v5098_v20 = vsub.f32 %v4265_v26, %v5066_v14  ;;  %v5419_v23 = vsub.f32 0.0, %v13073_v5 }
 0x5db   : > { %v5286_v34 = vrot.slane %v5285_v58, 4  ;;  %v5421_v45 = vsub.f32 0.0, %v13077_v35 }
 0x5dc   : > { %v5146_v47 = vmax.f32 %v5145_v44, %v5096_v61  ;;  %v5467_v9 = vmul.f32 1.442695, %v5419_v23 }
 0x5dd   : > { %v5287_v15 = vadd.f32 %v5286_v34, %v5285_v58  ;;  %v5471_v22 = vmul.f32 1.442695, %v5421_v45  ;;  %v14734_v34 = vld [vmem:[#allocation76_spill] sm:$0xff] }
 0x5de   : > { %v5147_v10 = vmax.f32 %v5146_v47, %v5098_v20  ;;  %7359 = vpow2.f32 %v5467_v9  ;;  %v14736_v45 = vld [vmem:[#allocation156_spill] sm:$0xff] }
 0x5df   : > { %v5288_v30 = vrot.slane %v5287_v15, 2  ;;  %7361 = vpow2.f32 %v5471_v22 }
 0x5e0   : > { %v5148_v31 = vmax.f32 %v5147_v10, %v13059_v33  ;;  %v1372_v13 = vpop.f32.mrf.mxu2 }
 0x5e1   : > { %v5289_v12 = vadd.f32 %v5288_v30, %v5287_v15  ;;  %v1416_v15 = vpop.f32.mrf.mxu3 }
 0x5e2   : > { %v5149_v11 = vmax.f32 %v5148_v31, %v13062_v8 }
 0x5e3   : > { %v5290_v49 = vrot.slane %v5289_v12, 1 }
 0x5e4   : > { %v5150_v41 = vmax.f32 %v5149_v11, %v13065_v43  ;;  %v7360_v37 = vpop.eup %7359 }
 0x5e5   : > { %v5291_v27 = vadd.f32 %v5290_v49, %v5289_v12  ;;  %v7362_v39 = vpop.eup %7361  ;;  %v5515_v46 = vadd.f32 1.0, %v7360_v37 }
 0x5e6   : > { %v5151_v29 = vrot.slane %v5150_v41, 4  ;;  %v5517_v28 = vadd.f32 1.0, %v7362_v39 }
 0x5e7   : > { %7363 = vlog2.f32 %v5291_v27 }
 0x5e8   : > { %v5152_v7 = vmax.f32 %v5150_v41, %v5151_v29  ;;  %7365 = vrcp.f32 %v5515_v46 }
 0x5e9   : > { %7367 = vrcp.f32 %v5517_v28 }
 0x5ea   : > { %v5153_v1 = vrot.slane %v5152_v7, 2 }
 0x5ec   : > { %v5154_v51 = vmax.f32 %v5152_v7, %v5153_v1 }
 0x5ed   : > { %v7364_v53 = vpop.eup %7363 }
 0x5ee   : > { %v5155_v18 = vrot.slane %v5154_v51, 1  ;;  %v5310_v62 = vmul.f32 0.6931472, %v7364_v53 }
 0x5f0   : > { %v13084_v21 = vmax.f32 %v5154_v51, %v5155_v18  ;;  %v5315_v25 = vadd.f32 %v5310_v62, %v12977_v50 }
 0x5f2   : > { %v5174_v38 = vsub.f32 %v13050_v63, %v13084_v21  ;;  %v5176_v2 = vsub.f32 %v13054_v6, %v13084_v21  ;;  %v5178_v54 = vsub.f32 %v5094_v32, %v13084_v21  ;;  %v5180_v56 = vsub.f32 %v5096_v61, %v13084_v21  ;;  %v1375_v63 = vpop.f32.mrf.mxu2  ;;  %v7366_v32 = vpop.eup %7365 }
 0x5f3   : > { %v5319_v55 = vadd.f32 %v5315_v25, %v12838_v19  ;;  %v5182_v59 = vsub.f32 %v5098_v20, %v13084_v21  ;;  %v5184_v17 = vsub.f32 %v13059_v33, %v13084_v21  ;;  %v5186_v50 = vsub.f32 %v13062_v8, %v13084_v21  ;;  %v14735_v20 = vld [vmem:[#allocation145_spill] sm:$0xff] }
 0x5f4   : > { %v5188_v6 = vsub.f32 %v13065_v43, %v13084_v21  ;;  %v5223_v24 = vmul.f32 1.442695, %v5174_v38  ;;  %v5227_v48 = vmul.f32 1.442695, %v5176_v2  ;;  %v13107_v19 = vadd.f32 %v1372_v13, %v14732_v16  ;;  %v7368_v43 = vpop.eup %7367  ;;  %v1419_v2 = vpop.f32.mrf.mxu3 }
 0x5f5   : > { %v5325_v3 = vmul.f32 1.442695, %v5319_v55  ;;  %v5231_v14 = vmul.f32 1.442695, %v5178_v54  ;;  %v5423_v33 = vsub.f32 0.0, %v13087_v52  ;;  %v5351_v47 = vmul.f32 %v14735_v20, %v14734_v34 }
 0x5f6   : > { %7369 = vpow2.f32 %v5223_v24  ;;  %v5235_v8 = vmul.f32 1.442695, %v5180_v56  ;;  %v5425_v0 = vsub.f32 0.0, %v13107_v19  ;;  %v5239_v60 = vmul.f32 1.442695, %v5182_v59 }
 0x5f7   : > { %7371 = vpow2.f32 %v5325_v3  ;;  %v5475_v26 = vmul.f32 1.442695, %v5423_v33  ;;  %v5243_v57 = vmul.f32 1.442695, %v5184_v17  ;;  %v5353_v36 = vmul.f32 %v14735_v20, %v14736_v45 }
 0x5f8   : > { %7373 = vpow2.f32 %v5227_v48  ;;  %v5479_v44 = vmul.f32 1.442695, %v5425_v0  ;;  %v5247_v31 = vmul.f32 1.442695, %v5186_v50  ;;  %v5579_v9 = vmul.f32 %v7366_v32, %v13073_v5  ;;  %v14737_v50 = vld [vmem:[#allocation30_spill] sm:$0xff] }
 0x5f9   : > { %7375 = vpow2.f32 %v5231_v14  ;;  %v5581_v12 = vmul.f32 %v7368_v43, %v13077_v35  ;;  %v5251_v27 = vmul.f32 1.442695, %v5188_v6  ;;  %v13122_v37 = vadd.f32 %v1375_v63, %v14732_v16 }
 0x5fa   : > { %7377 = vpow2.f32 %v5235_v8  ;;  %v1377_v10 = vpop.f32.mrf.mxu2  ;;  %v13131_v63 = vadd.f32 %v13102_v42, %v14737_v50  ;;  %v13134_v3 = vadd.f32 %v1416_v15, %v14737_v50 }
 0x5fb   : > { %7379 = vpow2.f32 %v5239_v60  ;;  %v13125_v53 = vadd.f32 %v1377_v10, %v14732_v16  ;;  %v5427_v28 = vsub.f32 0.0, %v13122_v37  ;;  %v14738_v10 = vld [vmem:[#allocation101_spill] sm:$0xff] }
 0x5fc   : > { %v7370_v58 = vpop.eup %7369  ;;  %7381 = vpow2.f32 %v5475_v26  ;;  %v5420_v8 = vsub.f32 0.0, %v13131_v63  ;;  %v5422_v32 = vsub.f32 0.0, %v13134_v3  ;;  %v1421_v43 = vpop.f32.mrf.mxu3  ;;  %v5355_v45 = vmul.f32 %v14735_v20, %v14738_v10 }
 0x5fd   : > { %v7372_v61 = vpop.eup %7371  ;;  %7383 = vpow2.f32 %v5243_v57  ;;  %v5429_v55 = vsub.f32 0.0, %v13125_v53  ;;  %v5483_v24 = vmul.f32 1.442695, %v5427_v28 }
 0x5fe   : > { %v7374_v23 = vpop.eup %7373  ;;  %v13115_v30 = vperm.slane %v7372_v61, 7  ;;  %7385 = vpow2.f32 %v5479_v44  ;;  %v5469_v42 = vmul.f32 1.442695, %v5420_v8  ;;  %v5473_v44 = vmul.f32 1.442695, %v5422_v32 }
 0x5ff   : > { %v5292_v11 = vadd.f32 %v7374_v23, %v7370_v58  ;;  %v7376_v22 = vpop.eup %7375  ;;  %7387 = vpow2.f32 %v5247_v31  ;;  %v5487_v14 = vmul.f32 1.442695, %v5429_v55 }
 0x600   : > { %v5387_v49 = vadd.f32 %v13115_v30, %v5351_v47  ;;  %v5389_v41 = vadd.f32 %v13115_v30, %v5353_v36  ;;  %v7378_v7 = vpop.eup %7377  ;;  %7389 = vpow2.f32 %v5251_v27  ;;  %v14739_v36 = vld [vmem:[#allocation70_spill] sm:$0xff] }
 0x601   : > { %v5293_v29 = vadd.f32 %v7376_v22, %v5292_v11  ;;  %v7380_v35 = vpop.eup %7379  ;;  %v5357_v31 = vmul.f32 %v14735_v20, %v14739_v36 }
 0x602   : > { %v5611_v13 = vmul.f32 %v5579_v9, %v5387_v49  ;;  %v5613_v1 = vmul.f32 %v5581_v12, %v5389_v41  ;;  %v7382_v39 = vpop.eup %7381  ;;  %v1380_v54 = vpop.f32.mrf.mxu2  ;;  %v5391_v49 = vadd.f32 %v13115_v30, %v5355_v45 }
 0x603   : > { %v5294_v5 = vadd.f32 %v7378_v7, %v5293_v29  ;;  %v7384_v62 = vpop.eup %7383  ;;  %v5519_v56 = vadd.f32 1.0, %v7382_v39  ;;  %v13139_v34 = vadd.f32 %v1380_v54, %v14732_v16  ;;  %v5393_v41 = vadd.f32 %v13115_v30, %v5357_v31 }
 0x604   : > { %v5635_v51 = vpack.c.bf16 %v5613_v1, %v5611_v13  ;;  %v7386_v46 = vpop.eup %7385 }
 0x605   : > { %v5295_v18 = vadd.f32 %v7380_v35, %v5294_v5  ;;  %v7388_v38 = vpop.eup %7387  ;;  %v5521_v6 = vadd.f32 1.0, %v7386_v46  ;;  %7391 = vrcp.f32 %v5519_v56  ;;  %v5431_v29 = vsub.f32 0.0, %v13139_v34 }
 0x606   : > { %5803 = vmatmul.bf16.gmra.mxu0 %v5635_v51  ;;  %v7390_v17 = vpop.eup %7389  ;;  %v1424_v51 = vpop.f32.mrf.mxu3 }
 0x607   : > { %v5296_v25 = vadd.f32 %v7384_v62, %v5295_v18  ;;  %7393 = vrcp.f32 %v5521_v6  ;;  %v5491_v39 = vmul.f32 1.442695, %v5431_v29  ;;  %v13159_v18 = vadd.f32 %v1421_v43, %v14737_v50 }
 0x608   : > { %7395 = vpow2.f32 %v5483_v24  ;;  %v13173_v36 = vadd.f32 %v1424_v51, %v14737_v50 }
 0x609   : > { %v5297_v59 = vadd.f32 %v7388_v38, %v5296_v25  ;;  %7397 = vpow2.f32 %v5487_v14  ;;  %v5426_v54 = vsub.f32 0.0, %v13159_v18 }
 0x60a   : > { %v1382_v26 = vpop.f32.mrf.mxu2  ;;  %7399 = vpow2.f32 %v5469_v42  ;;  %v5428_v29 = vsub.f32 0.0, %v13173_v36 }
 0x60b   : > { %v5298_v48 = vadd.f32 %v7390_v17, %v5297_v59  ;;  %v7392_v58 = vpop.eup %7391  ;;  %v13142_v23 = vadd.f32 %v1382_v26, %v14732_v16  ;;  %7401 = vpow2.f32 %v5473_v44  ;;  %v13153_v16 = vadd.f32 %v1419_v2, %v14737_v50 }
 0x60c   : > { %v5583_v9 = vmul.f32 %v7392_v58, %v13087_v52  ;;  %v5481_v24 = vmul.f32 1.442695, %v5426_v54 }
 0x60d   : > { %v5299_v33 = vrot.slane %v5298_v48, 4  ;;  %v7394_v61 = vpop.eup %7393  ;;  %v5433_v7 = vsub.f32 0.0, %v13142_v23  ;;  %v5424_v35 = vsub.f32 0.0, %v13153_v16 }
 0x60e   : > { %v7396_v47 = vpop.eup %7395  ;;  %v5585_v11 = vmul.f32 %v7394_v61, %v13107_v19  ;;  %v5615_v13 = vmul.f32 %v5583_v9, %v5391_v49  ;;  %v1426_v32 = vpop.f32.mrf.mxu3  ;;  %v14742_v9 = vld [vmem:[#allocation164_spill] sm:$0xff] }
 0x60f   : > { %v5300_v0 = vadd.f32 %v5299_v33, %v5298_v48  ;;  %v7398_v12 = vpop.eup %7397  ;;  %v5523_v27 = vadd.f32 1.0, %v7396_v47  ;;  %v5495_v62 = vmul.f32 1.442695, %v5433_v7  ;;  %v5477_v25 = vmul.f32 1.442695, %v5424_v35  ;;  %v14740_v48 = vld [vmem:[#allocation85_spill] sm:$0xff] }
 0x610   : > { %v5617_v52 = vmul.f32 %v5585_v11, %v5393_v41  ;;  %v5525_v1 = vadd.f32 1.0, %v7398_v12  ;;  %v7400_v19 = vpop.eup %7399  ;;  %v5359_v14 = vmul.f32 %v14735_v20, %v14740_v48  ;;  %v14741_v33 = vld [vmem:[#allocation53_spill] sm:$0xff]  ;;  %v5352_v12 = vmul.f32 %v12654_v4, %v14742_v9  ;;  %v14743_v11 = vld [vmem:[#allocation146_spill] sm:$0xff] }
 0x611   : > { %v5301_v60 = vrot.slane %v5300_v0, 2  ;;  %v7402_v46 = vpop.eup %7401  ;;  %v5516_v2 = vadd.f32 1.0, %v7400_v19  ;;  %v5361_v8 = vmul.f32 %v14735_v20, %v14741_v33  ;;  %v14749_v9 = vld [vmem:[#allocation46_spill] sm:$0xff] }
 0x612   : > { %v5637_v5 = vpack.c.bf16 %v5617_v52, %v5615_v13  ;;  %v5518_v56 = vadd.f32 1.0, %v7402_v46  ;;  %v5395_v26 = vadd.f32 %v13115_v30, %v5359_v14  ;;  %v5485_v46 = vmul.f32 1.442695, %v5428_v29  ;;  %v14746_v14 = vld [vmem:[#allocation114_spill] sm:$0xff] }
 0x613   : > { %v5302_v57 = vadd.f32 %v5301_v60, %v5300_v0  ;;  %v5356_v33 = vmul.f32 %v12654_v4, %v14746_v14 }
 0x615   : > { %v5303_v15 = vrot.slane %v5302_v57, 1 }
 0x616   : > { %5808 = vmatmul.bf16.gmra.mxu0 %v5637_v5  ;;  %v1429_v7 = vpop.f32.mrf.mxu3 }
 0x617   : > { %v5304_v22 = vadd.f32 %v5303_v15, %v5302_v57 }
 0x619   : > { %7403 = vlog2.f32 %v5304_v22  ;;  %v5354_v22 = vmul.f32 %v12654_v4, %v14743_v11  ;;  %v14750_v11 = vld [vmem:[#allocation47_spill] sm:$0xff] }
 0x61a   : > { %7405 = vrcp.f32 %v5523_v27 }
 0x61b   : > { %7407 = vrcp.f32 %v5525_v1 }
 0x61c   : > { %7409 = vpow2.f32 %v5491_v39 }
 0x61d   : > { %7411 = vpow2.f32 %v5495_v62 }
 0x61e   : > { %7413 = vpow2.f32 %v5477_v25  ;;  %v14744_v25 = vld [vmem:[#allocation104_spill] sm:$0xff]  ;;  %v1431_v48 = vpop.f32.mrf.mxu3 }
 0x61f   : > { %v7404_v28 = vpop.eup %7403  ;;  %7415 = vrcp.f32 %v5516_v2  ;;  %v14745_v2 = vld [vmem:[#allocation120_spill] sm:$0xff] }
 0x620   : > { %v5312_v38 = vmul.f32 0.6931472, %v7404_v28  ;;  %v7406_v59 = vpop.eup %7405  ;;  %7417 = vrcp.f32 %v5518_v56 }
 0x621   : > { %v7408_v17 = vpop.eup %7407 }
 0x622   : > { %v5316_v55 = vadd.f32 %v5312_v38, %v13084_v21  ;;  %v7410_v0 = vpop.eup %7409  ;;  %v5587_v21 = vmul.f32 %v7406_v59, %v13122_v37  ;;  %v5589_v43 = vmul.f32 %v7408_v17, %v13125_v53  ;;  %v13176_v37 = vadd.f32 %v1426_v32, %v14737_v50 }
 0x623   : > { %v7412_v42 = vpop.eup %7411  ;;  %v5527_v58 = vadd.f32 1.0, %v7410_v0  ;;  %v5363_v38 = vmul.f32 %v14735_v20, %v14744_v25  ;;  %v13206_v32 = vadd.f32 %v1431_v48, %v14737_v50 }
 0x624   : > { %v5320_v6 = vadd.f32 %v5316_v55, %v13048_v40  ;;  %v5397_v40 = vadd.f32 %v13115_v30, %v5361_v8  ;;  %v5619_v57 = vmul.f32 %v5587_v21, %v5395_v26  ;;  %v7414_v44 = vpop.eup %7413  ;;  %v5529_v47 = vadd.f32 1.0, %v7412_v42 }
 0x625   : > { %v7416_v15 = vpop.eup %7415  ;;  %v5520_v27 = vadd.f32 1.0, %v7414_v44  ;;  %v5430_v52 = vsub.f32 0.0, %v13176_v37  ;;  %v5399_v55 = vadd.f32 %v13115_v30, %v5363_v38 }
 0x626   : > { %v5327_v60 = vmul.f32 1.442695, %v5320_v6  ;;  %v5621_v61 = vmul.f32 %v5589_v43, %v5397_v40  ;;  %v7418_v45 = vpop.eup %7417  ;;  %v5580_v41 = vmul.f32 %v7416_v15, %v13131_v63 }
 0x627   : > { %v5582_v13 = vmul.f32 %v7418_v45, %v13134_v3  ;;  %v5489_v63 = vmul.f32 1.442695, %v5430_v52  ;;  %v5365_v3 = vmul.f32 %v14735_v20, %v14745_v2  ;;  %v14747_v20 = vld [vmem:[#allocation82_spill] sm:$0xff]  ;;  %v5833_v45 = vpop.f32.mrf.mxu1  ;;  %v7526_v2 = vld [vmem:[%s8145_s27 + $0x8] sm:$0xff] }
 0x628   : > { %7419 = vpow2.f32 %v5327_v60  ;;  %v5639_v10 = vpack.c.bf16 %v5621_v61, %v5619_v57  ;;  %v5358_v8 = vmul.f32 %v12654_v4, %v14747_v20  ;;  %v5434_v57 = vsub.f32 0.0, %v13206_v32 }
 0x629   : > { %7421 = vpow2.f32 %v5481_v24  ;;  %v5401_v59 = vadd.f32 %v13115_v30, %v5365_v3 }
 0x62a   : > { %7423 = vrcp.f32 %v5527_v58  ;;  %5813 = vmatmul.bf16.gmra.mxu0 %v5639_v10  ;;  %v5497_v15 = vmul.f32 1.442695, %v5434_v57 }
 0x62b   : > { %7425 = vrcp.f32 %v5529_v47 }
 0x62c   : > { %7427 = vrcp.f32 %v5520_v27 }
 0x62e   : > { %v7420_v53 = vpop.eup %7419 }
 0x62f   : > { %v7422_v31 = vpop.eup %7421  ;;  %v13182_v49 = vperm.slane %v7420_v53, 7 }
 0x630   : > { %v5522_v19 = vadd.f32 1.0, %v7422_v31  ;;  %v7424_v35 = vpop.eup %7423 }
 0x631   : > { %v5388_v1 = vadd.f32 %v13182_v49, %v5352_v12  ;;  %v5390_v5 = vadd.f32 %v13182_v49, %v5354_v22  ;;  %v7426_v62 = vpop.eup %7425  ;;  %v5591_v54 = vmul.f32 %v7424_v35, %v13139_v34  ;;  %v5392_v30 = vadd.f32 %v13182_v49, %v5356_v33  ;;  %v7527_v33 = vld [vmem:[%s8145_s27 + $0x10] sm:$0xff] }
 0x632   : > { %7429 = vrcp.f32 %v5522_v19  ;;  %v5593_v56 = vmul.f32 %v7426_v62, %v13142_v23  ;;  %v7428_v24 = vpop.eup %7427  ;;  %v13203_v23 = vadd.f32 %v1429_v7, %v14737_v50  ;;  %v5394_v60 = vadd.f32 %v13182_v49, %v5358_v8 }
 0x633   : > { %v5612_v51 = vmul.f32 %v5580_v41, %v5388_v1  ;;  %v5614_v39 = vmul.f32 %v5582_v13, %v5390_v5  ;;  %7431 = vpow2.f32 %v5485_v46  ;;  %v5623_v17 = vmul.f32 %v5591_v54, %v5399_v55  ;;  %v7525_v13 = vld [vmem:[%s8145_s27] sm:$0xff] }
 0x634   : > { %7433 = vpow2.f32 %v5489_v63  ;;  %v5625_v6 = vmul.f32 %v5593_v56, %v5401_v59  ;;  %v5584_v43 = vmul.f32 %v7428_v24, %v13153_v16  ;;  %v5432_v40 = vsub.f32 0.0, %v13203_v23  ;;  %v13217_v16 = vld [vmem:[%s14748_s13] ss:$0 sm:$0xff] }
 0x635   : > { %v5636_v28 = vpack.c.bf16 %v5614_v39, %v5612_v51  ;;  %v5360_v12 = vmul.f32 %v12654_v4, %v14749_v9  ;;  %v5362_v22 = vmul.f32 %v12654_v4, %v14750_v11  ;;  %v5835_v39 = vpop.f32.mrf.mxu1  ;;  %v14752_v24 = vld [vmem:[#allocation123_spill] sm:$0xff] }
 0x636   : > { %v5641_v34 = vpack.c.bf16 %v5625_v6, %v5623_v17  ;;  %v5616_v61 = vmul.f32 %v5584_v43, %v5392_v30  ;;  %v5493_v47 = vmul.f32 1.442695, %v5432_v40  ;;  %v14751_v17 = vld [vmem:[#allocation122_spill] sm:$0xff]  ;;  %v5366_v48 = vmul.f32 %v12654_v4, %v14752_v24 }
 0x637   : > { %5852 = vmatmul.bf16.gmra.mxu1 %v5636_v28  ;;  %v5396_v29 = vadd.f32 %v13182_v49, %v5360_v12  ;;  %v5398_v7 = vadd.f32 %v13182_v49, %v5362_v22  ;;  %v5364_v6 = vmul.f32 %v12654_v4, %v14751_v17  ;;  %v7528_v40 = vld [vmem:[%s8145_s27 + $0x18] sm:$0xff]  ;;  %v7531_v22 = vld [vmem:[%s8145_s27 + $0x30] sm:$0xff] }
 0x638   : > { %v7430_v0 = vpop.eup %7429 }
 0x639   : > { %v7432_v42 = vpop.eup %7431  ;;  %v5586_v26 = vmul.f32 %v7430_v0, %v13159_v18  ;;  %v5784_v18 = vpop.f32.mrf.mxu0  ;;  %v5400_v8 = vadd.f32 %v13182_v49, %v5364_v6 }
 0x63a   : > { %5818 = vmatmul.bf16.gmra.mxu0 %v5641_v34  ;;  %v7434_v21 = vpop.eup %7433  ;;  %v5524_v58 = vadd.f32 1.0, %v7432_v42  ;;  %v5785_v53 = vadd.f32 %v13217_v16, %v5784_v18  ;;  %v5402_v34 = vadd.f32 %v13182_v49, %v5366_v48 }
 0x63b   : > { %v5618_v44 = vmul.f32 %v5586_v26, %v5394_v60  ;;  %v5526_v50 = vadd.f32 1.0, %v7434_v21 }
 0x63c   : > { %7435 = vrcp.f32 %v5524_v58  ;;  %v5834_v41 = vadd.f32 %v5833_v45, %v5785_v53  ;;  %v7530_v45 = vld [vmem:[%s8145_s27 + $0x28] sm:$0xff] }
 0x63d   : > { %v5638_v10 = vpack.c.bf16 %v5618_v44, %v5616_v61  ;;  %7437 = vrcp.f32 %v5526_v50  ;;  %v5838_v54 = vpop.f32.mrf.mxu1  ;;  %v7529_v44 = vld [vmem:[%s8145_s27 + $0x20] sm:$0xff] }
 0x63e   : > { %7439 = vpow2.f32 %v5493_v47  ;;  %v5873_v52 = vadd.f32 %v7525_v13, %v5834_v41 }
 0x63f   : > { %7441 = vpow2.f32 %v5497_v15 }
 0x640   : > { %5889 = vst [vmem:[%s13231_s2] sm:$0xff] %v5873_v52  ;;  %v7532_v52 = vld [vmem:[%s8145_s27 + $0x38] sm:$0xff] }
 0x641   : > { %v5786_v51 = vpop.f32.mrf.mxu0 }
 0x642   : > { %v7436_v31 = vpop.eup %7435  ;;  %v5787_v62 = vadd.f32 %v13217_v16, %v5786_v51 }
 0x643   : > { %v7438_v27 = vpop.eup %7437  ;;  %v5588_v19 = vmul.f32 %v7436_v31, %v13173_v36 }
 0x644   : > { %v7440_v1 = vpop.eup %7439  ;;  %v5590_v35 = vmul.f32 %v7438_v27, %v13176_v37  ;;  %v5836_v38 = vadd.f32 %v5835_v39, %v5787_v62 }
 0x645   : > { %v7442_v5 = vpop.eup %7441  ;;  %v5528_v46 = vadd.f32 1.0, %v7440_v1  ;;  %v5620_v63 = vmul.f32 %v5588_v19, %v5396_v29  ;;  %v5840_v42 = vpop.f32.mrf.mxu1 }
 0x646   : > { %v5622_v28 = vmul.f32 %v5590_v35, %v5398_v7  ;;  %v5530_v25 = vadd.f32 1.0, %v7442_v5  ;;  %v5874_v36 = vadd.f32 %v7526_v2, %v5836_v38 }
 0x647   : > { %5857 = vmatmul.bf16.gmra.mxu1 %v5638_v10  ;;  %7443 = vrcp.f32 %v5528_v46  ;;  %v7533_v46 = vld [vmem:[%s8145_s27 + $0x40] sm:$0xff] }
 0x648   : > { %v5640_v37 = vpack.c.bf16 %v5622_v28, %v5620_v63  ;;  %7445 = vrcp.f32 %v5530_v25  ;;  %5890 = vst [vmem:[%s13231_s2 + $0x8] sm:$0xff] %v5874_v36  ;;  %v7534_v36 = vld [vmem:[%s8145_s27 + $0x48] sm:$0xff] }
 0x649   : > { %v5789_v3 = vpop.f32.mrf.mxu0 }
 0x64a   : > { %v5790_v56 = vadd.f32 %v13217_v16, %v5789_v3 }
 0x64c   : > { %v5839_v55 = vadd.f32 %v5838_v54, %v5790_v56 }
 0x64d   : > { %v7444_v59 = vpop.eup %7443 }
 0x64e   : > { %v7446_v14 = vpop.eup %7445  ;;  %v5875_v20 = vadd.f32 %v7527_v33, %v5839_v55  ;;  %v5592_v0 = vmul.f32 %v7444_v59, %v13203_v23  ;;  %v5843_v23 = vpop.f32.mrf.mxu1  ;;  %v7535_v55 = vld [vmem:[%s8145_s27 + $0x50] sm:$0xff] }
 0x64f   : > { %v5594_v30 = vmul.f32 %v7446_v14, %v13206_v32  ;;  %v7536_v14 = vld [vmem:[%s8145_s27 + $0x58] sm:$0xff] }
 0x650   : > { %5891 = vst [vmem:[%s13231_s2 + $0x10] sm:$0xff] %v5875_v20  ;;  %v5624_v4 = vmul.f32 %v5592_v0, %v5400_v8 }
 0x651   : > { %v5791_v60 = vpop.f32.mrf.mxu0  ;;  %v5626_v43 = vmul.f32 %v5594_v30, %v5402_v34  ;;  %v7537_v30 = vld [vmem:[%s8145_s27 + $0x60] sm:$0xff] }
 0x652   : > { %v5792_v21 = vadd.f32 %v13217_v16, %v5791_v60 }
 0x653   : > { %v5642_v57 = vpack.c.bf16 %v5626_v43, %v5624_v4 }
 0x654   : > { %v5841_v26 = vadd.f32 %v5840_v42, %v5792_v21 }
 0x656   : > { %v5876_v58 = vadd.f32 %v7528_v40, %v5841_v26  ;;  %v5845_v15 = vpop.f32.mrf.mxu1  ;;  %v7538_v26 = vld [vmem:[%s8145_s27 + $0x68] sm:$0xff] }
 0x657   : > { %5862 = vmatmul.bf16.gmra.mxu1 %v5640_v37 }
 0x658   : > { %5892 = vst [vmem:[%s13231_s2 + $0x18] sm:$0xff] %v5876_v58 }
 0x659   : > { %v5794_v49 = vpop.f32.mrf.mxu0 }
 0x65a   : > { %v5795_v32 = vadd.f32 %v13217_v16, %v5794_v49 }
 0x65c   : > { %v5844_v61 = vadd.f32 %v5843_v23, %v5795_v32  ;;  %v7539_v32 = vld [vmem:[%s8145_s27 + $0x70] sm:$0xff] }
 0x65e   : > { %v5877_v50 = vadd.f32 %v7529_v44, %v5844_v61  ;;  %v5848_v9 = vpop.f32.mrf.mxu1 }
 0x660   : > { %5893 = vst [vmem:[%s13231_s2 + $0x20] sm:$0xff] %v5877_v50 }
 0x661   : > { %v5796_v47 = vpop.f32.mrf.mxu0 }
 0x662   : > { %v5797_v10 = vadd.f32 %v13217_v16, %v5796_v47 }
 0x664   : > { %v5846_v18 = vadd.f32 %v5845_v15, %v5797_v10  ;;  %v7540_v15 = vld [vmem:[%s8145_s27 + $0x78] sm:$0xff] }
 0x666   : > { %v5878_v53 = vadd.f32 %v7530_v45, %v5846_v18  ;;  %v5850_v7 = vpop.f32.mrf.mxu1 }
 0x667   : > { %5867 = vmatmul.bf16.gmra.mxu1 %v5642_v57 }
 0x668   : > { %5894 = vst [vmem:[%s13231_s2 + $0x28] sm:$0xff] %v5878_v53 }
 0x669   : > { %v5799_v31 = vpop.f32.mrf.mxu0 }
 0x66a   : > { %v5800_v12 = vadd.f32 %v13217_v16, %v5799_v31 }
 0x66c   : > { %v5849_v11 = vadd.f32 %v5848_v9, %v5800_v12 }
 0x66e   : > { %v5879_v41 = vadd.f32 %v7531_v22, %v5849_v11 }
 0x670   : > { %5895 = vst [vmem:[%s13231_s2 + $0x30] sm:$0xff] %v5879_v41 }
 0x671   : > { %v5801_v27 = vpop.f32.mrf.mxu0 }
 0x672   : > { %v5802_v29 = vadd.f32 %v13217_v16, %v5801_v27 }
 0x674   : > { %v5851_v13 = vadd.f32 %v5850_v7, %v5802_v29 }
 0x676   : > { %v5880_v1 = vadd.f32 %v7532_v52, %v5851_v13 }
 0x678   : > { %5896 = vst [vmem:[%s13231_s2 + $0x38] sm:$0xff] %v5880_v1 }
 0x683   : > { %v5804_v5 = vpop.f32.mrf.mxu0 }
 0x684   : > { %v5805_v35 = vadd.f32 %v13217_v16, %v5804_v5 }
 0x68b   : > { %v5806_v19 = vpop.f32.mrf.mxu0 }
 0x68c   : > { %v5807_v28 = vadd.f32 %v13217_v16, %v5806_v19 }
 0x693   : > { %v5809_v39 = vpop.f32.mrf.mxu0 }
 0x694   : > { %v5810_v3 = vadd.f32 %v13217_v16, %v5809_v39 }
 0x69b   : > { %v5811_v2 = vpop.f32.mrf.mxu0 }
 0x69c   : > { %v5812_v6 = vadd.f32 %v13217_v16, %v5811_v2 }
 0x6a7   : > { %v5814_v17 = vpop.f32.mrf.mxu0 }
 0x6a8   : > { %v5815_v20 = vadd.f32 %v13217_v16, %v5814_v17 }
 0x6af   : > { %v5816_v8 = vpop.f32.mrf.mxu0 }
 0x6b0   : > { %v5817_v42 = vadd.f32 %v13217_v16, %v5816_v8 }
 0x6b4   : > { %v5853_v51 = vpop.f32.mrf.mxu1 }
 0x6b5   : > { %v5854_v62 = vadd.f32 %v5853_v51, %v5805_v35 }
 0x6b7   : > { %v5881_v63 = vadd.f32 %v7533_v46, %v5854_v62  ;;  %v5819_v4 = vpop.f32.mrf.mxu0 }
 0x6b8   : > { %v5820_v58 = vadd.f32 %v13217_v16, %v5819_v4 }
 0x6b9   : > { %5897 = vst [vmem:[%s13231_s2 + $0x40] sm:$0xff] %v5881_v63 }
 0x6bc   : > { %v5855_v25 = vpop.f32.mrf.mxu1 }
 0x6bd   : > { %v5856_v38 = vadd.f32 %v5855_v25, %v5807_v28 }
 0x6bf   : > { %v5882_v37 = vadd.f32 %v7534_v36, %v5856_v38  ;;  %v5821_v23 = vpop.f32.mrf.mxu0 }
 0x6c0   : > { %v5822_v44 = vadd.f32 %v13217_v16, %v5821_v23 }
 0x6c1   : > { %5898 = vst [vmem:[%s13231_s2 + $0x48] sm:$0xff] %v5882_v37 }
 0x6c4   : > { %v5858_v54 = vpop.f32.mrf.mxu1 }
 0x6c5   : > { %v5859_v56 = vadd.f32 %v5858_v54, %v5810_v3 }
 0x6c7   : > { %v5883_v59 = vadd.f32 %v7535_v55, %v5859_v56 }
 0x6c9   : > { %5899 = vst [vmem:[%s13231_s2 + $0x50] sm:$0xff] %v5883_v59 }
 0x6cc   : > { %v5860_v24 = vpop.f32.mrf.mxu1 }
 0x6cd   : > { %v5861_v48 = vadd.f32 %v5860_v24, %v5812_v6 }
 0x6cf   : > { %v5884_v33 = vadd.f32 %v7536_v14, %v5861_v48 }
 0x6d1   : > { %5900 = vst [vmem:[%s13231_s2 + $0x58] sm:$0xff] %v5884_v33 }
 0x6d4   : > { %v5863_v34 = vpop.f32.mrf.mxu1 }
 0x6d5   : > { %v5864_v0 = vadd.f32 %v5863_v34, %v5815_v20 }
 0x6d7   : > { %v5885_v60 = vadd.f32 %v7537_v30, %v5864_v0 }
 0x6d9   : > { %5901 = vst [vmem:[%s13231_s2 + $0x60] sm:$0xff] %v5885_v60 }
 0x6dc   : > { %v5865_v21 = vpop.f32.mrf.mxu1 }
 0x6dd   : > { %v5866_v43 = vadd.f32 %v5865_v21, %v5817_v42 }
 0x6df   : > { %v5886_v40 = vadd.f32 %v7538_v26, %v5866_v43 }
 0x6e1   : > { %5902 = vst [vmem:[%s13231_s2 + $0x68] sm:$0xff] %v5886_v40 }
 0x6e4   : > { %v5868_v57 = vpop.f32.mrf.mxu1 }
 0x6e5   : > { %v5869_v49 = vadd.f32 %v5868_v57, %v5820_v58 }
 0x6e7   : > { %v5887_v61 = vadd.f32 %v7539_v32, %v5869_v49 }
 0x6e9   : > { %5903 = vst [vmem:[%s13231_s2 + $0x70] sm:$0xff] %v5887_v61 }
 0x6ec   : > { %v5870_v50 = vpop.f32.mrf.mxu1 }
 0x6ed   : > { %v5871_v47 = vadd.f32 %v5870_v50, %v5822_v44 }
 0x6ef   : > { %v5888_v10 = vadd.f32 %v7540_v15, %v5871_v47 }
 0x6f1   : > { %5904 = vst [vmem:[%s13231_s2 + $0x78] sm:$0xff] %v5888_v10 }
 0x6f2   : > { %7838 = shalt.err (!%p7835_p9)
}
 0x6f3   : > { %s7910_s7 = smov 128   ;;  %s7911_s27 = smov 8  }
 0x6f4   : > { %6397 = dma.vmem_to_hbm [thread:$0]  (%p8105_p5), %s5920_s16, 2048, %s5922_s17, %s5906_s25, %s7910_s7, %s7910_s7, %s7911_s27  }
 0x6f5 PF: > { %s5936_s13 = sand.u32 1, %s7881_s18   ;;  %p14754_p10 = scmp.ge.s32.totalorder %s7893_s21, 2 }
 0x6f6   : > { %s5937_s2 = scalar_lea.sflag [#allocation4], %s5936_s13 }
 0x6f7   : > { %p6429_p13 = pnand %p14754_p10, %p8109_p6 }
 0x6f9   : > { %p6430_p11 = pneg %p6429_p13 }
 0x6fb   : > { %7876 = dma.done.wait (%p6430_p11), %s5937_s2, 2048  }
 0x6fc   : > { %7878 = vsyncadd (%p6430_p11), %s5937_s2, 4294965248  ;;  %p32_p0 = scmp.ge.s32.totalorder %s8079_s14, 4   ;;  %s14755_s18 = smov %s7885_s19 }
 0x6fd   : > { %s14756_s19 = smov %s7889_s20  ;;  %s14757_s20 = smov %s8090_s28 }
 0x6fe   : > { %s14758_s21 = smov %s8079_s14  ;;  %34 = sbr.rel (!%p32_p0) target bundleno = 22 (0x16), region = 165 }
 0x703   :  { %5943 = vsyncpa [#allocation3], 1 }
 0x704   :  { %5945 = vsyncpa [#allocation3 + $0x1], 1 }
 0x705   :  { %5946 = vsyncpa [#allocation6], 1 }
 0x706   :  { %5947 = vsyncpa [#allocation9], 1 }
 0x707   :  { %5948 = vsyncpa [#allocation12], 1 }
 0x708   :  { %5949 = vsyncpa [#allocation15], 1 }
 0x709   :  { %5950 = vsyncpa [#allocation4], 1 }
 0x70a   :  { %5952 = vsyncpa [#allocation4 + $0x1], 1 }

</bundles_post_ra>
